<compile_context>
chip_gen: v7x
topology: tpu7x:2x2x1
jax: 0.10.0
libtpu: 0.0.40
codegen_flags: <defaults>
</compile_context>

<pallas_src>
import functools

import jax
import jax.numpy as jnp
from jax import lax
from jax.experimental import pallas as pl
from jax.experimental.pallas import tpu as pltpu


def _estimate_vmem_bytes(th, H, W):
    """Rough per-core VMEM footprint (scratch + double-buffered blocks)."""
    wp = W + 4
    lx = (th + 5) * wp
    l1 = (th + 2) * wp
    l1s = (th + 3) * wp
    l2 = th * wp
    scratch = 4 * (8 * lx + 72 * l1 + 64 * l1s + 192 * l2 + 64 * l2)
    x_buf = 2 * 4 * 3 * (H + 5) * wp            # input block, double buffered
    out_buf = 2 * 2 * 4 * 64 * th * W           # two outputs, double buffered
    misc = 2 * 4 * (l1 + 64 * 72 + 3 * 64 * 192 + 2 * 64)
    return scratch + x_buf + out_buf + misc


def _pick_row_tile(H, W, budget=26 * 1024 * 1024, max_tile=256):
    """Largest multiple-of-8 divisor of H fitting the VMEM budget."""
    divisors = [t for t in range(8, min(H, max_tile) + 1, 8) if H % t == 0]
    fitting = [t for t in divisors if _estimate_vmem_bytes(t, H, W) <= budget]
    if fitting:
        return max(fitting)
    if divisors:
        return min(divisors)   # best effort; see TODO about W tiling
    return H                   # no multiple-of-8 divisor: single full tile


def _sfenet_kernel(x_ref, mask_ref, w1_ref, b1_ref, w2_ref, b2_ref,   # inputs
                   f1_ref, f0_ref,                                    # outputs
                   xt_ref, xcol_ref, f1s_ref, f1col_ref, acc_ref,     # scratch
                   *, TH, W, Wp, R):
    """One (batch, row-tile) step of the fused SFE1 -> SFE2 pipeline.

    x_ref   : (1, 3, H+5, W+4)   whole zero-padded input (2 top/left, 3 bottom,
                                 2 right) in NCHW, resident per batch element
    mask_ref: (1, (TH+2)*Wp)     1.0 on in-image f1 columns, 0.0 elsewhere
    w1_ref  : (64, 72)           SFE1 weights, col = (dy*3+dx)*8 + ci (ci<3)
    b1_ref  : (64, 1)
    w2_ref  : (3, 64, 192)       SFE2 weights, [dy][co, dx*64+ci]
    b2_ref  : (64, 1)
    f1_ref  : (1, 64, TH, W)     SFE1 output block (NCHW)
    f0_ref  : (1, 64, TH, W)     SFE2 output block (NCHW)
    xt_ref  : (8, (TH+5)*Wp)     flat (row-major, full padded width) input rows
    xcol_ref: (72, (TH+2)*Wp)    conv1 im2col (9 taps x 8 channel rows)
    f1s_ref : (64, (TH+3)*Wp)    flat f1 tile with 'same' zero ring applied
    f1col_ref:(192, TH*Wp)       conv2 dy-group im2col
    acc_ref : (64, TH*Wp)        f32 conv2 accumulator
    """
    r = pl.program_id(1)
    row0 = r * TH
    LX = (TH + 5) * Wp
    L1 = (TH + 2) * Wp
    L2 = TH * Wp

    # ---- stage input rows into flat layout (one dynamic sublane slice) -----
    xt_ref[0:3, :] = x_ref[0, :, pl.ds(row0, TH + 5), :].reshape(3, LX)
    xt_ref[3:8, :] = jnp.zeros((5, LX), jnp.float32)      # channel padding

    # ---- conv1 (3 -> 64): one K=72 MXU matmul via flat im2col --------------
    for a in range(3):
        for b in range(3):
            k = a * 3 + b
            off = a * Wp + b                                # static lane shift
            xcol_ref[8 * k:8 * k + 8, :] = xt_ref[:, off:off + L1]

    f1s_ref[:, 0:L1] = ((jnp.dot(w1_ref[...], xcol_ref[...],
                                 preferred_element_type=jnp.float32)
                         + b1_ref[...]) * mask_ref[...])
    # Guard row past the computed region (read only for discarded columns).
    f1s_ref[:, L1:L1 + Wp] = jnp.zeros((64, Wp), jnp.float32)

    # Top / bottom zero rows of the f1 'same' padding (edge tiles only).
    @pl.when(r == 0)
    def _():
        f1s_ref[:, 0:Wp] = jnp.zeros((64, Wp), jnp.float32)

    @pl.when(r == R - 1)
    def _():
        f1s_ref[:, (TH + 1) * Wp:(TH + 2) * Wp] = jnp.zeros((64, Wp),
                                                            jnp.float32)

    # F_1 output: the only layout change this tensor ever undergoes.
    f1_ref[0] = (f1s_ref[:, 0:L1]
                 .reshape(64, TH + 2, Wp)[:, 1:TH + 1, 1:W + 1]
                 .astype(f1_ref.dtype))

    # ---- conv2 (64 -> 64): 3 dy-grouped K=192 MXU matmuls ------------------
    for a in range(3):
        for b in range(3):
            off = a * Wp + b                                # static lane shift
            f1col_ref[64 * b:64 * (b + 1), :] = f1s_ref[:, off:off + L2]
        part = jnp.dot(w2_ref[a], f1col_ref[...],
                       preferred_element_type=jnp.float32)
        if a == 0:
            acc_ref[...] = part + b2_ref[...]
        else:
            acc_ref[...] += part

    f0_ref[0] = (acc_ref[...].reshape(64, TH, Wp)[:, :, 0:W]
                 .astype(f0_ref.dtype))


def _sfenet_pallas(xp, colmask, w1p, b1c, w2p, b2c, N, H, W, TH):
    R = H // TH
    Wp = W + 4
    L1 = (TH + 2) * Wp
    kernel = functools.partial(_sfenet_kernel, TH=TH, W=W, Wp=Wp, R=R)

    flops = 2 * 9 * (3 * 64 + 64 * 64) * H * W * N
    bytes_accessed = 4 * (N * 3 * (H + 5) * Wp          # padded input read
                          + 2 * N * 64 * H * W          # f1 + f0 written once
                          + L1 + 64 * 72 + 3 * 64 * 192 + 2 * 64)

    return pl.pallas_call(
        kernel,
        out_shape=(jax.ShapeDtypeStruct((N, 64, H, W), jnp.float32),
                   jax.ShapeDtypeStruct((N, 64, H, W), jnp.float32)),
        grid_spec=pltpu.PrefetchScalarGridSpec(
            num_scalar_prefetch=0,
            grid=(N, R),
            in_specs=[
                # whole padded 3-channel image per batch element (resident
                # across the row-tile axis, re-fetched only when n changes)
                pl.BlockSpec((1, 3, H + 5, Wp), lambda n, r: (n, 0, 0, 0)),
                pl.BlockSpec((1, L1), lambda n, r: (0, 0)),
                pl.BlockSpec((64, 72), lambda n, r: (0, 0)),
                pl.BlockSpec((64, 1), lambda n, r: (0, 0)),
                pl.BlockSpec((3, 64, 192), lambda n, r: (0, 0, 0)),
                pl.BlockSpec((64, 1), lambda n, r: (0, 0)),
            ],
            out_specs=[
                pl.BlockSpec((1, 64, TH, W), lambda n, r: (n, 0, r, 0)),
                pl.BlockSpec((1, 64, TH, W), lambda n, r: (n, 0, r, 0)),
            ],
            scratch_shapes=[
                pltpu.VMEM((8, (TH + 5) * Wp), jnp.float32),    # flat x rows
                pltpu.VMEM((72, (TH + 2) * Wp), jnp.float32),   # conv1 im2col
                pltpu.VMEM((64, (TH + 3) * Wp), jnp.float32),   # flat f1 tile
                pltpu.VMEM((192, TH * Wp), jnp.float32),        # conv2 im2col
                pltpu.VMEM((64, TH * Wp), jnp.float32),         # conv2 acc
            ],
        ),
        compiler_params=pltpu.CompilerParams(
            dimension_semantics=("parallel", "parallel"),
            vmem_limit_bytes=48 * 1024 * 1024,
        ),
        cost_estimate=pl.CostEstimate(flops=flops, transcendentals=0,
                                      bytes_accessed=bytes_accessed),
    )(xp, colmask, w1p, b1c, w2p, b2c)


@jax.jit
def sfenet_forward(lr_nchw, params):
    """SFENet forward.  lr_nchw: (N, 3, H, W) f32.  Returns (F_1, F0) NCHW."""
    N, C, H, W = lr_nchw.shape
    if C != 3:
        raise ValueError("SFENet expects 3 input channels")
    TH = _pick_row_tile(H, W)
    Wp = W + 4
    L1 = (TH + 2) * Wp

    # Only wrapper-side data movement: zero-pad the tiny 3-channel input
    # (2 px top/left/right, 3 px bottom so in-kernel flat slices stay in
    # bounds).  f1 is never padded nor round-tripped through HBM.
    xp = jnp.pad(lr_nchw, ((0, 0), (0, 0), (2, 3), (2, 2)))

    # Column mask reproducing the left/right zero padding of f1 seen by SFE2.
    col = jnp.arange(L1, dtype=jnp.int32) % Wp
    colmask = ((col >= 1) & (col <= W)).astype(jnp.float32).reshape(1, L1)

    # Pack weights for the in-kernel matmul forms.
    w1t = jnp.transpose(params["w1"], (0, 2, 3, 1))               # [co,dy,dx,ci]
    w1p = jnp.pad(w1t, ((0, 0), (0, 0), (0, 0), (0, 5))).reshape(64, 72)
    w2p = jnp.transpose(params["w2"], (2, 0, 3, 1)).reshape(3, 64, 192)
    b1c = params["b1"].reshape(64, 1)
    b2c = params["b2"].reshape(64, 1)

    return _sfenet_pallas(xp, colmask, w1p, b1c, w2p, b2c, N, H, W, TH)


def init_sfenet_params(key):
    """PyTorch Conv2d default init (uniform +/- 1/sqrt(fan_in)), OIHW layout."""
    k1, k2, k3, k4 = jax.random.split(key, 4)
    bd1 = 1.0 / float(3 * 3 * 3) ** 0.5
    w1 = jax.random.uniform(k1, (64, 3, 3, 3), jnp.float32, -bd1, bd1)
    b1 = jax.random.uniform(k2, (64,), jnp.float32, -bd1, bd1)
    bd2 = 1.0 / float(64 * 3 * 3) ** 0.5
    w2 = jax.random.uniform(k3, (64, 64, 3, 3), jnp.float32, -bd2, bd2)
    b2 = jax.random.uniform(k4, (64,), jnp.float32, -bd2, bd2)
    return dict(w1=w1, b1=b1, w2=w2, b2=b2)


def _reference_forward(lr, params):
    dn = ("NCHW", "OIHW", "NCHW")
    f1 = lax.conv_general_dilated(
        lr, params["w1"], (1, 1), "SAME", dimension_numbers=dn,
        precision=lax.Precision.HIGHEST) + params["b1"][None, :, None, None]
    f0 = lax.conv_general_dilated(
        f1, params["w2"], (1, 1), "SAME", dimension_numbers=dn,
        precision=lax.Precision.HIGHEST) + params["b2"][None, :, None, None]
    return f1, f0


if __name__ == "__main__":
    key = jax.random.PRNGKey(0)
    k_x, k_p = jax.random.split(key)

    # Small deterministic input: batch=2, 3 channels (required by SFE1), 16x16.
    x = jax.random.normal(k_x, (2, 3, 16, 16), jnp.float32)
    params = init_sfenet_params(k_p)

    F_1, F0 = sfenet_forward(x, params)
    jax.block_until_ready((F_1, F0))

    assert F_1.shape == (2, 64, 16, 16), F_1.shape
    assert F0.shape == (2, 64, 16, 16), F0.shape
    assert F_1.dtype == jnp.float32 and F0.dtype == jnp.float32

    # Numerical check against XLA conv with PyTorch Conv2d semantics.
    r1, r0 = _reference_forward(x, params)
    err1 = float(jnp.max(jnp.abs(F_1 - r1)))
    err0 = float(jnp.max(jnp.abs(F0 - r0)))
    assert err1 < 2e-2 and err0 < 2e-2, (err1, err0)

    print("KERNEL_OK")
</pallas_src>

<mosaic_0001>
module attributes {stable_mosaic.version = 11 : i64} {
  func.func @_sfenet_kernel(%arg0: i32, %arg1: i32, %arg2: memref<1x3x21x20xf32, #tpu.memory_space<vmem>>, %arg3: memref<1x360xf32, #tpu.memory_space<vmem>>, %arg4: memref<64x72xf32, #tpu.memory_space<vmem>>, %arg5: memref<64x1xf32, #tpu.memory_space<vmem>>, %arg6: memref<3x64x192xf32, #tpu.memory_space<vmem>>, %arg7: memref<64x1xf32, #tpu.memory_space<vmem>>, %arg8: memref<1x64x16x16xf32, #tpu.memory_space<vmem>>, %arg9: memref<1x64x16x16xf32, #tpu.memory_space<vmem>>, %arg10: memref<8x420xf32, #tpu.memory_space<vmem>>, %arg11: memref<72x360xf32, #tpu.memory_space<vmem>>, %arg12: memref<64x380xf32, #tpu.memory_space<vmem>>, %arg13: memref<192x320xf32, #tpu.memory_space<vmem>>, %arg14: memref<64x320xf32, #tpu.memory_space<vmem>>) attributes {dimension_semantics = [#tpu.dimension_semantics<parallel>, #tpu.dimension_semantics<parallel>], iteration_bounds = array<i64: 2, 1>, scalar_prefetch = 0 : i64, scratch_operands = 5 : i64, tpu.core_type = #tpu.core_type<tc>, window_params = [{transform_indices = @transform_0, window_bounds = array<i64: 1, 3, 21, 20>}, {pipeline_mode = #tpu.pipeline_mode<synchronous>, transform_indices = @transform_1, window_bounds = array<i64: 1, 360>}, {pipeline_mode = #tpu.pipeline_mode<synchronous>, transform_indices = @transform_2, window_bounds = array<i64: 64, 72>}, {pipeline_mode = #tpu.pipeline_mode<synchronous>, transform_indices = @transform_3, window_bounds = array<i64: 64, 1>}, {pipeline_mode = #tpu.pipeline_mode<synchronous>, transform_indices = @transform_4, window_bounds = array<i64: 3, 64, 192>}, {pipeline_mode = #tpu.pipeline_mode<synchronous>, transform_indices = @transform_5, window_bounds = array<i64: 64, 1>}, {transform_indices = @transform_6, window_bounds = array<i64: 1, 64, 16, 16>}, {transform_indices = @transform_7, window_bounds = array<i64: 1, 64, 16, 16>}]} {
    %c16_i32 = arith.constant 16 : i32
    %0 = arith.muli %arg1, %c16_i32 : i32
    %c0 = arith.constant 0 : index
    %c0_0 = arith.constant 0 : index
    %1 = arith.index_cast %0 : i32 to index
    %c0_1 = arith.constant 0 : index
    %2 = vector.load %arg2[%c0, %c0_0, %1, %c0_1] : memref<1x3x21x20xf32, #tpu.memory_space<vmem>>, vector<1x3x21x20xf32>
    %3 = vector.shape_cast %2 : vector<1x3x21x20xf32> to vector<3x21x20xf32>
    %4 = vector.shape_cast %3 : vector<3x21x20xf32> to vector<3x420xf32>
    %c0_2 = arith.constant 0 : index
    %c0_3 = arith.constant 0 : index
    %5 = vector.load %arg10[%c0_2, %c0_3] : memref<8x420xf32, #tpu.memory_space<vmem>>, vector<3x420xf32>
    tpu.vector_store %arg10[%c0_2, %c0_3], %4 {strides = array<i32>} : memref<8x420xf32, #tpu.memory_space<vmem>>, vector<3x420xf32>,
    %cst = arith.constant 0.000000e+00 : f32
    %6 = vector.broadcast %cst : f32 to vector<5x420xf32>
    %c3 = arith.constant 3 : index
    %c0_4 = arith.constant 0 : index
    %7 = vector.load %arg10[%c3, %c0_4] : memref<8x420xf32, #tpu.memory_space<vmem>>, vector<5x420xf32>
    tpu.vector_store %arg10[%c3, %c0_4], %6 {strides = array<i32>} : memref<8x420xf32, #tpu.memory_space<vmem>>, vector<5x420xf32>,
    %c0_5 = arith.constant 0 : index
    %c0_6 = arith.constant 0 : index
    %8 = vector.load %arg10[%c0_5, %c0_6] : memref<8x420xf32, #tpu.memory_space<vmem>>, vector<8x360xf32>
    %c0_7 = arith.constant 0 : index
    %c0_8 = arith.constant 0 : index
    %9 = vector.load %arg11[%c0_7, %c0_8] : memref<72x360xf32, #tpu.memory_space<vmem>>, vector<8x360xf32>
    tpu.vector_store %arg11[%c0_7, %c0_8], %8 {strides = array<i32>} : memref<72x360xf32, #tpu.memory_space<vmem>>, vector<8x360xf32>,
    %c0_9 = arith.constant 0 : index
    %c1 = arith.constant 1 : index
    %10 = vector.load %arg10[%c0_9, %c1] : memref<8x420xf32, #tpu.memory_space<vmem>>, vector<8x360xf32>
    %c8 = arith.constant 8 : index
    %c0_10 = arith.constant 0 : index
    %11 = vector.load %arg11[%c8, %c0_10] : memref<72x360xf32, #tpu.memory_space<vmem>>, vector<8x360xf32>
    tpu.vector_store %arg11[%c8, %c0_10], %10 {strides = array<i32>} : memref<72x360xf32, #tpu.memory_space<vmem>>, vector<8x360xf32>,
    %c0_11 = arith.constant 0 : index
    %c2 = arith.constant 2 : index
    %12 = vector.load %arg10[%c0_11, %c2] : memref<8x420xf32, #tpu.memory_space<vmem>>, vector<8x360xf32>
    %c16 = arith.constant 16 : index
    %c0_12 = arith.constant 0 : index
    %13 = vector.load %arg11[%c16, %c0_12] : memref<72x360xf32, #tpu.memory_space<vmem>>, vector<8x360xf32>
    tpu.vector_store %arg11[%c16, %c0_12], %12 {strides = array<i32>} : memref<72x360xf32, #tpu.memory_space<vmem>>, vector<8x360xf32>,
    %c0_13 = arith.constant 0 : index
    %c20 = arith.constant 20 : index
    %14 = vector.load %arg10[%c0_13, %c20] : memref<8x420xf32, #tpu.memory_space<vmem>>, vector<8x360xf32>
    %c24 = arith.constant 24 : index
    %c0_14 = arith.constant 0 : index
    %15 = vector.load %arg11[%c24, %c0_14] : memref<72x360xf32, #tpu.memory_space<vmem>>, vector<8x360xf32>
    tpu.vector_store %arg11[%c24, %c0_14], %14 {strides = array<i32>} : memref<72x360xf32, #tpu.memory_space<vmem>>, vector<8x360xf32>,
    %c0_15 = arith.constant 0 : index
    %c21 = arith.constant 21 : index
    %16 = vector.load %arg10[%c0_15, %c21] : memref<8x420xf32, #tpu.memory_space<vmem>>, vector<8x360xf32>
    %c32 = arith.constant 32 : index
    %c0_16 = arith.constant 0 : index
    %17 = vector.load %arg11[%c32, %c0_16] : memref<72x360xf32, #tpu.memory_space<vmem>>, vector<8x360xf32>
    tpu.vector_store %arg11[%c32, %c0_16], %16 {strides = array<i32>} : memref<72x360xf32, #tpu.memory_space<vmem>>, vector<8x360xf32>,
    %c0_17 = arith.constant 0 : index
    %c22 = arith.constant 22 : index
    %18 = vector.load %arg10[%c0_17, %c22] : memref<8x420xf32, #tpu.memory_space<vmem>>, vector<8x360xf32>
    %c40 = arith.constant 40 : index
    %c0_18 = arith.constant 0 : index
    %19 = vector.load %arg11[%c40, %c0_18] : memref<72x360xf32, #tpu.memory_space<vmem>>, vector<8x360xf32>
    tpu.vector_store %arg11[%c40, %c0_18], %18 {strides = array<i32>} : memref<72x360xf32, #tpu.memory_space<vmem>>, vector<8x360xf32>,
    %c0_19 = arith.constant 0 : index
    %c40_20 = arith.constant 40 : index
    %20 = vector.load %arg10[%c0_19, %c40_20] : memref<8x420xf32, #tpu.memory_space<vmem>>, vector<8x360xf32>
    %c48 = arith.constant 48 : index
    %c0_21 = arith.constant 0 : index
    %21 = vector.load %arg11[%c48, %c0_21] : memref<72x360xf32, #tpu.memory_space<vmem>>, vector<8x360xf32>
    tpu.vector_store %arg11[%c48, %c0_21], %20 {strides = array<i32>} : memref<72x360xf32, #tpu.memory_space<vmem>>, vector<8x360xf32>,
    %c0_22 = arith.constant 0 : index
    %c41 = arith.constant 41 : index
    %22 = vector.load %arg10[%c0_22, %c41] : memref<8x420xf32, #tpu.memory_space<vmem>>, vector<8x360xf32>
    %c56 = arith.constant 56 : index
    %c0_23 = arith.constant 0 : index
    %23 = vector.load %arg11[%c56, %c0_23] : memref<72x360xf32, #tpu.memory_space<vmem>>, vector<8x360xf32>
    tpu.vector_store %arg11[%c56, %c0_23], %22 {strides = array<i32>} : memref<72x360xf32, #tpu.memory_space<vmem>>, vector<8x360xf32>,
    %c0_24 = arith.constant 0 : index
    %c42 = arith.constant 42 : index
    %24 = vector.load %arg10[%c0_24, %c42] : memref<8x420xf32, #tpu.memory_space<vmem>>, vector<8x360xf32>
    %c64 = arith.constant 64 : index
    %c0_25 = arith.constant 0 : index
    %25 = vector.load %arg11[%c64, %c0_25] : memref<72x360xf32, #tpu.memory_space<vmem>>, vector<8x360xf32>
    tpu.vector_store %arg11[%c64, %c0_25], %24 {strides = array<i32>} : memref<72x360xf32, #tpu.memory_space<vmem>>, vector<8x360xf32>,
    %c0_26 = arith.constant 0 : index
    %c0_27 = arith.constant 0 : index
    %26 = vector.load %arg4[%c0_26, %c0_27] : memref<64x72xf32, #tpu.memory_space<vmem>>, vector<64x72xf32>
    %c0_28 = arith.constant 0 : index
    %c0_29 = arith.constant 0 : index
    %27 = vector.load %arg11[%c0_28, %c0_29] : memref<72x360xf32, #tpu.memory_space<vmem>>, vector<72x360xf32>
    %cst_30 = arith.constant dense<0.000000e+00> : vector<64x360xf32>
    %28 = tpu.matmul %26, %27, %cst_30 {dimension_numbers = #tpu.dot_dimension_numbers<[1], [0], [0], [1], [0, 0, 1, 1], [], []>} : vector<64x72xf32>, vector<72x360xf32>, vector<64x360xf32> -> vector<64x360xf32>
    %c0_31 = arith.constant 0 : index
    %c0_32 = arith.constant 0 : index
    %29 = vector.load %arg5[%c0_31, %c0_32] : memref<64x1xf32, #tpu.memory_space<vmem>>, vector<64x1xf32>
    %30 = vector.broadcast %29 : vector<64x1xf32> to vector<64x360xf32>
    %31 = arith.addf %28, %30 : vector<64x360xf32>
    %c0_33 = arith.constant 0 : index
    %c0_34 = arith.constant 0 : index
    %32 = vector.load %arg3[%c0_33, %c0_34] : memref<1x360xf32, #tpu.memory_space<vmem>>, vector<1x360xf32>
    %33 = vector.broadcast %32 : vector<1x360xf32> to vector<64x360xf32>
    %34 = arith.mulf %31, %33 : vector<64x360xf32>
    %c0_35 = arith.constant 0 : index
    %c0_36 = arith.constant 0 : index
    %35 = vector.load %arg12[%c0_35, %c0_36] : memref<64x380xf32, #tpu.memory_space<vmem>>, vector<64x360xf32>
    tpu.vector_store %arg12[%c0_35, %c0_36], %34 {strides = array<i32>} : memref<64x380xf32, #tpu.memory_space<vmem>>, vector<64x360xf32>,
    %cst_37 = arith.constant 0.000000e+00 : f32
    %36 = vector.broadcast %cst_37 : f32 to vector<64x20xf32>
    %c0_38 = arith.constant 0 : index
    %c360 = arith.constant 360 : index
    %37 = vector.load %arg12[%c0_38, %c360] : memref<64x380xf32, #tpu.memory_space<vmem>>, vector<64x20xf32>
    tpu.vector_store %arg12[%c0_38, %c360], %36 {strides = array<i32>} : memref<64x380xf32, #tpu.memory_space<vmem>>, vector<64x20xf32>,
    %c0_i32 = arith.constant 0 : i32
    %38 = arith.cmpi eq, %arg1, %c0_i32 : i32
    %39 = arith.extui %38 : i1 to i32
    %c0_i32_39 = arith.constant 0 : i32
    %40 = arith.cmpi ne, %39, %c0_i32_39 : i32
    scf.if %40 {
      %cst_119 = arith.constant 0.000000e+00 : f32
      %96 = vector.broadcast %cst_119 : f32 to vector<64x20xf32>
      %c0_120 = arith.constant 0 : index
      %c0_121 = arith.constant 0 : index
      %97 = vector.load %arg12[%c0_120, %c0_121] : memref<64x380xf32, #tpu.memory_space<vmem>>, vector<64x20xf32>
      tpu.vector_store %arg12[%c0_120, %c0_121], %96 {strides = array<i32>} : memref<64x380xf32, #tpu.memory_space<vmem>>, vector<64x20xf32>,
    } else {
    }
    %c0_i32_40 = arith.constant 0 : i32
    %41 = arith.cmpi eq, %arg1, %c0_i32_40 : i32
    %42 = arith.extui %41 : i1 to i32
    %c0_i32_41 = arith.constant 0 : i32
    %43 = arith.cmpi ne, %42, %c0_i32_41 : i32
    scf.if %43 {
      %cst_119 = arith.constant 0.000000e+00 : f32
      %96 = vector.broadcast %cst_119 : f32 to vector<64x20xf32>
      %c0_120 = arith.constant 0 : index
      %c340 = arith.constant 340 : index
      %97 = vector.load %arg12[%c0_120, %c340] : memref<64x380xf32, #tpu.memory_space<vmem>>, vector<64x20xf32>
      tpu.vector_store %arg12[%c0_120, %c340], %96 {strides = array<i32>} : memref<64x380xf32, #tpu.memory_space<vmem>>, vector<64x20xf32>,
    } else {
    }
    %c0_42 = arith.constant 0 : index
    %c0_43 = arith.constant 0 : index
    %44 = vector.load %arg12[%c0_42, %c0_43] : memref<64x380xf32, #tpu.memory_space<vmem>>, vector<64x360xf32>
    %45 = vector.shape_cast %44 : vector<64x360xf32> to vector<64x18x20xf32>
    %46 = vector.extract_strided_slice %45 {offsets = [0, 1, 1], sizes = [64, 16, 16], strides = [1, 1, 1]} : vector<64x18x20xf32> to vector<64x16x16xf32>
    %c0_44 = arith.constant 0 : index
    %c0_45 = arith.constant 0 : index
    %c0_46 = arith.constant 0 : index
    %c0_47 = arith.constant 0 : index
    %47 = vector.load %arg8[%c0_44, %c0_45, %c0_46, %c0_47] : memref<1x64x16x16xf32, #tpu.memory_space<vmem>>, vector<1x64x16x16xf32>
    %48 = vector.shape_cast %47 : vector<1x64x16x16xf32> to vector<64x16x16xf32>
    %49 = vector.shape_cast %46 : vector<64x16x16xf32> to vector<1x64x16x16xf32>
    tpu.vector_store %arg8[%c0_44, %c0_45, %c0_46, %c0_47], %49 {strides = array<i32>} : memref<1x64x16x16xf32, #tpu.memory_space<vmem>>, vector<1x64x16x16xf32>,
    %c0_48 = arith.constant 0 : index
    %c0_49 = arith.constant 0 : index
    %50 = vector.load %arg12[%c0_48, %c0_49] : memref<64x380xf32, #tpu.memory_space<vmem>>, vector<64x320xf32>
    %c0_50 = arith.constant 0 : index
    %c0_51 = arith.constant 0 : index
    %51 = vector.load %arg13[%c0_50, %c0_51] : memref<192x320xf32, #tpu.memory_space<vmem>>, vector<64x320xf32>
    tpu.vector_store %arg13[%c0_50, %c0_51], %50 {strides = array<i32>} : memref<192x320xf32, #tpu.memory_space<vmem>>, vector<64x320xf32>,
    %c0_52 = arith.constant 0 : index
    %c1_53 = arith.constant 1 : index
    %52 = vector.load %arg12[%c0_52, %c1_53] : memref<64x380xf32, #tpu.memory_space<vmem>>, vector<64x320xf32>
    %c64_54 = arith.constant 64 : index
    %c0_55 = arith.constant 0 : index
    %53 = vector.load %arg13[%c64_54, %c0_55] : memref<192x320xf32, #tpu.memory_space<vmem>>, vector<64x320xf32>
    tpu.vector_store %arg13[%c64_54, %c0_55], %52 {strides = array<i32>} : memref<192x320xf32, #tpu.memory_space<vmem>>, vector<64x320xf32>,
    %c0_56 = arith.constant 0 : index
    %c2_57 = arith.constant 2 : index
    %54 = vector.load %arg12[%c0_56, %c2_57] : memref<64x380xf32, #tpu.memory_space<vmem>>, vector<64x320xf32>
    %c128 = arith.constant 128 : index
    %c0_58 = arith.constant 0 : index
    %55 = vector.load %arg13[%c128, %c0_58] : memref<192x320xf32, #tpu.memory_space<vmem>>, vector<64x320xf32>
    tpu.vector_store %arg13[%c128, %c0_58], %54 {strides = array<i32>} : memref<192x320xf32, #tpu.memory_space<vmem>>, vector<64x320xf32>,
    %c0_59 = arith.constant 0 : index
    %c0_60 = arith.constant 0 : index
    %c0_61 = arith.constant 0 : index
    %56 = vector.load %arg6[%c0_59, %c0_60, %c0_61] : memref<3x64x192xf32, #tpu.memory_space<vmem>>, vector<1x64x192xf32>
    %57 = vector.shape_cast %56 : vector<1x64x192xf32> to vector<64x192xf32>
    %c0_62 = arith.constant 0 : index
    %c0_63 = arith.constant 0 : index
    %58 = vector.load %arg13[%c0_62, %c0_63] : memref<192x320xf32, #tpu.memory_space<vmem>>, vector<192x320xf32>
    %cst_64 = arith.constant dense<0.000000e+00> : vector<64x320xf32>
    %59 = tpu.matmul %57, %58, %cst_64 {dimension_numbers = #tpu.dot_dimension_numbers<[1], [0], [0], [1], [0, 0, 1, 1], [], []>} : vector<64x192xf32>, vector<192x320xf32>, vector<64x320xf32> -> vector<64x320xf32>
    %c0_65 = arith.constant 0 : index
    %c0_66 = arith.constant 0 : index
    %60 = vector.load %arg7[%c0_65, %c0_66] : memref<64x1xf32, #tpu.memory_space<vmem>>, vector<64x1xf32>
    %61 = vector.broadcast %60 : vector<64x1xf32> to vector<64x320xf32>
    %62 = arith.addf %59, %61 : vector<64x320xf32>
    %c0_67 = arith.constant 0 : index
    %c0_68 = arith.constant 0 : index
    %63 = vector.load %arg14[%c0_67, %c0_68] : memref<64x320xf32, #tpu.memory_space<vmem>>, vector<64x320xf32>
    tpu.vector_store %arg14[%c0_67, %c0_68], %62 {strides = array<i32>} : memref<64x320xf32, #tpu.memory_space<vmem>>, vector<64x320xf32>,
    %c0_69 = arith.constant 0 : index
    %c20_70 = arith.constant 20 : index
    %64 = vector.load %arg12[%c0_69, %c20_70] : memref<64x380xf32, #tpu.memory_space<vmem>>, vector<64x320xf32>
    %c0_71 = arith.constant 0 : index
    %c0_72 = arith.constant 0 : index
    %65 = vector.load %arg13[%c0_71, %c0_72] : memref<192x320xf32, #tpu.memory_space<vmem>>, vector<64x320xf32>
    tpu.vector_store %arg13[%c0_71, %c0_72], %64 {strides = array<i32>} : memref<192x320xf32, #tpu.memory_space<vmem>>, vector<64x320xf32>,
    %c0_73 = arith.constant 0 : index
    %c21_74 = arith.constant 21 : index
    %66 = vector.load %arg12[%c0_73, %c21_74] : memref<64x380xf32, #tpu.memory_space<vmem>>, vector<64x320xf32>
    %c64_75 = arith.constant 64 : index
    %c0_76 = arith.constant 0 : index
    %67 = vector.load %arg13[%c64_75, %c0_76] : memref<192x320xf32, #tpu.memory_space<vmem>>, vector<64x320xf32>
    tpu.vector_store %arg13[%c64_75, %c0_76], %66 {strides = array<i32>} : memref<192x320xf32, #tpu.memory_space<vmem>>, vector<64x320xf32>,
    %c0_77 = arith.constant 0 : index
    %c22_78 = arith.constant 22 : index
    %68 = vector.load %arg12[%c0_77, %c22_78] : memref<64x380xf32, #tpu.memory_space<vmem>>, vector<64x320xf32>
    %c128_79 = arith.constant 128 : index
    %c0_80 = arith.constant 0 : index
    %69 = vector.load %arg13[%c128_79, %c0_80] : memref<192x320xf32, #tpu.memory_space<vmem>>, vector<64x320xf32>
    tpu.vector_store %arg13[%c128_79, %c0_80], %68 {strides = array<i32>} : memref<192x320xf32, #tpu.memory_space<vmem>>, vector<64x320xf32>,
    %c1_81 = arith.constant 1 : index
    %c0_82 = arith.constant 0 : index
    %c0_83 = arith.constant 0 : index
    %70 = vector.load %arg6[%c1_81, %c0_82, %c0_83] : memref<3x64x192xf32, #tpu.memory_space<vmem>>, vector<1x64x192xf32>
    %71 = vector.shape_cast %70 : vector<1x64x192xf32> to vector<64x192xf32>
    %c0_84 = arith.constant 0 : index
    %c0_85 = arith.constant 0 : index
    %72 = vector.load %arg13[%c0_84, %c0_85] : memref<192x320xf32, #tpu.memory_space<vmem>>, vector<192x320xf32>
    %cst_86 = arith.constant dense<0.000000e+00> : vector<64x320xf32>
    %73 = tpu.matmul %71, %72, %cst_86 {dimension_numbers = #tpu.dot_dimension_numbers<[1], [0], [0], [1], [0, 0, 1, 1], [], []>} : vector<64x192xf32>, vector<192x320xf32>, vector<64x320xf32> -> vector<64x320xf32>
    %c0_87 = arith.constant 0 : index
    %c0_88 = arith.constant 0 : index
    %74 = vector.load %arg14[%c0_87, %c0_88] : memref<64x320xf32, #tpu.memory_space<vmem>>, vector<64x320xf32>
    %75 = arith.addf %74, %73 : vector<64x320xf32>
    %c0_89 = arith.constant 0 : index
    %c0_90 = arith.constant 0 : index
    %76 = vector.load %arg14[%c0_89, %c0_90] : memref<64x320xf32, #tpu.memory_space<vmem>>, vector<64x320xf32>
    tpu.vector_store %arg14[%c0_89, %c0_90], %75 {strides = array<i32>} : memref<64x320xf32, #tpu.memory_space<vmem>>, vector<64x320xf32>,
    %c0_91 = arith.constant 0 : index
    %c40_92 = arith.constant 40 : index
    %77 = vector.load %arg12[%c0_91, %c40_92] : memref<64x380xf32, #tpu.memory_space<vmem>>, vector<64x320xf32>
    %c0_93 = arith.constant 0 : index
    %c0_94 = arith.constant 0 : index
    %78 = vector.load %arg13[%c0_93, %c0_94] : memref<192x320xf32, #tpu.memory_space<vmem>>, vector<64x320xf32>
    tpu.vector_store %arg13[%c0_93, %c0_94], %77 {strides = array<i32>} : memref<192x320xf32, #tpu.memory_space<vmem>>, vector<64x320xf32>,
    %c0_95 = arith.constant 0 : index
    %c41_96 = arith.constant 41 : index
    %79 = vector.load %arg12[%c0_95, %c41_96] : memref<64x380xf32, #tpu.memory_space<vmem>>, vector<64x320xf32>
    %c64_97 = arith.constant 64 : index
    %c0_98 = arith.constant 0 : index
    %80 = vector.load %arg13[%c64_97, %c0_98] : memref<192x320xf32, #tpu.memory_space<vmem>>, vector<64x320xf32>
    tpu.vector_store %arg13[%c64_97, %c0_98], %79 {strides = array<i32>} : memref<192x320xf32, #tpu.memory_space<vmem>>, vector<64x320xf32>,
    %c0_99 = arith.constant 0 : index
    %c42_100 = arith.constant 42 : index
    %81 = vector.load %arg12[%c0_99, %c42_100] : memref<64x380xf32, #tpu.memory_space<vmem>>, vector<64x320xf32>
    %c128_101 = arith.constant 128 : index
    %c0_102 = arith.constant 0 : index
    %82 = vector.load %arg13[%c128_101, %c0_102] : memref<192x320xf32, #tpu.memory_space<vmem>>, vector<64x320xf32>
    tpu.vector_store %arg13[%c128_101, %c0_102], %81 {strides = array<i32>} : memref<192x320xf32, #tpu.memory_space<vmem>>, vector<64x320xf32>,
    %c2_103 = arith.constant 2 : index
    %c0_104 = arith.constant 0 : index
    %c0_105 = arith.constant 0 : index
    %83 = vector.load %arg6[%c2_103, %c0_104, %c0_105] : memref<3x64x192xf32, #tpu.memory_space<vmem>>, vector<1x64x192xf32>
    %84 = vector.shape_cast %83 : vector<1x64x192xf32> to vector<64x192xf32>
    %c0_106 = arith.constant 0 : index
    %c0_107 = arith.constant 0 : index
    %85 = vector.load %arg13[%c0_106, %c0_107] : memref<192x320xf32, #tpu.memory_space<vmem>>, vector<192x320xf32>
    %cst_108 = arith.constant dense<0.000000e+00> : vector<64x320xf32>
    %86 = tpu.matmul %84, %85, %cst_108 {dimension_numbers = #tpu.dot_dimension_numbers<[1], [0], [0], [1], [0, 0, 1, 1], [], []>} : vector<64x192xf32>, vector<192x320xf32>, vector<64x320xf32> -> vector<64x320xf32>
    %c0_109 = arith.constant 0 : index
    %c0_110 = arith.constant 0 : index
    %87 = vector.load %arg14[%c0_109, %c0_110] : memref<64x320xf32, #tpu.memory_space<vmem>>, vector<64x320xf32>
    %88 = arith.addf %87, %86 : vector<64x320xf32>
    %c0_111 = arith.constant 0 : index
    %c0_112 = arith.constant 0 : index
    %89 = vector.load %arg14[%c0_111, %c0_112] : memref<64x320xf32, #tpu.memory_space<vmem>>, vector<64x320xf32>
    tpu.vector_store %arg14[%c0_111, %c0_112], %88 {strides = array<i32>} : memref<64x320xf32, #tpu.memory_space<vmem>>, vector<64x320xf32>,
    %c0_113 = arith.constant 0 : index
    %c0_114 = arith.constant 0 : index
    %90 = vector.load %arg14[%c0_113, %c0_114] : memref<64x320xf32, #tpu.memory_space<vmem>>, vector<64x320xf32>
    %91 = vector.shape_cast %90 : vector<64x320xf32> to vector<64x16x20xf32>
    %92 = vector.extract_strided_slice %91 {offsets = [0, 0, 0], sizes = [64, 16, 16], strides = [1, 1, 1]} : vector<64x16x20xf32> to vector<64x16x16xf32>
    %c0_115 = arith.constant 0 : index
    %c0_116 = arith.constant 0 : index
    %c0_117 = arith.constant 0 : index
    %c0_118 = arith.constant 0 : index
    %93 = vector.load %arg9[%c0_115, %c0_116, %c0_117, %c0_118] : memref<1x64x16x16xf32, #tpu.memory_space<vmem>>, vector<1x64x16x16xf32>
    %94 = vector.shape_cast %93 : vector<1x64x16x16xf32> to vector<64x16x16xf32>
    %95 = vector.shape_cast %92 : vector<64x16x16xf32> to vector<1x64x16x16xf32>
    tpu.vector_store %arg9[%c0_115, %c0_116, %c0_117, %c0_118], %95 {strides = array<i32>} : memref<1x64x16x16xf32, #tpu.memory_space<vmem>>, vector<1x64x16x16xf32>,
    return
  }
  func.func @transform_0(%arg0: i32, %arg1: i32) -> (i32, i32, i32, i32) {
    %c0_i32 = arith.constant 0 : i32
    %c0_i32_0 = arith.constant 0 : i32
    %c0_i32_1 = arith.constant 0 : i32
    %c0_i32_2 = arith.constant 0 : i32
    return %arg0, %c0_i32, %c0_i32_0, %c0_i32_1 : i32, i32, i32, i32
  }
  func.func @transform_1(%arg0: i32, %arg1: i32) -> (i32, i32) {
    %c0_i32 = arith.constant 0 : i32
    %c0_i32_0 = arith.constant 0 : i32
    %c0_i32_1 = arith.constant 0 : i32
    return %c0_i32, %c0_i32_0 : i32, i32
  }
  func.func @transform_2(%arg0: i32, %arg1: i32) -> (i32, i32) {
    %c0_i32 = arith.constant 0 : i32
    %c0_i32_0 = arith.constant 0 : i32
    %c0_i32_1 = arith.constant 0 : i32
    return %c0_i32, %c0_i32_0 : i32, i32
  }
  func.func @transform_3(%arg0: i32, %arg1: i32) -> (i32, i32) {
    %c0_i32 = arith.constant 0 : i32
    %c0_i32_0 = arith.constant 0 : i32
    %c0_i32_1 = arith.constant 0 : i32
    return %c0_i32, %c0_i32_0 : i32, i32
  }
  func.func @transform_4(%arg0: i32, %arg1: i32) -> (i32, i32, i32) {
    %c0_i32 = arith.constant 0 : i32
    %c0_i32_0 = arith.constant 0 : i32
    %c0_i32_1 = arith.constant 0 : i32
    %c0_i32_2 = arith.constant 0 : i32
    return %c0_i32, %c0_i32_0, %c0_i32_1 : i32, i32, i32
  }
  func.func @transform_5(%arg0: i32, %arg1: i32) -> (i32, i32) {
    %c0_i32 = arith.constant 0 : i32
    %c0_i32_0 = arith.constant 0 : i32
    %c0_i32_1 = arith.constant 0 : i32
    return %c0_i32, %c0_i32_0 : i32, i32
  }
  func.func @transform_6(%arg0: i32, %arg1: i32) -> (i32, i32, i32, i32) {
    %c0_i32 = arith.constant 0 : i32
    %c0_i32_0 = arith.constant 0 : i32
    %c0_i32_1 = arith.constant 0 : i32
    return %arg0, %c0_i32, %arg1, %c0_i32_0 : i32, i32, i32, i32
  }
  func.func @transform_7(%arg0: i32, %arg1: i32) -> (i32, i32, i32, i32) {
    %c0_i32 = arith.constant 0 : i32
    %c0_i32_0 = arith.constant 0 : i32
    %c0_i32_1 = arith.constant 0 : i32
    return %arg0, %c0_i32, %arg1, %c0_i32_0 : i32, i32, i32, i32
  }
}

</mosaic_0001>

<bundles_post_ra>
// kernel: sfenet_forward.1
= control target key start
LH: loop header
LB: loop body
LE: loop exit
PB: predicated region body
PF: predicated region fallthrough
CT: control target
= control target key end

     0   :  { %s11492_s24 = smov 0   ;;  %s11494_s25 = smov 0   ;;  %s17198_s0 = inlined_call_operand.vmem [shape: f32[2,3,21,20], index: 0, kind: input, shape index: {}]   ;;  %s17199_s1 = inlined_call_operand.vmem [shape: f32[1,360], index: 1, kind: input, shape index: {}]   ;;  %s17200_s2 = inlined_call_operand.vmem [shape: f32[64,72], index: 2, kind: input, shape index: {}]   ;;  %s17201_s3 = inlined_call_operand.vmem [shape: f32[64,1], index: 3, kind: input, shape index: {}]   ;;  %s17202_s4 = inlined_call_operand.vmem [shape: f32[3,64,192], index: 4, kind: input, shape index: {}]   ;;  %s17203_s5 = inlined_call_operand.vmem [shape: f32[64,1], index: 5, kind: input, shape index: {}]   ;;  %s17204_s6 = inlined_call_operand.vmem [shape: f32[2,64,16,16], index: 6, kind: output, shape index: {0}]   ;;  %s17205_s7 = inlined_call_operand.vmem [shape: f32[2,64,16,16], index: 7, kind: output, shape index: {1}]  }
   0x1   :  { %s11496_s26 = smov 0  }
   0x2 LB: > { %s30_s27 = sadd.s32 1, %s11404_s25  ;;  %p10864_p0 = scmp.ge.s32.totalorder %s11408_s26, 1  ;;  %s11408_s26 = sphi %s11496_s26, %s18_s26   ;;  %s11404_s25 = sphi %s11494_s25, %s17624_s25   ;;  %s11400_s24 = sphi %s11492_s24, %s17623_s24  }
   0x3   : > { %p32_p1 = scmp.ge.s32.totalorder %s30_s27, 2  ;;  %p256_p2 = scmp.lt.s32.totalorder %s11408_s26, 3 }
   0x5   : > { %s17626_s27 = smov (%p32_p1, %s30_s27), 0  ;;  %p257_p3 = pnand %p10864_p0, %p256_p2 }
   0x7   : > { %260 = sbr.rel (%p257_p3) target bundleno = 2475 (0x9ab), region = 44 }
   0xe   : > { %p301_p4 = scmp.lt.s32.totalorder %s11400_s24, 1  ;;  %v342_v0 = vlaneseq  ;;  %v11410_v1 = vmov 1983009808   ;;  %v17214_v3 = vmov 0.0   ;;  %v11412_v5 = vmov 1934713408  }
   0xf   : > { %v340_v2 = vunpack.c.l.s4 %v11410_v1  ;;  %646 = vst [vmem:[#allocation2] sm:$0xf8] %v17214_v3  ;;  %647 = vst [vmem:[#allocation2 + $0x8] sm:$0xf8] %v17214_v3  ;;  %1011 = vmatprep.mubr.f32.mxu0 %v17214_v3  ;;  %v371_v6 = vunpack.c.l.s4 %v11412_v5  ;;  %v11413_v7 = vmov 0   ;;  %s11414_s9 = smov 80  }
  0x10   : > { %648 = vst [vmem:[#allocation2 + $0x10] sm:$0xf8] %v17214_v3  ;;  %s17628_s24 = smov (!%p301_p4, %s11400_s24), 1  ;;  %v11516_v4 = vshrl.u32 %v342_v0, 7  ;;  %11368 = vset.pattern.permute.xlu1 %v11413_v7  ;;  %11369 = vset.pattern.permute.xlu0 %v11413_v7  ;;  %s11415_s10 = smov 40   ;;  %vm649_vm0 = vcmask 293891  }
  0x11   : > { %v341_v8 = vunpack.c.0.s8 %v340_v2  ;;  %s11301_s28 = smul.u32 72, %s17628_s24  ;;  %v372_v10 = vunpack.c.0.s8 %v371_v6  ;;  %s11416_s11 = smov 120   ;;  %650 = vst.msk [vmem:[#allocation2 + $0x18] sm:$0xf8] %vm649_vm0, %v17214_v3  ;;  %v875_v5 = vld [vmem:[%s17201_s3] sm:$0xff]  ;;  %v876_v6 = vld [vmem:[%s17201_s3 + $0x8] sm:$0xff] }
  0x12   : > { %s11417_s12 = smov 20   ;;  %s11418_s13 = smov 32   ;;  %v877_v7 = vld [vmem:[%s17201_s3 + $0x10] sm:$0xff]  ;;  %vm601_vm1 = vcmask 162816   ;;  %vm613_vm2 = vcmask 97280   ;;  %vm603_vm3 = vcmask 326656  }
  0x13   : > { %v11520_v9 = vsub.s32 %v341_v8, %v11516_v4  ;;  %s11525_s8 = scalar_lea.vmem %s17198_s0, %s11301_s28  ;;  %v11537_v20 = vsub.s32 %v372_v10, %v11516_v4  ;;  %s11419_s14 = smov 100   ;;  %v879_v8 = vld [vmem:[%s17201_s3 + $0x20] sm:$0xff]  ;;  %v878_v10 = vld [vmem:[%s17201_s3 + $0x18] sm:$0xff]  ;;  %vm615_vm4 = vcmask 261120   ;;  %vm605_vm5 = vcmask 490496  }
  0x14   : > { %v331_v11 = vld [vmem:[%s11525_s8 + $0x18] sm:$0xff]  ;;  %v11370_v12 = vld [vmem:[%s11525_s8 + $0x4] ss:$48 sps:$4 sm:$0xff]   ;;  %v11372_v14 = vld [vmem:[%s11525_s8] ss:$48 sps:$4 sm:$0xff]   ;;  %s11420_s15 = smov 72  }
  0x15   : > { %v353_v13 = vcombine.high %v331_v11, %v17214_v3  ;;  %v360_v15 = vrot.slane %v331_v11, %v11520_v9  ;;  %v332_v16 = vld [vmem:[%s11525_s8 + $0x20] sm:$0xff]  ;;  %v11373_v17 = vld [vmem:[%s11525_s8 + $0x8] ss:$48 sps:$4 sm:$0xff]   ;;  %v352_v18 = vrot.slane %v11370_v12, %v11520_v9  ;;  %v345_v21 = vrot.slane %v11372_v14, %v11520_v9  ;;  %v11375_v34 = vld [vmem:[%s11525_s8 + $0xc] ss:$48 sps:$4 sm:$0xff]   ;;  %s11421_s16 = smov 12  }
  0x16   : > { %v412_v22 = vrot.slane %v11373_v17, %v11520_v9  ;;  %v427_v23 = vrot.slane %v332_v16, %v11520_v9  ;;  %v420_v35 = vcombine.high %v332_v16, %v17214_v3  ;;  %v419_v39 = vrot.slane %v11375_v34, %v11520_v9  ;;  %v11376_v46 = vld [vmem:[%s11525_s8 + $0x10] ss:$48 sps:$4 sm:$0xff]   ;;  %v333_v47 = vld [vmem:[%s11525_s8 + $0x28] sm:$0x1f]  ;;  %s11422_s17 = smov 60   ;;  %s11423_s18 = smov 52  }
  0x17   : > { %v367_v19 = vrot.slane %v353_v13, %v11520_v9  ;;  %v369_v25 = vcombine.high %v345_v21, %v360_v15  ;;  %v368_v26 = vcombine.low %v345_v21, %v360_v15  ;;  %v479_v51 = vrot.slane %v11376_v46, %v11520_v9  ;;  %v11378_v53 = vld [vmem:[%s11525_s8 + $0x14] ss:$48 sps:$4 sm:$0x11]   ;;  %s11424_s19 = smov 112   ;;  %s11425_s20 = smov 92   ;;  %v880_v12 = vld [vmem:[%s17201_s3 + $0x28] sm:$0xff] }
  0x18   : > { %v435_v33 = vcombine.low %v412_v22, %v427_v23  ;;  %v436_v38 = vcombine.high %v412_v22, %v427_v23  ;;  %v434_v40 = vrot.slane %v420_v35, %v11520_v9  ;;  %v493_v52 = vrot.slane %v333_v47, %v11520_v9  ;;  %s11426_s21 = smov 24   ;;  %s11427_s22 = smov 4   ;;  %v881_v11 = vld [vmem:[%s17201_s3 + $0x30] sm:$0xff]  ;;  %v882_v13 = vld [vmem:[%s17201_s3 + $0x38] sm:$0xff] }
  0x19   : > { %v384_v24 = vcombine.low %v352_v18, %v367_v19  ;;  %v385_v27 = vcombine.high %v352_v18, %v367_v19  ;;  %v383_v29 = vrot.slane %v369_v25, %v11537_v20  ;;  %v11545_v30 = vrot.slane %v368_v26, %v11537_v20  ;;  %s11428_s23 = smov 64   ;;  %s11429_s28 = smov 44  }
  0x1a   : > { %v443_v37 = vrot.slane %v435_v33, %v11537_v20  ;;  %v450_v41 = vrot.slane %v436_v38, %v11537_v20  ;;  %v451_v43 = vcombine.low %v419_v39, %v434_v40  ;;  %v452_v49 = vcombine.high %v419_v39, %v434_v40  ;;  %s17283_s29 = smov 104   ;;  %s17281_s30 = smov 84  }
  0x1b   : > { %v392_v28 = vrot.slane %v384_v24, %v11537_v20  ;;  %526 = vrot.lane.b32.xlu0 %v383_v29, %s11415_s10  ;;  %v399_v31 = vrot.slane %v385_v27, %v11537_v20  ;;  %v400_v32 = vcombine.high %v11545_v30, %v17214_v3  ;;  %v401_v44 = vcombine.high %v383_v29, %v17214_v3  ;;  %s17298_s8 = smov 16   ;;  %s11443_s10 = smov 68  }
  0x1c   : > { %v467_v45 = vcombine.high %v443_v37, %v17214_v3  ;;  %v459_v48 = vrot.slane %v451_v43, %v11537_v20  ;;  %v468_v50 = vcombine.high %v450_v41, %v17214_v3  ;;  %v466_v54 = vrot.slane %v452_v49, %v11537_v20 }
  0x1d   : > { %534 = vrot.lane.b32.xlu1 %v392_v28, %s11414_s9  ;;  %v402_v36 = vcombine.high %v392_v28, %v17214_v3  ;;  %v403_v42 = vcombine.high %v399_v31, %v17214_v3  ;;  %v495_v56 = vcombine.low %v479_v51, %v493_v52  ;;  %v486_v57 = vrot.slane %v11378_v53, %v11520_v9  ;;  %s17296_s9 = smov 124  }
  0x1e   : > { %v469_v55 = vcombine.high %v459_v48, %v17214_v3  ;;  %v494_v58 = vcombine.high %v333_v47, %v17214_v3  ;;  %v470_v60 = vcombine.high %v466_v54, %v17214_v3  ;;  %v496_v61 = vcombine.high %v479_v51, %v493_v52 }
  0x1f   : > { %522 = vrot.lane.b32.xlu0 %v400_v32, %s11417_s12  ;;  %v503_v59 = vrot.slane %v495_v56, %v11537_v20  ;;  %vm617_vm6 = vcmask 424960   ;;  %vm607_vm7 = vcmask 654336   ;;  %vm609_vm8 = vcmask 818176   ;;  %s11446_s12 = smov 116  }
  0x20   : > { %v510_v62 = vrot.slane %v496_v61, %v11537_v20  ;;  %v511_v0 = vcombine.low %v486_v57, %v494_v58  ;;  %vm611_vm9 = vcmask 982016   ;;  %vm619_vm10 = vcmask 588800  }
  0x21   : > { %542 = vrot.lane.b32.xlu1 %v399_v31, %s11416_s11  ;;  %v512_v63 = vcombine.high %v503_v59, %v17214_v3  ;;  %vm621_vm11 = vcmask 752640   ;;  %vm623_vm12 = vcmask 916480   ;;  %vm625_vm13 = vcmask 31744   ;;  %s11445_s11 = smov 28  }
  0x22   : > { %v520_v1 = vrot.slane %v511_v0, %v11537_v20  ;;  %v513_v2 = vcombine.high %v510_v62, %v17214_v3  ;;  %vm627_vm14 = vcmask 195584   ;;  %vm629_vm15 = vcmask 359424  }
  0x23   : > { %538 = vrot.lane.b32.xlu0 %v402_v36, %s11419_s14  ;;  %vm631_vm0 = vcmask 523264   ;;  %s11435_s14 = smov 126  }
  0x25   : > { %550 = vrot.lane.b32.xlu1 %v443_v37, %s11418_s13  ;;  %s11434_s13 = smov 127  }
  0x27   : > { %546 = vrot.lane.b32.xlu0 %v403_v42, %s11421_s16  ;;  %s17212_s16 = smov 107  }
  0x29   : > { %558 = vrot.lane.b32.xlu1 %v450_v41, %s11420_s15  ;;  %s11436_s15 = smov 108  }
  0x2b   : > { %554 = vrot.lane.b32.xlu0 %v467_v45, %s11423_s18  ;;  %s17210_s18 = smov 106  }
  0x2d   : > { %530 = vrot.lane.b32.xlu1 %v401_v44, %s11422_s17  ;;  %s11438_s17 = smov 88  }
  0x2f   : > { %562 = vrot.lane.b32.xlu0 %v468_v50, %s11425_s20  ;;  %s17206_s20 = smov 86  }
  0x31   : > { %566 = vrot.lane.b32.xlu1 %v459_v48, %s11424_s19  ;;  %s17208_s19 = smov 87  }
  0x33   : > { %570 = vrot.lane.b32.xlu0 %v469_v55, %s11427_s22  ;;  %s11442_s22 = smov 8  }
  0x35   : > { %574 = vrot.lane.b32.xlu1 %v466_v54, %s11426_s21  ;;  %s11447_s21 = smov 96  }
  0x37   : > { %578 = vrot.lane.b32.xlu0 %v470_v60, %s11429_s28 }
  0x39   : > { %582 = vrot.lane.b32.xlu1 %v503_v59, %s11428_s23  ;;  %v11665_v59 = vld [vmem:[%s17200_s2] sm:$0xff] }
  0x3a   : > { %11005 = vmatprep.mubr.msk.f32.mxu1 %vm619_vm10, %v11665_v59 }
  0x3b   : > { %586 = vrot.lane.b32.xlu0 %v512_v63, %s17281_s30 }
  0x3d   : > { %590 = vrot.lane.b32.xlu1 %v510_v62, %s17283_s29 }
  0x3f   : > { %594 = vrot.lane.b32.xlu0 %v513_v2, %s17296_s9 }
  0x41   : > { %598 = vrot.lane.b32.xlu1 %v520_v1, %s17298_s8 }
  0x43   : > { %890 = vperm.xlu0 %11369, %v876_v6  }
  0x45   : > { %885 = vperm.xlu1 %11368, %v875_v5  }
  0x47   : > { %905 = vperm.xlu0 %11369, %v879_v8  }
  0x49   : > { %895 = vperm.xlu1 %11368, %v877_v7  }
  0x4b   : > { %915 = vperm.xlu0 %11369, %v881_v11  }
  0x4d   : > { %900 = vperm.xlu1 %11368, %v878_v10  }
  0x51   : > { %910 = vperm.xlu1 %11368, %v880_v12  }
  0x55   : > { %920 = vperm.xlu1 %11368, %v882_v13  }
  0x8d   : > { %v527_v15 = vpop.permute.xlu0 %526 }
  0x8f   : > { %v535_v14 = vpop.permute.xlu1 %534 }
  0x91   : > { %v523_v17 = vpop.permute.xlu0 %522 }
  0x92   : > { %v602_v23 = vsel %vm601_vm1, %v11545_v30, %v523_v17 }
  0x93   : > { %v543_v16 = vpop.permute.xlu1 %542  ;;  %v604_v26 = vsel %vm603_vm3, %v602_v23, %v527_v15  ;;  %vm635_vm3 = vcmask 850944  }
  0x95   : > { %v539_v19 = vpop.permute.xlu0 %538 }
  0x97   : > { %v551_v18 = vpop.permute.xlu1 %550 }
  0x99   : > { %v547_v22 = vpop.permute.xlu0 %546 }
  0x9a   : > { %v614_v24 = vsel %vm613_vm2, %v543_v16, %v547_v22  ;;  %vm633_vm2 = vcmask 687104  }
  0x9b   : > { %v559_v21 = vpop.permute.xlu1 %558  ;;  %v616_v27 = vsel %vm615_vm4, %v614_v24, %v551_v18  ;;  %vm637_vm4 = vcmask 1014784  }
  0x9d   : > { %v555_v28 = vpop.permute.xlu0 %554 }
  0x9e   : > { %v618_v31 = vsel %vm617_vm6, %v616_v27, %v555_v28  ;;  %vm644_vm6 = vcmask 288768  }
  0x9f   : > { %v531_v25 = vpop.permute.xlu1 %530  ;;  %v620_v35 = vsel %vm619_vm10, %v618_v31, %v559_v21 }
  0xa0   : > { %v606_v29 = vsel %vm605_vm5, %v604_v26, %v531_v25  ;;  %vm639_vm5 = vcmask 130048  }
  0xa1   : > { %v608_v32 = vsel %vm607_vm7, %v606_v29, %v535_v14  ;;  %v563_v36 = vpop.permute.xlu0 %562  ;;  %vm669_vm7 = vcmask 1039360  }
  0xa2   : > { %v610_v33 = vsel %vm609_vm8, %v608_v32, %v539_v19  ;;  %v622_v37 = vsel %vm621_vm11, %v620_v35, %v563_v36  ;;  %vm690_vm8 = vcmask 1031168   ;;  %vm732_vm11 = vcmask 875520  }
  0xa3   : > { %v612_v30 = vsel %vm611_vm9, %v610_v33, %v543_v16  ;;  %v567_v34 = vpop.permute.xlu1 %566  ;;  %vm711_vm9 = vcmask 883712  }
  0xa4   : > { %641 = vst [vmem:[#allocation2] sm:$0x7] %v612_v30  ;;  %v624_v38 = vsel %vm623_vm12, %v622_v37, %v567_v34  ;;  %vm778_vm12 = vcmask 719872  }
  0xa5   : > { %642 = vst [vmem:[#allocation2 + $0x8] sm:$0x7] %v624_v38  ;;  %v571_v40 = vpop.permute.xlu0 %570 }
  0xa6   : > { %v626_v41 = vsel %vm625_vm13, %v567_v34, %v571_v40  ;;  %vm753_vm13 = vcmask 867328  }
  0xa7   : > { %v575_v39 = vpop.permute.xlu1 %574 }
  0xa8   : > { %v628_v43 = vsel %vm627_vm14, %v626_v41, %v575_v39  ;;  %vm804_vm14 = vcmask 711680  }
  0xa9   : > { %v579_v44 = vpop.permute.xlu0 %578 }
  0xaa   : > { %v630_v46 = vsel %vm629_vm15, %v628_v43, %v579_v44  ;;  %vm830_vm15 = vcmask 703488  }
  0xab   : > { %v583_v42 = vpop.permute.xlu1 %582  ;;  %v11611_v45 = vld [vmem:[#allocation2] sm:$0xff] }
  0xac   : > { %v11613_v47 = vld [vmem:[#allocation2 + $0x8] sm:$0xff]  ;;  %v632_v49 = vsel %vm631_vm0, %v630_v46, %v583_v42 }
  0xad   : > { %665 = vrot.lane.b32.xlu1 %v11613_v47, %s11434_s13  ;;  %v587_v50 = vpop.permute.xlu0 %586 }
  0xae   : > { %v634_v51 = vsel %vm633_vm2, %v632_v49, %v587_v50  ;;  %vm1251_vm2 = vcmask 851616  }
  0xaf   : > { %v591_v48 = vpop.permute.xlu1 %590 }
  0xb0   : > { %v636_v52 = vsel %vm635_vm3, %v634_v51, %v591_v48 }
  0xb1   : > { %684 = vrot.lane.b32.xlu1 %v11611_v45, %s11435_s14  ;;  %v595_v54 = vpop.permute.xlu0 %594 }
  0xb2   : > { %v638_v55 = vsel %vm637_vm4, %v636_v52, %v595_v54  ;;  %vm5237_vm4 = vcmask 130049  }
  0xb3   : > { %v599_v53 = vpop.permute.xlu1 %598  ;;  %643 = vst [vmem:[#allocation2 + $0x10] sm:$0x7] %v638_v55 }
  0xb4   : > { %v640_v56 = vsel %vm639_vm5, %v595_v54, %v599_v53 }
  0xb5   : > { %645 = vst.msk [vmem:[#allocation2 + $0x18] sm:$0x7] %vm644_vm6, %v640_v56  ;;  %707 = vrot.lane.b32.xlu1 %v11613_v47, %s11436_s15 }
  0xb9   : > { %726 = vrot.lane.b32.xlu1 %v11611_v45, %s17212_s16 }
  0xba   : > { %v680_v58 = vld [vmem:[#allocation2 + $0x10] sm:$0xff] }
  0xbb   : > { %656 = vst.msk [vmem:[#allocation3 + $0x10] sm:$0xff] %vm635_vm3, %v680_v58 }
  0xbc   : > { %v765_v57 = vld [vmem:[#allocation2 + $0x18] sm:$0xff] }
  0xbd   : > { %776 = vrot.lane.b32.xlu0 %v765_v57, %s11438_s17  ;;  %749 = vrot.lane.b32.xlu1 %v11613_v47, %s17210_s18 }
  0xc1   : > { %802 = vrot.lane.b32.xlu0 %v765_v57, %s17208_s19  ;;  %770 = vrot.lane.b32.xlu1 %v11611_v45, %s11438_s17 }
  0xc2   : > { %v11679_v1 = vpop.permute.xlu0 %890 }
  0xc4   : > { %v11669_v60 = vpop.permute.xlu1 %885 }
  0xc5   : > { %828 = vrot.lane.b32.xlu0 %v765_v57, %s17206_s20  ;;  %796 = vrot.lane.b32.xlu1 %v11611_v45, %s17208_s19 }
  0xc6   : > { %v11681_v6 = vpop.permute.xlu0 %905 }
  0xc8   : > { %v11671_v61 = vpop.permute.xlu1 %895 }
  0xc9   : > { %663 = vrot.lane.b32.xlu0 %v11611_v45, %s11434_s13  ;;  %822 = vrot.lane.b32.xlu1 %v11611_v45, %s17206_s20 }
  0xca   : > { %v11683_v8 = vpop.permute.xlu0 %915 }
  0xcc   : > { %v11673_v62 = vpop.permute.xlu1 %900 }
  0xcd   : > { %686 = vrot.lane.b32.xlu0 %v11613_v47, %s11435_s14  ;;  %688 = vrot.lane.b32.xlu1 %v680_v58, %s11435_s14 }
  0xd0   : > { %v11675_v63 = vpop.permute.xlu1 %910 }
  0xd1   : > { %705 = vrot.lane.b32.xlu0 %v11611_v45, %s11436_s15  ;;  %730 = vrot.lane.b32.xlu1 %v680_v58, %s17212_s16 }
  0xd4   : > { %v11677_v0 = vpop.permute.xlu1 %920 }
  0xd5   : > { %728 = vrot.lane.b32.xlu0 %v11613_v47, %s17212_s16  ;;  %774 = vrot.lane.b32.xlu1 %v680_v58, %s11438_s17  ;;  %s11450_s16 = smov 36  }
  0xd9   : > { %747 = vrot.lane.b32.xlu0 %v11611_v45, %s17210_s18  ;;  %800 = vrot.lane.b32.xlu1 %v680_v58, %s17208_s19 }
  0xdd   : > { %772 = vrot.lane.b32.xlu0 %v11613_v47, %s11438_s17  ;;  %826 = vrot.lane.b32.xlu1 %v680_v58, %s17206_s20 }
  0xe1   : > { %798 = vrot.lane.b32.xlu0 %v11613_v47, %s17208_s19  ;;  %s11448_s19 = smov 76  }
  0xe5   : > { %824 = vrot.lane.b32.xlu0 %v11613_v47, %s17206_s20  ;;  %s11444_s20 = smov 48  }
  0xe9   : > { %667 = vrot.lane.b32.xlu0 %v680_v58, %s11434_s13 }
  0xed   : > { %709 = vrot.lane.b32.xlu0 %v680_v58, %s11436_s15 }
  0xf1   : > { %751 = vrot.lane.b32.xlu0 %v680_v58, %s17210_s18  ;;  %s11449_s18 = smov 56  }
 0x11f   : > { %v666_v2 = vpop.permute.xlu1 %665 }
 0x123   : > { %v685_v5 = vpop.permute.xlu1 %684 }
 0x127   : > { %v708_v7 = vpop.permute.xlu1 %707 }
 0x12b   : > { %v727_v10 = vpop.permute.xlu1 %726 }
 0x12f   : > { %v777_v11 = vpop.permute.xlu0 %776  ;;  %v11685_v12 = vpop.permute.xlu1 %749 }
 0x133   : > { %v803_v13 = vpop.permute.xlu0 %802  ;;  %v771_v14 = vpop.permute.xlu1 %770 }
 0x137   : > { %v829_v15 = vpop.permute.xlu0 %828  ;;  %v797_v16 = vpop.permute.xlu1 %796 }
 0x13b   : > { %v664_v17 = vpop.permute.xlu0 %663  ;;  %v823_v19 = vpop.permute.xlu1 %822 }
 0x13c   : > { %v670_v18 = vsel %vm669_vm7, %v664_v17, %v666_v2 }
 0x13d   : > { %v11019_v53 = vpack.c.bf16 %v670_v18, %v11611_v45 }
 0x13f   : > { %v687_v21 = vpop.permute.xlu0 %686  ;;  %v689_v23 = vpop.permute.xlu1 %688 }
 0x140   : > { %v691_v22 = vsel %vm690_vm8, %v685_v5, %v687_v21  ;;  %v692_v24 = vsel %vm690_vm8, %v687_v21, %v689_v23  ;;  %698 = vst.msk [vmem:[#allocation3 + $0x40] sm:$0xff] %vm635_vm3, %v689_v23  ;;  %v850_v5 = vld [vmem:[#allocation3 + $0x10] sm:$0xff]  ;;  %v841_v23 = vld [vmem:[%s17200_s2 + $0x8] sm:$0xff] }
 0x143   : > { %v706_v25 = vpop.permute.xlu0 %705  ;;  %v731_v27 = vpop.permute.xlu1 %730 }
 0x144   : > { %v712_v26 = vsel %vm711_vm9, %v706_v25, %v708_v7  ;;  %740 = vst.msk [vmem:[#allocation3 + $0x70] sm:$0xff] %vm635_vm3, %v731_v27  ;;  %v842_v25 = vld [vmem:[%s17200_s2 + $0x10] sm:$0xff] }
 0x145   : > { %v11023_v57 = vpack.c.bf16 %v712_v26, %v691_v22  ;;  %v844_v26 = vld [vmem:[%s17200_s2 + $0x20] sm:$0xff] }
 0x147   : > { %v729_v28 = vpop.permute.xlu0 %728  ;;  %v775_v32 = vpop.permute.xlu1 %774 }
 0x148   : > { %v733_v29 = vsel %vm732_vm11, %v727_v10, %v729_v28  ;;  %v734_v31 = vsel %vm732_vm11, %v729_v28, %v731_v27  ;;  %v781_v33 = vsel %vm778_vm12, %v775_v32, %v777_v11  ;;  %v845_v27 = vld [vmem:[%s17200_s2 + $0x28] sm:$0xff]  ;;  %v846_v28 = vld [vmem:[%s17200_s2 + $0x30] sm:$0xff] }
 0x149   : > { %787 = vst.msk [vmem:[#allocation3 + $0xa0] sm:$0xff] %vm635_vm3, %v781_v33  ;;  %v1173_v33 = vsub.s32 1, %v11516_v4 }
 0x14b   : > { %v748_v30 = vpop.permute.xlu0 %747  ;;  %v801_v35 = vpop.permute.xlu1 %800  ;;  %v862_v17 = vld [vmem:[#allocation3 + $0x70] sm:$0xff] }
 0x14c   : > { %v754_v34 = vsel %vm753_vm13, %v748_v30, %v11685_v12  ;;  %v807_v36 = vsel %vm804_vm14, %v801_v35, %v803_v13 }
 0x14d   : > { %813 = vst.msk [vmem:[#allocation3 + $0xb8] sm:$0xff] %vm635_vm3, %v807_v36  ;;  %v11027_v11 = vpack.c.bf16 %v754_v34, %v733_v29  ;;  %v847_v29 = vld [vmem:[%s17200_s2 + $0x38] sm:$0xff] }
 0x14f   : > { %v773_v37 = vpop.permute.xlu0 %772  ;;  %v827_v40 = vpop.permute.xlu1 %826 }
 0x150   : > { %v779_v38 = vsel %vm778_vm12, %v771_v14, %v773_v37  ;;  %v780_v39 = vsel %vm778_vm12, %v773_v37, %v775_v32  ;;  %v833_v41 = vsel %vm830_vm15, %v827_v40, %v829_v15  ;;  %v868_v21 = vld [vmem:[#allocation3 + $0xa0] sm:$0xff] }
 0x151   : > { %839 = vst.msk [vmem:[#allocation3 + $0xd0] sm:$0xff] %vm635_vm3, %v833_v41  ;;  %v1165_v32 = vld [vmem:[%s17199_s1] sm:$0x7] }
 0x153   : > { %v799_v42 = vpop.permute.xlu0 %798 }
 0x154   : > { %v805_v43 = vsel %vm804_vm14, %v797_v16, %v799_v42  ;;  %v806_v44 = vsel %vm804_vm14, %v799_v42, %v801_v35  ;;  %v871_v18 = vld [vmem:[#allocation3 + $0xb8] sm:$0xff]  ;;  %v11769_v35 = vrot.slane %v1165_v32, %v1173_v33 }
 0x155   : > { %v11029_v14 = vpack.c.bf16 %v806_v44, %v780_v39  ;;  %v11031_v16 = vpack.c.bf16 %v805_v43, %v779_v38  ;;  %v11045_v22 = vpack.c.bf16 %v871_v18, %v868_v21  ;;  %v1177_v38 = vsub.s32 2, %v11516_v4 }
 0x157   : > { %v825_v46 = vpop.permute.xlu0 %824 }
 0x158   : > { %v831_v48 = vsel %vm830_vm15, %v823_v19, %v825_v46  ;;  %v832_v49 = vsel %vm830_vm15, %v825_v46, %v827_v40  ;;  %v11779_v46 = vrot.slane %v1165_v32, %v1177_v38 }
 0x15b   : > { %v668_v50 = vpop.permute.xlu0 %667 }
 0x15c   : > { %v671_v51 = vsel %vm669_vm7, %v666_v2, %v668_v50  ;;  %677 = vst.msk [vmem:[#allocation3 + $0x28] sm:$0xff] %vm635_vm3, %v668_v50 }
 0x15d   : > { %v11017_v52 = vpack.c.bf16 %v671_v51, %v11613_v47 }
 0x15f   : > { %v710_v54 = vpop.permute.xlu0 %709  ;;  %11018 = vmatprep.subr.bf16.mxu0 %v11017_v52 }
 0x160   : > { %v713_v55 = vsel %vm711_vm9, %v708_v7, %v710_v54  ;;  %719 = vst.msk [vmem:[#allocation3 + $0x58] sm:$0xff] %vm635_vm3, %v710_v54  ;;  %11020 = vmatpush1.bf16.msra.mxu0 %v11019_v53  ;;  %v856_v7 = vld [vmem:[#allocation3 + $0x40] sm:$0xff] }
 0x161   : > { %v11021_v56 = vpack.c.bf16 %v713_v55, %v692_v24  ;;  %v874_v24 = vld [vmem:[#allocation3 + $0xd0] sm:$0xff] }
 0x163   : > { %v752_v58 = vpop.permute.xlu0 %751  ;;  %v853_v10 = vld [vmem:[#allocation3 + $0x28] sm:$0xff]  ;;  %11022 = vmatprep.subr.bf16.mxu0 %v11021_v56 }
 0x164   : > { %v755_v2 = vsel %vm753_vm13, %v11685_v12, %v752_v58  ;;  %761 = vst.msk [vmem:[#allocation3 + $0x88] sm:$0xff] %vm635_vm3, %v752_v58  ;;  %v11033_v47 = vpack.c.bf16 %v853_v10, %v850_v5  ;;  %11024 = vmatpush1.bf16.msra.mxu0 %v11023_v57 }
 0x165   : > { %v11025_v45 = vpack.c.bf16 %v755_v2, %v734_v31  ;;  %v1169_v31 = vsub.s32 0, %v11516_v4 }
 0x166   : > { %11034 = vmatprep.subr.bf16.mxu1 %v11033_v47 }
 0x167   : > { %11036 = vmatpush3.bf16.msra.mxu1 %v11033_v47  ;;  %v859_v13 = vld [vmem:[#allocation3 + $0x58] sm:$0xff]  ;;  %11026 = vmatprep.subr.bf16.mxu0 %v11025_v45  ;;  %v11767_v30 = vrot.slane %v1165_v32, %v1169_v31 }
 0x168   : > { %v11037_v15 = vpack.c.bf16 %v859_v13, %v856_v7  ;;  %11028 = vmatpush1.bf16.msra.mxu0 %v11027_v11 }
 0x169   : > { %11030 = vmatprep.subr.bf16.mxu0 %v11029_v14 }
 0x16a   : > { %11038 = vmatprep.subr.bf16.mxu1 %v11037_v15 }
 0x16b   : > { %11040 = vmatpush3.bf16.msra.mxu1 %v11037_v15  ;;  %v865_v12 = vld [vmem:[#allocation3 + $0x88] sm:$0xff] }
 0x16c   : > { %v11041_v19 = vpack.c.bf16 %v865_v12, %v862_v17  ;;  %11032 = vmatpush1.bf16.msra.mxu0 %v11031_v16 }
 0x16d   : > { %963 = vmatprep.subr.mxu0 %v832_v49 }
 0x16e   : > { %11042 = vmatprep.subr.bf16.mxu1 %v11041_v19 }
 0x16f   : > { %11044 = vmatpush3.bf16.msra.mxu1 %v11041_v19 }
 0x170   : > { %11046 = vmatprep.subr.bf16.mxu1 %v11045_v22  ;;  %964 = vmatpush1.msra.mxu0 %v831_v48 }
 0x171   : > { %10870 = vmatmul.mubr.msk.f32.vlgmr.msra.gmra.mrb[0].mxu0 %vm619_vm10, %v11665_v59  ;;  %v843_v59 = vld [vmem:[%s17200_s2 + $0x18] sm:$0xff] }
 0x172   : > { %1017 = vmatprep.mubr.f32.mxu0 %v17214_v3 }
 0x173   : > { %11048 = vmatpush3.bf16.msra.mxu1 %v11045_v22 }
 0x174   : > { %11003 = vmatprep.subr.mxu1 %v874_v24 }
 0x175   : > { %10871 = vmatmul.mubr.msk.f32.gmra.mrb[2].mxu0 %vm619_vm10, %v841_v23 }
 0x176   : > { %1023 = vmatprep.mubr.f32.mxu0 %v17214_v3 }
 0x177   : > { %11004 = vmatpush3.msra.mxu1 %v874_v24 }
 0x178   : > { %11006 = vmatmul.mubr.msk.f32.vlgmr.msra.gmra.mrb[0].mxu1 %vm619_vm10, %v841_v23 }
 0x179   : > { %11008 = vmatprep.mubr.msk.f32.mxu1 %vm619_vm10, %v842_v25  ;;  %10872 = vmatmul.mubr.msk.f32.gmra.mrb[4].mxu0 %vm619_vm10, %v842_v25 }
 0x17a   : > { %1029 = vmatprep.mubr.f32.mxu0 %v17214_v3 }
 0x17c   : > { %11009 = vmatmul.mubr.msk.f32.gmra.mrb[2].mxu1 %vm619_vm10, %v843_v59 }
 0x17d   : > { %11011 = vmatprep.mubr.msk.f32.mxu1 %vm619_vm10, %v844_v26  ;;  %10873 = vmatmul.mubr.msk.f32.gmra.mrb[6].mxu0 %vm619_vm10, %v843_v59 }
 0x17e   : > { %1035 = vmatprep.mubr.f32.mxu0 %v17214_v3 }
 0x180   : > { %11012 = vmatmul.mubr.msk.f32.gmra.mrb[4].mxu1 %vm619_vm10, %v845_v27 }
 0x181   : > { %11014 = vmatprep.mubr.msk.f32.mxu1 %vm619_vm10, %v846_v28  ;;  %10874 = vmatmul.mubr.msk.f32.gmra.mrb[8].mxu0 %vm619_vm10, %v844_v26 }
 0x182   : > { %1041 = vmatprep.mubr.f32.mxu0 %v17214_v3 }
 0x184   : > { %11015 = vmatmul.mubr.msk.f32.gmra.mrb[6].mxu1 %vm619_vm10, %v847_v29 }
 0x185   : > { %10875 = vmatmul.mubr.msk.f32.gmra.mrb[10].mxu0 %vm619_vm10, %v845_v27 }
 0x186   : > { %1047 = vmatprep.mubr.f32.mxu0 %v17214_v3 }
 0x189   : > { %10876 = vmatmul.mubr.msk.f32.gmra.mrb[12].mxu0 %vm619_vm10, %v846_v28 }
 0x18a   : > { %1053 = vmatprep.mubr.f32.mxu0 %v17214_v3 }
 0x18d   : > { %10877 = vmatmul.mubr.msk.f32.gmra.mrb[14].mxu0 %vm619_vm10, %v847_v29  ;;  %vm1230_vm10 = vcmask 1015616  }
 0x244   : > { %v1013_v34 = vpop.f32.mrb[0].mxu0 }
 0x245   : > { %v1014_v36 = vadd.f32 %v1013_v34, %v11669_v60  ;;  %v1015_v37 = vpop.f32.mrb[1].mxu0 }
 0x246   : > { %v1016_v39 = vadd.f32 %v1015_v37, %v11669_v60 }
 0x247   : > { %v1182_v40 = vmul.f32 %v11767_v30, %v1014_v36 }
 0x248   : > { %v11776_v41 = vmul.f32 %v11769_v35, %v1016_v39  ;;  %v1019_v42 = vpop.f32.mrb[2].mxu0 }
 0x249   : > { %1206 = vst [vmem:[#allocation4] sm:$0xff] %v1182_v40  ;;  %v1020_v43 = vadd.f32 %v1019_v42, %v11679_v1  ;;  %v1021_v44 = vpop.f32.mrb[3].mxu0 }
 0x24a   : > { %1243 = vst.msk [vmem:[#allocation4] sm:$0xff] %vm601_vm1, %v17214_v3  ;;  %1207 = vst [vmem:[#allocation4 + $0x8] sm:$0xff] %v11776_v41  ;;  %v1022_v4 = vadd.f32 %v1021_v44, %v11679_v1  ;;  %1422 = vrot.lane.b32.xlu1 %v11776_v41, %s11442_s22 }
 0x24b   : > { %v11007_v48 = vpop.f32.mrb[0].mxu1  ;;  %v1185_v49 = vmul.f32 %v11767_v30, %v1020_v43 }
 0x24c   : > { %v1132_v50 = vadd.f32 %v11007_v48, %v11679_v1  ;;  %v1126_v51 = vpop.f32.mrb[1].mxu1  ;;  %v11790_v52 = vmul.f32 %v11769_v35, %v1022_v4  ;;  %v1025_v53 = vpop.f32.mrb[4].mxu0 }
 0x24d   : > { %v1127_v54 = vadd.f32 %v1126_v51, %v11669_v60  ;;  %1209 = vst [vmem:[#allocation4 + $0x18] sm:$0xff] %v1185_v49  ;;  %v1026_v55 = vadd.f32 %v1025_v53, %v11671_v61  ;;  %v1027_v56 = vpop.f32.mrb[5].mxu0 }
 0x24e   : > { %v1187_v57 = vmul.f32 %v11779_v46, %v1132_v50  ;;  %1244 = vst.msk [vmem:[#allocation4 + $0x18] sm:$0xff] %vm601_vm1, %v17214_v3  ;;  %1210 = vst [vmem:[#allocation4 + $0x20] sm:$0xff] %v11790_v52  ;;  %v1028_v1 = vadd.f32 %v1027_v56, %v11671_v61  ;;  %v11049_v58 = vpack.c.bf16 %v11790_v52, %v11776_v41 }
 0x24f   : > { %v1184_v60 = vmul.f32 %v11779_v46, %v1127_v54  ;;  %v11010_v5 = vpop.f32.mrb[2].mxu1  ;;  %v1188_v10 = vmul.f32 %v11767_v30, %v1026_v55 }
 0x250   : > { %1211 = vst.msk [vmem:[#allocation4 + $0x28] sm:$0xff] %vm635_vm3, %v1187_v57  ;;  %v1142_v2 = vadd.f32 %v11010_v5, %v11673_v62  ;;  %v1136_v47 = vpop.f32.mrb[3].mxu1  ;;  %v11806_v45 = vmul.f32 %v11769_v35, %v1028_v1  ;;  %v1031_v11 = vpop.f32.mrb[6].mxu0  ;;  %11050 = vmatprep.subr.bf16.mxu0 %v11049_v58 }
 0x251   : > { %1232 = vst.msk [vmem:[#allocation4 + $0x28] sm:$0xff] %vm1230_vm10, %v17214_v3  ;;  %v11810_v7 = vld [vmem:[#allocation4] sm:$0xff]  ;;  %v1137_v13 = vadd.f32 %v1136_v47, %v11671_v61  ;;  %1212 = vst [vmem:[#allocation4 + $0x30] sm:$0xff] %v1188_v10  ;;  %v1032_v14 = vadd.f32 %v1031_v11, %v11673_v62  ;;  %v1033_v15 = vpop.f32.mrb[7].mxu0 }
 0x252   : > { %1208 = vst.msk [vmem:[#allocation4 + $0x10] sm:$0xff] %vm635_vm3, %v1184_v60  ;;  %v1193_v16 = vmul.f32 %v11779_v46, %v1142_v2  ;;  %1213 = vst [vmem:[#allocation4 + $0x38] sm:$0xff] %v11806_v45  ;;  %v1034_v17 = vadd.f32 %v1033_v15, %v11673_v62  ;;  %1292 = vrot.lane.b32.xlu0 %v11810_v7, %s11436_s15 }
 0x253   : > { %1253 = vst.msk [vmem:[#allocation4 + $0x28] sm:$0xff] %vm1251_vm2, %v17214_v3  ;;  %v1190_v61 = vmul.f32 %v11779_v46, %v1137_v13  ;;  %v11013_v12 = vpop.f32.mrb[4].mxu1  ;;  %v1191_v18 = vmul.f32 %v11767_v30, %v1032_v14 }
 0x254   : > { %1231 = vst.msk [vmem:[#allocation4 + $0x10] sm:$0xff] %vm1230_vm10, %v17214_v3  ;;  %v1152_v19 = vadd.f32 %v11013_v12, %v11675_v63  ;;  %v1146_v21 = vpop.f32.mrb[5].mxu1  ;;  %v11833_v22 = vmul.f32 %v11769_v35, %v1034_v17  ;;  %v1037_v62 = vpop.f32.mrb[8].mxu0 }
 0x255   : > { %1245 = vst.msk [vmem:[#allocation4 + $0x30] sm:$0xff] %vm601_vm1, %v17214_v3  ;;  %v11837_v23 = vld [vmem:[#allocation4 + $0x18] sm:$0xff]  ;;  %v1147_v24 = vadd.f32 %v1146_v21, %v11681_v6  ;;  %1215 = vst [vmem:[#allocation4 + $0x48] sm:$0xff] %v1191_v18  ;;  %v1038_v25 = vadd.f32 %v1037_v62, %v11681_v6  ;;  %v1039_v59 = vpop.f32.mrb[9].mxu0 }
 0x256   : > { %1252 = vst.msk [vmem:[#allocation4 + $0x10] sm:$0xff] %vm1251_vm2, %v17214_v3  ;;  %v1199_v26 = vmul.f32 %v11779_v46, %v1152_v19  ;;  %1216 = vst [vmem:[#allocation4 + $0x50] sm:$0xff] %v11833_v22  ;;  %v1040_v27 = vadd.f32 %v1039_v59, %v11681_v6  ;;  %1316 = vrot.lane.b32.xlu0 %v11810_v7, %s11438_s17  ;;  %v11051_v28 = vpack.c.bf16 %v11837_v23, %v11810_v7 }
 0x257   : > { %1217 = vst.msk [vmem:[#allocation4 + $0x58] sm:$0xff] %vm635_vm3, %v1193_v16  ;;  %1214 = vst.msk [vmem:[#allocation4 + $0x40] sm:$0xff] %vm635_vm3, %v1190_v61  ;;  %v11053_v29 = vpack.c.bf16 %v11833_v22, %v11806_v45  ;;  %v1196_v31 = vmul.f32 %v11779_v46, %v1147_v24  ;;  %v11016_v32 = vpop.f32.mrb[6].mxu1  ;;  %v1194_v33 = vmul.f32 %v11767_v30, %v1038_v25 }
 0x258   : > { %1234 = vst.msk [vmem:[#allocation4 + $0x58] sm:$0xff] %vm1230_vm10, %v17214_v3  ;;  %1233 = vst.msk [vmem:[#allocation4 + $0x40] sm:$0xff] %vm1230_vm10, %v17214_v3  ;;  %v1162_v6 = vadd.f32 %v11016_v32, %v11677_v0  ;;  %v1156_v34 = vpop.f32.mrb[7].mxu1  ;;  %v11864_v36 = vmul.f32 %v11769_v35, %v1040_v27  ;;  %v1043_v37 = vpop.f32.mrb[10].mxu0  ;;  %11052 = vmatpush1.bf16.msra.mxu0 %v11051_v28 }
 0x259   : > { %1255 = vst.msk [vmem:[#allocation4 + $0x58] sm:$0xff] %vm1251_vm2, %v17214_v3  ;;  %1254 = vst.msk [vmem:[#allocation4 + $0x40] sm:$0xff] %vm1251_vm2, %v17214_v3  ;;  %v1157_v39 = vadd.f32 %v1156_v34, %v11683_v8  ;;  %v1044_v40 = vadd.f32 %v1043_v37, %v11675_v63  ;;  %v1045_v42 = vpop.f32.mrb[11].mxu0  ;;  %11054 = vmatprep.subr.bf16.mxu0 %v11053_v29 }
 0x25a   : > { %1246 = vst.msk [vmem:[#allocation4 + $0x48] sm:$0xff] %vm601_vm1, %v17214_v3  ;;  %v11866_v38 = vld [vmem:[#allocation4 + $0x28] sm:$0xff]  ;;  %1218 = vst [vmem:[#allocation4 + $0x60] sm:$0xff] %v1194_v33  ;;  %v1205_v44 = vmul.f32 %v11779_v46, %v1162_v6  ;;  %v1046_v4 = vadd.f32 %v1045_v42, %v11675_v63  ;;  %1340 = vrot.lane.b32.xlu0 %v11810_v7, %s11443_s10 }
 0x25b   : > { %1223 = vst.msk [vmem:[#allocation4 + $0x88] sm:$0xff] %vm635_vm3, %v1199_v26  ;;  %1220 = vst.msk [vmem:[#allocation4 + $0x70] sm:$0xff] %vm635_vm3, %v1196_v31  ;;  %1603 = vrot.lane.b32.xlu1 %v11866_v38, %s17298_s8  ;;  %v1202_v49 = vmul.f32 %v11779_v46, %v1157_v39  ;;  %v1197_v50 = vmul.f32 %v11767_v30, %v1044_v40 }
 0x25c   : > { %1236 = vst.msk [vmem:[#allocation4 + $0x88] sm:$0xff] %vm1230_vm10, %v17214_v3  ;;  %1235 = vst.msk [vmem:[#allocation4 + $0x70] sm:$0xff] %vm1230_vm10, %v17214_v3  ;;  %v11892_v48 = vld [vmem:[#allocation4 + $0x30] sm:$0xff]  ;;  %v11900_v63 = vmul.f32 %v11769_v35, %v1046_v4  ;;  %v1049_v51 = vpop.f32.mrb[12].mxu0 }
 0x25d   : > { %5460 = vst.msk [vmem:[#allocation5 + $0x28] sm:$0xff] %vm631_vm0, %v11866_v38  ;;  %v11875_v43 = vld [vmem:[#allocation4 + $0x10] sm:$0xff]  ;;  %1219 = vst [vmem:[#allocation4 + $0x68] sm:$0xff] %v11864_v36  ;;  %v1050_v46 = vadd.f32 %v1049_v51, %v11683_v8  ;;  %v1051_v55 = vpop.f32.mrb[13].mxu0 }
 0x25e   : > { %1257 = vst.msk [vmem:[#allocation4 + $0x88] sm:$0xff] %vm1251_vm2, %v17214_v3  ;;  %1256 = vst.msk [vmem:[#allocation4 + $0x70] sm:$0xff] %vm1251_vm2, %v17214_v3  ;;  %v1052_v57 = vadd.f32 %v1051_v55, %v11683_v8  ;;  %1364 = vrot.lane.b32.xlu0 %v11810_v7, %s11444_s20  ;;  %v11057_v58 = vpack.c.bf16 %v11900_v63, %v11864_v36 }
 0x25f   : > { %1247 = vst.msk [vmem:[#allocation4 + $0x60] sm:$0xff] %vm601_vm1, %v17214_v3  ;;  %1221 = vst [vmem:[#allocation4 + $0x78] sm:$0xff] %v1197_v50  ;;  %1647 = vrot.lane.b32.xlu1 %v11866_v38, %s17296_s9  ;;  %v1200_v60 = vmul.f32 %v11767_v30, %v1050_v46 }
 0x260   : > { %5457 = vst.msk [vmem:[#allocation5 + $0x10] sm:$0xff] %vm631_vm0, %v11875_v43  ;;  %v11902_v53 = vld [vmem:[#allocation4 + $0x58] sm:$0xff]  ;;  %v11912_v56 = vld [vmem:[#allocation4 + $0x40] sm:$0xff]  ;;  %1222 = vst [vmem:[#allocation4 + $0x80] sm:$0xff] %v11900_v63  ;;  %v11936_v8 = vmul.f32 %v11769_v35, %v1052_v57  ;;  %v1055_v5 = vpop.f32.mrb[14].mxu0 }
 0x261   : > { %1229 = vst.msk [vmem:[#allocation4 + $0xb8] sm:$0xff] %vm635_vm3, %v1205_v44  ;;  %v11906_v54 = vld [vmem:[#allocation4 + $0x48] sm:$0xff]  ;;  %1226 = vst.msk [vmem:[#allocation4 + $0xa0] sm:$0xff] %vm635_vm3, %v1202_v49  ;;  %v1056_v2 = vadd.f32 %v1055_v5, %v11677_v0  ;;  %v1057_v47 = vpop.f32.mrb[15].mxu0  ;;  %vm5240_vm3 = vcmask 122880  }
 0x262   : > { %1238 = vst.msk [vmem:[#allocation4 + $0xb8] sm:$0xff] %vm1230_vm10, %v17214_v3  ;;  %1237 = vst.msk [vmem:[#allocation4 + $0xa0] sm:$0xff] %vm1230_vm10, %v17214_v3  ;;  %v11055_v1 = vpack.c.bf16 %v11906_v54, %v11892_v48  ;;  %v1058_v13 = vadd.f32 %v1057_v47, %v11677_v0  ;;  %1388 = vrot.lane.b32.xlu0 %v11810_v7, %s11445_s11 }
 0x263   : > { %5466 = vst.msk [vmem:[#allocation5 + $0x58] sm:$0xff] %vm631_vm0, %v11902_v53  ;;  %5463 = vst.msk [vmem:[#allocation5 + $0x40] sm:$0xff] %vm631_vm0, %v11912_v56  ;;  %1671 = vrot.lane.b32.xlu1 %v11866_v38, %s17283_s29  ;;  %v1203_v15 = vmul.f32 %v11767_v30, %v1056_v2 }
 0x264   : > { %1259 = vst.msk [vmem:[#allocation4 + $0xb8] sm:$0xff] %vm1251_vm2, %v17214_v3  ;;  %1258 = vst.msk [vmem:[#allocation4 + $0xa0] sm:$0xff] %vm1251_vm2, %v17214_v3  ;;  %11056 = vmatpush1.bf16.msra.mxu0 %v11055_v1  ;;  %v1204_v16 = vmul.f32 %v11769_v35, %v1058_v13 }
 0x265   : > { %1248 = vst.msk [vmem:[#allocation4 + $0x78] sm:$0xff] %vm601_vm1, %v17214_v3  ;;  %v11938_v10 = vld [vmem:[#allocation4 + $0x88] sm:$0xff]  ;;  %1224 = vst [vmem:[#allocation4 + $0x90] sm:$0xff] %v1200_v60  ;;  %11058 = vmatprep.subr.bf16.mxu0 %v11057_v58  ;;  %v11943_v11 = vld [vmem:[#allocation4 + $0x70] sm:$0xff] }
 0x266   : > { %5472 = vst.msk [vmem:[#allocation5 + $0x88] sm:$0xff] %vm631_vm0, %v11938_v10  ;;  %1225 = vst [vmem:[#allocation4 + $0x98] sm:$0xff] %v11936_v8  ;;  %v11955_v14 = vld [vmem:[#allocation4 + $0x60] sm:$0xff]  ;;  %1420 = vrot.lane.b32.xlu0 %v11810_v7, %s11442_s22  ;;  %v11061_v35 = vpack.c.bf16 %v1204_v16, %v11936_v8 }
 0x267   : > { %1249 = vst.msk [vmem:[#allocation4 + $0x90] sm:$0xff] %vm601_vm1, %v17214_v3  ;;  %1227 = vst [vmem:[#allocation4 + $0xa8] sm:$0xff] %v1203_v15  ;;  %1695 = vrot.lane.b32.xlu1 %v11866_v38, %s17281_s30 }
 0x268   : > { %5469 = vst.msk [vmem:[#allocation5 + $0x70] sm:$0xff] %vm631_vm0, %v11943_v11  ;;  %1228 = vst [vmem:[#allocation4 + $0xb0] sm:$0xff] %v1204_v16 }
 0x269   : > { %1250 = vst.msk [vmem:[#allocation4 + $0xa8] sm:$0xff] %vm601_vm1, %v17214_v3  ;;  %vm1452_vm1 = vcmask 64512  }
 0x26a   : > { %1469 = vrot.lane.b32.xlu0 %v11776_v41, %s11446_s12 }
 0x26b   : > { %v11959_v17 = vld [vmem:[#allocation4 + $0xb8] sm:$0xff]  ;;  %v11965_v0 = vld [vmem:[#allocation4 + $0xa0] sm:$0xff]  ;;  %1719 = vrot.lane.b32.xlu1 %v11866_v38, %s11428_s23 }
 0x26c   : > { %v11961_v61 = vld [vmem:[#allocation4 + $0x78] sm:$0xff]  ;;  %5478 = vst.msk [vmem:[#allocation5 + $0xb8] sm:$0xff] %vm631_vm0, %v11959_v17  ;;  %5475 = vst.msk [vmem:[#allocation5 + $0xa0] sm:$0xff] %vm631_vm0, %v11965_v0 }
 0x26d   : > { %v11059_v30 = vpack.c.bf16 %v11961_v61, %v11955_v14 }
 0x26e   : > { %v11978_v12 = vld [vmem:[#allocation4 + $0x90] sm:$0xff]  ;;  %1493 = vrot.lane.b32.xlu0 %v11776_v41, %s11447_s21 }
 0x26f   : > { %11060 = vmatpush1.bf16.msra.mxu0 %v11059_v30  ;;  %5473 = vst [vmem:[#allocation5 + $0x90] sm:$0xff] %v11978_v12  ;;  %1743 = vrot.lane.b32.xlu1 %v11866_v38, %s11429_s28 }
 0x270   : > { %11062 = vmatprep.subr.bf16.mxu0 %v11061_v35  ;;  %v11985_v18 = vld [vmem:[#allocation4 + $0xa8] sm:$0xff] }
 0x271   : > { %5476 = vst [vmem:[#allocation5 + $0xa8] sm:$0xff] %v11985_v18 }
 0x272   : > { %1517 = vrot.lane.b32.xlu0 %v11776_v41, %s11448_s19 }
 0x273   : > { %1599 = vrot.lane.b32.xlu1 %v11875_v43, %s17298_s8 }
 0x276   : > { %1541 = vrot.lane.b32.xlu0 %v11776_v41, %s11449_s18 }
 0x277   : > { %1294 = vrot.lane.b32.xlu1 %v11837_v23, %s11436_s15 }
 0x27a   : > { %1565 = vrot.lane.b32.xlu0 %v11776_v41, %s11450_s16 }
 0x27b   : > { %1318 = vrot.lane.b32.xlu1 %v11837_v23, %s11438_s17 }
 0x27e   : > { %1597 = vrot.lane.b32.xlu0 %v11776_v41, %s17298_s8 }
 0x27f   : > { %1342 = vrot.lane.b32.xlu1 %v11837_v23, %s11443_s10 }
 0x282   : > { %1645 = vrot.lane.b32.xlu0 %v11875_v43, %s17296_s9 }
 0x283   : > { %1366 = vrot.lane.b32.xlu1 %v11837_v23, %s11444_s20 }
 0x286   : > { %1669 = vrot.lane.b32.xlu0 %v11875_v43, %s17283_s29 }
 0x287   : > { %1390 = vrot.lane.b32.xlu1 %v11837_v23, %s11445_s11 }
 0x28a   : > { %1693 = vrot.lane.b32.xlu0 %v11875_v43, %s17281_s30 }
 0x28b   : > { %1426 = vrot.lane.b32.xlu1 %v11790_v52, %s11442_s22 }
 0x28e   : > { %1717 = vrot.lane.b32.xlu0 %v11875_v43, %s11428_s23 }
 0x28f   : > { %1471 = vrot.lane.b32.xlu1 %v11790_v52, %s11446_s12 }
 0x292   : > { %1741 = vrot.lane.b32.xlu0 %v11875_v43, %s11429_s28 }
 0x293   : > { %1495 = vrot.lane.b32.xlu1 %v11790_v52, %s11447_s21 }
 0x296   : > { %1424 = vrot.lane.b32.xlu0 %v11837_v23, %s11442_s22 }
 0x297   : > { %1519 = vrot.lane.b32.xlu1 %v11790_v52, %s11448_s19 }
 0x29a   : > { %1601 = vrot.lane.b32.xlu0 %v11790_v52, %s17298_s8 }
 0x29b   : > { %1543 = vrot.lane.b32.xlu1 %v11790_v52, %s11449_s18 }
 0x29e   : > { %1649 = vrot.lane.b32.xlu0 %v11912_v56, %s17296_s9 }
 0x29f   : > { %1567 = vrot.lane.b32.xlu1 %v11790_v52, %s11450_s16 }
 0x2a2   : > { %1673 = vrot.lane.b32.xlu0 %v11912_v56, %s17283_s29 }
 0x2a3   : > { %1611 = vrot.lane.b32.xlu1 %v11902_v53, %s17298_s8 }
 0x2a6   : > { %1697 = vrot.lane.b32.xlu0 %v11912_v56, %s17281_s30 }
 0x2a7   : > { %1651 = vrot.lane.b32.xlu1 %v11902_v53, %s17296_s9 }
 0x2aa   : > { %1721 = vrot.lane.b32.xlu0 %v11912_v56, %s11428_s23 }
 0x2ab   : > { %1675 = vrot.lane.b32.xlu1 %v11902_v53, %s17283_s29 }
 0x2ae   : > { %1745 = vrot.lane.b32.xlu0 %v11912_v56, %s11429_s28 }
 0x2af   : > { %1699 = vrot.lane.b32.xlu1 %v11902_v53, %s17281_s30 }
 0x2b2   : > { %1296 = vrot.lane.b32.xlu0 %v11892_v48, %s11436_s15 }
 0x2b3   : > { %1723 = vrot.lane.b32.xlu1 %v11902_v53, %s11428_s23 }
 0x2b6   : > { %1320 = vrot.lane.b32.xlu0 %v11892_v48, %s11438_s17 }
 0x2b7   : > { %1747 = vrot.lane.b32.xlu1 %v11902_v53, %s11429_s28 }
 0x2ba   : > { %1344 = vrot.lane.b32.xlu0 %v11892_v48, %s11443_s10 }
 0x2bb   : > { %1607 = vrot.lane.b32.xlu1 %v11912_v56, %s17298_s8 }
 0x2bc   : > { %v12082_v52 = vpop.permute.xlu1 %1422 }
 0x2be   : > { %1368 = vrot.lane.b32.xlu0 %v11892_v48, %s11444_s20 }
 0x2bf   : > { %1430 = vrot.lane.b32.xlu1 %v11806_v45, %s11442_s22 }
 0x2c2   : > { %1392 = vrot.lane.b32.xlu0 %v11892_v48, %s11445_s11 }
 0x2c3   : > { %1619 = vrot.lane.b32.xlu1 %v11938_v10, %s17298_s8 }
 0x2c4   : > { %v12076_v41 = vpop.permute.xlu0 %1292 }
 0x2c6   : > { %1428 = vrot.lane.b32.xlu0 %v11892_v48, %s11442_s22 }
 0x2c7   : > { %1655 = vrot.lane.b32.xlu1 %v11938_v10, %s17296_s9 }
 0x2c8   : > { %v12084_v19 = vpop.permute.xlu0 %1316 }
 0x2ca   : > { %1473 = vrot.lane.b32.xlu0 %v11806_v45, %s11446_s12 }
 0x2cb   : > { %1679 = vrot.lane.b32.xlu1 %v11938_v10, %s17283_s29 }
 0x2cc   : > { %v12092_v62 = vpop.permute.xlu0 %1340 }
 0x2cd   : > { %v12090_v21 = vpop.permute.xlu1 %1603 }
 0x2ce   : > { %1497 = vrot.lane.b32.xlu0 %v11806_v45, %s11447_s21 }
 0x2cf   : > { %1703 = vrot.lane.b32.xlu1 %v11938_v10, %s17281_s30 }
 0x2d0   : > { %v12100_v24 = vpop.permute.xlu0 %1364 }
 0x2d1   : > { %v12098_v23 = vpop.permute.xlu1 %1647 }
 0x2d2   : > { %1521 = vrot.lane.b32.xlu0 %v11806_v45, %s11448_s19 }
 0x2d3   : > { %1727 = vrot.lane.b32.xlu1 %v11938_v10, %s11428_s23 }
 0x2d4   : > { %v12108_v59 = vpop.permute.xlu0 %1388 }
 0x2d5   : > { %v12106_v25 = vpop.permute.xlu1 %1671 }
 0x2d6   : > { %1545 = vrot.lane.b32.xlu0 %v11806_v45, %s11449_s18 }
 0x2d7   : > { %1751 = vrot.lane.b32.xlu1 %v11938_v10, %s11429_s28 }
 0x2d8   : > { %v12116_v27 = vpop.permute.xlu0 %1420 }
 0x2d9   : > { %v12114_v26 = vpop.permute.xlu1 %1695 }
 0x2da   : > { %1569 = vrot.lane.b32.xlu0 %v11806_v45, %s11450_s16 }
 0x2db   : > { %1615 = vrot.lane.b32.xlu1 %v11943_v11, %s17298_s8 }
 0x2dc   : > { %v12124_v29 = vpop.permute.xlu0 %1469 }
 0x2dd   : > { %v12122_v28 = vpop.permute.xlu1 %1719 }
 0x2de   : > { %1605 = vrot.lane.b32.xlu0 %v11806_v45, %s17298_s8 }
 0x2df   : > { %1298 = vrot.lane.b32.xlu1 %v11906_v54, %s11436_s15 }
 0x2e0   : > { %v12132_v32 = vpop.permute.xlu0 %1493 }
 0x2e1   : > { %v12130_v31 = vpop.permute.xlu1 %1743 }
 0x2e2   : > { %1653 = vrot.lane.b32.xlu0 %v11943_v11, %s17296_s9 }
 0x2e3   : > { %1322 = vrot.lane.b32.xlu1 %v11906_v54, %s11438_s17 }
 0x2e4   : > { %v12140_v6 = vpop.permute.xlu0 %1517 }
 0x2e5   : > { %v12138_v33 = vpop.permute.xlu1 %1599 }
 0x2e6   : > { %1677 = vrot.lane.b32.xlu0 %v11943_v11, %s17283_s29 }
 0x2e7   : > { %1346 = vrot.lane.b32.xlu1 %v11906_v54, %s11443_s10 }
 0x2e8   : > { %v12148_v34 = vpop.permute.xlu0 %1541 }
 0x2e9   : > { %v12146_v45 = vpop.permute.xlu1 %1294 }
 0x2ea   : > { %1701 = vrot.lane.b32.xlu0 %v11943_v11, %s17281_s30 }
 0x2eb   : > { %1370 = vrot.lane.b32.xlu1 %v11906_v54, %s11444_s20 }
 0x2ec   : > { %v12156_v38 = vpop.permute.xlu0 %1565 }
 0x2ed   : > { %v12154_v37 = vpop.permute.xlu1 %1318 }
 0x2ee   : > { %1725 = vrot.lane.b32.xlu0 %v11943_v11, %s11428_s23 }
 0x2ef   : > { %1394 = vrot.lane.b32.xlu1 %v11906_v54, %s11445_s11 }
 0x2f0   : > { %v12164_v40 = vpop.permute.xlu0 %1597 }
 0x2f1   : > { %v12162_v39 = vpop.permute.xlu1 %1342 }
 0x2f2   : > { %1749 = vrot.lane.b32.xlu0 %v11943_v11, %s11429_s28 }
 0x2f3   : > { %1434 = vrot.lane.b32.xlu1 %v11833_v22, %s11442_s22 }
 0x2f4   : > { %v12172_v43 = vpop.permute.xlu0 %1645 }
 0x2f5   : > { %v12170_v42 = vpop.permute.xlu1 %1366 }
 0x2f6   : > { %1432 = vrot.lane.b32.xlu0 %v11906_v54, %s11442_s22 }
 0x2f7   : > { %1475 = vrot.lane.b32.xlu1 %v11833_v22, %s11446_s12 }
 0x2f8   : > { %v12180_v4 = vpop.permute.xlu0 %1669 }
 0x2f9   : > { %v12178_v44 = vpop.permute.xlu1 %1390 }
 0x2fa   : > { %1609 = vrot.lane.b32.xlu0 %v11833_v22, %s17298_s8 }
 0x2fb   : > { %1499 = vrot.lane.b32.xlu1 %v11833_v22, %s11447_s21 }
 0x2fc   : > { %v12188_v49 = vpop.permute.xlu0 %1693 }
 0x2fd   : > { %v12186_v48 = vpop.permute.xlu1 %1426 }
 0x2fe   : > { %1657 = vrot.lane.b32.xlu0 %v11965_v0, %s17296_s9 }
 0x2ff   : > { %1523 = vrot.lane.b32.xlu1 %v11833_v22, %s11448_s19 }
 0x300   : > { %v12196_v51 = vpop.permute.xlu0 %1717 }
 0x301   : > { %v12194_v50 = vpop.permute.xlu1 %1471 }
 0x302   : > { %1681 = vrot.lane.b32.xlu0 %v11965_v0, %s17283_s29 }
 0x303   : > { %1547 = vrot.lane.b32.xlu1 %v11833_v22, %s11449_s18 }
 0x304   : > { %v12204_v54 = vpop.permute.xlu0 %1741 }
 0x305   : > { %v12202_v53 = vpop.permute.xlu1 %1495 }
 0x306   : > { %1705 = vrot.lane.b32.xlu0 %v11965_v0, %s17281_s30 }
 0x307   : > { %1571 = vrot.lane.b32.xlu1 %v11833_v22, %s11450_s16 }
 0x308   : > { %v12212_v55 = vpop.permute.xlu0 %1424 }
 0x309   : > { %v12210_v46 = vpop.permute.xlu1 %1519 }
 0x30a   : > { %1729 = vrot.lane.b32.xlu0 %v11965_v0, %s11428_s23 }
 0x30b   : > { %1627 = vrot.lane.b32.xlu1 %v11959_v17, %s17298_s8 }
 0x30c   : > { %v12220_v57 = vpop.permute.xlu0 %1601 }
 0x30d   : > { %v12218_v56 = vpop.permute.xlu1 %1543 }
 0x30e   : > { %1753 = vrot.lane.b32.xlu0 %v11965_v0, %s11429_s28 }
 0x30f   : > { %1659 = vrot.lane.b32.xlu1 %v11959_v17, %s17296_s9  ;;  %s17522_s9 = smov 87  }
 0x310   : > { %v12228_v1 = vpop.permute.xlu0 %1649 }
 0x311   : > { %v12226_v22 = vpop.permute.xlu1 %1567  ;;  %17336 = vst [vmem:[#allocation7_spill] sm:$0xff] %v12228_v1  ;;  %v2059_v1 = vrot.slane %v12204_v54, %v11520_v9 }
 0x312   : > { %1300 = vrot.lane.b32.xlu0 %v11955_v14, %s11436_s15 }
 0x313   : > { %1683 = vrot.lane.b32.xlu1 %v11959_v17, %s17283_s29 }
 0x314   : > { %v12236_v60 = vpop.permute.xlu0 %1673 }
 0x315   : > { %v12234_v58 = vpop.permute.xlu1 %1611  ;;  %17338 = vst [vmem:[#allocation9_spill] sm:$0xff] %v12236_v60 }
 0x316   : > { %17337 = vst [vmem:[#allocation8_spill] sm:$0xff] %v12234_v58  ;;  %1324 = vrot.lane.b32.xlu0 %v11955_v14, %s11438_s17 }
 0x317   : > { %1707 = vrot.lane.b32.xlu1 %v11959_v17, %s17281_s30 }
 0x318   : > { %v12244_v10 = vpop.permute.xlu0 %1697 }
 0x319   : > { %v12242_v5 = vpop.permute.xlu1 %1651  ;;  %17340 = vst [vmem:[#allocation11_spill] sm:$0xff] %v12244_v10 }
 0x31a   : > { %17339 = vst [vmem:[#allocation10_spill] sm:$0xff] %v12242_v5  ;;  %1348 = vrot.lane.b32.xlu0 %v11955_v14, %s11443_s10 }
 0x31b   : > { %1731 = vrot.lane.b32.xlu1 %v11959_v17, %s11428_s23  ;;  %s17295_s23 = sshll.u32 %s17628_s24, 10 }
 0x31c   : > { %v12252_v47 = vpop.permute.xlu0 %1721  ;;  %s12869_s29 = scalar_lea.vmem %s17204_s6, %s17295_s23  ;;  %s17521_s23 = smov 106  }
 0x31d   : > { %v12250_v2 = vpop.permute.xlu1 %1675 }
 0x31e   : > { %17341 = vst [vmem:[#allocation12_spill] sm:$0xff] %v12250_v2  ;;  %1372 = vrot.lane.b32.xlu0 %v11955_v14, %s11444_s20 }
 0x31f   : > { %1755 = vrot.lane.b32.xlu1 %v11959_v17, %s11429_s28 }
 0x320   : > { %v12260_v13 = vpop.permute.xlu0 %1745 }
 0x321   : > { %v12258_v11 = vpop.permute.xlu1 %1699 }
 0x322   : > { %17342 = vst [vmem:[#allocation13_spill] sm:$0xff] %v12258_v11  ;;  %1396 = vrot.lane.b32.xlu0 %v11955_v14, %s11445_s11 }
 0x323   : > { %1623 = vrot.lane.b32.xlu1 %v11965_v0, %s17298_s8 }
 0x324   : > { %v12268_v16 = vpop.permute.xlu0 %1296 }
 0x325   : > { %v12266_v15 = vpop.permute.xlu1 %1723  ;;  %17343 = vst [vmem:[#allocation14_spill] sm:$0xff] %v12268_v16 }
 0x326   : > { %1436 = vrot.lane.b32.xlu0 %v11955_v14, %s11442_s22 }
 0x327   : > { %1438 = vrot.lane.b32.xlu1 %v11864_v36, %s11442_s22 }
 0x328   : > { %v12276_v30 = vpop.permute.xlu0 %1320 }
 0x329   : > { %v12274_v17 = vpop.permute.xlu1 %1747  ;;  %17344 = vst [vmem:[#allocation15_spill] sm:$0xff] %v12276_v30 }
 0x32a   : > { %1477 = vrot.lane.b32.xlu0 %v11864_v36, %s11446_s12 }
 0x32b   : > { %1302 = vrot.lane.b32.xlu1 %v11961_v61, %s11436_s15 }
 0x32c   : > { %v12284_v35 = vpop.permute.xlu0 %1344 }
 0x32d   : > { %v12282_v0 = vpop.permute.xlu1 %1607  ;;  %17346 = vst [vmem:[#allocation17_spill] sm:$0xff] %v12284_v35 }
 0x32e   : > { %17345 = vst [vmem:[#allocation16_spill] sm:$0xff] %v12282_v0  ;;  %1501 = vrot.lane.b32.xlu0 %v11864_v36, %s11447_s21 }
 0x32f   : > { %1326 = vrot.lane.b32.xlu1 %v11961_v61, %s11438_s17 }
 0x330   : > { %v12292_v3 = vpop.permute.xlu0 %1368 }
 0x331   : > { %v12290_v14 = vpop.permute.xlu1 %1430  ;;  %17348 = vst [vmem:[#allocation19_spill] sm:$0xff] %v12292_v3 }
 0x332   : > { %17347 = vst [vmem:[#allocation18_spill] sm:$0xff] %v12290_v14  ;;  %1525 = vrot.lane.b32.xlu0 %v11864_v36, %s11448_s19 }
 0x333   : > { %1350 = vrot.lane.b32.xlu1 %v11961_v61, %s11443_s10 }
 0x334   : > { %v12300_v11 = vpop.permute.xlu0 %1392 }
 0x335   : > { %v12298_v5 = vpop.permute.xlu1 %1619  ;;  %17350 = vst [vmem:[#allocation21_spill] sm:$0xff] %v12300_v11 }
 0x336   : > { %17349 = vst [vmem:[#allocation20_spill] sm:$0xff] %v12298_v5  ;;  %1549 = vrot.lane.b32.xlu0 %v11864_v36, %s11449_s18 }
 0x337   : > { %1374 = vrot.lane.b32.xlu1 %v11961_v61, %s11444_s20 }
 0x338   : > { %v12308_v58 = vpop.permute.xlu0 %1428 }
 0x339   : > { %v12306_v2 = vpop.permute.xlu1 %1655  ;;  %17352 = vst [vmem:[#allocation23_spill] sm:$0xff] %v12308_v58  ;;  %v1282_v58 = vld [vmem:[#allocation4 + $0xb0] sm:$0xff] }
 0x33a   : > { %17351 = vst [vmem:[#allocation22_spill] sm:$0xff] %v12306_v2  ;;  %1573 = vrot.lane.b32.xlu0 %v11864_v36, %s11450_s16 }
 0x33b   : > { %1398 = vrot.lane.b32.xlu1 %v11961_v61, %s11445_s11 }
 0x33c   : > { %v12316_v5 = vpop.permute.xlu0 %1473 }
 0x33d   : > { %v12314_v3 = vpop.permute.xlu1 %1679  ;;  %17354 = vst [vmem:[#allocation25_spill] sm:$0xff] %v12316_v5 }
 0x33e   : > { %17353 = vst [vmem:[#allocation24_spill] sm:$0xff] %v12314_v3  ;;  %1613 = vrot.lane.b32.xlu0 %v11864_v36, %s17298_s8 }
 0x33f   : > { %1442 = vrot.lane.b32.xlu1 %v11900_v63, %s11442_s22 }
 0x340   : > { %v12324_v2 = vpop.permute.xlu0 %1497 }
 0x341   : > { %v12322_v16 = vpop.permute.xlu1 %1703  ;;  %17356 = vst [vmem:[#allocation27_spill] sm:$0xff] %v12324_v2 }
 0x342   : > { %17355 = vst [vmem:[#allocation26_spill] sm:$0xff] %v12322_v16  ;;  %1440 = vrot.lane.b32.xlu0 %v11961_v61, %s11442_s22 }
 0x343   : > { %1479 = vrot.lane.b32.xlu1 %v11900_v63, %s11446_s12 }
 0x344   : > { %v12332_v3 = vpop.permute.xlu0 %1521 }
 0x345   : > { %v12330_v35 = vpop.permute.xlu1 %1727  ;;  %17358 = vst [vmem:[#allocation29_spill] sm:$0xff] %v12332_v3  ;;  %v2382_v3 = vrot.slane %v12122_v28, %v11520_v9 }
 0x346   : > { %17357 = vst [vmem:[#allocation28_spill] sm:$0xff] %v12330_v35  ;;  %1617 = vrot.lane.b32.xlu0 %v11900_v63, %s17298_s8  ;;  %v12344_v30 = vrot.slane %v12330_v35, %v11520_v9 }
 0x347   : > { %1503 = vrot.lane.b32.xlu1 %v11900_v63, %s11447_s21 }
 0x348   : > { %v12340_v16 = vpop.permute.xlu0 %1545 }
 0x349   : > { %v12338_v36 = vpop.permute.xlu1 %1751  ;;  %17360 = vst [vmem:[#allocation31_spill] sm:$0xff] %v12340_v16 }
 0x34a   : > { %17359 = vst [vmem:[#allocation30_spill] sm:$0xff] %v12338_v36  ;;  %v12348_v61 = vrot.slane %v12338_v36, %v11520_v9  ;;  %1304 = vrot.lane.b32.xlu0 %v11978_v12, %s11436_s15 }
 0x34b   : > { %1527 = vrot.lane.b32.xlu1 %v11900_v63, %s11448_s19 }
 0x34c   : > { %v12358_v16 = vpop.permute.xlu0 %1569 }
 0x34d   : > { %v12356_v11 = vpop.permute.xlu1 %1615  ;;  %17362 = vst [vmem:[#allocation33_spill] sm:$0xff] %v12358_v16 }
 0x34e   : > { %17361 = vst [vmem:[#allocation32_spill] sm:$0xff] %v12356_v11  ;;  %1328 = vrot.lane.b32.xlu0 %v11978_v12, %s11438_s17 }
 0x34f   : > { %1551 = vrot.lane.b32.xlu1 %v11900_v63, %s11449_s18 }
 0x350   : > { %v12366_v36 = vpop.permute.xlu0 %1605 }
 0x351   : > { %v12364_v35 = vpop.permute.xlu1 %1298  ;;  %17364 = vst [vmem:[#allocation35_spill] sm:$0xff] %v12366_v36 }
 0x352   : > { %17363 = vst [vmem:[#allocation34_spill] sm:$0xff] %v12364_v35  ;;  %1352 = vrot.lane.b32.xlu0 %v11978_v12, %s11443_s10 }
 0x353   : > { %1575 = vrot.lane.b32.xlu1 %v11900_v63, %s11450_s16 }
 0x354   : > { %v12374_v11 = vpop.permute.xlu0 %1653 }
 0x355   : > { %v12372_v2 = vpop.permute.xlu1 %1322  ;;  %17366 = vst [vmem:[#allocation37_spill] sm:$0xff] %v12374_v11 }
 0x356   : > { %17365 = vst [vmem:[#allocation36_spill] sm:$0xff] %v12372_v2  ;;  %1376 = vrot.lane.b32.xlu0 %v11978_v12, %s11444_s20 }
 0x357   : > { %1446 = vrot.lane.b32.xlu1 %v11936_v8, %s11442_s22 }
 0x358   : > { %v12382_v35 = vpop.permute.xlu0 %1677 }
 0x359   : > { %v12380_v5 = vpop.permute.xlu1 %1346  ;;  %17368 = vst [vmem:[#allocation39_spill] sm:$0xff] %v12382_v35 }
 0x35a   : > { %17367 = vst [vmem:[#allocation38_spill] sm:$0xff] %v12380_v5  ;;  %1400 = vrot.lane.b32.xlu0 %v11978_v12, %s11445_s11 }
 0x35b   : > { %1306 = vrot.lane.b32.xlu1 %v11985_v18, %s11436_s15 }
 0x35c   : > { %v12390_v2 = vpop.permute.xlu0 %1701 }
 0x35d   : > { %v12388_v63 = vpop.permute.xlu1 %1370  ;;  %17370 = vst [vmem:[#allocation41_spill] sm:$0xff] %v12390_v2 }
 0x35e   : > { %17369 = vst [vmem:[#allocation40_spill] sm:$0xff] %v12388_v63  ;;  %1444 = vrot.lane.b32.xlu0 %v11978_v12, %s11442_s22 }
 0x35f   : > { %1330 = vrot.lane.b32.xlu1 %v11985_v18, %s11438_s17 }
 0x360   : > { %v12398_v5 = vpop.permute.xlu0 %1725 }
 0x361   : > { %v12396_v11 = vpop.permute.xlu1 %1394 }
 0x362   : > { %17371 = vst [vmem:[#allocation42_spill] sm:$0xff] %v12396_v11  ;;  %1481 = vrot.lane.b32.xlu0 %v11936_v8, %s11446_s12 }
 0x363   : > { %1354 = vrot.lane.b32.xlu1 %v11985_v18, %s11443_s10 }
 0x364   : > { %v12406_v63 = vpop.permute.xlu0 %1749 }
 0x365   : > { %v12404_v35 = vpop.permute.xlu1 %1434  ;;  %17373 = vst [vmem:[#allocation44_spill] sm:$0xff] %v12406_v63 }
 0x366   : > { %17372 = vst [vmem:[#allocation43_spill] sm:$0xff] %v12404_v35  ;;  %1505 = vrot.lane.b32.xlu0 %v11936_v8, %s11447_s21 }
 0x367   : > { %1378 = vrot.lane.b32.xlu1 %v11985_v18, %s11444_s20 }
 0x368   : > { %v12414_v2 = vpop.permute.xlu0 %1432 }
 0x369   : > { %v12412_v12 = vpop.permute.xlu1 %1475  ;;  %17375 = vst [vmem:[#allocation46_spill] sm:$0xff] %v12414_v2 }
 0x36a   : > { %17374 = vst [vmem:[#allocation45_spill] sm:$0xff] %v12412_v12  ;;  %1529 = vrot.lane.b32.xlu0 %v11936_v8, %s11448_s19 }
 0x36b   : > { %1402 = vrot.lane.b32.xlu1 %v11985_v18, %s11445_s11 }
 0x36c   : > { %v12422_v35 = vpop.permute.xlu0 %1609 }
 0x36d   : > { %v12420_v11 = vpop.permute.xlu1 %1499  ;;  %17377 = vst [vmem:[#allocation48_spill] sm:$0xff] %v12422_v35  ;;  %v2397_v35 = vrot.slane %v12130_v31, %v11520_v9 }
 0x36e   : > { %17376 = vst [vmem:[#allocation47_spill] sm:$0xff] %v12420_v11  ;;  %1553 = vrot.lane.b32.xlu0 %v11936_v8, %s11449_s18 }
 0x36f   : > { %1450 = vrot.lane.b32.xlu1 %v1282_v58, %s11442_s22 }
 0x370   : > { %v12429_v12 = vpop.permute.xlu0 %1657 }
 0x371   : > { %v12427_v14 = vpop.permute.xlu1 %1523  ;;  %17379 = vst [vmem:[#allocation50_spill] sm:$0xff] %v12429_v12 }
 0x372   : > { %17378 = vst [vmem:[#allocation49_spill] sm:$0xff] %v12427_v14  ;;  %1577 = vrot.lane.b32.xlu0 %v11936_v8, %s11450_s16 }
 0x373   : > { %1483 = vrot.lane.b32.xlu1 %v1282_v58, %s11446_s12 }
 0x374   : > { %v12436_v11 = vpop.permute.xlu0 %1681 }
 0x375   : > { %v12434_v2 = vpop.permute.xlu1 %1547  ;;  %17381 = vst [vmem:[#allocation52_spill] sm:$0xff] %v12436_v11  ;;  %v2405_v11 = vcombine.low %v2382_v3, %v2397_v35 }
 0x376   : > { %17380 = vst [vmem:[#allocation51_spill] sm:$0xff] %v12434_v2  ;;  %1621 = vrot.lane.b32.xlu0 %v11936_v8, %s17298_s8  ;;  %v2406_v8 = vcombine.high %v2382_v3, %v2397_v35 }
 0x377   : > { %1507 = vrot.lane.b32.xlu1 %v1282_v58, %s11447_s21 }
 0x378   : > { %v12445_v12 = vpop.permute.xlu0 %1705  ;;  %v2420_v3 = vrot.slane %v2406_v8, %v11537_v20 }
 0x379   : > { %v12443_v14 = vpop.permute.xlu1 %1571  ;;  %17383 = vst [vmem:[#allocation54_spill] sm:$0xff] %v12445_v12  ;;  %v2413_v12 = vrot.slane %v2405_v11, %v11537_v20 }
 0x37a   : > { %17382 = vst [vmem:[#allocation53_spill] sm:$0xff] %v12443_v14  ;;  %1448 = vrot.lane.b32.xlu0 %v11985_v18, %s11442_s22  ;;  %v2044_v14 = vrot.slane %v12196_v51, %v11520_v9 }
 0x37b   : > { %1531 = vrot.lane.b32.xlu1 %v1282_v58, %s11448_s19 }
 0x37c   : > { %v12454_v16 = vpop.permute.xlu0 %1729  ;;  %v2067_v11 = vcombine.low %v2044_v14, %v2059_v1 }
 0x37d   : > { %v12452_v2 = vpop.permute.xlu1 %1627  ;;  %17385 = vst [vmem:[#allocation56_spill] sm:$0xff] %v12454_v16 }
 0x37e   : > { %17384 = vst [vmem:[#allocation55_spill] sm:$0xff] %v12452_v2  ;;  %1625 = vrot.lane.b32.xlu0 %v1282_v58, %s17298_s8  ;;  %v17388_v2 = vmov 0.0   ;;  %v2075_v8 = vrot.slane %v2067_v11, %v11537_v20 }
 0x37f   : > { %1555 = vrot.lane.b32.xlu1 %v1282_v58, %s11449_s18  ;;  %v2390_v16 = vcombine.high %v12130_v31, %v17388_v2  ;;  %v2437_v60 = vcombine.high %v2413_v12, %v17388_v2  ;;  %v2068_v31 = vcombine.high %v2044_v14, %v2059_v1  ;;  %v1813_v1 = vcombine.low %v12108_v59, %v12124_v29 }
 0x380   : > { %v12465_v18 = vpop.permute.xlu0 %1753  ;;  %v2052_v11 = vcombine.high %v12204_v54, %v17388_v2 }
 0x381   : > { %v12463_v10 = vpop.permute.xlu1 %1659  ;;  %17387 = vst [vmem:[#allocation58_spill] sm:$0xff] %v12465_v18 }
 0x382   : > { %17386 = vst [vmem:[#allocation57_spill] sm:$0xff] %v12463_v10  ;;  %4713 = vrot.lane.b32.xlu0 %v2413_v12, %s11434_s13  ;;  %v2375_v10 = vcombine.high %v12122_v28, %v17388_v2  ;;  %v1453_v28 = vsel %vm1452_vm1, %v12116_v27, %v12082_v52  ;;  %v1765_v52 = vcombine.low %v11810_v7, %v12084_v19 }
 0x383   : > { %1579 = vrot.lane.b32.xlu1 %v1282_v58, %s11450_s16  ;;  %v2404_v58 = vrot.slane %v2390_v16, %v11520_v9  ;;  %v2082_v16 = vrot.slane %v2068_v31, %v11537_v20  ;;  %v1781_v27 = vcombine.low %v12076_v41, %v12092_v62  ;;  %v1797_v31 = vcombine.low %v12100_v24, %v1453_v28 }
 0x384   : > { %v12475_v36 = vpop.permute.xlu0 %1300  ;;  %v1773_v63 = vrot.slane %v1765_v52, %v11520_v9 }
 0x385   : > { %v12472_v35 = vpop.permute.xlu1 %1683  ;;  %17390 = vst [vmem:[#allocation60_spill] sm:$0xff] %v12475_v36  ;;  %v2389_v36 = vrot.slane %v2375_v10, %v11520_v9  ;;  %v2037_v10 = vcombine.high %v12196_v51, %v17388_v2  ;;  %v1821_v51 = vrot.slane %v1813_v1, %v11520_v9  ;;  %v2100_v54 = vcombine.high %v2082_v16, %v17388_v2 }
 0x386   : > { %17389 = vst [vmem:[#allocation59_spill] sm:$0xff] %v12472_v35  ;;  %4725 = vrot.lane.b32.xlu0 %v2420_v3, %s11434_s13  ;;  %v2438_v35 = vcombine.high %v2420_v3, %v17388_v2  ;;  %v2099_v3 = vcombine.high %v2075_v8, %v17388_v2 }
 0x387   : > { %4719 = vrot.lane.b32.xlu1 %v2437_v60, %s11434_s13  ;;  %v2421_v60 = vcombine.low %v2389_v36, %v2404_v58 }
 0x388   : > { %v12486_v12 = vpop.permute.xlu0 %1324 }
 0x389   : > { %v12483_v18 = vpop.permute.xlu1 %1707  ;;  %17392 = vst [vmem:[#allocation62_spill] sm:$0xff] %v12486_v12  ;;  %v2066_v12 = vrot.slane %v2052_v11, %v11520_v9  ;;  %v1766_v11 = vcombine.high %v11810_v7, %v12084_v19 }
 0x38a   : > { %17391 = vst [vmem:[#allocation61_spill] sm:$0xff] %v12483_v18  ;;  %4665 = vrot.lane.b32.xlu0 %v2075_v8, %s11434_s13  ;;  %v2422_v8 = vcombine.high %v2389_v36, %v2404_v58  ;;  %v2429_v18 = vrot.slane %v2421_v60, %v11537_v20  ;;  %v1805_v36 = vrot.slane %v1797_v31, %v11520_v9 }
 0x38b   : > { %4731 = vrot.lane.b32.xlu1 %v2438_v35, %s11434_s13  ;;  %v1814_v58 = vcombine.high %v12108_v59, %v12124_v29  ;;  %v1782_v31 = vcombine.high %v12076_v41, %v12092_v62  ;;  %v3073_v41 = vrot.slane %v12274_v17, %v11520_v9 }
 0x38c   : > { %v12504_v35 = vpop.permute.xlu0 %1348  ;;  %v1861_v60 = vcombine.low %v1805_v36, %v1821_v51  ;;  %v1862_v29 = vcombine.high %v1805_v36, %v1821_v51 }
 0x38d   : > { %v12497_v14 = vpop.permute.xlu1 %1731  ;;  %17394 = vst [vmem:[#allocation64_spill] sm:$0xff] %v12504_v35  ;;  %v2051_v35 = vrot.slane %v2037_v10, %v11520_v9  ;;  %v2436_v10 = vrot.slane %v2422_v8, %v11537_v20  ;;  %v1828_v59 = vrot.slane %v1814_v58, %v11520_v9  ;;  %v1780_v8 = vrot.slane %v1766_v11, %v11520_v9 }
 0x38e   : > { %17393 = vst [vmem:[#allocation63_spill] sm:$0xff] %v12497_v14  ;;  %4677 = vrot.lane.b32.xlu0 %v2082_v16, %s11434_s13  ;;  %v2439_v16 = vcombine.high %v2429_v18, %v17388_v2  ;;  %v1869_v19 = vrot.slane %v1861_v60, %v11537_v20  ;;  %v3058_v60 = vrot.slane %v12266_v15, %v11520_v9 }
 0x38f   : > { %4671 = vrot.lane.b32.xlu1 %v2099_v3, %s11434_s13  ;;  %v1789_v3 = vrot.slane %v1781_v27, %v11520_v9  ;;  %v2083_v52 = vcombine.low %v2051_v35, %v2066_v12  ;;  %v2440_v7 = vcombine.high %v2436_v10, %v17388_v2 }
 0x390   : > { %v12520_v0 = vpop.permute.xlu0 %1372  ;;  %v3081_v11 = vcombine.low %v3058_v60, %v3073_v41 }
 0x391   : > { %v12514_v14 = vpop.permute.xlu1 %1755  ;;  %17396 = vst [vmem:[#allocation66_spill] sm:$0xff] %v12520_v0  ;;  %v1830_v58 = vcombine.high %v1773_v63, %v1789_v3 }
 0x392   : > { %17395 = vst [vmem:[#allocation65_spill] sm:$0xff] %v12514_v14  ;;  %4737 = vrot.lane.b32.xlu0 %v2429_v18, %s11434_s13  ;;  %v1798_v14 = vcombine.high %v12100_v24, %v1453_v28  ;;  %v2091_v24 = vrot.slane %v2083_v52, %v11537_v20  ;;  %v1796_v28 = vrot.slane %v1782_v31, %v11520_v9 }
 0x393   : > { %4683 = vrot.lane.b32.xlu1 %v2100_v54, %s11434_s13  ;;  %v1829_v54 = vcombine.low %v1773_v63, %v1789_v3  ;;  %v1844_v3 = vrot.slane %v1830_v58, %v11537_v20 }
 0x394   : > { %v12535_v27 = vpop.permute.xlu0 %1396  ;;  %v1812_v51 = vrot.slane %v1798_v14, %v11520_v9  ;;  %v1845_v14 = vcombine.low %v1780_v8, %v1796_v28 }
 0x395   : > { %v12529_v1 = vpop.permute.xlu1 %1623  ;;  %v1837_v36 = vrot.slane %v1829_v54, %v11537_v20 }
 0x396   : > { %17397 = vst [vmem:[#allocation67_spill] sm:$0xff] %v12529_v1  ;;  %4749 = vrot.lane.b32.xlu0 %v2436_v10, %s11434_s13  ;;  %v2084_v1 = vcombine.high %v2051_v35, %v2066_v12  ;;  %v1877_v12 = vcombine.low %v1812_v51, %v1828_v59  ;;  %v1876_v10 = vrot.slane %v1862_v29, %v11537_v20 }
 0x397   : > { %4743 = vrot.lane.b32.xlu1 %v2439_v16, %s11434_s13  ;;  %v1894_v16 = vcombine.high %v1837_v36, %v1869_v19  ;;  %v12575_v29 = vrot.slane %v3081_v11, %v11537_v20  ;;  %v1878_v58 = vcombine.high %v1812_v51, %v1828_v59  ;;  %v1901_v51 = vcombine.low %v12132_v32, %v12148_v34 }
 0x398   : > { %v12550_v62 = vpop.permute.xlu0 %1436  ;;  %v2098_v63 = vrot.slane %v2084_v1, %v11537_v20  ;;  %v1896_v54 = vcombine.high %v1844_v3, %v1876_v10  ;;  %v1853_v1 = vrot.slane %v1845_v14, %v11537_v20  ;;  %v1846_v14 = vcombine.high %v1780_v8, %v1796_v28 }
 0x399   : > { %v12543_v18 = vpop.permute.xlu1 %1438  ;;  %v1892_v8 = vrot.slane %v1878_v58, %v11537_v20 }
 0x39a   : > { %4689 = vrot.lane.b32.xlu0 %v2091_v24, %s11434_s13 }
 0x39b   : > { %4755 = vrot.lane.b32.xlu1 %v2440_v7, %s11434_s13  ;;  %v1885_v7 = vrot.slane %v1877_v12, %v11537_v20 }
 0x39c   : > { %v12563_v52 = vpop.permute.xlu0 %1477 }
 0x39d   : > { %v12560_v35 = vpop.permute.xlu1 %1302  ;;  %v1898_v12 = vcombine.high %v1853_v1, %v1885_v7 }
 0x39e   : > { %17398 = vst [vmem:[#allocation68_spill] sm:$0xff] %v12560_v35  ;;  %4701 = vrot.lane.b32.xlu0 %v2098_v63, %s11434_s13  ;;  %v3082_v35 = vcombine.high %v3058_v60, %v3073_v41  ;;  %v1629_v41 = vsel %vm639_vm5, %v12164_v40, %v12138_v33 }
 0x39f   : > { %4667 = vrot.lane.b32.xlu1 %v1894_v16, %s11434_s13  ;;  %v1949_v16 = vcombine.low %v12172_v43, %v12188_v49  ;;  %v1933_v59 = vcombine.low %v1629_v41, %v12180_v4 }
 0x3a0   : > { %v12572_v0 = vpop.permute.xlu0 %1501  ;;  %v12591_v11 = vrot.slane %v3082_v35, %v11537_v20  ;;  %v2101_v35 = vcombine.high %v2091_v24, %v17388_v2  ;;  %v1950_v24 = vcombine.high %v12172_v43, %v12188_v49 }
 0x3a1   : > { %v12569_v31 = vpop.permute.xlu1 %1326  ;;  %17400 = vst [vmem:[#allocation70_spill] sm:$0xff] %v12572_v0  ;;  %v1957_v33 = vrot.slane %v1949_v16, %v11520_v9  ;;  %v1909_v16 = vrot.slane %v1901_v51, %v11520_v9 }
 0x3a2   : > { %17399 = vst [vmem:[#allocation69_spill] sm:$0xff] %v12569_v31  ;;  %4809 = vrot.lane.b32.xlu0 %v12575_v29, %s11434_s13  ;;  %v1964_v43 = vrot.slane %v1950_v24, %v11520_v9 }
 0x3a3   : > { %4679 = vrot.lane.b32.xlu1 %v1896_v54, %s11434_s13  ;;  %v1917_v54 = vcombine.low %v12140_v6, %v12156_v38 }
 0x3a4   : > { %v12588_v60 = vpop.permute.xlu0 %1525 }
 0x3a5   : > { %v12583_v31 = vpop.permute.xlu1 %1350  ;;  %17402 = vst [vmem:[#allocation72_spill] sm:$0xff] %v12588_v60  ;;  %v1925_v0 = vrot.slane %v1917_v54, %v11520_v9  ;;  %v1860_v60 = vrot.slane %v1846_v14, %v11537_v20  ;;  %v1918_v54 = vcombine.high %v12140_v6, %v12156_v38  ;;  %v1934_v14 = vcombine.high %v1629_v41, %v12180_v4 }
 0x3a6   : > { %17401 = vst [vmem:[#allocation71_spill] sm:$0xff] %v12583_v31  ;;  %4821 = vrot.lane.b32.xlu0 %v12591_v11, %s11434_s13  ;;  %v1893_v31 = vcombine.low %v1837_v36, %v1869_v19  ;;  %v1895_v36 = vcombine.low %v1844_v3, %v1876_v10  ;;  %v2102_v10 = vcombine.high %v2098_v63, %v17388_v2 }
 0x3a7   : > { %4691 = vrot.lane.b32.xlu1 %v1898_v12, %s11434_s13  ;;  %v1941_v12 = vrot.slane %v1933_v59, %v11520_v9  ;;  %v1965_v59 = vcombine.low %v1909_v16, %v1925_v0  ;;  %v2720_v6 = vrot.slane %v12252_v47, %v11520_v9  ;;  %v2735_v38 = vrot.slane %v12260_v13, %v11520_v9 }
 0x3a8   : > { %v12606_v28 = vpop.permute.xlu0 %1549  ;;  %v1966_v41 = vcombine.high %v1909_v16, %v1925_v0  ;;  %v1899_v0 = vcombine.low %v1860_v60, %v1892_v8 }
 0x3a9   : > { %v12602_v40 = vpop.permute.xlu1 %1374  ;;  %17404 = vst [vmem:[#allocation74_spill] sm:$0xff] %v12606_v28  ;;  %v1900_v28 = vcombine.high %v1860_v60, %v1892_v8  ;;  %v1998_v49 = vcombine.high %v1941_v12, %v1957_v33  ;;  %v1973_v63 = vrot.slane %v1965_v59, %v11537_v20 }
 0x3aa   : > { %17403 = vst [vmem:[#allocation73_spill] sm:$0xff] %v12602_v40  ;;  %4661 = vrot.lane.b32.xlu0 %v1893_v31, %s11434_s13  ;;  %v1997_v40 = vcombine.low %v1941_v12, %v1957_v33  ;;  %v1902_v31 = vcombine.high %v12132_v32, %v12148_v34  ;;  %v1897_v32 = vcombine.low %v1853_v1, %v1885_v7 }
 0x3ab   : > { %4695 = vrot.lane.b32.xlu1 %v2101_v35, %s11434_s13  ;;  %v1932_v34 = vrot.slane %v1918_v54, %v11520_v9  ;;  %v1948_v33 = vrot.slane %v1934_v14, %v11520_v9  ;;  %v2012_v24 = vrot.slane %v1998_v49, %v11537_v20  ;;  %v2743_v7 = vcombine.low %v2720_v6, %v2735_v38 }
 0x3ac   : > { %v12618_v19 = vpop.permute.xlu0 %1573  ;;  %v2005_v3 = vrot.slane %v1997_v40, %v11537_v20  ;;  %v1916_v40 = vrot.slane %v1902_v31, %v11520_v9 }
 0x3ad   : > { %v12616_v58 = vpop.permute.xlu1 %1398  ;;  %v2013_v35 = vcombine.low %v1948_v33, %v1964_v43  ;;  %v2014_v54 = vcombine.high %v1948_v33, %v1964_v43  ;;  %v2751_v49 = vrot.slane %v2743_v7, %v11537_v20  ;;  %v3066_v7 = vcombine.high %v12274_v17, %v17388_v2 }
 0x3ae   : > { %17405 = vst [vmem:[#allocation75_spill] sm:$0xff] %v12616_v58  ;;  %4673 = vrot.lane.b32.xlu0 %v1895_v36, %s11434_s13  ;;  %v2029_v12 = vcombine.low %v1973_v63, %v2005_v3  ;;  %v1981_v16 = vcombine.low %v1916_v40, %v1932_v34  ;;  %v1980_v36 = vrot.slane %v1966_v41, %v11537_v20 }
 0x3af   : > { %4703 = vrot.lane.b32.xlu1 %v1900_v28, %s11434_s13  ;;  %v2021_v31 = vrot.slane %v2013_v35, %v11537_v20  ;;  %v1982_v58 = vcombine.high %v1916_v40, %v1932_v34  ;;  %v2028_v41 = vrot.slane %v2014_v54, %v11537_v20  ;;  %v3114_v17 = vcombine.high %v12591_v11, %v17388_v2 }
 0x3b0   : > { %v12636_v4 = vpop.permute.xlu0 %1613  ;;  %v2031_v14 = vcombine.low %v1980_v36, %v2012_v24  ;;  %v1989_v60 = vrot.slane %v1981_v16, %v11537_v20  ;;  %v2032_v54 = vcombine.high %v1980_v36, %v2012_v24  ;;  %v12706_v24 = vsel %vm1452_vm1, %v12212_v55, %v12186_v48 }
 0x3b1   : > { %v12628_v51 = vpop.permute.xlu1 %1442  ;;  %v2255_v11 = vcombine.low %v12210_v46, %v12226_v22  ;;  %v2239_v48 = vcombine.low %v12202_v53, %v12218_v56 }
 0x3b2   : > { %4685 = vrot.lane.b32.xlu0 %v1897_v32, %s11434_s13  ;;  %v2033_v43 = vcombine.low %v1989_v60, %v2021_v31 }
 0x3b3   : > { %4707 = vrot.lane.b32.xlu1 %v2102_v10, %s11434_s13  ;;  %v2744_v10 = vcombine.high %v2720_v6, %v2735_v38  ;;  %v1996_v38 = vrot.slane %v1982_v58, %v11537_v20  ;;  %v3113_v58 = vcombine.high %v12575_v29, %v17388_v2  ;;  %v2034_v29 = vcombine.high %v1989_v60, %v2021_v31 }
 0x3b4   : > { %v12647_v1 = vpop.permute.xlu0 %1440  ;;  %v2775_v60 = vcombine.high %v2751_v49, %v17388_v2 }
 0x3b5   : > { %v12644_v28 = vpop.permute.xlu1 %1479  ;;  %v2758_v6 = vrot.slane %v2744_v10, %v11537_v20  ;;  %v2035_v40 = vcombine.low %v1996_v38, %v2028_v41 }
 0x3b6   : > { %4697 = vrot.lane.b32.xlu0 %v1899_v0, %s11434_s13 }
 0x3b7   : > { %4663 = vrot.lane.b32.xlu1 %v2029_v12, %s11434_s13  ;;  %v2030_v12 = vcombine.high %v1973_v63, %v2005_v3  ;;  %v3080_v3 = vrot.slane %v3066_v7, %v11520_v9 }
 0x3b8   : > { %v12655_v32 = vpop.permute.xlu0 %1617 }
 0x3b9   : > { %v12652_v59 = vpop.permute.xlu1 %1503 }
 0x3ba   : > { %4761 = vrot.lane.b32.xlu0 %v2751_v49, %s11434_s13  ;;  %v2287_v49 = vcombine.low %v12098_v23, %v12114_v26 }
 0x3bb   : > { %4675 = vrot.lane.b32.xlu1 %v2031_v14, %s11434_s13  ;;  %v3051_v14 = vcombine.high %v12266_v15, %v17388_v2  ;;  %v12700_v15 = vsel %vm639_vm5, %v12220_v57, %v12090_v21  ;;  %v2728_v21 = vcombine.high %v12260_v13, %v17388_v2  ;;  %v2263_v13 = vrot.slane %v2255_v11, %v11520_v9  ;;  %v12746_v11 = vld [vmem:[#allocation4 + $0x18] sm:$0xff] }
 0x3bc   : > { %v12664_v33 = vpop.permute.xlu0 %1304  ;;  %v2271_v55 = vcombine.low %v12700_v15, %v12106_v25 }
 0x3bd   : > { %v12661_v8 = vpop.permute.xlu1 %1527  ;;  %17406 = vst [vmem:[#allocation76_spill] sm:$0xff] %v12664_v33 }
 0x3be   : > { %4773 = vrot.lane.b32.xlu0 %v2758_v6, %s11434_s13 }
 0x3bf   : > { %4687 = vrot.lane.b32.xlu1 %v2033_v43, %s11434_s13  ;;  %v3065_v43 = vrot.slane %v3051_v14, %v11520_v9  ;;  %v2742_v14 = vrot.slane %v2728_v21, %v11520_v9 }
 0x3c0   : > { %v12672_v35 = vpop.permute.xlu0 %1328 }
 0x3c1   : > { %v12670_v34 = vpop.permute.xlu1 %1551  ;;  %17407 = vst [vmem:[#allocation77_spill] sm:$0xff] %v12672_v35  ;;  %v3097_v36 = vcombine.low %v3065_v43, %v3080_v3  ;;  %v3098_v7 = vcombine.high %v3065_v43, %v3080_v3  ;;  %v2247_v3 = vrot.slane %v2239_v48, %v11520_v9  ;;  %v2279_v43 = vrot.slane %v2271_v55, %v11520_v9 }
 0x3c2   : > { %4669 = vrot.lane.b32.xlu0 %v2030_v12, %s11434_s13  ;;  %v2036_v12 = vcombine.high %v1996_v38, %v2028_v41  ;;  %v2776_v38 = vcombine.high %v2758_v6, %v17388_v2  ;;  %v2295_v6 = vrot.slane %v2287_v49, %v11520_v9 }
 0x3c3   : > { %4699 = vrot.lane.b32.xlu1 %v2035_v40, %s11434_s13  ;;  %v2713_v40 = vcombine.high %v12252_v47, %v17388_v2  ;;  %v2135_v47 = vcombine.low %v12170_v42, %v12706_v24  ;;  %v2303_v21 = vcombine.low %v2247_v3, %v2263_v13  ;;  %v3112_v55 = vrot.slane %v3098_v7, %v11537_v20 }
 0x3c4   : > { %v12682_v16 = vpop.permute.xlu0 %1352 }
 0x3c5   : > { %v12678_v0 = vpop.permute.xlu1 %1575  ;;  %17408 = vst [vmem:[#allocation78_spill] sm:$0xff] %v12682_v16  ;;  %v12767_v7 = vrot.slane %v2303_v21, %v11537_v20  ;;  %v2256_v21 = vcombine.high %v12210_v46, %v12226_v22  ;;  %v2336_v46 = vcombine.high %v2279_v43, %v2295_v6 }
 0x3c6   : > { %4681 = vrot.lane.b32.xlu0 %v2032_v54, %s11434_s13  ;;  %v2727_v54 = vrot.slane %v2713_v40, %v11520_v9  ;;  %v2143_v40 = vrot.slane %v2135_v47, %v11520_v9 }
 0x3c7   : > { %4815 = vrot.lane.b32.xlu1 %v3113_v58, %s11434_s13  ;;  %v3105_v58 = vrot.slane %v3097_v36, %v11537_v20  ;;  %v2103_v36 = vcombine.low %v12746_v11, %v12154_v37 }
 0x3c8   : > { %v12693_v10 = vpop.permute.xlu0 %1376  ;;  %v2760_v16 = vcombine.high %v2727_v54, %v2742_v14 }
 0x3c9   : > { %v12689_v63 = vpop.permute.xlu1 %1446  ;;  %17409 = vst [vmem:[#allocation79_spill] sm:$0xff] %v12693_v10  ;;  %v3115_v48 = vcombine.high %v3105_v58, %v17388_v2  ;;  %v2335_v10 = vcombine.low %v2279_v43, %v2295_v6  ;;  %v2111_v47 = vrot.slane %v2103_v36, %v11520_v9  ;;  %v2120_v43 = vcombine.high %v12146_v45, %v12162_v39 }
 0x3ca   : > { %4693 = vrot.lane.b32.xlu0 %v2034_v29, %s11434_s13  ;;  %v2119_v29 = vcombine.low %v12146_v45, %v12162_v39  ;;  %v2104_v45 = vcombine.high %v12746_v11, %v12154_v37 }
 0x3cb   : > { %4827 = vrot.lane.b32.xlu1 %v3114_v17, %s11434_s13 }
 0x3cc   : > { %v12717_v57 = vpop.permute.xlu0 %1400  ;;  %v2127_v49 = vrot.slane %v2119_v29, %v11520_v9  ;;  %v2118_v11 = vrot.slane %v2104_v45, %v11520_v9 }
 0x3cd   : > { %v12710_v31 = vpop.permute.xlu1 %1306 }
 0x3ce   : > { %17410 = vst [vmem:[#allocation80_spill] sm:$0xff] %v12710_v31  ;;  %4705 = vrot.lane.b32.xlu0 %v2036_v12, %s11434_s13  ;;  %v2168_v6 = vcombine.high %v2111_v47, %v2127_v49 }
 0x3cf   : > { %4767 = vrot.lane.b32.xlu1 %v2775_v60, %s11434_s13  ;;  %v2151_v60 = vcombine.low %v12178_v44, %v12194_v50 }
 0x3d0   : > { %v12736_v17 = vpop.permute.xlu0 %1444  ;;  %v2182_v37 = vrot.slane %v2168_v6, %v11537_v20 }
 0x3d1   : > { %v12730_v41 = vpop.permute.xlu1 %1330  ;;  %v2159_v31 = vrot.slane %v2151_v60, %v11520_v9  ;;  %v2167_v60 = vcombine.low %v2111_v47, %v2127_v49 }
 0x3d2   : > { %17411 = vst [vmem:[#allocation81_spill] sm:$0xff] %v12730_v41  ;;  %4833 = vrot.lane.b32.xlu0 %v3105_v58, %s11434_s13  ;;  %v2759_v41 = vcombine.low %v2727_v54, %v2742_v14  ;;  %v3116_v58 = vcombine.high %v3112_v55, %v17388_v2 }
 0x3d3   : > { %4779 = vrot.lane.b32.xlu1 %v2776_v38, %s11434_s13  ;;  %v2199_v33 = vcombine.low %v2143_v40, %v2159_v31  ;;  %v2175_v22 = vrot.slane %v2167_v60, %v11537_v20 }
 0x3d4   : > { %v12756_v38 = vpop.permute.xlu0 %1481  ;;  %v12772_v29 = vrot.slane %v2759_v41, %v11537_v20  ;;  %v3757_v41 = vcombine.low %v12344_v30, %v12348_v61 }
 0x3d5   : > { %v12752_v12 = vpop.permute.xlu1 %1354  ;;  %v2207_v36 = vrot.slane %v2199_v33, %v11537_v20  ;;  %v2272_v33 = vcombine.high %v12700_v15, %v12106_v25 }
 0x3d6   : > { %17412 = vst [vmem:[#allocation82_spill] sm:$0xff] %v12752_v12  ;;  %4845 = vrot.lane.b32.xlu0 %v3112_v55, %s11434_s13  ;;  %v2304_v55 = vcombine.high %v2247_v3, %v2263_v13  ;;  %v2288_v13 = vcombine.high %v12098_v23, %v12114_v26  ;;  %v2136_v3 = vcombine.high %v12170_v42, %v12706_v24 }
 0x3d7   : > { %4839 = vrot.lane.b32.xlu1 %v3115_v48, %s11434_s13  ;;  %v2343_v48 = vrot.slane %v2335_v10, %v11537_v20  ;;  %v12789_v10 = vrot.slane %v2760_v16, %v11537_v20  ;;  %v2200_v16 = vcombine.high %v2143_v40, %v2159_v31  ;;  %v2232_v25 = vcombine.high %v2175_v22, %v2207_v36 }
 0x3d8   : > { %v12769_v35 = vpop.permute.xlu0 %1505  ;;  %v2318_v15 = vrot.slane %v2304_v55, %v11537_v20  ;;  %v12812_v23 = vrot.slane %v3757_v41, %v11537_v20  ;;  %v2152_v26 = vcombine.high %v12178_v44, %v12194_v50  ;;  %v2286_v24 = vrot.slane %v2272_v33, %v11520_v9 }
 0x3d9   : > { %v12763_v12 = vpop.permute.xlu1 %1378  ;;  %17414 = vst [vmem:[#allocation84_spill] sm:$0xff] %v12769_v35  ;;  %v2367_v14 = vcombine.low %v12767_v7, %v2343_v48  ;;  %v2350_v31 = vrot.slane %v2336_v46, %v11537_v20  ;;  %v2302_v40 = vrot.slane %v2288_v13, %v11520_v9  ;;  %v2150_v39 = vrot.slane %v2136_v3, %v11520_v9 }
 0x3da   : > { %17413 = vst [vmem:[#allocation83_spill] sm:$0xff] %v12763_v12  ;;  %4785 = vrot.lane.b32.xlu0 %v12772_v29, %s11434_s13  ;;  %v2214_v44 = vrot.slane %v2200_v16, %v11537_v20  ;;  %v2231_v55 = vcombine.low %v2175_v22, %v2207_v36  ;;  %v2166_v41 = vrot.slane %v2152_v26, %v11520_v9 }
 0x3db   : > { %4851 = vrot.lane.b32.xlu1 %v3116_v58, %s11434_s13  ;;  %v2240_v58 = vcombine.high %v12202_v53, %v12218_v56  ;;  %v2270_v53 = vrot.slane %v2256_v21, %v11520_v9  ;;  %v2369_v47 = vcombine.low %v2318_v15, %v2350_v31  ;;  %v2368_v22 = vcombine.high %v12767_v7, %v2343_v48 }
 0x3dc   : > { %v12786_v12 = vpop.permute.xlu0 %1529  ;;  %v2215_v33 = vcombine.low %v2150_v39, %v2166_v41  ;;  %v2234_v13 = vcombine.high %v2182_v37, %v2214_v44  ;;  %v2216_v48 = vcombine.high %v2150_v39, %v2166_v41  ;;  %v3396_v41 = vrot.slane %v12398_v5, %v11520_v9 }
 0x3dd   : > { %v12781_v54 = vpop.permute.xlu1 %1402  ;;  %17416 = vst [vmem:[#allocation86_spill] sm:$0xff] %v12786_v12  ;;  %v2254_v42 = vrot.slane %v2240_v58, %v11520_v9  ;;  %v2351_v58 = vcombine.low %v2286_v24, %v2302_v40 }
 0x3de   : > { %17415 = vst [vmem:[#allocation85_spill] sm:$0xff] %v12781_v54  ;;  %4797 = vrot.lane.b32.xlu0 %v12789_v10, %s11434_s13  ;;  %v3389_v54 = vcombine.high %v12398_v5, %v17388_v2 }
 0x3df   : > { %4711 = vrot.lane.b32.xlu1 %v2367_v14, %s11434_s13  ;;  %v2319_v50 = vcombine.low %v2254_v42, %v2270_v53  ;;  %v2134_v14 = vrot.slane %v2120_v43, %v11520_v9  ;;  %v2223_v43 = vrot.slane %v2215_v33, %v11537_v20  ;;  %v2320_v6 = vcombine.high %v2254_v42, %v2270_v53 }
 0x3e0   : > { %v12809_v60 = vpop.permute.xlu0 %1553 }
 0x3e1   : > { %v12804_v56 = vpop.permute.xlu1 %1450  ;;  %17418 = vst [vmem:[#allocation88_spill] sm:$0xff] %v12809_v60  ;;  %v2327_v3 = vrot.slane %v2319_v50, %v11537_v20  ;;  %v2183_v16 = vcombine.low %v2118_v11, %v2134_v14  ;;  %v2233_v50 = vcombine.low %v2182_v37, %v2214_v44  ;;  %v12858_v53 = vrot.slane %v2320_v6, %v11537_v20  ;;  %v17428_v37 = vld [vmem:[#allocation44_spill] sm:$0xff] }
 0x3e2   : > { %17417 = vst [vmem:[#allocation87_spill] sm:$0xff] %v12804_v56  ;;  %4905 = vrot.lane.b32.xlu0 %v12812_v23, %s11434_s13  ;;  %v17445_v56 = vld [vmem:[#allocation19_spill] sm:$0xff] }
 0x3e3   : > { %4715 = vrot.lane.b32.xlu1 %v2232_v25, %s11434_s13  ;;  %v2359_v25 = vrot.slane %v2351_v58, %v11537_v20  ;;  %v2191_v7 = vrot.slane %v2183_v16, %v11537_v20 }
 0x3e4   : > { %v12829_v21 = vpop.permute.xlu0 %1577 }
 0x3e5   : > { %v12827_v49 = vpop.permute.xlu1 %1483  ;;  %17420 = vst [vmem:[#allocation90_spill] sm:$0xff] %v12829_v21  ;;  %v2371_v45 = vcombine.low %v2327_v3, %v2359_v25  ;;  %v2236_v33 = vcombine.high %v2191_v7, %v2223_v43  ;;  %v2235_v44 = vcombine.low %v2191_v7, %v2223_v43  ;;  %v2372_v7 = vcombine.high %v2327_v3, %v2359_v25 }
 0x3e6   : > { %17419 = vst [vmem:[#allocation89_spill] sm:$0xff] %v12827_v49  ;;  %4709 = vrot.lane.b32.xlu0 %v2231_v55, %s11434_s13  ;;  %v2352_v55 = vcombine.high %v2286_v24, %v2302_v40  ;;  %v2230_v40 = vrot.slane %v2216_v48, %v11537_v20  ;;  %v17431_v48 = vld [vmem:[#allocation9_spill] sm:$0xff] }
 0x3e7   : > { %4723 = vrot.lane.b32.xlu1 %v2369_v47, %s11434_s13  ;;  %v12935_v49 = vld [vmem:[#allocation4 + $0x30] sm:$0xff] }
 0x3e8   : > { %v12840_v36 = vpop.permute.xlu0 %1621  ;;  %v2366_v24 = vrot.slane %v2352_v55, %v11537_v20 }
 0x3e9   : > { %v12837_v46 = vpop.permute.xlu1 %1507  ;;  %17422 = vst [vmem:[#allocation92_spill] sm:$0xff] %v12840_v36 }
 0x3ea   : > { %17421 = vst [vmem:[#allocation91_spill] sm:$0xff] %v12837_v46  ;;  %4717 = vrot.lane.b32.xlu0 %v2368_v22, %s11434_s13  ;;  %v2184_v22 = vcombine.high %v2118_v11, %v2134_v14  ;;  %v3411_v11 = vrot.slane %v17428_v37, %v11520_v9 }
 0x3eb   : > { %4727 = vrot.lane.b32.xlu1 %v2234_v13, %s11434_s13  ;;  %v2370_v13 = vcombine.high %v2318_v15, %v2350_v31  ;;  %v2373_v15 = vcombine.low %v12858_v53, %v2366_v24 }
 0x3ec   : > { %v12849_v47 = vpop.permute.xlu0 %1448  ;;  %v2198_v14 = vrot.slane %v2184_v22, %v11537_v20 }
 0x3ed   : > { %v12847_v26 = vpop.permute.xlu1 %1531  ;;  %17424 = vst [vmem:[#allocation94_spill] sm:$0xff] %v12849_v47 }
 0x3ee   : > { %17423 = vst [vmem:[#allocation93_spill] sm:$0xff] %v12847_v26  ;;  %4721 = vrot.lane.b32.xlu0 %v2233_v50, %s11434_s13  ;;  %v2238_v6 = vcombine.high %v2198_v14, %v2230_v40  ;;  %v17430_v50 = vld [vmem:[#allocation35_spill] sm:$0xff]  ;;  %v2237_v25 = vcombine.low %v2198_v14, %v2230_v40 }
 0x3ef   : > { %4735 = vrot.lane.b32.xlu1 %v2371_v45, %s11434_s13  ;;  %v17429_v45 = vld [vmem:[#allocation16_spill] sm:$0xff]  ;;  %v17440_v40 = vld [vmem:[#allocation31_spill] sm:$0xff] }
 0x3f0   : > { %v12860_v42 = vpop.permute.xlu0 %1625  ;;  %v12888_v43 = vsel %vm639_vm5, %v17430_v50, %v17429_v45  ;;  %v17435_v45 = vld [vmem:[#allocation29_spill] sm:$0xff]  ;;  %v17441_v14 = vld [vmem:[#allocation27_spill] sm:$0xff] }
 0x3f1   : > { %v12855_v58 = vpop.permute.xlu1 %1555  ;;  %17426 = vst [vmem:[#allocation96_spill] sm:$0xff] %v12860_v42 }
 0x3f2   : > { %17425 = vst [vmem:[#allocation95_spill] sm:$0xff] %v12855_v58  ;;  %4729 = vrot.lane.b32.xlu0 %v2370_v13, %s11434_s13  ;;  %v3419_v13 = vcombine.low %v3396_v41, %v3411_v11  ;;  %v17439_v58 = vld [vmem:[#allocation21_spill] sm:$0xff] }
 0x3f3   : > { %4739 = vrot.lane.b32.xlu1 %v2236_v33, %s11434_s13  ;;  %v2609_v33 = vcombine.low %v12888_v43, %v17431_v48 }
 0x3f4   : > { %v4714_v31 = vpop.permute.xlu0 %4713  ;;  %v3427_v42 = vrot.slane %v3419_v13, %v11537_v20  ;;  %v17443_v13 = vld [vmem:[#allocation17_spill] sm:$0xff] }
 0x3f5   : > { %v12873_v39 = vpop.permute.xlu1 %1579  ;;  %5265 = vst.msk [vmem:[%s12869_s29 + $0x8f] sm:$0x1] %vm5240_vm3, %v4714_v31  ;;  %v17432_v31 = vld [vmem:[#allocation11_spill] sm:$0xff] }
 0x3f6   : > { %17427 = vst [vmem:[#allocation97_spill] sm:$0xff] %v12873_v39  ;;  %4733 = vrot.lane.b32.xlu0 %v2235_v44, %s11434_s13  ;;  %v17433_v44 = vld [vmem:[#allocation7_spill] sm:$0xff]  ;;  %v2577_v39 = vcombine.low %v17441_v14, %v17440_v40  ;;  %v3451_v60 = vcombine.high %v3427_v42, %v17388_v2 }
 0x3f7   : > { %4747 = vrot.lane.b32.xlu1 %v2373_v15, %s11434_s13  ;;  %v2777_v15 = vcombine.high %v12772_v29, %v17388_v2  ;;  %v17438_v29 = vld [vmem:[#allocation25_spill] sm:$0xff] }
 0x3f8   : > { %v4726_v55 = vpop.permute.xlu0 %4725  ;;  %v2489_v26 = vcombine.low %v17439_v58, %v17438_v29 }
 0x3f9   : > { %v4720_v16 = vpop.permute.xlu1 %4719  ;;  %5271 = vst.msk [vmem:[%s12869_s29 + $0xaf] sm:$0x1] %vm5240_vm3, %v4726_v55  ;;  %v17436_v55 = vld [vmem:[#allocation18_spill] sm:$0xff] }
 0x3fa   : > { %5268 = vst.msk [vmem:[%s12869_s29 + $0x9f] sm:$0x1] %vm5240_vm3, %v4720_v16  ;;  %4741 = vrot.lane.b32.xlu0 %v2372_v7, %s11434_s13  ;;  %v2625_v16 = vcombine.low %v17433_v44, %v17432_v31  ;;  %v17437_v7 = vld [vmem:[#allocation23_spill] sm:$0xff] }
 0x3fb   : > { %4751 = vrot.lane.b32.xlu1 %v2238_v6, %s11434_s13  ;;  %v17434_v6 = vld [vmem:[#allocation33_spill] sm:$0xff]  ;;  %v12912_v46 = vsel %vm1452_vm1, %v17437_v7, %v17436_v55 }
 0x3fc   : > { %v4666_v3 = vpop.permute.xlu0 %4665  ;;  %v2593_v50 = vcombine.low %v17435_v45, %v17434_v6  ;;  %v12926_v7 = vrot.slane %v2625_v16, %v11520_v9  ;;  %v17444_v16 = vld [vmem:[#allocation14_spill] sm:$0xff]  ;;  %v2473_v5 = vcombine.low %v17445_v56, %v12912_v46 }
 0x3fd   : > { %v4732_v22 = vpop.permute.xlu1 %4731  ;;  %5241 = vst.msk [vmem:[%s12869_s29 + $0xf] sm:$0x1] %vm5240_vm3, %v4666_v3  ;;  %v3420_v3 = vcombine.high %v3396_v41, %v3411_v11  ;;  %v17442_v41 = vld [vmem:[#allocation15_spill] sm:$0xff]  ;;  %v2457_v47 = vcombine.low %v17444_v16, %v17443_v13 }
 0x3fe   : > { %5274 = vst.msk [vmem:[%s12869_s29 + $0xbf] sm:$0x1] %vm5240_vm3, %v4732_v22  ;;  %v2778_v22 = vcombine.high %v12789_v10, %v17388_v2  ;;  %4745 = vrot.lane.b32.xlu0 %v2237_v25, %s11434_s13  ;;  %v3404_v10 = vcombine.high %v17428_v37, %v17388_v2  ;;  %v2441_v11 = vcombine.low %v12935_v49, %v17442_v41 }
 0x3ff   : > { %4791 = vrot.lane.b32.xlu1 %v2777_v15, %s11434_s13  ;;  %v12922_v15 = vrot.slane %v2609_v33, %v11520_v9  ;;  %v2374_v33 = vcombine.high %v12858_v53, %v2366_v24  ;;  %v12944_v35 = vrot.slane %v2593_v50, %v11520_v9  ;;  %v12950_v53 = vrot.slane %v2489_v26, %v11520_v9 }
 0x400   : > { %v4678_v25 = vpop.permute.xlu0 %4677  ;;  %v12954_v24 = vrot.slane %v2577_v39, %v11520_v9  ;;  %v3418_v26 = vrot.slane %v3404_v10, %v11520_v9  ;;  %v12968_v39 = vrot.slane %v2457_v47, %v11520_v9 }
 0x401   : > { %v4672_v55 = vpop.permute.xlu1 %4671  ;;  %5247 = vst.msk [vmem:[%s12869_s29 + $0x2f] sm:$0x1] %vm5240_vm3, %v4678_v25  ;;  %v2673_v37 = vcombine.low %v12922_v15, %v12926_v7 }
 0x402   : > { %5244 = vst.msk [vmem:[%s12869_s29 + $0x1f] sm:$0x1] %vm5240_vm3, %v4672_v55  ;;  %4753 = vrot.lane.b32.xlu0 %v2374_v33, %s11434_s13  ;;  %v3434_v55 = vrot.slane %v3420_v3, %v11537_v20  ;;  %v12965_v33 = vrot.slane %v2441_v11, %v11520_v9  ;;  %v2481_v3 = vrot.slane %v2473_v5, %v11520_v9 }
 0x403   : > { %4803 = vrot.lane.b32.xlu1 %v2778_v22, %s11434_s13  ;;  %v3403_v22 = vrot.slane %v3389_v54, %v11520_v9  ;;  %v2641_v12 = vcombine.low %v12954_v24, %v12944_v35  ;;  %v12979_v10 = vrot.slane %v2673_v37, %v11537_v20  ;;  %v2610_v37 = vcombine.high %v12888_v43, %v17431_v48 }
 0x404   : > { %v4738_v25 = vpop.permute.xlu0 %4737  ;;  %v2537_v54 = vcombine.low %v2481_v3, %v12950_v53  ;;  %v3452_v47 = vcombine.high %v3434_v55, %v17388_v2  ;;  %v2594_v43 = vcombine.high %v17435_v45, %v17434_v6  ;;  %v2642_v48 = vcombine.high %v12954_v24, %v12944_v35 }
 0x405   : > { %v4684_v50 = vpop.permute.xlu1 %4683  ;;  %5277 = vst.msk [vmem:[%s12869_s29 + $0xcf] sm:$0x1] %vm5240_vm3, %v4738_v25  ;;  %v2674_v25 = vcombine.high %v12922_v15, %v12926_v7  ;;  %v2538_v15 = vcombine.high %v2481_v3, %v12950_v53  ;;  %v2578_v35 = vcombine.high %v17441_v14, %v17440_v40  ;;  %v2624_v6 = vrot.slane %v2610_v37, %v11520_v9 }
 0x406   : > { %5250 = vst.msk [vmem:[%s12869_s29 + $0x3f] sm:$0x1] %vm5240_vm3, %v4684_v50  ;;  %4857 = vrot.lane.b32.xlu0 %v3427_v42, %s11434_s13  ;;  %v3435_v50 = vcombine.low %v3403_v22, %v3418_v26  ;;  %v12990_v42 = vrot.slane %v2641_v12, %v11537_v20  ;;  %v3436_v12 = vcombine.high %v3403_v22, %v3418_v26 }
 0x407   : > { %4863 = vrot.lane.b32.xlu1 %v3451_v60, %s11434_s13  ;;  %v2505_v60 = vcombine.low %v12965_v33, %v12968_v39  ;;  %v2506_v14 = vcombine.high %v12965_v33, %v12968_v39  ;;  %v2474_v24 = vcombine.high %v17445_v56, %v12912_v46  ;;  %v2608_v22 = vrot.slane %v2594_v43, %v11520_v9 }
 0x408   : > { %v4750_v5 = vpop.permute.xlu0 %4749  ;;  %v2705_v21 = vcombine.low %v12990_v42, %v12979_v10  ;;  %v13034_v40 = vrot.slane %v3436_v12, %v11537_v20  ;;  %v2552_v46 = vrot.slane %v2538_v15, %v11537_v20  ;;  %v2706_v43 = vcombine.high %v12990_v42, %v12979_v10 }
 0x409   : > { %v4744_v11 = vpop.permute.xlu1 %4743  ;;  %5283 = vst.msk [vmem:[%s12869_s29 + $0xef] sm:$0x1] %vm5240_vm3, %v4750_v5  ;;  %v2626_v5 = vcombine.high %v17433_v44, %v17432_v31  ;;  %v2513_v31 = vrot.slane %v2505_v60, %v11537_v20  ;;  %v2490_v44 = vcombine.high %v17439_v58, %v17438_v29  ;;  %v2442_v58 = vcombine.high %v12935_v49, %v17442_v41 }
 0x40a   : > { %5280 = vst.msk [vmem:[%s12869_s29 + $0xdf] sm:$0x1] %vm5240_vm3, %v4744_v11  ;;  %4869 = vrot.lane.b32.xlu0 %v3434_v55, %s11434_s13  ;;  %v13005_v55 = vrot.slane %v3435_v50, %v11537_v20  ;;  %v2458_v29 = vcombine.high %v17444_v16, %v17443_v13  ;;  %v2656_v49 = vrot.slane %v2642_v48, %v11537_v20 }
 0x40b   : > { %4875 = vrot.lane.b32.xlu1 %v3452_v47, %s11434_s13  ;;  %v2545_v47 = vrot.slane %v2537_v54, %v11537_v20  ;;  %v2640_v7 = vrot.slane %v2626_v5, %v11520_v9  ;;  %v2504_v41 = vrot.slane %v2490_v44, %v11520_v9  ;;  %v2592_v13 = vrot.slane %v2578_v35, %v11520_v9 }
 0x40c   : > { %v4690_v36 = vpop.permute.xlu0 %4689  ;;  %v13052_v33 = vrot.slane %v2442_v58, %v11520_v9  ;;  %v2472_v54 = vrot.slane %v2458_v29, %v11520_v9  ;;  %v2488_v50 = vrot.slane %v2474_v24, %v11520_v9  ;;  %v2520_v37 = vrot.slane %v2506_v14, %v11537_v20 }
 0x40d   : > { %v4756_v11 = vpop.permute.xlu1 %4755  ;;  %5253 = vst.msk [vmem:[%s12869_s29 + $0x4f] sm:$0x1] %vm5240_vm3, %v4690_v36  ;;  %v2570_v45 = vcombine.high %v2513_v31, %v2545_v47  ;;  %v2689_v16 = vcombine.low %v2624_v6, %v2640_v7  ;;  %v2569_v3 = vcombine.low %v2513_v31, %v2545_v47  ;;  %v2657_v60 = vcombine.low %v2592_v13, %v2608_v22 }
 0x40e   : > { %5286 = vst.msk [vmem:[%s12869_s29 + $0xff] sm:$0x1] %vm5240_vm3, %v4756_v11  ;;  %4881 = vrot.lane.b32.xlu0 %v13005_v55, %s11434_s13  ;;  %v2572_v5 = vcombine.high %v2520_v37, %v2552_v46  ;;  %v2521_v48 = vcombine.low %v13052_v33, %v2472_v54  ;;  %v2690_v44 = vcombine.high %v2624_v6, %v2640_v7 }
 0x40f   : > { %4759 = vrot.lane.b32.xlu1 %v2705_v21, %s11434_s13  ;;  %v13024_v21 = vrot.slane %v2674_v25, %v11537_v20  ;;  %v2553_v25 = vcombine.low %v2488_v50, %v2504_v41  ;;  %v13064_v11 = vrot.slane %v2689_v16, %v11537_v20  ;;  %v2665_v31 = vrot.slane %v2657_v60, %v11537_v20  ;;  %v17447_v16 = vld [vmem:[#allocation46_spill] sm:$0xff]  ;;  %v17452_v60 = vld [vmem:[#allocation45_spill] sm:$0xff] }
 0x410   : > { %v4702_v53 = vpop.permute.xlu0 %4701  ;;  %v2571_v42 = vcombine.low %v2520_v37, %v2552_v46  ;;  %v2529_v58 = vrot.slane %v2521_v48, %v11537_v20  ;;  %v2554_v6 = vcombine.high %v2488_v50, %v2504_v41  ;;  %v13086_v7 = vrot.slane %v2690_v44, %v11537_v20  ;;  %v17449_v46 = vld [vmem:[#allocation48_spill] sm:$0xff]  ;;  %v17453_v37 = vld [vmem:[#allocation42_spill] sm:$0xff] }
 0x411   : > { %v4668_v36 = vpop.permute.xlu1 %4667  ;;  %5259 = vst.msk [vmem:[%s12869_s29 + $0x6f] sm:$0x1] %vm5240_vm3, %v4702_v53  ;;  %v2707_v56 = vcombine.low %v2656_v49, %v13024_v21  ;;  %v2709_v35 = vcombine.low %v2665_v31, %v13064_v11  ;;  %v2708_v24 = vcombine.high %v2656_v49, %v13024_v21  ;;  %v17450_v21 = vld [vmem:[#allocation53_spill] sm:$0xff]  ;;  %v17455_v48 = vld [vmem:[#allocation12_spill] sm:$0xff] }
 0x412   : > { %5242 = vst.msk [vmem:[%s12869_s29 + $0xf] sm:$0xfe] %vm5237_vm4, %v4668_v36  ;;  %4893 = vrot.lane.b32.xlu0 %v13034_v40, %s11434_s13  ;;  %v2561_v36 = vrot.slane %v2553_v25, %v11537_v20  ;;  %v17451_v49 = vld [vmem:[#allocation49_spill] sm:$0xff]  ;;  %v2568_v50 = vrot.slane %v2554_v6, %v11537_v20  ;;  %v2827_v25 = vcombine.low %v17453_v37, %v17452_v60  ;;  %v17459_v6 = vld [vmem:[#allocation34_spill] sm:$0xff] }
 0x413   : > { %4763 = vrot.lane.b32.xlu1 %v2570_v45, %s11434_s13  ;;  %v2658_v45 = vcombine.high %v2592_v13, %v2608_v22  ;;  %v2522_v22 = vcombine.high %v13052_v33, %v2472_v54  ;;  %v17446_v13 = vld [vmem:[#allocation43_spill] sm:$0xff]  ;;  %v2931_v33 = vcombine.low %v17451_v49, %v17450_v21 }
 0x414   : > { %v4810_v39 = vpop.permute.xlu0 %4809  ;;  %v2574_v53 = vcombine.high %v2529_v58, %v2561_v36 }
 0x415   : > { %v4680_v26 = vpop.permute.xlu1 %4679  ;;  %5313 = vst.msk [vmem:[%s12869_s29 + $0x18f] sm:$0x1] %vm5240_vm3, %v4810_v39  ;;  %v2672_v41 = vrot.slane %v2658_v45, %v11537_v20  ;;  %v17458_v45 = vld [vmem:[#allocation38_spill] sm:$0xff] }
 0x416   : > { %5248 = vst.msk [vmem:[%s12869_s29 + $0x2f] sm:$0xfe] %vm5237_vm4, %v4680_v26  ;;  %4757 = vrot.lane.b32.xlu0 %v2569_v3, %s11434_s13  ;;  %v13095_v26 = vsel %vm1452_vm1, %v17447_v16, %v17446_v13  ;;  %v13133_v16 = vld [vmem:[#allocation4 + $0x48] sm:$0xff] }
 0x417   : > { %4771 = vrot.lane.b32.xlu1 %v2707_v56, %s11434_s13  ;;  %v17448_v56 = vld [vmem:[#allocation8_spill] sm:$0xff]  ;;  %v2711_v54 = vcombine.low %v2672_v41, %v13086_v7 }
 0x418   : > { %v4822_v12 = vpop.permute.xlu0 %4821  ;;  %v13104_v39 = vsel %vm639_vm5, %v17449_v46, %v17448_v56  ;;  %v17462_v56 = vld [vmem:[#allocation36_spill] sm:$0xff] }
 0x419   : > { %v4692_v47 = vpop.permute.xlu1 %4691  ;;  %5319 = vst.msk [vmem:[%s12869_s29 + $0x1af] sm:$0x1] %vm5240_vm3, %v4822_v12  ;;  %v2947_v44 = vcombine.low %v13104_v39, %v17455_v48  ;;  %v2779_v46 = vcombine.low %v13133_v16, %v17462_v56 }
 0x41a   : > { %5254 = vst.msk [vmem:[%s12869_s29 + $0x4f] sm:$0xfe] %vm5237_vm4, %v4692_v47  ;;  %4765 = vrot.lane.b32.xlu0 %v2706_v43, %s11434_s13  ;;  %v17454_v47 = vld [vmem:[#allocation40_spill] sm:$0xff]  ;;  %v2573_v43 = vcombine.low %v2529_v58, %v2561_v36  ;;  %v17460_v36 = vld [vmem:[#allocation13_spill] sm:$0xff]  ;;  %v17461_v58 = vld [vmem:[#allocation10_spill] sm:$0xff] }
 0x41b   : > { %4775 = vrot.lane.b32.xlu1 %v2572_v5, %s11434_s13  ;;  %v2811_v5 = vcombine.low %v17454_v47, %v13095_v26 }
 0x41c   : > { %v4662_v10 = vpop.permute.xlu0 %4661 }
 0x41d   : > { %v4696_v15 = vpop.permute.xlu1 %4695  ;;  %5238 = vst.msk [vmem:[%s12869_s29 - $0x1] sm:$0xfe] %vm5237_vm4, %v4662_v10 }
 0x41e   : > { %5256 = vst.msk [vmem:[%s12869_s29 + $0x5f] sm:$0x1] %vm5240_vm3, %v4696_v15  ;;  %4769 = vrot.lane.b32.xlu0 %v2571_v42, %s11434_s13  ;;  %v17456_v15 = vld [vmem:[#allocation51_spill] sm:$0xff]  ;;  %v2536_v42 = vrot.slane %v2522_v22, %v11537_v20  ;;  %v13138_v22 = vrot.slane %v2827_v25, %v11520_v9 }
 0x41f   : > { %4783 = vrot.lane.b32.xlu1 %v2709_v35, %s11434_s13  ;;  %v17457_v35 = vld [vmem:[#allocation47_spill] sm:$0xff] }
 0x420   : > { %v4674_v14 = vpop.permute.xlu0 %4673  ;;  %v2915_v10 = vcombine.low %v17457_v35, %v17456_v15  ;;  %v2576_v13 = vcombine.high %v2536_v42, %v2568_v50 }
 0x421   : > { %v4704_v29 = vpop.permute.xlu1 %4703  ;;  %5245 = vst.msk [vmem:[%s12869_s29 + $0x1f] sm:$0xfe] %vm5237_vm4, %v4674_v14  ;;  %v13131_v14 = vrot.slane %v2931_v33, %v11520_v9  ;;  %v2710_v33 = vcombine.high %v2665_v31, %v13064_v11  ;;  %v3453_v31 = vcombine.high %v13005_v55, %v17388_v2 }
 0x422   : > { %5260 = vst.msk [vmem:[%s12869_s29 + $0x6f] sm:$0xfe] %vm5237_vm4, %v4704_v29  ;;  %4777 = vrot.lane.b32.xlu0 %v2708_v24, %s11434_s13  ;;  %v2795_v29 = vcombine.low %v17459_v6, %v17458_v45 }
 0x423   : > { %4787 = vrot.lane.b32.xlu1 %v2574_v53, %s11434_s13  ;;  %v2963_v53 = vcombine.low %v17461_v58, %v17460_v36 }
 0x424   : > { %v4686_v12 = vpop.permute.xlu0 %4685  ;;  %v13154_v25 = vrot.slane %v2795_v29, %v11520_v9 }
 0x425   : > { %v4708_v3 = vpop.permute.xlu1 %4707  ;;  %5251 = vst.msk [vmem:[%s12869_s29 + $0x3f] sm:$0xfe] %vm5237_vm4, %v4686_v12  ;;  %v13147_v12 = vrot.slane %v2947_v44, %v11520_v9  ;;  %v2787_v44 = vrot.slane %v2779_v46, %v11520_v9  ;;  %v3454_v46 = vcombine.high %v13034_v40, %v17388_v2 }
 0x426   : > { %5262 = vst.msk [vmem:[%s12869_s29 + $0x7f] sm:$0x1] %vm5240_vm3, %v4708_v3  ;;  %4781 = vrot.lane.b32.xlu0 %v2573_v43, %s11434_s13  ;;  %v13141_v3 = vrot.slane %v2811_v5, %v11520_v9  ;;  %v2923_v43 = vrot.slane %v2915_v10, %v11520_v9  ;;  %v2971_v5 = vrot.slane %v2963_v53, %v11520_v9 }
 0x427   : > { %4795 = vrot.lane.b32.xlu1 %v2711_v54, %s11434_s13  ;;  %v2843_v53 = vcombine.low %v2787_v44, %v13154_v25 }
 0x428   : > { %v4698_v54 = vpop.permute.xlu0 %4697  ;;  %v2875_v10 = vcombine.low %v13141_v3, %v13138_v22 }
 0x429   : > { %v4664_v24 = vpop.permute.xlu1 %4663  ;;  %5257 = vst.msk [vmem:[%s12869_s29 + $0x5f] sm:$0xfe] %vm5237_vm4, %v4698_v54  ;;  %v3011_v54 = vcombine.low %v13147_v12, %v2971_v5  ;;  %v2851_v40 = vrot.slane %v2843_v53, %v11537_v20 }
 0x42a   : > { %5239 = vst.msk [vmem:[%s12869_s29 + $0x7] sm:$0xff] %vm639_vm5, %v4664_v24  ;;  %4789 = vrot.lane.b32.xlu0 %v2710_v33, %s11434_s13  ;;  %v2979_v24 = vcombine.low %v2923_v43, %v13131_v14 }
 0x42b   : > { %4799 = vrot.lane.b32.xlu1 %v2576_v13, %s11434_s13  ;;  %v2575_v13 = vcombine.low %v2536_v42, %v2568_v50  ;;  %v2712_v42 = vcombine.high %v2672_v41, %v13086_v7  ;;  %v2828_v7 = vcombine.high %v17453_v37, %v17452_v60  ;;  %v2812_v41 = vcombine.high %v17454_v47, %v13095_v26 }
 0x42c   : > { %v4762_v29 = vpop.permute.xlu0 %4761  ;;  %v2987_v33 = vrot.slane %v2979_v24, %v11537_v20  ;;  %v2932_v24 = vcombine.high %v17451_v49, %v17450_v21  ;;  %v2948_v21 = vcombine.high %v13104_v39, %v17455_v48  ;;  %v3012_v49 = vcombine.high %v13147_v12, %v2971_v5 }
 0x42d   : > { %v4676_v11 = vpop.permute.xlu1 %4675  ;;  %5289 = vst.msk [vmem:[%s12869_s29 + $0x10f] sm:$0x1] %vm5240_vm3, %v4762_v29  ;;  %v2964_v26 = vcombine.high %v17461_v58, %v17460_v36  ;;  %v2796_v60 = vcombine.high %v17459_v6, %v17458_v45  ;;  %v2844_v37 = vcombine.high %v2787_v44, %v13154_v25  ;;  %v2780_v39 = vcombine.high %v13133_v16, %v17462_v56 }
 0x42e   : > { %5246 = vst.msk [vmem:[%s12869_s29 + $0x27] sm:$0xff] %vm639_vm5, %v4676_v11  ;;  %4793 = vrot.lane.b32.xlu0 %v2575_v13, %s11434_s13  ;;  %v2883_v11 = vrot.slane %v2875_v10, %v11537_v20  ;;  %v2980_v10 = vcombine.high %v2923_v43, %v13131_v14  ;;  %v2916_v14 = vcombine.high %v17457_v35, %v17456_v15 }
 0x42f   : > { %4887 = vrot.lane.b32.xlu1 %v3453_v31, %s11434_s13  ;;  %v3019_v31 = vrot.slane %v3011_v54, %v11537_v20  ;;  %v2876_v54 = vcombine.high %v13141_v3, %v13138_v22  ;;  %v13213_v47 = vrot.slane %v2932_v24, %v11520_v9  ;;  %v13217_v36 = vrot.slane %v2828_v7, %v11520_v9  ;;  %v17463_v7 = vld [vmem:[#allocation32_spill] sm:$0xff] }
 0x430   : > { %v4774_v50 = vpop.permute.xlu0 %4773  ;;  %v2907_v53 = vcombine.low %v2851_v40, %v2883_v11  ;;  %v2908_v15 = vcombine.high %v2851_v40, %v2883_v11  ;;  %v2994_v35 = vrot.slane %v2980_v10, %v11537_v20  ;;  %v13220_v45 = vrot.slane %v2812_v41, %v11520_v9 }
 0x431   : > { %v4688_v55 = vpop.permute.xlu1 %4687  ;;  %5295 = vst.msk [vmem:[%s12869_s29 + $0x12f] sm:$0x1] %vm5240_vm3, %v4774_v50  ;;  %v3043_v13 = vcombine.low %v2987_v33, %v3019_v31  ;;  %v2890_v6 = vrot.slane %v2876_v54, %v11537_v20  ;;  %v3044_v16 = vcombine.high %v2987_v33, %v3019_v31  ;;  %v13226_v56 = vrot.slane %v2948_v21, %v11520_v9 }
 0x432   : > { %5252 = vst.msk [vmem:[%s12869_s29 + $0x47] sm:$0xff] %vm639_vm5, %v4688_v55  ;;  %4801 = vrot.lane.b32.xlu0 %v2712_v42, %s11434_s13  ;;  %v3026_v22 = vrot.slane %v3012_v49, %v11537_v20  ;;  %v2930_v3 = vrot.slane %v2916_v14, %v11520_v9  ;;  %v13234_v12 = vrot.slane %v2796_v60, %v11520_v9  ;;  %v17464_v14 = vld [vmem:[#allocation39_spill] sm:$0xff] }
 0x433   : > { %4899 = vrot.lane.b32.xlu1 %v3454_v46, %s11434_s13  ;;  %v2858_v43 = vrot.slane %v2844_v37, %v11537_v20  ;;  %v2978_v25 = vrot.slane %v2964_v26, %v11520_v9  ;;  %v13241_v33 = vrot.slane %v2780_v39, %v11520_v9  ;;  %v2891_v11 = vcombine.low %v13220_v45, %v13217_v36 }
 0x434   : > { %v4670_v55 = vpop.permute.xlu0 %4669  ;;  %v2995_v5 = vcombine.low %v2930_v3, %v13213_v47  ;;  %v3045_v46 = vcombine.low %v2994_v35, %v3026_v22  ;;  %v13259_v41 = vsel %vm639_vm5, %v12636_v4, %v17463_v7  ;;  %v2996_v49 = vcombine.high %v2930_v3, %v13213_v47 }
 0x435   : > { %v4700_v29 = vpop.permute.xlu1 %4699  ;;  %5243 = vst.msk [vmem:[%s12869_s29 + $0x17] sm:$0xff] %vm639_vm5, %v4670_v55  ;;  %v2909_v42 = vcombine.low %v2858_v43, %v2890_v6  ;;  %v3027_v31 = vcombine.low %v13226_v56, %v2978_v25  ;;  %v2859_v40 = vcombine.low %v13241_v33, %v13234_v12  ;;  %v2910_v10 = vcombine.high %v2858_v43, %v2890_v6  ;;  %v17466_v6 = vld [vmem:[#allocation37_spill] sm:$0xff]  ;;  %v17469_v43 = vld [vmem:[#allocation64_spill] sm:$0xff] }
 0x436   : > { %5258 = vst.msk [vmem:[%s12869_s29 + $0x67] sm:$0xff] %vm639_vm5, %v4700_v29  ;;  %4805 = vrot.lane.b32.xlu0 %v2907_v53, %s11434_s13  ;;  %v3003_v29 = vrot.slane %v2995_v5, %v11537_v20  ;;  %v3046_v55 = vcombine.high %v2994_v35, %v3026_v22  ;;  %v13273_v4 = vsel %vm1452_vm1, %v12550_v62, %v12543_v18  ;;  %v17465_v35 = vld [vmem:[#allocation41_spill] sm:$0xff]  ;;  %v17467_v62 = vld [vmem:[#allocation72_spill] sm:$0xff]  ;;  %v17468_v22 = vld [vmem:[#allocation62_spill] sm:$0xff] }
 0x437   : > { %4807 = vrot.lane.b32.xlu1 %v3043_v13, %s11434_s13  ;;  %v2899_v13 = vrot.slane %v2891_v11, %v11537_v20  ;;  %v3035_v53 = vrot.slane %v3027_v31, %v11537_v20  ;;  %v2867_v21 = vrot.slane %v2859_v40, %v11537_v20  ;;  %v3285_v26 = vcombine.low %v13259_v41, %v17464_v14  ;;  %v17470_v5 = vld [vmem:[#allocation60_spill] sm:$0xff]  ;;  %v17473_v11 = vld [vmem:[#allocation70_spill] sm:$0xff] }
 0x438   : > { %v4682_v58 = vpop.permute.xlu0 %4681  ;;  %v2892_v39 = vcombine.high %v13220_v45, %v13217_v36  ;;  %v3028_v18 = vcombine.high %v13226_v56, %v2978_v25  ;;  %v2860_v36 = vcombine.high %v13241_v33, %v13234_v12  ;;  %v13293_v45 = vld [vmem:[#allocation4 + $0x60] sm:$0xff]  ;;  %v17471_v56 = vld [vmem:[#allocation66_spill] sm:$0xff]  ;;  %v3010_v31 = vrot.slane %v2996_v49, %v11537_v20 }
 0x439   : > { %v4816_v48 = vpop.permute.xlu1 %4815  ;;  %5249 = vst.msk [vmem:[%s12869_s29 + $0x37] sm:$0xff] %vm639_vm5, %v4682_v58  ;;  %v3047_v37 = vcombine.low %v3003_v29, %v3035_v53  ;;  %v2911_v47 = vcombine.low %v2867_v21, %v2899_v13  ;;  %v3301_v58 = vcombine.low %v17466_v6, %v17465_v35  ;;  %v3117_v3 = vcombine.low %v13293_v45, %v17468_v22 }
 0x43a   : > { %5316 = vst.msk [vmem:[%s12869_s29 + $0x19f] sm:$0x1] %vm5240_vm3, %v4816_v48  ;;  %4813 = vrot.lane.b32.xlu0 %v3044_v16, %s11434_s13  ;;  %v3165_v48 = vcombine.low %v12535_v27, %v12563_v52  ;;  %v3269_v16 = vcombine.low %v17467_v62, %v12618_v19  ;;  %v3149_v25 = vcombine.low %v17471_v56, %v13273_v4 }
 0x43b   : > { %4811 = vrot.lane.b32.xlu1 %v2908_v15, %s11434_s13  ;;  %v2912_v33 = vcombine.high %v2867_v21, %v2899_v13  ;;  %v2906_v40 = vrot.slane %v2892_v39, %v11537_v20  ;;  %v3048_v7 = vcombine.high %v3003_v29, %v3035_v53  ;;  %v13323_v13 = vrot.slane %v3117_v3, %v11520_v9 }
 0x43c   : > { %v4694_v50 = vpop.permute.xlu0 %4693  ;;  %v3157_v29 = vrot.slane %v3149_v25, %v11520_v9  ;;  %v2874_v53 = vrot.slane %v2860_v36, %v11537_v20 }
 0x43d   : > { %v4828_v44 = vpop.permute.xlu1 %4827  ;;  %5255 = vst.msk [vmem:[%s12869_s29 + $0x57] sm:$0xff] %vm639_vm5, %v4694_v50 }
 0x43e   : > { %5322 = vst.msk [vmem:[%s12869_s29 + $0x1bf] sm:$0x1] %vm5240_vm3, %v4828_v44  ;;  %4817 = vrot.lane.b32.xlu0 %v2909_v42, %s11434_s13  ;;  %v3133_v44 = vcombine.low %v17470_v5, %v17469_v43  ;;  %v13305_v42 = vrot.slane %v3285_v26, %v11520_v9  ;;  %v13317_v26 = vrot.slane %v3269_v16, %v11520_v9 }
 0x43f   : > { %4819 = vrot.lane.b32.xlu1 %v3045_v46, %s11434_s13  ;;  %v17472_v46 = vld [vmem:[#allocation74_spill] sm:$0xff]  ;;  %v2914_v3 = vcombine.high %v2874_v53, %v2906_v40 }
 0x440   : > { %v4706_v54 = vpop.permute.xlu0 %4705  ;;  %v3253_v50 = vcombine.low %v17473_v11, %v17472_v46  ;;  %v13326_v21 = vrot.slane %v3133_v44, %v11520_v9 }
 0x441   : > { %v4768_v24 = vpop.permute.xlu1 %4767  ;;  %5261 = vst.msk [vmem:[%s12869_s29 + $0x77] sm:$0xff] %vm639_vm5, %v4706_v54  ;;  %v3309_v54 = vrot.slane %v3301_v58, %v11520_v9 }
 0x442   : > { %5292 = vst.msk [vmem:[%s12869_s29 + $0x11f] sm:$0x1] %vm5240_vm3, %v4768_v24  ;;  %4825 = vrot.lane.b32.xlu0 %v3046_v55, %s11434_s13  ;;  %v13310_v24 = vrot.slane %v3165_v48, %v11520_v9  ;;  %v3042_v55 = vrot.slane %v3028_v18, %v11537_v20  ;;  %v3261_v49 = vrot.slane %v3253_v50, %v11520_v9 }
 0x443   : > { %4823 = vrot.lane.b32.xlu1 %v2910_v10, %s11434_s13  ;;  %v3181_v18 = vcombine.low %v13323_v13, %v13326_v21 }
 0x444   : > { %v4834_v15 = vpop.permute.xlu0 %4833  ;;  %v3049_v39 = vcombine.low %v3010_v31, %v3042_v55  ;;  %v3213_v48 = vcombine.low %v3157_v29, %v13310_v24  ;;  %v3317_v58 = vcombine.low %v3261_v49, %v13317_v26  ;;  %v3050_v25 = vcombine.high %v3010_v31, %v3042_v55 }
 0x445   : > { %v4780_v60 = vpop.permute.xlu1 %4779  ;;  %5325 = vst.msk [vmem:[%s12869_s29 + $0x1cf] sm:$0x1] %vm5240_vm3, %v4834_v15  ;;  %v3166_v55 = vcombine.high %v12535_v27, %v12563_v52  ;;  %v3118_v27 = vcombine.high %v13293_v45, %v17468_v22  ;;  %v3134_v52 = vcombine.high %v17470_v5, %v17469_v43 }
 0x446   : > { %5298 = vst.msk [vmem:[%s12869_s29 + $0x13f] sm:$0x1] %vm5240_vm3, %v4780_v60  ;;  %4829 = vrot.lane.b32.xlu0 %v2911_v47, %s11434_s13  ;;  %v3349_v60 = vcombine.low %v13305_v42, %v3309_v54  ;;  %v2913_v47 = vcombine.low %v2874_v53, %v2906_v40  ;;  %v3221_v50 = vrot.slane %v3213_v48, %v11537_v20 }
 0x447   : > { %4831 = vrot.lane.b32.xlu1 %v3047_v37, %s11434_s13  ;;  %v3286_v40 = vcombine.high %v13259_v41, %v17464_v14  ;;  %v3214_v53 = vcombine.high %v3157_v29, %v13310_v24  ;;  %v3270_v41 = vcombine.high %v17467_v62, %v12618_v19  ;;  %v3318_v14 = vcombine.high %v3261_v49, %v13317_v26 }
 0x448   : > { %v4846_v10 = vpop.permute.xlu0 %4845  ;;  %v3357_v16 = vrot.slane %v3349_v60, %v11537_v20  ;;  %v3254_v19 = vcombine.high %v17473_v11, %v17472_v46  ;;  %v13385_v43 = vrot.slane %v3166_v55, %v11520_v9  ;;  %v13402_v26 = vrot.slane %v3134_v52, %v11520_v9 }
 0x449   : > { %v4840_v12 = vpop.permute.xlu1 %4839  ;;  %5331 = vst.msk [vmem:[%s12869_s29 + $0x1ef] sm:$0x1] %vm5240_vm3, %v4846_v10  ;;  %v3350_v10 = vcombine.high %v13305_v42, %v3309_v54  ;;  %v3182_v42 = vcombine.high %v13323_v13, %v13326_v21  ;;  %v13392_v46 = vrot.slane %v3270_v41, %v11520_v9  ;;  %v3332_v11 = vrot.slane %v3318_v14, %v11537_v20 }
 0x44a   : > { %5328 = vst.msk [vmem:[%s12869_s29 + $0x1df] sm:$0x1] %vm5240_vm3, %v4840_v12  ;;  %4837 = vrot.lane.b32.xlu0 %v3048_v7, %s11434_s13  ;;  %v3325_v12 = vrot.slane %v3317_v58, %v11537_v20  ;;  %v13399_v54 = vrot.slane %v3118_v27, %v11520_v9  ;;  %v13408_v29 = vrot.slane %v3254_v19, %v11520_v9 }
 0x44b   : > { %4835 = vrot.lane.b32.xlu1 %v2912_v33, %s11434_s13  ;;  %v3189_v33 = vrot.slane %v3181_v18, %v11537_v20  ;;  %v3364_v62 = vrot.slane %v3350_v10, %v11537_v20  ;;  %v3196_v21 = vrot.slane %v3182_v42, %v11537_v20 }
 0x44c   : > { %v4786_v15 = vpop.permute.xlu0 %4785  ;;  %v3381_v31 = vcombine.low %v3325_v12, %v3357_v16  ;;  %v3382_v24 = vcombine.high %v3325_v12, %v3357_v16  ;;  %v3333_v16 = vcombine.low %v13408_v29, %v13392_v46  ;;  %v3334_v42 = vcombine.high %v13408_v29, %v13392_v46  ;;  %v17482_v46 = vld [vmem:[#allocation69_spill] sm:$0xff] }
 0x44d   : > { %v4852_v37 = vpop.permute.xlu1 %4851  ;;  %5301 = vst.msk [vmem:[%s12869_s29 + $0x14f] sm:$0x1] %vm5240_vm3, %v4786_v15  ;;  %v3246_v22 = vcombine.high %v3189_v33, %v3221_v50  ;;  %v3383_v15 = vcombine.low %v3332_v11, %v3364_v62  ;;  %v3384_v12 = vcombine.high %v3332_v11, %v3364_v62  ;;  %v17478_v62 = vld [vmem:[#allocation26_spill] sm:$0xff] }
 0x44e   : > { %5334 = vst.msk [vmem:[%s12869_s29 + $0x1ff] sm:$0x1] %vm5240_vm3, %v4852_v37  ;;  %4841 = vrot.lane.b32.xlu0 %v2913_v47, %s11434_s13  ;;  %v3245_v37 = vcombine.low %v3189_v33, %v3221_v50  ;;  %v3341_v10 = vrot.slane %v3333_v16, %v11537_v20  ;;  %v3348_v16 = vrot.slane %v3334_v42, %v11537_v20 }
 0x44f   : > { %4843 = vrot.lane.b32.xlu1 %v3049_v39, %s11434_s13  ;;  %v3302_v39 = vcombine.high %v17466_v6, %v17465_v35  ;;  %v3150_v35 = vcombine.high %v17471_v56, %v13273_v4  ;;  %v13381_v6 = vrot.slane %v3286_v40, %v11520_v9  ;;  %v3228_v4 = vrot.slane %v3214_v53, %v11537_v20 }
 0x450   : > { %v4798_v44 = vpop.permute.xlu0 %4797  ;;  %v13429_v40 = vsel %vm1452_vm1, %v12647_v1, %v12628_v51  ;;  %v3607_v51 = vcombine.low %v12661_v8, %v12678_v0 }
 0x451   : > { %v4712_v36 = vpop.permute.xlu1 %4711  ;;  %5307 = vst.msk [vmem:[%s12869_s29 + $0x16f] sm:$0x1] %vm5240_vm3, %v4798_v44  ;;  %v3316_v56 = vrot.slane %v3302_v39, %v11520_v9  ;;  %v3164_v13 = vrot.slane %v3150_v35, %v11520_v9  ;;  %v3247_v18 = vcombine.low %v3196_v21, %v3228_v4  ;;  %v17475_v39 = vld [vmem:[#allocation75_spill] sm:$0xff]  ;;  %v17477_v35 = vld [vmem:[#allocation24_spill] sm:$0xff] }
 0x452   : > { %5264 = vst.msk [vmem:[%s12869_s29 + $0x87] sm:$0xff] %vm639_vm5, %v4712_v36  ;;  %4849 = vrot.lane.b32.xlu0 %v3050_v25, %s11434_s13  ;;  %v3197_v36 = vcombine.low %v13399_v54, %v13402_v26  ;;  %v3248_v25 = vcombine.high %v3196_v21, %v3228_v4  ;;  %v3503_v41 = vcombine.low %v17475_v39, %v12644_v28 }
 0x453   : > { %4847 = vrot.lane.b32.xlu1 %v2914_v3, %s11434_s13  ;;  %v3365_v49 = vcombine.low %v13381_v6, %v3316_v56  ;;  %v3229_v47 = vcombine.low %v3164_v13, %v13385_v43  ;;  %v3366_v53 = vcombine.high %v13381_v6, %v3316_v56  ;;  %v3591_v6 = vcombine.low %v12652_v59, %v12670_v34  ;;  %v13468_v56 = vld [vmem:[#allocation4 + $0x78] sm:$0xff] }
 0x454   : > { %v4906_v60 = vpop.permute.xlu0 %4905  ;;  %v3205_v55 = vrot.slane %v3197_v36, %v11537_v20  ;;  %v3455_v11 = vcombine.low %v13468_v56, %v17482_v46  ;;  %v13474_v21 = vrot.slane %v3607_v51, %v11520_v9 }
 0x455   : > { %v4716_v7 = vpop.permute.xlu1 %4715  ;;  %5361 = vst.msk [vmem:[%s12869_s29 + $0x28f] sm:$0x1] %vm5240_vm3, %v4906_v60  ;;  %v3373_v3 = vrot.slane %v3365_v49, %v11537_v20  ;;  %v3237_v33 = vrot.slane %v3229_v47, %v11537_v20 }
 0x456   : > { %5266 = vst.msk [vmem:[%s12869_s29 + $0x8f] sm:$0xfe] %vm5237_vm4, %v4716_v7  ;;  %4853 = vrot.lane.b32.xlu0 %v3245_v37, %s11434_s13  ;;  %v17474_v7 = vld [vmem:[#allocation20_spill] sm:$0xff]  ;;  %v3230_v37 = vcombine.high %v3164_v13, %v13385_v43  ;;  %v3198_v43 = vcombine.high %v13399_v54, %v13402_v26  ;;  %v3380_v13 = vrot.slane %v3366_v53, %v11537_v20 }
 0x457   : > { %4855 = vrot.lane.b32.xlu1 %v3381_v31, %s11434_s13  ;;  %v13438_v31 = vsel %vm639_vm5, %v12655_v32, %v17474_v7  ;;  %v3385_v60 = vcombine.low %v3341_v10, %v3373_v3  ;;  %v17476_v32 = vld [vmem:[#allocation73_spill] sm:$0xff]  ;;  %v3249_v52 = vcombine.low %v3205_v55, %v3237_v33  ;;  %v3250_v49 = vcombine.high %v3205_v55, %v3237_v33 }
 0x458   : > { %v4710_v5 = vpop.permute.xlu0 %4709  ;;  %v3487_v14 = vcombine.low %v17476_v32, %v13429_v40  ;;  %v3623_v19 = vcombine.low %v13438_v31, %v17477_v35  ;;  %v3511_v54 = vrot.slane %v3503_v41, %v11520_v9  ;;  %v3244_v47 = vrot.slane %v3230_v37, %v11537_v20 }
 0x459   : > { %v4724_v45 = vpop.permute.xlu1 %4723  ;;  %5263 = vst.msk [vmem:[%s12869_s29 + $0x7f] sm:$0xfe] %vm5237_vm4, %v4710_v5  ;;  %v17480_v5 = vld [vmem:[#allocation71_spill] sm:$0xff]  ;;  %v3463_v33 = vrot.slane %v3455_v11, %v11520_v9 }
 0x45a   : > { %5270 = vst.msk [vmem:[%s12869_s29 + $0xa7] sm:$0xff] %vm639_vm5, %v4724_v45  ;;  %4861 = vrot.lane.b32.xlu0 %v3382_v24, %s11434_s13  ;;  %v17479_v45 = vld [vmem:[#allocation22_spill] sm:$0xff]  ;;  %v17481_v24 = vld [vmem:[#allocation68_spill] sm:$0xff]  ;;  %v3495_v26 = vrot.slane %v3487_v14, %v11520_v9 }
 0x45b   : > { %4859 = vrot.lane.b32.xlu1 %v3246_v22, %s11434_s13  ;;  %v3639_v22 = vcombine.low %v17479_v45, %v17478_v62  ;;  %v3471_v4 = vcombine.low %v17481_v24, %v17480_v5 }
 0x45c   : > { %v4718_v58 = vpop.permute.xlu0 %4717 }
 0x45d   : > { %v4728_v48 = vpop.permute.xlu1 %4727  ;;  %5267 = vst.msk [vmem:[%s12869_s29 + $0x97] sm:$0xff] %vm639_vm5, %v4718_v58  ;;  %v13482_v58 = vrot.slane %v3623_v19, %v11520_v9  ;;  %v3479_v36 = vrot.slane %v3471_v4, %v11520_v9 }
 0x45e   : > { %5272 = vst.msk [vmem:[%s12869_s29 + $0xaf] sm:$0xfe] %vm5237_vm4, %v4728_v48  ;;  %4865 = vrot.lane.b32.xlu0 %v3247_v18, %s11434_s13  ;;  %v3599_v18 = vrot.slane %v3591_v6, %v11520_v9 }
 0x45f   : > { %4867 = vrot.lane.b32.xlu1 %v3383_v15, %s11434_s13  ;;  %v3386_v15 = vcombine.high %v3341_v10, %v3373_v3  ;;  %v3212_v3 = vrot.slane %v3198_v43, %v11537_v20  ;;  %v3551_v10 = vcombine.low %v3495_v26, %v3511_v54  ;;  %v3519_v51 = vcombine.low %v3463_v33, %v3479_v36 }
 0x460   : > { %v4722_v50 = vpop.permute.xlu0 %4721  ;;  %v3520_v11 = vcombine.high %v3463_v33, %v3479_v36 }
 0x461   : > { %v4736_v44 = vpop.permute.xlu1 %4735  ;;  %5269 = vst.msk [vmem:[%s12869_s29 + $0x9f] sm:$0xfe] %vm5237_vm4, %v4722_v50  ;;  %v3251_v55 = vcombine.low %v3212_v3, %v3244_v47  ;;  %v3559_v41 = vrot.slane %v3551_v10, %v11537_v20  ;;  %v3527_v42 = vrot.slane %v3519_v51, %v11537_v20 }
 0x462   : > { %5276 = vst.msk [vmem:[%s12869_s29 + $0xc7] sm:$0xff] %vm639_vm5, %v4736_v44  ;;  %4873 = vrot.lane.b32.xlu0 %v3384_v12, %s11434_s13  ;;  %v13493_v44 = vrot.slane %v3639_v22, %v11520_v9  ;;  %v3387_v12 = vcombine.low %v3348_v16, %v3380_v13  ;;  %v3552_v22 = vcombine.high %v3495_v26, %v3511_v54 }
 0x463   : > { %4871 = vrot.lane.b32.xlu1 %v3248_v25, %s11434_s13  ;;  %v3655_v25 = vcombine.low %v3599_v18, %v13474_v21  ;;  %v3583_v4 = vcombine.low %v3527_v42, %v3559_v41  ;;  %v3488_v54 = vcombine.high %v17476_v32, %v13429_v40  ;;  %v3534_v40 = vrot.slane %v3520_v11, %v11537_v20 }
 0x464   : > { %v4730_v27 = vpop.permute.xlu0 %4729  ;;  %v3687_v53 = vcombine.low %v13482_v58, %v13493_v44  ;;  %v3566_v26 = vrot.slane %v3552_v22, %v11537_v20 }
 0x465   : > { %v4740_v1 = vpop.permute.xlu1 %4739  ;;  %5273 = vst.msk [vmem:[%s12869_s29 + $0xb7] sm:$0xff] %vm639_vm5, %v4730_v27  ;;  %v3663_v37 = vrot.slane %v3655_v25, %v11537_v20  ;;  %v3388_v27 = vcombine.high %v3348_v16, %v3380_v13  ;;  %v3656_v13 = vcombine.high %v3599_v18, %v13474_v21  ;;  %v3688_v16 = vcombine.high %v13482_v58, %v13493_v44 }
 0x466   : > { %5278 = vst.msk [vmem:[%s12869_s29 + $0xcf] sm:$0xfe] %vm5237_vm4, %v4740_v1  ;;  %4877 = vrot.lane.b32.xlu0 %v3249_v52, %s11434_s13  ;;  %v3695_v52 = vrot.slane %v3687_v53, %v11537_v20  ;;  %v3789_v21 = vcombine.high %v12812_v23, %v17388_v2  ;;  %v3456_v18 = vcombine.high %v13468_v56, %v17482_v46 }
 0x467   : > { %4879 = vrot.lane.b32.xlu1 %v3385_v60, %s11434_s13  ;;  %v3252_v60 = vcombine.high %v3212_v3, %v3244_v47  ;;  %v3670_v58 = vrot.slane %v3656_v13, %v11537_v20  ;;  %v3702_v23 = vrot.slane %v3688_v16, %v11537_v20  ;;  %v3592_v3 = vcombine.high %v12652_v59, %v12670_v34  ;;  %v17483_v59 = vld [vmem:[#allocation30_spill] sm:$0xff] }
 0x468   : > { %v4734_v48 = vpop.permute.xlu0 %4733  ;;  %v3719_v6 = vcombine.low %v3663_v37, %v3695_v52  ;;  %v3720_v47 = vcombine.high %v3663_v37, %v3695_v52  ;;  %v3640_v46 = vcombine.high %v17479_v45, %v17478_v62  ;;  %v3742_v34 = vcombine.high %v17483_v59, %v17388_v2 }
 0x469   : > { %v4748_v29 = vpop.permute.xlu1 %4747  ;;  %5275 = vst.msk [vmem:[%s12869_s29 + $0xbf] sm:$0xfe] %vm5237_vm4, %v4734_v48  ;;  %v3504_v48 = vcombine.high %v17475_v39, %v12644_v28  ;;  %v3472_v28 = vcombine.high %v17481_v24, %v17480_v5  ;;  %v3608_v39 = vcombine.high %v12661_v8, %v12678_v0  ;;  %v13549_v5 = vrot.slane %v3488_v54, %v11520_v9 }
 0x46a   : > { %5282 = vst.msk [vmem:[%s12869_s29 + $0xe7] sm:$0xff] %vm639_vm5, %v4748_v29  ;;  %4885 = vrot.lane.b32.xlu0 %v3386_v15, %s11434_s13  ;;  %v3585_v8 = vcombine.low %v3534_v40, %v3566_v26  ;;  %v3624_v0 = vcombine.high %v13438_v31, %v17477_v35  ;;  %v3721_v44 = vcombine.low %v3670_v58, %v3702_v23 }
 0x46b   : > { %4883 = vrot.lane.b32.xlu1 %v3250_v49, %s11434_s13  ;;  %v3584_v49 = vcombine.high %v3527_v42, %v3559_v41  ;;  %v13546_v36 = vrot.slane %v3504_v48, %v11520_v9  ;;  %v13562_v56 = vrot.slane %v3472_v28, %v11520_v9  ;;  %v13568_v31 = vrot.slane %v3608_v39, %v11520_v9 }
 0x46c   : > { %v4742_v7 = vpop.permute.xlu0 %4741  ;;  %v13573_v25 = vrot.slane %v3456_v18, %v11520_v9  ;;  %v17484_v62 = vcombine.high %v12344_v30, %v12348_v61  ;;  %v13584_v33 = vrot.slane %v3624_v0, %v11520_v9  ;;  %v13587_v10 = vrot.slane %v3592_v3, %v11520_v9  ;;  %v17489_v0 = vld [vmem:[#allocation78_spill] sm:$0xff] }
 0x46d   : > { %v4752_v50 = vpop.permute.xlu1 %4751  ;;  %5279 = vst.msk [vmem:[%s12869_s29 + $0xd7] sm:$0xff] %vm639_vm5, %v4742_v7  ;;  %v17485_v7 = vld [vmem:[#allocation28_spill] sm:$0xff]  ;;  %v13598_v30 = vrot.slane %v3640_v46, %v11520_v9  ;;  %v3568_v48 = vcombine.high %v13549_v5, %v13546_v36  ;;  %v13645_v16 = vsel %vm1452_vm1, %v12736_v17, %v12689_v63  ;;  %v13662_v17 = vld [vmem:[#allocation5 + $0x90] sm:$0xff] }
 0x46e   : > { %5284 = vst.msk [vmem:[%s12869_s29 + $0xef] sm:$0xfe] %vm5237_vm4, %v4752_v50  ;;  %4889 = vrot.lane.b32.xlu0 %v3251_v55, %s11434_s13  ;;  %v3567_v50 = vcombine.low %v13549_v5, %v13546_v36  ;;  %v3772_v45 = vrot.slane %v17484_v62, %v11537_v20  ;;  %v3727_v55 = vcombine.high %v17485_v7, %v17388_v2 }
 0x46f   : > { %4891 = vrot.lane.b32.xlu1 %v3387_v12, %s11434_s13  ;;  %v3535_v53 = vcombine.low %v13573_v25, %v13562_v56  ;;  %v3671_v61 = vcombine.low %v13587_v10, %v13568_v31  ;;  %v3582_v39 = vrot.slane %v3568_v48, %v11537_v20  ;;  %v3704_v63 = vcombine.high %v13584_v33, %v13598_v30 }
 0x470   : > { %v4746_v14 = vpop.permute.xlu0 %4745  ;;  %v3575_v37 = vrot.slane %v3567_v50, %v11537_v20  ;;  %v13614_v52 = vrot.slane %v3727_v55, %v11520_v9 }
 0x471   : > { %v4792_v1 = vpop.permute.xlu1 %4791  ;;  %5281 = vst.msk [vmem:[%s12869_s29 + $0xdf] sm:$0xfe] %vm5237_vm4, %v4746_v14  ;;  %v3722_v14 = vcombine.high %v3670_v58, %v3702_v23  ;;  %v3543_v42 = vrot.slane %v3535_v53, %v11537_v20  ;;  %v3679_v22 = vrot.slane %v3671_v61, %v11537_v20  ;;  %v17487_v58 = vld [vmem:[#allocation92_spill] sm:$0xff]  ;;  %v3718_v55 = vrot.slane %v3704_v63, %v11537_v20  ;;  %v17495_v53 = vld [vmem:[#allocation90_spill] sm:$0xff] }
 0x472   : > { %5304 = vst.msk [vmem:[%s12869_s29 + $0x15f] sm:$0x1] %vm5240_vm3, %v4792_v1  ;;  %4897 = vrot.lane.b32.xlu0 %v3388_v27, %s11434_s13  ;;  %v3586_v1 = vcombine.high %v3534_v40, %v3566_v26  ;;  %v3703_v27 = vcombine.low %v13584_v33, %v13598_v30  ;;  %v17490_v23 = vld [vmem:[#allocation76_spill] sm:$0xff]  ;;  %v17493_v33 = vld [vmem:[#allocation54_spill] sm:$0xff] }
 0x473   : > { %4895 = vrot.lane.b32.xlu1 %v3252_v60, %s11434_s13  ;;  %v13603_v60 = vrot.slane %v3742_v34, %v11520_v9  ;;  %v3587_v11 = vcombine.low %v3543_v42, %v3575_v37  ;;  %v3588_v40 = vcombine.high %v3543_v42, %v3575_v37  ;;  %v3809_v3 = vcombine.low %v17490_v23, %v17489_v0  ;;  %v17496_v30 = vld [vmem:[#allocation86_spill] sm:$0xff]  ;;  %v17497_v37 = vld [vmem:[#allocation88_spill] sm:$0xff] }
 0x474   : > { %v4754_v43 = vpop.permute.xlu0 %4753  ;;  %v3711_v13 = vrot.slane %v3703_v27, %v11537_v20  ;;  %v3945_v61 = vcombine.low %v17496_v30, %v17495_v53 }
 0x475   : > { %v4804_v19 = vpop.permute.xlu1 %4803  ;;  %5285 = vst.msk [vmem:[%s12869_s29 + $0xf7] sm:$0xff] %vm639_vm5, %v4754_v43  ;;  %v3773_v43 = vcombine.low %v13614_v52, %v13603_v60  ;;  %v3774_v50 = vcombine.high %v13614_v52, %v13603_v60 }
 0x476   : > { %5310 = vst.msk [vmem:[%s12869_s29 + $0x17f] sm:$0x1] %vm5240_vm3, %v4804_v19  ;;  %4901 = vrot.lane.b32.xlu0 %v3583_v4, %s11434_s13  ;;  %v3724_v5 = vcombine.high %v3679_v22, %v3711_v13 }
 0x477   : > { %4903 = vrot.lane.b32.xlu1 %v3719_v6, %s11434_s13  ;;  %v3790_v6 = vcombine.high %v3772_v45, %v17388_v2  ;;  %v3781_v26 = vrot.slane %v3773_v43, %v11537_v20 }
 0x478   : > { %v4858_v15 = vpop.permute.xlu0 %4857 }
 0x479   : > { %v4864_v29 = vpop.permute.xlu1 %4863  ;;  %5337 = vst.msk [vmem:[%s12869_s29 + $0x20f] sm:$0x1] %vm5240_vm3, %v4858_v15  ;;  %v3536_v15 = vcombine.high %v13573_v25, %v13562_v56  ;;  %v17491_v56 = vld [vmem:[#allocation79_spill] sm:$0xff]  ;;  %v3791_v34 = vcombine.high %v3781_v26, %v17388_v2 }
 0x47a   : > { %5340 = vst.msk [vmem:[%s12869_s29 + $0x21f] sm:$0x1] %vm5240_vm3, %v4864_v29  ;;  %4909 = vrot.lane.b32.xlu0 %v3720_v47, %s11434_s13  ;;  %v3672_v47 = vcombine.high %v13587_v10, %v13568_v31  ;;  %v3825_v46 = vcombine.low %v17491_v56, %v13645_v16  ;;  %v17494_v10 = vld [vmem:[#allocation50_spill] sm:$0xff] }
 0x47b   : > { %4907 = vrot.lane.b32.xlu1 %v3584_v49, %s11434_s13  ;;  %v3723_v49 = vcombine.low %v3679_v22, %v3711_v13  ;;  %v3550_v31 = vrot.slane %v3536_v15, %v11537_v20  ;;  %v3977_v7 = vcombine.low %v17494_v10, %v17493_v33  ;;  %v3788_v22 = vrot.slane %v3774_v50, %v11537_v20  ;;  %v17500_v15 = vld [vmem:[#allocation58_spill] sm:$0xff] }
 0x47c   : > { %v4870_v24 = vpop.permute.xlu0 %4869  ;;  %v3686_v25 = vrot.slane %v3672_v47, %v11537_v20  ;;  %v3833_v60 = vrot.slane %v3825_v46, %v11520_v9  ;;  %v13728_v47 = vrot.slane %v17500_v15, %v11520_v9 }
 0x47d   : > { %v4876_v32 = vpop.permute.xlu1 %4875  ;;  %5343 = vst.msk [vmem:[%s12869_s29 + $0x22f] sm:$0x1] %vm5240_vm3, %v4870_v24  ;;  %v17488_v24 = vld [vmem:[#allocation77_spill] sm:$0xff]  ;;  %v3985_v43 = vrot.slane %v3977_v7, %v11520_v9  ;;  %v3590_v48 = vcombine.high %v3550_v31, %v3582_v39 }
 0x47e   : > { %5346 = vst.msk [vmem:[%s12869_s29 + $0x23f] sm:$0x1] %vm5240_vm3, %v4876_v32  ;;  %4913 = vrot.lane.b32.xlu0 %v3585_v8, %s11434_s13  ;;  %v3841_v32 = vcombine.low %v12717_v57, %v12756_v38  ;;  %v3793_v8 = vcombine.low %v13662_v17, %v17488_v24  ;;  %v3725_v42 = vcombine.low %v3686_v25, %v3718_v55 }
 0x47f   : > { %4911 = vrot.lane.b32.xlu1 %v3789_v21, %s11434_s13  ;;  %v17486_v21 = vld [vmem:[#allocation67_spill] sm:$0xff] }
 0x480   : > { %v4882_v12 = vpop.permute.xlu0 %4881  ;;  %v13653_v18 = vsel %vm639_vm5, %v17487_v58, %v17486_v21 }
 0x481   : > { %v4760_v35 = vpop.permute.xlu1 %4759  ;;  %5349 = vst.msk [vmem:[%s12869_s29 + $0x24f] sm:$0x1] %vm5240_vm3, %v4882_v12  ;;  %v13679_v12 = vrot.slane %v3841_v32, %v11520_v9 }
 0x482   : > { %5288 = vst.msk [vmem:[%s12869_s29 + $0x107] sm:$0xff] %vm639_vm5, %v4760_v35  ;;  %4917 = vrot.lane.b32.xlu0 %v3772_v45, %s11434_s13  ;;  %v17492_v35 = vld [vmem:[#allocation52_spill] sm:$0xff]  ;;  %v3589_v45 = vcombine.low %v3550_v31, %v3582_v39 }
 0x483   : > { %4915 = vrot.lane.b32.xlu1 %v3721_v44, %s11434_s13  ;;  %v3961_v44 = vcombine.low %v13653_v18, %v17492_v35 }
 0x484   : > { %v4894_v41 = vpop.permute.xlu0 %4893 }
 0x485   : > { %v4764_v51 = vpop.permute.xlu1 %4763  ;;  %5355 = vst.msk [vmem:[%s12869_s29 + $0x26f] sm:$0x1] %vm5240_vm3, %v4894_v41  ;;  %v17498_v41 = vld [vmem:[#allocation84_spill] sm:$0xff]  ;;  %v13702_v27 = vrot.slane %v3961_v44, %v11520_v9 }
 0x486   : > { %5290 = vst.msk [vmem:[%s12869_s29 + $0x10f] sm:$0xfe] %vm5237_vm4, %v4764_v51  ;;  %4921 = vrot.lane.b32.xlu0 %v3722_v14, %s11434_s13  ;;  %v13692_v51 = vrot.slane %v3793_v8, %v11520_v9  ;;  %v3929_v14 = vcombine.low %v17498_v41, %v17497_v37 }
 0x487   : > { %4919 = vrot.lane.b32.xlu1 %v3586_v1, %s11434_s13  ;;  %v13695_v1 = vrot.slane %v3809_v3, %v11520_v9 }
 0x488   : > { %v4758_v4 = vpop.permute.xlu0 %4757  ;;  %v13719_v13 = vrot.slane %v3929_v14, %v11520_v9 }
 0x489   : > { %v4772_v19 = vpop.permute.xlu1 %4771  ;;  %5287 = vst.msk [vmem:[%s12869_s29 + $0xff] sm:$0xfe] %vm5237_vm4, %v4758_v4  ;;  %v13710_v4 = vrot.slane %v3945_v61, %v11520_v9  ;;  %v3858_v50 = vcombine.high %v13692_v51, %v13695_v1 }
 0x48a   : > { %5294 = vst.msk [vmem:[%s12869_s29 + $0x127] sm:$0xff] %vm639_vm5, %v4772_v19  ;;  %4925 = vrot.lane.b32.xlu0 %v3587_v11, %s11434_s13  ;;  %v3889_v19 = vcombine.low %v3833_v60, %v13679_v12  ;;  %v3857_v11 = vcombine.low %v13692_v51, %v13695_v1  ;;  %v3794_v51 = vcombine.high %v13662_v17, %v17488_v24 }
 0x48b   : > { %4923 = vrot.lane.b32.xlu1 %v3790_v6, %s11434_s13  ;;  %v3993_v21 = vcombine.low %v13719_v13, %v13710_v4  ;;  %v3994_v14 = vcombine.high %v13719_v13, %v13710_v4  ;;  %v3872_v1 = vrot.slane %v3858_v50, %v11537_v20  ;;  %v4080_v4 = vcombine.high %v17500_v15, %v17388_v2 }
 0x48c   : > { %v4766_v54 = vpop.permute.xlu0 %4765  ;;  %v3897_v32 = vrot.slane %v3889_v19, %v11537_v20  ;;  %v3865_v39 = vrot.slane %v3857_v11, %v11537_v20 }
 0x48d   : > { %v4776_v29 = vpop.permute.xlu1 %4775  ;;  %5291 = vst.msk [vmem:[%s12869_s29 + $0x117] sm:$0xff] %vm639_vm5, %v4766_v54  ;;  %v17499_v54 = vld [vmem:[#allocation56_spill] sm:$0xff]  ;;  %v4001_v46 = vrot.slane %v3993_v21, %v11537_v20 }
 0x48e   : > { %5296 = vst.msk [vmem:[%s12869_s29 + $0x12f] sm:$0xfe] %vm5237_vm4, %v4776_v29  ;;  %4929 = vrot.lane.b32.xlu0 %v3781_v26, %s11434_s13  ;;  %v4025_v29 = vcombine.low %v13702_v27, %v3985_v43  ;;  %v13724_v26 = vrot.slane %v17499_v54, %v11520_v9  ;;  %v3921_v3 = vcombine.low %v3865_v39, %v3897_v32 }
 0x48f   : > { %4927 = vrot.lane.b32.xlu1 %v3723_v49, %s11434_s13  ;;  %v3922_v7 = vcombine.high %v3865_v39, %v3897_v32 }
 0x490   : > { %v4770_v36 = vpop.permute.xlu0 %4769  ;;  %v4033_v58 = vrot.slane %v4025_v29, %v11537_v20  ;;  %v4095_v63 = vcombine.low %v13724_v26, %v13728_v47  ;;  %v4096_v17 = vcombine.high %v13724_v26, %v13728_v47 }
 0x491   : > { %v4784_v28 = vpop.permute.xlu1 %4783  ;;  %5293 = vst.msk [vmem:[%s12869_s29 + $0x11f] sm:$0xfe] %vm5237_vm4, %v4770_v36 }
 0x492   : > { %5300 = vst.msk [vmem:[%s12869_s29 + $0x147] sm:$0xff] %vm639_vm5, %v4784_v28  ;;  %4933 = vrot.lane.b32.xlu0 %v3724_v5, %s11434_s13  ;;  %v3792_v5 = vcombine.high %v3788_v22, %v17388_v2  ;;  %v4057_v44 = vcombine.low %v4001_v46, %v4033_v58  ;;  %v4058_v61 = vcombine.high %v4001_v46, %v4033_v58 }
 0x493   : > { %4931 = vrot.lane.b32.xlu1 %v3588_v40, %s11434_s13  ;;  %v3726_v40 = vcombine.high %v3686_v25, %v3718_v55  ;;  %v4103_v25 = vrot.slane %v4095_v63, %v11537_v20 }
 0x494   : > { %v4778_v62 = vpop.permute.xlu0 %4777 }
 0x495   : > { %v4788_v59 = vpop.permute.xlu1 %4787  ;;  %5297 = vst.msk [vmem:[%s12869_s29 + $0x137] sm:$0xff] %vm639_vm5, %v4778_v62  ;;  %v4026_v62 = vcombine.high %v13702_v27, %v3985_v43  ;;  %v3962_v27 = vcombine.high %v13653_v18, %v17492_v35  ;;  %v4127_v19 = vcombine.high %v4103_v25, %v17388_v2  ;;  %v3946_v18 = vcombine.high %v17496_v30, %v17495_v53 }
 0x496   : > { %5302 = vst.msk [vmem:[%s12869_s29 + $0x14f] sm:$0xfe] %vm5237_vm4, %v4788_v59  ;;  %4937 = vrot.lane.b32.xlu0 %v3589_v45, %s11434_s13  ;;  %v3890_v59 = vcombine.high %v3833_v60, %v13679_v12  ;;  %v3842_v12 = vcombine.high %v12717_v57, %v12756_v38  ;;  %v3810_v57 = vcombine.high %v17490_v23, %v17489_v0 }
 0x497   : > { %4935 = vrot.lane.b32.xlu1 %v3791_v34, %s11434_s13  ;;  %v3826_v38 = vcombine.high %v17491_v56, %v13645_v16  ;;  %v3978_v23 = vcombine.high %v17494_v10, %v17493_v33  ;;  %v4008_v56 = vrot.slane %v3994_v14, %v11537_v20  ;;  %v13800_v35 = vrot.slane %v3794_v51, %v11520_v9  ;;  %v17503_v14 = vld [vmem:[#allocation83_spill] sm:$0xff] }
 0x498   : > { %v4782_v6 = vpop.permute.xlu0 %4781  ;;  %v3904_v60 = vrot.slane %v3890_v59, %v11537_v20  ;;  %v13787_v24 = vrot.slane %v3842_v12, %v11520_v9  ;;  %v3930_v33 = vcombine.high %v17498_v41, %v17497_v37  ;;  %v13812_v10 = vrot.slane %v3962_v27, %v11520_v9 }
 0x499   : > { %v4796_v52 = vpop.permute.xlu1 %4795  ;;  %5299 = vst.msk [vmem:[%s12869_s29 + $0x13f] sm:$0xfe] %vm5237_vm4, %v4782_v6  ;;  %v13803_v6 = vrot.slane %v3810_v57, %v11520_v9  ;;  %v4065_v43 = vcombine.high %v17499_v54, %v17388_v2  ;;  %v4110_v37 = vrot.slane %v4096_v17, %v11537_v20  ;;  %v3992_v41 = vrot.slane %v3978_v23, %v11520_v9  ;;  %v17506_v17 = vld [vmem:[#allocation89_spill] sm:$0xff]  ;;  %v17509_v23 = vld [vmem:[#allocation96_spill] sm:$0xff] }
 0x49a   : > { %5306 = vst.msk [vmem:[%s12869_s29 + $0x167] sm:$0xff] %vm639_vm5, %v4796_v52  ;;  %4941 = vrot.lane.b32.xlu0 %v3788_v22, %s11434_s13  ;;  %v4040_v52 = vrot.slane %v4026_v62, %v11537_v20  ;;  %v3923_v0 = vcombine.low %v3872_v1, %v3904_v60  ;;  %v13806_v22 = vrot.slane %v3826_v38, %v11520_v9  ;;  %v17501_v62 = vld [vmem:[#allocation87_spill] sm:$0xff] }
 0x49b   : > { %4939 = vrot.lane.b32.xlu1 %v3725_v42, %s11434_s13  ;;  %v13825_v29 = vrot.slane %v3946_v18, %v11520_v9  ;;  %v4041_v54 = vcombine.low %v13812_v10, %v3992_v41  ;;  %v3924_v15 = vcombine.high %v3872_v1, %v3904_v60  ;;  %v13838_v47 = vrot.slane %v4065_v43, %v11520_v9  ;;  %v13908_v43 = vld [vmem:[#allocation5 + $0xa8] sm:$0xff] }
 0x49c   : > { %v4790_v28 = vpop.permute.xlu0 %4789  ;;  %v4059_v30 = vcombine.low %v4008_v56, %v4040_v52  ;;  %v3905_v11 = vcombine.low %v13806_v22, %v13787_v24  ;;  %v4060_v32 = vcombine.high %v4008_v56, %v4040_v52  ;;  %v4128_v63 = vcombine.high %v4110_v37, %v17388_v2  ;;  %v17504_v52 = vld [vmem:[#allocation82_spill] sm:$0xff] }
 0x49d   : > { %v4800_v49 = vpop.permute.xlu1 %4799  ;;  %5303 = vst.msk [vmem:[%s12869_s29 + $0x157] sm:$0xff] %vm639_vm5, %v4790_v28  ;;  %v13841_v28 = vrot.slane %v4080_v4, %v11520_v9  ;;  %v3874_v12 = vcombine.high %v13800_v35, %v13803_v6  ;;  %v17512_v4 = vld [vmem:[#allocation81_spill] sm:$0xff] }
 0x49e   : > { %5308 = vst.msk [vmem:[%s12869_s29 + $0x16f] sm:$0xfe] %vm5237_vm4, %v4800_v49  ;;  %4945 = vrot.lane.b32.xlu0 %v3726_v40, %s11434_s13  ;;  %v3873_v49 = vcombine.low %v13800_v35, %v13803_v6  ;;  %v3913_v21 = vrot.slane %v3905_v11, %v11537_v20  ;;  %v17510_v6 = vld [vmem:[#allocation97_spill] sm:$0xff]  ;;  %v4131_v11 = vcombine.low %v13908_v43, %v17512_v4 }
 0x49f   : > { %4943 = vrot.lane.b32.xlu1 %v3590_v48, %s11434_s13  ;;  %v13834_v48 = vrot.slane %v3930_v33, %v11520_v9  ;;  %v3888_v56 = vrot.slane %v3874_v12, %v11537_v20 }
 0x4a0   : > { %v4794_v8 = vpop.permute.xlu0 %4793  ;;  %v3881_v58 = vrot.slane %v3873_v49, %v11537_v20  ;;  %v17514_v49 = vld [vmem:[#allocation91_spill] sm:$0xff] }
 0x4a1   : > { %v4888_v36 = vpop.permute.xlu1 %4887  ;;  %5305 = vst.msk [vmem:[%s12869_s29 + $0x15f] sm:$0xfe] %vm5237_vm4, %v4794_v8  ;;  %v4009_v39 = vcombine.low %v13834_v48, %v13825_v29  ;;  %v4111_v8 = vcombine.low %v13838_v47, %v13841_v28  ;;  %v4010_v27 = vcombine.high %v13834_v48, %v13825_v29  ;;  %v17513_v29 = vld [vmem:[#allocation95_spill] sm:$0xff] }
 0x4a2   : > { %5352 = vst.msk [vmem:[%s12869_s29 + $0x25f] sm:$0x1] %vm5240_vm3, %v4888_v36  ;;  %4949 = vrot.lane.b32.xlu0 %v3921_v3, %s11434_s13  ;;  %v4049_v36 = vrot.slane %v4041_v54, %v11537_v20  ;;  %v3925_v46 = vcombine.low %v3881_v58, %v3913_v21  ;;  %v3926_v60 = vcombine.high %v3881_v58, %v3913_v21  ;;  %v17515_v54 = vld [vmem:[#allocation59_spill] sm:$0xff] }
 0x4a3   : > { %4947 = vrot.lane.b32.xlu1 %v3792_v5, %s11434_s13  ;;  %v4119_v50 = vrot.slane %v4111_v8, %v11537_v20  ;;  %v4267_v48 = vcombine.low %v17514_v49, %v17513_v29 }
 0x4a4   : > { %v4802_v34 = vpop.permute.xlu0 %4801 }
 0x4a5   : > { %v4900_v31 = vpop.permute.xlu1 %4899  ;;  %5309 = vst.msk [vmem:[%s12869_s29 + $0x177] sm:$0xff] %vm639_vm5, %v4802_v34  ;;  %v3906_v34 = vcombine.high %v13806_v22, %v13787_v24  ;;  %v17507_v24 = vld [vmem:[#allocation85_spill] sm:$0xff] }
 0x4a6   : > { %5358 = vst.msk [vmem:[%s12869_s29 + $0x27f] sm:$0x1] %vm5240_vm3, %v4900_v31  ;;  %4953 = vrot.lane.b32.xlu0 %v4103_v25, %s11434_s13  ;;  %v4017_v31 = vrot.slane %v4009_v39, %v11537_v20  ;;  %v17511_v22 = vld [vmem:[#allocation93_spill] sm:$0xff] }
 0x4a7   : > { %4951 = vrot.lane.b32.xlu1 %v4057_v44, %s11434_s13  ;;  %v3920_v1 = vrot.slane %v3906_v34, %v11537_v20  ;;  %v4283_v33 = vcombine.low %v17511_v22, %v17510_v6 }
 0x4a8   : > { %v4806_v55 = vpop.permute.xlu0 %4805  ;;  %v4061_v59 = vcombine.low %v4017_v31, %v4049_v36  ;;  %v4062_v38 = vcombine.high %v4017_v31, %v4049_v36 }
 0x4a9   : > { %v4808_v45 = vpop.permute.xlu1 %4807  ;;  %5311 = vst.msk [vmem:[%s12869_s29 + $0x17f] sm:$0xfe] %vm5237_vm4, %v4806_v55  ;;  %v4042_v55 = vcombine.high %v13812_v10, %v3992_v41  ;;  %v3927_v41 = vcombine.low %v3888_v56, %v3920_v1  ;;  %v13933_v39 = vrot.slane %v4283_v33, %v11520_v9 }
 0x4aa   : > { %5312 = vst.msk [vmem:[%s12869_s29 + $0x187] sm:$0xff] %vm639_vm5, %v4808_v45  ;;  %4957 = vrot.lane.b32.xlu0 %v4058_v61, %s11434_s13  ;;  %v17502_v45 = vld [vmem:[#allocation94_spill] sm:$0xff] }
 0x4ab   : > { %4955 = vrot.lane.b32.xlu1 %v3922_v7, %s11434_s13  ;;  %v13872_v7 = vsel %vm1452_vm1, %v17502_v45, %v17501_v62  ;;  %v4056_v35 = vrot.slane %v4042_v55, %v11537_v20  ;;  %v17518_v62 = vld [vmem:[#allocation65_spill] sm:$0xff] }
 0x4ac   : > { %v4814_v16 = vpop.permute.xlu0 %4813  ;;  %v4163_v51 = vcombine.low %v17503_v14, %v13872_v7  ;;  %v13955_v45 = vrot.slane %v17518_v62, %v11520_v9 }
 0x4ad   : > { %v4812_v42 = vpop.permute.xlu1 %4811  ;;  %5315 = vst.msk [vmem:[%s12869_s29 + $0x197] sm:$0xff] %vm639_vm5, %v4814_v16  ;;  %v4179_v16 = vcombine.low %v17507_v24, %v17506_v17 }
 0x4ae   : > { %5314 = vst.msk [vmem:[%s12869_s29 + $0x18f] sm:$0xfe] %vm5237_vm4, %v4812_v42  ;;  %4961 = vrot.lane.b32.xlu0 %v3923_v0, %s11434_s13  ;;  %v17505_v42 = vld [vmem:[#allocation80_spill] sm:$0xff]  ;;  %v17508_v0 = vld [vmem:[#allocation55_spill] sm:$0xff] }
 0x4af   : > { %4959 = vrot.lane.b32.xlu1 %v4127_v19, %s11434_s13  ;;  %v4147_v19 = vcombine.low %v17505_v42, %v17504_v52  ;;  %v13898_v18 = vsel %vm639_vm5, %v17509_v23, %v17508_v0 }
 0x4b0   : > { %v4818_v13 = vpop.permute.xlu0 %4817 }
 0x4b1   : > { %v4820_v53 = vpop.permute.xlu1 %4819  ;;  %5317 = vst.msk [vmem:[%s12869_s29 + $0x19f] sm:$0xfe] %vm5237_vm4, %v4818_v13  ;;  %v13913_v13 = vrot.slane %v4163_v51, %v11520_v9  ;;  %v17519_v51 = vld [vmem:[#allocation63_spill] sm:$0xff] }
 0x4b2   : > { %5318 = vst.msk [vmem:[%s12869_s29 + $0x1a7] sm:$0xff] %vm639_vm5, %v4820_v53  ;;  %4965 = vrot.lane.b32.xlu0 %v4110_v37, %s11434_s13  ;;  %v4129_v53 = vcombine.high %v4119_v50, %v17388_v2 }
 0x4b3   : > { %4963 = vrot.lane.b32.xlu1 %v4059_v30, %s11434_s13  ;;  %v4112_v30 = vcombine.high %v13838_v47, %v13841_v28  ;;  %v13926_v47 = vrot.slane %v4147_v19, %v11520_v9  ;;  %v4187_v28 = vrot.slane %v4179_v16, %v11520_v9 }
 0x4b4   : > { %v4826_v40 = vpop.permute.xlu0 %4825 }
 0x4b5   : > { %v4824_v26 = vpop.permute.xlu1 %4823  ;;  %5321 = vst.msk [vmem:[%s12869_s29 + $0x1b7] sm:$0xff] %vm639_vm5, %v4826_v40  ;;  %v17516_v40 = vld [vmem:[#allocation61_spill] sm:$0xff] }
 0x4b6   : > { %5320 = vst.msk [vmem:[%s12869_s29 + $0x1af] sm:$0xfe] %vm5237_vm4, %v4824_v26  ;;  %4969 = vrot.lane.b32.xlu0 %v4060_v32, %s11434_s13  ;;  %v4299_v26 = vcombine.low %v13898_v18, %v17515_v54  ;;  %v17517_v32 = vld [vmem:[#allocation57_spill] sm:$0xff] }
 0x4b7   : > { %4967 = vrot.lane.b32.xlu1 %v3924_v15, %s11434_s13  ;;  %v4024_v15 = vrot.slane %v4010_v27, %v11537_v20  ;;  %v4315_v21 = vcombine.low %v17517_v32, %v17516_v40 }
 0x4b8   : > { %v4830_v3 = vpop.permute.xlu0 %4829  ;;  %v13942_v31 = vrot.slane %v4299_v26, %v11520_v9 }
 0x4b9   : > { %v4832_v5 = vpop.permute.xlu1 %4831  ;;  %5323 = vst.msk [vmem:[%s12869_s29 + $0x1bf] sm:$0xfe] %vm5237_vm4, %v4830_v3  ;;  %v4063_v36 = vcombine.low %v4024_v15, %v4056_v35  ;;  %v4126_v3 = vrot.slane %v4112_v30, %v11537_v20 }
 0x4ba   : > { %5324 = vst.msk [vmem:[%s12869_s29 + $0x1c7] sm:$0xff] %vm639_vm5, %v4832_v5  ;;  %4973 = vrot.lane.b32.xlu0 %v3925_v46, %s11434_s13  ;;  %v4139_v5 = vrot.slane %v4131_v11, %v11520_v9  ;;  %v4275_v46 = vrot.slane %v4267_v48, %v11520_v9 }
 0x4bb   : > { %4971 = vrot.lane.b32.xlu1 %v4128_v63, %s11434_s13  ;;  %v4227_v63 = vcombine.low %v13913_v13, %v4187_v28  ;;  %v4130_v27 = vcombine.high %v4126_v3, %v17388_v2 }
 0x4bc   : > { %v4838_v25 = vpop.permute.xlu0 %4837  ;;  %v4331_v34 = vcombine.low %v4275_v46, %v13933_v39  ;;  %v4196_v11 = vcombine.high %v4139_v5, %v13926_v47 }
 0x4bd   : > { %v4836_v44 = vpop.permute.xlu1 %4835  ;;  %5327 = vst.msk [vmem:[%s12869_s29 + $0x1d7] sm:$0xff] %vm639_vm5, %v4838_v25  ;;  %v4235_v12 = vrot.slane %v4227_v63, %v11537_v20 }
 0x4be   : > { %5326 = vst.msk [vmem:[%s12869_s29 + $0x1cf] sm:$0xfe] %vm5237_vm4, %v4836_v44  ;;  %4977 = vrot.lane.b32.xlu0 %v4119_v50, %s11434_s13  ;;  %v4195_v44 = vcombine.low %v4139_v5, %v13926_v47  ;;  %v3928_v50 = vcombine.high %v3888_v56, %v3920_v1  ;;  %v4339_v19 = vrot.slane %v4331_v34, %v11537_v20 }
 0x4bf   : > { %4975 = vrot.lane.b32.xlu1 %v4061_v59, %s11434_s13  ;;  %v13950_v59 = vrot.slane %v4315_v21, %v11520_v9  ;;  %v4148_v47 = vcombine.high %v17505_v42, %v17504_v52  ;;  %v4132_v52 = vcombine.high %v13908_v43, %v17512_v4  ;;  %v4403_v34 = vcombine.high %v17519_v51, %v17388_v2 }
 0x4c0   : > { %v4842_v57 = vpop.permute.xlu0 %4841 }
 0x4c1   : > { %v4844_v61 = vpop.permute.xlu1 %4843  ;;  %5329 = vst.msk [vmem:[%s12869_s29 + $0x1df] sm:$0xfe] %vm5237_vm4, %v4842_v57  ;;  %v13967_v57 = vrot.slane %v17519_v51, %v11520_v9  ;;  %v4364_v21 = vcombine.high %v13942_v31, %v13950_v59  ;;  %v14030_v43 = vrot.slane %v4148_v47, %v11520_v9 }
 0x4c2   : > { %5330 = vst.msk [vmem:[%s12869_s29 + $0x1e7] sm:$0xff] %vm639_vm5, %v4844_v61  ;;  %4981 = vrot.lane.b32.xlu0 %v4062_v38, %s11434_s13  ;;  %v4064_v61 = vcombine.high %v4024_v15, %v4056_v35  ;;  %v4203_v38 = vrot.slane %v4195_v44, %v11537_v20 }
 0x4c3   : > { %4979 = vrot.lane.b32.xlu1 %v3926_v60, %s11434_s13  ;;  %v4363_v60 = vcombine.low %v13942_v31, %v13950_v59  ;;  %v4433_v16 = vcombine.low %v13967_v57, %v13955_v45  ;;  %v4434_v63 = vcombine.high %v13967_v57, %v13955_v45 }
 0x4c4   : > { %v4850_v37 = vpop.permute.xlu0 %4849  ;;  %v4259_v23 = vcombine.low %v4203_v38, %v4235_v12  ;;  %v4260_v48 = vcombine.high %v4203_v38, %v4235_v12  ;;  %v4417_v38 = vrot.slane %v4403_v34, %v11520_v9  ;;  %v5832_v34 = vld [vmem:[#allocation5 + $0x88] sm:$0xff] }
 0x4c5   : > { %v4848_v10 = vpop.permute.xlu1 %4847  ;;  %5333 = vst.msk [vmem:[%s12869_s29 + $0x1f7] sm:$0xff] %vm639_vm5, %v4850_v37  ;;  %v4371_v56 = vrot.slane %v4363_v60, %v11537_v20  ;;  %v4441_v30 = vrot.slane %v4433_v16, %v11537_v20  ;;  %v4332_v37 = vcombine.high %v4275_v46, %v13933_v39  ;;  %v4284_v39 = vcombine.high %v17511_v22, %v17510_v6 }
 0x4c6   : > { %5332 = vst.msk [vmem:[%s12869_s29 + $0x1ef] sm:$0xfe] %vm5237_vm4, %v4848_v10  ;;  %4985 = vrot.lane.b32.xlu0 %v3927_v41, %s11434_s13  ;;  %v4228_v10 = vcombine.high %v13913_v13, %v4187_v28  ;;  %v4164_v13 = vcombine.high %v17503_v14, %v13872_v7  ;;  %v4180_v7 = vcombine.high %v17507_v24, %v17506_v17 }
 0x4c7   : > { %4983 = vrot.lane.b32.xlu1 %v4129_v53, %s11434_s13  ;;  %v4395_v33 = vcombine.low %v4339_v19, %v4371_v56  ;;  %v4396_v28 = vcombine.high %v4339_v19, %v4371_v56  ;;  %v4210_v14 = vrot.slane %v4196_v11, %v11537_v20  ;;  %v4346_v5 = vrot.slane %v4332_v37, %v11537_v20 }
 0x4c8   : > { %v4854_v8 = vpop.permute.xlu0 %4853  ;;  %v4242_v26 = vrot.slane %v4228_v10, %v11537_v20  ;;  %v14017_v42 = vrot.slane %v4164_v13, %v11520_v9  ;;  %v4268_v6 = vcombine.high %v17514_v49, %v17513_v29  ;;  %v4300_v22 = vcombine.high %v13898_v18, %v17515_v54 }
 0x4c9   : > { %v4856_v58 = vpop.permute.xlu1 %4855  ;;  %5335 = vst.msk [vmem:[%s12869_s29 + $0x1ff] sm:$0xfe] %vm5237_vm4, %v4854_v8  ;;  %v4378_v8 = vrot.slane %v4364_v21, %v11537_v20  ;;  %v4194_v4 = vrot.slane %v4180_v7, %v11520_v9  ;;  %v4316_v29 = vcombine.high %v17517_v32, %v17516_v40  ;;  %v14037_v49 = vrot.slane %v4284_v39, %v11520_v9 }
 0x4ca   : > { %5336 = vst.msk [vmem:[%s12869_s29 + $0x207] sm:$0xff] %vm639_vm5, %v4856_v58  ;;  %4989 = vrot.lane.b32.xlu0 %v4126_v3, %s11434_s13  ;;  %v4261_v24 = vcombine.low %v4210_v14, %v4242_v26  ;;  %v4418_v3 = vcombine.high %v17518_v62, %v17388_v2  ;;  %v4146_v46 = vrot.slane %v4132_v52, %v11520_v9 }
 0x4cb   : > { %4987 = vrot.lane.b32.xlu1 %v4063_v36, %s11434_s13  ;;  %v4465_v36 = vcombine.high %v4441_v30, %v17388_v2  ;;  %v4397_v54 = vcombine.low %v4346_v5, %v4378_v8  ;;  %v4243_v31 = vcombine.low %v14017_v42, %v4194_v4  ;;  %v4448_v59 = vrot.slane %v4434_v63, %v11537_v20 }
 0x4cc   : > { %v4862_v55 = vpop.permute.xlu0 %4861  ;;  %v4282_v40 = vrot.slane %v4268_v6, %v11520_v9  ;;  %v4314_v32 = vrot.slane %v4300_v22, %v11520_v9  ;;  %v4262_v12 = vcombine.high %v4210_v14, %v4242_v26  ;;  %v4398_v57 = vcombine.high %v4346_v5, %v4378_v8  ;;  %v5817_v22 = vld [vmem:[#allocation5 + $0x10] sm:$0xff]  ;;  %v5820_v8 = vld [vmem:[#allocation5 + $0x28] sm:$0xff] }
 0x4cd   : > { %v4860_v25 = vpop.permute.xlu1 %4859  ;;  %5339 = vst.msk [vmem:[%s12869_s29 + $0x217] sm:$0xff] %vm639_vm5, %v4862_v55  ;;  %v4432_v55 = vrot.slane %v4418_v3, %v11520_v9  ;;  %v4466_v19 = vcombine.high %v4448_v59, %v17388_v2  ;;  %v4212_v37 = vcombine.high %v4146_v46, %v14030_v43  ;;  %v11451_v6 = vmov 0.0|0.0   ;;  %v5826_v3 = vld [vmem:[#allocation5 + $0x58] sm:$0xff] }
 0x4ce   : > { %5338 = vst.msk [vmem:[%s12869_s29 + $0x20f] sm:$0xfe] %vm5237_vm4, %v4860_v25  ;;  %4993 = vrot.lane.b32.xlu0 %v4064_v61, %s11434_s13  ;;  %v4211_v25 = vcombine.low %v4146_v46, %v14030_v43  ;;  %v4347_v62 = vcombine.low %v4282_v40, %v14037_v49  ;;  %v4251_v61 = vrot.slane %v4243_v31, %v11537_v20 }
 0x4cf   : > { %4991 = vrot.lane.b32.xlu1 %v3928_v50, %s11434_s13  ;;  %v4330_v50 = vrot.slane %v4316_v29, %v11520_v9  ;;  %v4226_v47 = vrot.slane %v4212_v37, %v11537_v20  ;;  %11097 = vmatprep.subr.bf16.mxu1 %v11451_v6  ;;  %v11098_v43 = vpack.c.bf16 %v5820_v8, %v5817_v22  ;;  %v14243_v22 = vld [vmem:[#allocation4 + $0x98] sm:$0xff] }
 0x4d0   : > { %v4866_v0 = vpop.permute.xlu0 %4865  ;;  %v4355_v16 = vrot.slane %v4347_v62, %v11537_v20  ;;  %v14133_v62 = vld [vmem:[#allocation4 + $0x8] sm:$0xff] }
 0x4d1   : > { %v4868_v1 = vpop.permute.xlu1 %4867  ;;  %5341 = vst.msk [vmem:[%s12869_s29 + $0x21f] sm:$0xfe] %vm5237_vm4, %v4866_v0  ;;  %v4379_v51 = vcombine.low %v4314_v32, %v4330_v50  ;;  %v4449_v0 = vcombine.low %v4417_v38, %v4432_v55  ;;  %v4380_v21 = vcombine.high %v4314_v32, %v4330_v50  ;;  %11099 = vmatpush1.bf16.msra.mxu1 %v11098_v43  ;;  %v5829_v32 = vld [vmem:[#allocation5 + $0x70] sm:$0xff]  ;;  %v14249_v43 = vld [vmem:[#allocation4 + $0xa8] sm:$0xff] }
 0x4d2   : > { %5342 = vst.msk [vmem:[%s12869_s29 + $0x227] sm:$0xff] %vm639_vm5, %v4868_v1  ;;  %4997 = vrot.lane.b32.xlu0 %v4259_v23, %s11434_s13  ;;  %v4219_v1 = vrot.slane %v4211_v25, %v11537_v20  ;;  %11100 = vmatprep.subr.bf16.mxu1 %v11451_v6  ;;  %v11104_v25 = vpack.c.bf16 %v5832_v34, %v5829_v32  ;;  %v14129_v50 = vld [vmem:[#allocation4 + $0x10] sm:$0xff] }
 0x4d3   : > { %4995 = vrot.lane.b32.xlu1 %v4130_v27, %s11434_s13  ;;  %v4457_v11 = vrot.slane %v4449_v0, %v11537_v20  ;;  %v4394_v63 = vrot.slane %v4380_v21, %v11537_v20  ;;  %v14203_v21 = vld [vmem:[#allocation4 + $0x70] sm:$0xff] }
 0x4d4   : > { %v4874_v53 = vpop.permute.xlu0 %4873  ;;  %v4263_v56 = vcombine.low %v4219_v1, %v4251_v61  ;;  %v4264_v13 = vcombine.high %v4219_v1, %v4251_v61  ;;  %v14140_v61 = vld [vmem:[#allocation4 + $0x18] sm:$0xff] }
 0x4d5   : > { %v4872_v35 = vpop.permute.xlu1 %4871  ;;  %5345 = vst.msk [vmem:[%s12869_s29 + $0x237] sm:$0xff] %vm639_vm5, %v4874_v53  ;;  %v4244_v53 = vcombine.high %v14017_v42, %v4194_v4  ;;  %v4467_v14 = vcombine.high %v4457_v11, %v17388_v2 }
 0x4d6   : > { %5344 = vst.msk [vmem:[%s12869_s29 + $0x22f] sm:$0xfe] %vm5237_vm4, %v4872_v35  ;;  %5001 = vrot.lane.b32.xlu0 %v4441_v30, %s11434_s13  ;;  %v4387_v35 = vrot.slane %v4379_v51, %v11537_v20  ;;  %v5833_v51 = vld [vmem:[#allocation5 + $0x90] sm:$0xff] }
 0x4d7   : > { %4999 = vrot.lane.b32.xlu1 %v4395_v33, %s11434_s13  ;;  %v4258_v26 = vrot.slane %v4244_v53, %v11537_v20 }
 0x4d8   : > { %v4878_v15 = vpop.permute.xlu0 %4877  ;;  %v4399_v10 = vcombine.low %v4355_v16, %v4387_v35 }
 0x4d9   : > { %v4880_v41 = vpop.permute.xlu1 %4879  ;;  %5347 = vst.msk [vmem:[%s12869_s29 + $0x23f] sm:$0xfe] %vm5237_vm4, %v4878_v15  ;;  %v4265_v5 = vcombine.low %v4226_v47, %v4258_v26  ;;  %v4266_v29 = vcombine.high %v4226_v47, %v4258_v26  ;;  %v14193_v26 = vld [vmem:[#allocation4 + $0x60] sm:$0xff]  ;;  %v14207_v47 = vld [vmem:[#allocation4 + $0x68] sm:$0xff] }
 0x4da   : > { %5348 = vst.msk [vmem:[%s12869_s29 + $0x247] sm:$0xff] %vm639_vm5, %v4880_v41  ;;  %5005 = vrot.lane.b32.xlu0 %v4396_v28, %s11434_s13  ;;  %v4348_v41 = vcombine.high %v4282_v40, %v14037_v49  ;;  %v4400_v28 = vcombine.high %v4355_v16, %v4387_v35  ;;  %v14153_v16 = vld [vmem:[#allocation4 + $0x28] sm:$0xff] }
 0x4db   : > { %5003 = vrot.lane.b32.xlu1 %v4260_v48, %s11434_s13 }
 0x4dc   : > { %v4886_v17 = vpop.permute.xlu0 %4885  ;;  %v4362_v39 = vrot.slane %v4348_v41, %v11537_v20  ;;  %v14187_v41 = vld [vmem:[#allocation4 + $0x50] sm:$0xff] }
 0x4dd   : > { %v4884_v58 = vpop.permute.xlu1 %4883  ;;  %5351 = vst.msk [vmem:[%s12869_s29 + $0x257] sm:$0xff] %vm639_vm5, %v4886_v17 }
 0x4de   : > { %5350 = vst.msk [vmem:[%s12869_s29 + $0x24f] sm:$0xfe] %vm5237_vm4, %v4884_v58  ;;  %5009 = vrot.lane.b32.xlu0 %v4261_v24, %s11434_s13  ;;  %v4450_v58 = vcombine.high %v4417_v38, %v4432_v55  ;;  %v4401_v42 = vcombine.low %v4362_v39, %v4394_v63  ;;  %v5838_v55 = vld [vmem:[#allocation5 + $0xb8] sm:$0xff]  ;;  %v5836_v38 = vld [vmem:[#allocation5 + $0xa8] sm:$0xff] }
 0x4df   : > { %5007 = vrot.lane.b32.xlu1 %v4465_v36, %s11434_s13 }
 0x4e0   : > { %v4890_v44 = vpop.permute.xlu0 %4889  ;;  %v4464_v24 = vrot.slane %v4450_v58, %v11537_v20 }
 0x4e1   : > { %v4892_v18 = vpop.permute.xlu1 %4891  ;;  %5353 = vst.msk [vmem:[%s12869_s29 + $0x25f] sm:$0xfe] %vm5237_vm4, %v4890_v44 }
 0x4e2   : > { %5354 = vst.msk [vmem:[%s12869_s29 + $0x267] sm:$0xff] %vm639_vm5, %v4892_v18  ;;  %5013 = vrot.lane.b32.xlu0 %v4448_v59, %s11434_s13  ;;  %v4402_v18 = vcombine.high %v4362_v39, %v4394_v63  ;;  %v4468_v44 = vcombine.high %v4464_v24, %v17388_v2  ;;  %v14119_v59 = vld [vmem:[#allocation4] sm:$0xff] }
 0x4e3   : > { %5011 = vrot.lane.b32.xlu1 %v4397_v54, %s11434_s13  ;;  %v5823_v54 = vld [vmem:[#allocation5 + $0x40] sm:$0xff] }
 0x4e4   : > { %v4898_v60 = vpop.permute.xlu0 %4897  ;;  %v11101_v46 = vpack.c.bf16 %v5826_v3, %v5823_v54 }
 0x4e5   : > { %v4896_v45 = vpop.permute.xlu1 %4895  ;;  %5357 = vst.msk [vmem:[%s12869_s29 + $0x277] sm:$0xff] %vm639_vm5, %v4898_v60 }
 0x4e6   : > { %5356 = vst.msk [vmem:[%s12869_s29 + $0x26f] sm:$0xfe] %vm5237_vm4, %v4896_v45  ;;  %5017 = vrot.lane.b32.xlu0 %v4398_v57, %s11434_s13  ;;  %11102 = vmatpush1.bf16.msra.mxu1 %v11101_v46 }
 0x4e7   : > { %5015 = vrot.lane.b32.xlu1 %v4262_v12, %s11434_s13  ;;  %11103 = vmatprep.subr.bf16.mxu1 %v11451_v6  ;;  %v5835_v12 = vld [vmem:[#allocation5 + $0xa0] sm:$0xff] }
 0x4e8   : > { %v4902_v23 = vpop.permute.xlu0 %4901  ;;  %v11107_v60 = vpack.c.bf16 %v5838_v55, %v5835_v12 }
 0x4e9   : > { %v4904_v27 = vpop.permute.xlu1 %4903  ;;  %5359 = vst.msk [vmem:[%s12869_s29 + $0x27f] sm:$0xfe] %vm5237_vm4, %v4902_v23  ;;  %v14157_v23 = vld [vmem:[#allocation4 + $0x30] sm:$0xff] }
 0x4ea   : > { %5360 = vst.msk [vmem:[%s12869_s29 + $0x287] sm:$0xff] %vm639_vm5, %v4904_v27  ;;  %5021 = vrot.lane.b32.xlu0 %v4263_v56, %s11434_s13  ;;  %11105 = vmatpush1.bf16.msra.mxu1 %v11104_v25  ;;  %v11063_v27 = vpack.c.bf16 %v5836_v38, %v5833_v51 }
 0x4eb   : > { %5019 = vrot.lane.b32.xlu1 %v4466_v19, %s11434_s13  ;;  %11106 = vmatprep.subr.bf16.mxu1 %v11451_v6  ;;  %v14150_v19 = vld [vmem:[#allocation4 + $0x20] sm:$0xff] }
 0x4ec   : > { %v4910_v30 = vpop.permute.xlu0 %4909  ;;  %11064 = vmatpush1.bf16.msra.mxu0 %v11063_v27 }
 0x4ed   : > { %v4908_v33 = vpop.permute.xlu1 %4907  ;;  %5363 = vst.msk [vmem:[%s12869_s29 + $0x297] sm:$0xff] %vm639_vm5, %v4910_v30  ;;  %v14177_v30 = vld [vmem:[#allocation4 + $0x48] sm:$0xff] }
 0x4ee   : > { %5362 = vst.msk [vmem:[%s12869_s29 + $0x28f] sm:$0xfe] %vm5237_vm4, %v4908_v33  ;;  %5025 = vrot.lane.b32.xlu0 %v4457_v11, %s11434_s13  ;;  %11108 = vmatpush1.bf16.msra.mxu1 %v11107_v60  ;;  %v14167_v33 = vld [vmem:[#allocation4 + $0x40] sm:$0xff] }
 0x4ef   : > { %5023 = vrot.lane.b32.xlu1 %v4399_v10, %s11434_s13  ;;  %11109 = vmatprep.subr.bf16.mxu1 %v11451_v6  ;;  %v14171_v10 = vld [vmem:[#allocation4 + $0x38] sm:$0xff] }
 0x4f0   : > { %v4914_v15 = vpop.permute.xlu0 %4913 }
 0x4f1   : > { %v4912_v48 = vpop.permute.xlu1 %4911  ;;  %5365 = vst.msk [vmem:[%s12869_s29 + $0x29f] sm:$0xfe] %vm5237_vm4, %v4914_v15 }
 0x4f2   : > { %5364 = vst.msk [vmem:[%s12869_s29 + $0x29f] sm:$0x1] %vm5240_vm3, %v4912_v48  ;;  %5029 = vrot.lane.b32.xlu0 %v4400_v28, %s11434_s13  ;;  %v14189_v48 = vld [vmem:[#allocation4 + $0x58] sm:$0xff] }
 0x4f3   : > { %5027 = vrot.lane.b32.xlu1 %v4264_v13, %s11434_s13 }
 0x4f4   : > { %v4918_v36 = vpop.permute.xlu0 %4917 }
 0x4f5   : > { %v4916_v7 = vpop.permute.xlu1 %4915  ;;  %5367 = vst.msk [vmem:[%s12869_s29 + $0x2af] sm:$0x1] %vm5240_vm3, %v4918_v36  ;;  %v14223_v36 = vld [vmem:[#allocation4 + $0x80] sm:$0xff] }
 0x4f6   : > { %5366 = vst.msk [vmem:[%s12869_s29 + $0x2a7] sm:$0xff] %vm639_vm5, %v4916_v7  ;;  %5033 = vrot.lane.b32.xlu0 %v4265_v5, %s11434_s13  ;;  %v14225_v5 = vld [vmem:[#allocation4 + $0x88] sm:$0xff] }
 0x4f7   : > { %5031 = vrot.lane.b32.xlu1 %v4467_v14, %s11434_s13  ;;  %v14213_v14 = vld [vmem:[#allocation4 + $0x78] sm:$0xff] }
 0x4f8   : > { %v4922_v17 = vpop.permute.xlu0 %4921 }
 0x4f9   : > { %v4920_v52 = vpop.permute.xlu1 %4919  ;;  %5369 = vst.msk [vmem:[%s12869_s29 + $0x2b7] sm:$0xff] %vm639_vm5, %v4922_v17 }
 0x4fa   : > { %5368 = vst.msk [vmem:[%s12869_s29 + $0x2af] sm:$0xfe] %vm5237_vm4, %v4920_v52  ;;  %5037 = vrot.lane.b32.xlu0 %v4464_v24, %s11434_s13  ;;  %v14229_v52 = vld [vmem:[#allocation4 + $0x90] sm:$0xff]  ;;  %v14239_v24 = vld [vmem:[#allocation4 + $0xa0] sm:$0xff] }
 0x4fb   : > { %5035 = vrot.lane.b32.xlu1 %v4401_v42, %s11434_s13 }
 0x4fc   : > { %v4926_v49 = vpop.permute.xlu0 %4925 }
 0x4fd   : > { %v4924_v4 = vpop.permute.xlu1 %4923  ;;  %5371 = vst.msk [vmem:[%s12869_s29 + $0x2bf] sm:$0xfe] %vm5237_vm4, %v4926_v49  ;;  %v14259_v49 = vld [vmem:[#allocation4 + $0xb0] sm:$0xff] }
 0x4fe   : > { %5370 = vst.msk [vmem:[%s12869_s29 + $0x2bf] sm:$0x1] %vm5240_vm3, %v4924_v4  ;;  %5041 = vrot.lane.b32.xlu0 %v4402_v18, %s11434_s13  ;;  %v14261_v18 = vld [vmem:[#allocation4 + $0xb8] sm:$0xff] }
 0x4ff   : > { %5039 = vrot.lane.b32.xlu1 %v4266_v29, %s11434_s13 }
 0x500   : > { %v4930_v40 = vpop.permute.xlu0 %4929 }
 0x501   : > { %v4928_v31 = vpop.permute.xlu1 %4927  ;;  %5373 = vst.msk [vmem:[%s12869_s29 + $0x2cf] sm:$0x1] %vm5240_vm3, %v4930_v40 }
 0x502   : > { %5372 = vst.msk [vmem:[%s12869_s29 + $0x2c7] sm:$0xff] %vm639_vm5, %v4928_v31  ;;  %5527 = vrot.lane.b32.xlu0 %v14119_v59, %s11434_s13 }
 0x503   : > { %5043 = vrot.lane.b32.xlu1 %v4468_v44, %s11434_s13 }
 0x504   : > { %v4934_v45 = vpop.permute.xlu0 %4933 }
 0x505   : > { %v4932_v2 = vpop.permute.xlu1 %4931  ;;  %5375 = vst.msk [vmem:[%s12869_s29 + $0x2d7] sm:$0xff] %vm639_vm5, %v4934_v45 }
 0x506   : > { %5374 = vst.msk [vmem:[%s12869_s29 + $0x2cf] sm:$0xfe] %vm5237_vm4, %v4932_v2  ;;  %5531 = vrot.lane.b32.xlu0 %v14129_v50, %s11434_s13 }
 0x507   : > { %5529 = vrot.lane.b32.xlu1 %v14133_v62, %s11434_s13 }
 0x508   : > { %v4938_v1 = vpop.permute.xlu0 %4937 }
 0x509   : > { %v4936_v57 = vpop.permute.xlu1 %4935  ;;  %5377 = vst.msk [vmem:[%s12869_s29 + $0x2df] sm:$0xfe] %vm5237_vm4, %v4938_v1 }
 0x50a   : > { %5376 = vst.msk [vmem:[%s12869_s29 + $0x2df] sm:$0x1] %vm5240_vm3, %v4936_v57  ;;  %5535 = vrot.lane.b32.xlu0 %v14150_v19, %s11434_s13 }
 0x50b   : > { %5533 = vrot.lane.b32.xlu1 %v14140_v61, %s11434_s13 }
 0x50c   : > { %v4942_v56 = vpop.permute.xlu0 %4941 }
 0x50d   : > { %v4940_v0 = vpop.permute.xlu1 %4939  ;;  %5379 = vst.msk [vmem:[%s12869_s29 + $0x2ef] sm:$0x1] %vm5240_vm3, %v4942_v56 }
 0x50e   : > { %5378 = vst.msk [vmem:[%s12869_s29 + $0x2e7] sm:$0xff] %vm639_vm5, %v4940_v0  ;;  %5539 = vrot.lane.b32.xlu0 %v14157_v23, %s11434_s13 }
 0x50f   : > { %5537 = vrot.lane.b32.xlu1 %v14153_v16, %s11434_s13 }
 0x510   : > { %v4946_v53 = vpop.permute.xlu0 %4945 }
 0x511   : > { %v4944_v35 = vpop.permute.xlu1 %4943  ;;  %5381 = vst.msk [vmem:[%s12869_s29 + $0x2f7] sm:$0xff] %vm639_vm5, %v4946_v53 }
 0x512   : > { %5380 = vst.msk [vmem:[%s12869_s29 + $0x2ef] sm:$0xfe] %vm5237_vm4, %v4944_v35  ;;  %5543 = vrot.lane.b32.xlu0 %v14167_v33, %s11434_s13 }
 0x513   : > { %5541 = vrot.lane.b32.xlu1 %v14171_v10, %s11434_s13 }
 0x514   : > { %v4950_v37 = vpop.permute.xlu0 %4949 }
 0x515   : > { %v4948_v11 = vpop.permute.xlu1 %4947  ;;  %5383 = vst.msk [vmem:[%s12869_s29 + $0x2ff] sm:$0xfe] %vm5237_vm4, %v4950_v37  ;;  %v5800_v37 = vld [vmem:[%s17202_s4 + $0x8] sm:$0xff] }
 0x516   : > { %5382 = vst.msk [vmem:[%s12869_s29 + $0x2ff] sm:$0x1] %vm5240_vm3, %v4948_v11  ;;  %5547 = vrot.lane.b32.xlu0 %v14187_v41, %s11434_s13  ;;  %10894 = vmatprep.mubr.msk.f32.mxu1 %vm631_vm0, %v5800_v37 }
 0x517   : > { %5545 = vrot.lane.b32.xlu1 %v14177_v30, %s11434_s13  ;;  %10886 = vmatprep.mubr.msk.f32.mxu0 %vm631_vm0, %v5800_v37 }
 0x518   : > { %v4954_v15 = vpop.permute.xlu0 %4953 }
 0x519   : > { %v4952_v13 = vpop.permute.xlu1 %4951  ;;  %5385 = vst.msk [vmem:[%s12869_s29 + $0x30f] sm:$0x1] %vm5240_vm3, %v4954_v15  ;;  %v5887_v15 = vld [vmem:[%s17203_s5] sm:$0xff] }
 0x51a   : > { %5384 = vst.msk [vmem:[%s12869_s29 + $0x307] sm:$0xff] %vm639_vm5, %v4952_v13  ;;  %5551 = vrot.lane.b32.xlu0 %v14193_v26, %s11434_s13 }
 0x51b   : > { %5549 = vrot.lane.b32.xlu1 %v14189_v48, %s11434_s13 }
 0x51c   : > { %v4958_v7 = vpop.permute.xlu0 %4957 }
 0x51d   : > { %v4956_v28 = vpop.permute.xlu1 %4955  ;;  %5387 = vst.msk [vmem:[%s12869_s29 + $0x317] sm:$0xff] %vm639_vm5, %v4958_v7  ;;  %v5888_v7 = vld [vmem:[%s17203_s5 + $0x8] sm:$0xff] }
 0x51e   : > { %5386 = vst.msk [vmem:[%s12869_s29 + $0x30f] sm:$0xfe] %vm5237_vm4, %v4956_v28  ;;  %5555 = vrot.lane.b32.xlu0 %v14203_v21, %s11434_s13 }
 0x51f   : > { %5553 = vrot.lane.b32.xlu1 %v14207_v47, %s11434_s13 }
 0x520   : > { %v4962_v58 = vpop.permute.xlu0 %4961 }
 0x521   : > { %v4960_v39 = vpop.permute.xlu1 %4959  ;;  %5389 = vst.msk [vmem:[%s12869_s29 + $0x31f] sm:$0xfe] %vm5237_vm4, %v4962_v58  ;;  %v5889_v58 = vld [vmem:[%s17203_s5 + $0x10] sm:$0xff] }
 0x522   : > { %5388 = vst.msk [vmem:[%s12869_s29 + $0x31f] sm:$0x1] %vm5240_vm3, %v4960_v39  ;;  %5559 = vrot.lane.b32.xlu0 %v14223_v36, %s11434_s13 }
 0x523   : > { %5557 = vrot.lane.b32.xlu1 %v14213_v14, %s11434_s13 }
 0x524   : > { %v4966_v42 = vpop.permute.xlu0 %4965 }
 0x525   : > { %v4964_v63 = vpop.permute.xlu1 %4963  ;;  %5391 = vst.msk [vmem:[%s12869_s29 + $0x32f] sm:$0x1] %vm5240_vm3, %v4966_v42  ;;  %v5890_v42 = vld [vmem:[%s17203_s5 + $0x18] sm:$0xff] }
 0x526   : > { %5390 = vst.msk [vmem:[%s12869_s29 + $0x327] sm:$0xff] %vm639_vm5, %v4964_v63  ;;  %5563 = vrot.lane.b32.xlu0 %v14229_v52, %s11434_s13 }
 0x527   : > { %5561 = vrot.lane.b32.xlu1 %v14225_v5, %s11434_s13 }
 0x528   : > { %v4970_v8 = vpop.permute.xlu0 %4969 }
 0x529   : > { %v4968_v17 = vpop.permute.xlu1 %4967  ;;  %5393 = vst.msk [vmem:[%s12869_s29 + $0x337] sm:$0xff] %vm639_vm5, %v4970_v8  ;;  %v5891_v8 = vld [vmem:[%s17203_s5 + $0x20] sm:$0xff] }
 0x52a   : > { %5392 = vst.msk [vmem:[%s12869_s29 + $0x32f] sm:$0xfe] %vm5237_vm4, %v4968_v17  ;;  %5567 = vrot.lane.b32.xlu0 %v14239_v24, %s11434_s13 }
 0x52b   : > { %5565 = vrot.lane.b32.xlu1 %v14243_v22, %s11434_s13 }
 0x52c   : > { %v4974_v29 = vpop.permute.xlu0 %4973 }
 0x52d   : > { %v4972_v4 = vpop.permute.xlu1 %4971  ;;  %5395 = vst.msk [vmem:[%s12869_s29 + $0x33f] sm:$0xfe] %vm5237_vm4, %v4974_v29  ;;  %v5892_v29 = vld [vmem:[%s17203_s5 + $0x28] sm:$0xff] }
 0x52e   : > { %5394 = vst.msk [vmem:[%s12869_s29 + $0x33f] sm:$0x1] %vm5240_vm3, %v4972_v4  ;;  %5571 = vrot.lane.b32.xlu0 %v14259_v49, %s11434_s13 }
 0x52f   : > { %5569 = vrot.lane.b32.xlu1 %v14249_v43, %s11434_s13 }
 0x530   : > { %v4978_v3 = vpop.permute.xlu0 %4977 }
 0x531   : > { %v4976_v54 = vpop.permute.xlu1 %4975  ;;  %5397 = vst.msk [vmem:[%s12869_s29 + $0x34f] sm:$0x1] %vm5240_vm3, %v4978_v3  ;;  %v5893_v3 = vld [vmem:[%s17203_s5 + $0x30] sm:$0xff] }
 0x532   : > { %5396 = vst.msk [vmem:[%s12869_s29 + $0x347] sm:$0xff] %vm639_vm5, %v4976_v54  ;;  %5687 = vrot.lane.b32.xlu0 %v14119_v59, %s11435_s14 }
 0x533   : > { %5573 = vrot.lane.b32.xlu1 %v14261_v18, %s11434_s13 }
 0x534   : > { %v4982_v31 = vpop.permute.xlu0 %4981 }
 0x535   : > { %v4980_v46 = vpop.permute.xlu1 %4979  ;;  %5399 = vst.msk [vmem:[%s12869_s29 + $0x357] sm:$0xff] %vm639_vm5, %v4982_v31  ;;  %v5894_v31 = vld [vmem:[%s17203_s5 + $0x38] sm:$0xff] }
 0x536   : > { %5398 = vst.msk [vmem:[%s12869_s29 + $0x34f] sm:$0xfe] %vm5237_vm4, %v4980_v46  ;;  %5691 = vrot.lane.b32.xlu0 %v14129_v50, %s11435_s14 }
 0x537   : > { %5689 = vrot.lane.b32.xlu1 %v14133_v62, %s11435_s14 }
 0x538   : > { %v4986_v40 = vpop.permute.xlu0 %4985 }
 0x539   : > { %v4984_v44 = vpop.permute.xlu1 %4983  ;;  %5401 = vst.msk [vmem:[%s12869_s29 + $0x35f] sm:$0xfe] %vm5237_vm4, %v4986_v40 }
 0x53a   : > { %5400 = vst.msk [vmem:[%s12869_s29 + $0x35f] sm:$0x1] %vm5240_vm3, %v4984_v44  ;;  %5695 = vrot.lane.b32.xlu0 %v14150_v19, %s11435_s14 }
 0x53b   : > { %5693 = vrot.lane.b32.xlu1 %v14140_v61, %s11435_s14 }
 0x53c   : > { %v4990_v34 = vpop.permute.xlu0 %4989 }
 0x53d   : > { %v4988_v32 = vpop.permute.xlu1 %4987  ;;  %5403 = vst.msk [vmem:[%s12869_s29 + $0x36f] sm:$0x1] %vm5240_vm3, %v4990_v34 }
 0x53e   : > { %5402 = vst.msk [vmem:[%s12869_s29 + $0x367] sm:$0xff] %vm639_vm5, %v4988_v32  ;;  %5699 = vrot.lane.b32.xlu0 %v14157_v23, %s11435_s14 }
 0x53f   : > { %5697 = vrot.lane.b32.xlu1 %v14153_v16, %s11435_s14 }
 0x540   : > { %v4994_v2 = vpop.permute.xlu0 %4993 }
 0x541   : > { %v4992_v25 = vpop.permute.xlu1 %4991  ;;  %5405 = vst.msk [vmem:[%s12869_s29 + $0x377] sm:$0xff] %vm639_vm5, %v4994_v2 }
 0x542   : > { %5404 = vst.msk [vmem:[%s12869_s29 + $0x36f] sm:$0xfe] %vm5237_vm4, %v4992_v25  ;;  %5703 = vrot.lane.b32.xlu0 %v14167_v33, %s11435_s14 }
 0x543   : > { %5701 = vrot.lane.b32.xlu1 %v14171_v10, %s11435_s14 }
 0x544   : > { %v4998_v12 = vpop.permute.xlu0 %4997 }
 0x545   : > { %v4996_v45 = vpop.permute.xlu1 %4995  ;;  %5407 = vst.msk [vmem:[%s12869_s29 + $0x37f] sm:$0xfe] %vm5237_vm4, %v4998_v12 }
 0x546   : > { %5406 = vst.msk [vmem:[%s12869_s29 + $0x37f] sm:$0x1] %vm5240_vm3, %v4996_v45  ;;  %5707 = vrot.lane.b32.xlu0 %v14187_v41, %s11435_s14 }
 0x547   : > { %5705 = vrot.lane.b32.xlu1 %v14177_v30, %s11435_s14 }
 0x548   : > { %v5002_v60 = vpop.permute.xlu0 %5001 }
 0x549   : > { %v5000_v55 = vpop.permute.xlu1 %4999  ;;  %5409 = vst.msk [vmem:[%s12869_s29 + $0x38f] sm:$0x1] %vm5240_vm3, %v5002_v60 }
 0x54a   : > { %5408 = vst.msk [vmem:[%s12869_s29 + $0x387] sm:$0xff] %vm639_vm5, %v5000_v55  ;;  %5711 = vrot.lane.b32.xlu0 %v14193_v26, %s11435_s14 }
 0x54b   : > { %5709 = vrot.lane.b32.xlu1 %v14189_v48, %s11435_s14 }
 0x54c   : > { %v5006_v51 = vpop.permute.xlu0 %5005 }
 0x54d   : > { %v5004_v57 = vpop.permute.xlu1 %5003  ;;  %5411 = vst.msk [vmem:[%s12869_s29 + $0x397] sm:$0xff] %vm639_vm5, %v5006_v51 }
 0x54e   : > { %5410 = vst.msk [vmem:[%s12869_s29 + $0x38f] sm:$0xfe] %vm5237_vm4, %v5004_v57  ;;  %5715 = vrot.lane.b32.xlu0 %v14203_v21, %s11435_s14 }
 0x54f   : > { %5713 = vrot.lane.b32.xlu1 %v14207_v47, %s11435_s14 }
 0x550   : > { %v5010_v1 = vpop.permute.xlu0 %5009 }
 0x551   : > { %v5008_v38 = vpop.permute.xlu1 %5007  ;;  %5413 = vst.msk [vmem:[%s12869_s29 + $0x39f] sm:$0xfe] %vm5237_vm4, %v5010_v1 }
 0x552   : > { %5412 = vst.msk [vmem:[%s12869_s29 + $0x39f] sm:$0x1] %vm5240_vm3, %v5008_v38  ;;  %5719 = vrot.lane.b32.xlu0 %v14223_v36, %s11435_s14 }
 0x553   : > { %5717 = vrot.lane.b32.xlu1 %v14213_v14, %s11435_s14 }
 0x554   : > { %v5014_v0 = vpop.permute.xlu0 %5013 }
 0x555   : > { %v5012_v27 = vpop.permute.xlu1 %5011  ;;  %5415 = vst.msk [vmem:[%s12869_s29 + $0x3af] sm:$0x1] %vm5240_vm3, %v5014_v0 }
 0x556   : > { %5414 = vst.msk [vmem:[%s12869_s29 + $0x3a7] sm:$0xff] %vm639_vm5, %v5012_v27  ;;  %5723 = vrot.lane.b32.xlu0 %v14229_v52, %s11435_s14 }
 0x557   : > { %5721 = vrot.lane.b32.xlu1 %v14225_v5, %s11435_s14 }
 0x558   : > { %v5018_v35 = vpop.permute.xlu0 %5017 }
 0x559   : > { %v5016_v56 = vpop.permute.xlu1 %5015  ;;  %5417 = vst.msk [vmem:[%s12869_s29 + $0x3b7] sm:$0xff] %vm639_vm5, %v5018_v35 }
 0x55a   : > { %5416 = vst.msk [vmem:[%s12869_s29 + $0x3af] sm:$0xfe] %vm5237_vm4, %v5016_v56  ;;  %5727 = vrot.lane.b32.xlu0 %v14239_v24, %s11435_s14 }
 0x55b   : > { %5725 = vrot.lane.b32.xlu1 %v14243_v22, %s11435_s14 }
 0x55c   : > { %v5022_v11 = vpop.permute.xlu0 %5021 }
 0x55d   : > { %v5020_v53 = vpop.permute.xlu1 %5019  ;;  %5419 = vst.msk [vmem:[%s12869_s29 + $0x3bf] sm:$0xfe] %vm5237_vm4, %v5022_v11 }
 0x55e   : > { %5418 = vst.msk [vmem:[%s12869_s29 + $0x3bf] sm:$0x1] %vm5240_vm3, %v5020_v53  ;;  %5731 = vrot.lane.b32.xlu0 %v14259_v49, %s11435_s14 }
 0x55f   : > { %5729 = vrot.lane.b32.xlu1 %v14249_v43, %s11435_s14 }
 0x560   : > { %v5026_v28 = vpop.permute.xlu0 %5025 }
 0x561   : > { %v5024_v13 = vpop.permute.xlu1 %5023  ;;  %5421 = vst.msk [vmem:[%s12869_s29 + $0x3cf] sm:$0x1] %vm5240_vm3, %v5026_v28 }
 0x562   : > { %5420 = vst.msk [vmem:[%s12869_s29 + $0x3c7] sm:$0xff] %vm639_vm5, %v5024_v13  ;;  %5897 = vperm.xlu0 %11369, %v5887_v15  }
 0x563   : > { %5733 = vrot.lane.b32.xlu1 %v14261_v18, %s11435_s14  ;;  %s17523_s14 = smov 86  }
 0x564   : > { %v5030_v63 = vpop.permute.xlu0 %5029 }
 0x565   : > { %v5028_v39 = vpop.permute.xlu1 %5027  ;;  %5423 = vst.msk [vmem:[%s12869_s29 + $0x3d7] sm:$0xff] %vm639_vm5, %v5030_v63 }
 0x566   : > { %5422 = vst.msk [vmem:[%s12869_s29 + $0x3cf] sm:$0xfe] %vm5237_vm4, %v5028_v39  ;;  %5907 = vperm.xlu0 %11369, %v5889_v58  }
 0x567   : > { %5902 = vperm.xlu1 %11368, %v5888_v7  }
 0x568   : > { %v5034_v4 = vpop.permute.xlu0 %5033 }
 0x569   : > { %v5032_v17 = vpop.permute.xlu1 %5031  ;;  %5425 = vst.msk [vmem:[%s12869_s29 + $0x3df] sm:$0xfe] %vm5237_vm4, %v5034_v4 }
 0x56a   : > { %5424 = vst.msk [vmem:[%s12869_s29 + $0x3df] sm:$0x1] %vm5240_vm3, %v5032_v17  ;;  %5917 = vperm.xlu0 %11369, %v5891_v8  }
 0x56b   : > { %5912 = vperm.xlu1 %11368, %v5890_v42  }
 0x56c   : > { %v5038_v46 = vpop.permute.xlu0 %5037 }
 0x56d   : > { %v5036_v54 = vpop.permute.xlu1 %5035  ;;  %5427 = vst.msk [vmem:[%s12869_s29 + $0x3ef] sm:$0x1] %vm5240_vm3, %v5038_v46 }
 0x56e   : > { %5426 = vst.msk [vmem:[%s12869_s29 + $0x3e7] sm:$0xff] %vm639_vm5, %v5036_v54  ;;  %5927 = vperm.xlu0 %11369, %v5893_v3  }
 0x56f   : > { %5922 = vperm.xlu1 %11368, %v5892_v29  }
 0x570   : > { %v5042_v40 = vpop.permute.xlu0 %5041 }
 0x571   : > { %v5040_v44 = vpop.permute.xlu1 %5039  ;;  %5429 = vst.msk [vmem:[%s12869_s29 + $0x3f7] sm:$0xff] %vm639_vm5, %v5042_v40 }
 0x572   : > { %5428 = vst.msk [vmem:[%s12869_s29 + $0x3ef] sm:$0xfe] %vm5237_vm4, %v5040_v44  ;;  %6249 = vrot.lane.b32.xlu0 %v14119_v59, %s11436_s15 }
 0x573   : > { %5932 = vperm.xlu1 %11368, %v5894_v31  }
 0x574   : > { %v5528_v34 = vpop.permute.xlu0 %5527 }
 0x575   : > { %v5044_v32 = vpop.permute.xlu1 %5043 }
 0x576   : > { %5430 = vst.msk [vmem:[%s12869_s29 + $0x3ff] sm:$0x1] %vm5240_vm3, %v5044_v32  ;;  %6253 = vrot.lane.b32.xlu0 %v14129_v50, %s11436_s15  ;;  %s17520_s29 = smov 107  }
 0x577   : > { %6251 = vrot.lane.b32.xlu1 %v14133_v62, %s11436_s15 }
 0x578   : > { %v5532_v2 = vpop.permute.xlu0 %5531 }
 0x579   : > { %v5530_v25 = vpop.permute.xlu1 %5529  ;;  %5617 = vst.msk [vmem:[#allocation5 + $0xd0] sm:$0xff] %vm631_vm0, %v5532_v2 }
 0x57a   : > { %6257 = vrot.lane.b32.xlu0 %v14150_v19, %s11436_s15  ;;  %v5576_v57 = vsel %vm669_vm7, %v5530_v25, %v5532_v2  ;;  %v5575_v1 = vsel %vm669_vm7, %v5528_v34, %v5530_v25 }
 0x57b   : > { %6255 = vrot.lane.b32.xlu1 %v14140_v61, %s11436_s15 }
 0x57c   : > { %v5536_v12 = vpop.permute.xlu0 %5535 }
 0x57d   : > { %v5534_v45 = vpop.permute.xlu1 %5533 }
 0x57e   : > { %6261 = vrot.lane.b32.xlu0 %v14157_v23, %s11436_s15  ;;  %v5577_v60 = vsel %vm669_vm7, %v5534_v45, %v5536_v12 }
 0x57f   : > { %6259 = vrot.lane.b32.xlu1 %v14153_v16, %s11436_s15  ;;  %v11067_v0 = vpack.c.bf16 %v5577_v60, %v5575_v1 }
 0x580   : > { %v5540_v38 = vpop.permute.xlu0 %5539  ;;  %v5841_v11 = vld [vmem:[#allocation5 + $0xd0] sm:$0xff] }
 0x581   : > { %v5538_v55 = vpop.permute.xlu1 %5537 }
 0x582   : > { %5620 = vst.msk [vmem:[#allocation5 + $0xe8] sm:$0xff] %vm631_vm0, %v5538_v55  ;;  %v5578_v51 = vsel %vm669_vm7, %v5536_v12, %v5538_v55  ;;  %6265 = vrot.lane.b32.xlu0 %v14167_v33, %s11436_s15 }
 0x583   : > { %6263 = vrot.lane.b32.xlu1 %v14171_v10, %s11436_s15  ;;  %v11065_v27 = vpack.c.bf16 %v5578_v51, %v5576_v57 }
 0x584   : > { %v5544_v35 = vpop.permute.xlu0 %5543 }
 0x585   : > { %v5542_v56 = vpop.permute.xlu1 %5541  ;;  %11066 = vmatprep.subr.bf16.mxu0 %v11065_v27  ;;  %5623 = vst.msk [vmem:[#allocation5 + $0x100] sm:$0xff] %vm631_vm0, %v5544_v35 }
 0x586   : > { %11068 = vmatpush1.bf16.msra.mxu0 %v11067_v0  ;;  %6269 = vrot.lane.b32.xlu0 %v14187_v41, %s11436_s15  ;;  %v5580_v39 = vsel %vm669_vm7, %v5542_v56, %v5544_v35  ;;  %v5579_v42 = vsel %vm669_vm7, %v5540_v38, %v5542_v56 }
 0x587   : > { %6267 = vrot.lane.b32.xlu1 %v14177_v30, %s11436_s15 }
 0x588   : > { %v5548_v15 = vpop.permute.xlu0 %5547 }
 0x589   : > { %v5546_v53 = vpop.permute.xlu1 %5545  ;;  %v5844_v37 = vld [vmem:[#allocation5 + $0xe8] sm:$0xff] }
 0x58a   : > { %v11110_v13 = vpack.c.bf16 %v5844_v37, %v5841_v11  ;;  %6273 = vrot.lane.b32.xlu0 %v14193_v26, %s11436_s15  ;;  %v5581_v7 = vsel %vm669_vm7, %v5546_v53, %v5548_v15 }
 0x58b   : > { %6271 = vrot.lane.b32.xlu1 %v14189_v48, %s11436_s15  ;;  %v11071_v8 = vpack.c.bf16 %v5581_v7, %v5579_v42 }
 0x58c   : > { %11111 = vmatpush1.bf16.msra.mxu1 %v11110_v13  ;;  %v5552_v63 = vpop.permute.xlu0 %5551  ;;  %v5847_v3 = vld [vmem:[#allocation5 + $0x100] sm:$0xff] }
 0x58d   : > { %v5550_v28 = vpop.permute.xlu1 %5549  ;;  %11112 = vmatprep.subr.bf16.mxu1 %v11451_v6 }
 0x58e   : > { %5626 = vst.msk [vmem:[#allocation5 + $0x118] sm:$0xff] %vm631_vm0, %v5550_v28  ;;  %v5582_v58 = vsel %vm669_vm7, %v5548_v15, %v5550_v28  ;;  %6277 = vrot.lane.b32.xlu0 %v14203_v21, %s11436_s15 }
 0x58f   : > { %6275 = vrot.lane.b32.xlu1 %v14207_v47, %s11436_s15  ;;  %v11069_v17 = vpack.c.bf16 %v5582_v58, %v5580_v39 }
 0x590   : > { %v5556_v29 = vpop.permute.xlu0 %5555 }
 0x591   : > { %v5554_v4 = vpop.permute.xlu1 %5553  ;;  %11070 = vmatprep.subr.bf16.mxu0 %v11069_v17  ;;  %5629 = vst.msk [vmem:[#allocation5 + $0x130] sm:$0xff] %vm631_vm0, %v5556_v29 }
 0x592   : > { %11072 = vmatpush1.bf16.msra.mxu0 %v11071_v8  ;;  %6281 = vrot.lane.b32.xlu0 %v14223_v36, %s11436_s15  ;;  %v5584_v34 = vsel %vm669_vm7, %v5554_v4, %v5556_v29  ;;  %v5583_v45 = vsel %vm669_vm7, %v5552_v63, %v5554_v4 }
 0x593   : > { %6279 = vrot.lane.b32.xlu1 %v14213_v14, %s11436_s15 }
 0x594   : > { %v5560_v44 = vpop.permute.xlu0 %5559 }
 0x595   : > { %v5558_v54 = vpop.permute.xlu1 %5557  ;;  %v5850_v46 = vld [vmem:[#allocation5 + $0x118] sm:$0xff] }
 0x596   : > { %v11113_v31 = vpack.c.bf16 %v5850_v46, %v5847_v3  ;;  %6285 = vrot.lane.b32.xlu0 %v14229_v52, %s11436_s15  ;;  %v5585_v32 = vsel %vm669_vm7, %v5558_v54, %v5560_v44 }
 0x597   : > { %6283 = vrot.lane.b32.xlu1 %v14225_v5, %s11436_s15  ;;  %v11075_v55 = vpack.c.bf16 %v5585_v32, %v5583_v45 }
 0x598   : > { %11114 = vmatpush1.bf16.msra.mxu1 %v11113_v31  ;;  %v5564_v2 = vpop.permute.xlu0 %5563  ;;  %v5853_v38 = vld [vmem:[#allocation5 + $0x130] sm:$0xff] }
 0x599   : > { %v5562_v40 = vpop.permute.xlu1 %5561  ;;  %11115 = vmatprep.subr.bf16.mxu1 %v11451_v6 }
 0x59a   : > { %5632 = vst.msk [vmem:[#allocation5 + $0x148] sm:$0xff] %vm631_vm0, %v5562_v40  ;;  %v5586_v25 = vsel %vm669_vm7, %v5560_v44, %v5562_v40  ;;  %6289 = vrot.lane.b32.xlu0 %v14239_v24, %s11436_s15 }
 0x59b   : > { %6287 = vrot.lane.b32.xlu1 %v14243_v22, %s11436_s15  ;;  %v11073_v12 = vpack.c.bf16 %v5586_v25, %v5584_v34 }
 0x59c   : > { %v5568_v57 = vpop.permute.xlu0 %5567 }
 0x59d   : > { %v5566_v60 = vpop.permute.xlu1 %5565  ;;  %11074 = vmatprep.subr.bf16.mxu0 %v11073_v12  ;;  %5635 = vst.msk [vmem:[#allocation5 + $0x160] sm:$0xff] %vm631_vm0, %v5568_v57 }
 0x59e   : > { %11076 = vmatpush1.bf16.msra.mxu0 %v11075_v55  ;;  %6293 = vrot.lane.b32.xlu0 %v14259_v49, %s11436_s15  ;;  %v5588_v53 = vsel %vm669_vm7, %v5566_v60, %v5568_v57  ;;  %v5587_v13 = vsel %vm669_vm7, %v5564_v2, %v5566_v60 }
 0x59f   : > { %6291 = vrot.lane.b32.xlu1 %v14249_v43, %s11436_s15 }
 0x5a0   : > { %v5572_v0 = vpop.permute.xlu0 %5571 }
 0x5a1   : > { %v5570_v51 = vpop.permute.xlu1 %5569  ;;  %v5856_v1 = vld [vmem:[#allocation5 + $0x148] sm:$0xff] }
 0x5a2   : > { %v11116_v27 = vpack.c.bf16 %v5856_v1, %v5853_v38  ;;  %6409 = vrot.lane.b32.xlu0 %v14119_v59, %s17520_s29  ;;  %v5589_v35 = vsel %vm669_vm7, %v5570_v51, %v5572_v0 }
 0x5a3   : > { %6295 = vrot.lane.b32.xlu1 %v14261_v18, %s11436_s15  ;;  %v11079_v59 = vpack.c.bf16 %v5589_v35, %v5587_v13  ;;  %v14557_v35 = vld [vmem:[#allocation4] sm:$0xff] }
 0x5a4   : > { %11117 = vmatpush1.bf16.msra.mxu1 %v11116_v27  ;;  %v5688_v37 = vpop.permute.xlu0 %5687  ;;  %v5859_v58 = vld [vmem:[#allocation5 + $0x160] sm:$0xff] }
 0x5a5   : > { %v5574_v56 = vpop.permute.xlu1 %5573  ;;  %11118 = vmatprep.subr.bf16.mxu1 %v11451_v6 }
 0x5a6   : > { %5638 = vst.msk [vmem:[#allocation5 + $0x178] sm:$0xff] %vm631_vm0, %v5574_v56  ;;  %v5590_v11 = vsel %vm669_vm7, %v5572_v0, %v5574_v56  ;;  %6413 = vrot.lane.b32.xlu0 %v14129_v50, %s17520_s29 }
 0x5a7   : > { %6411 = vrot.lane.b32.xlu1 %v14133_v62, %s17520_s29  ;;  %v11077_v15 = vpack.c.bf16 %v5590_v11, %v5588_v53 }
 0x5a8   : > { %v5692_v7 = vpop.permute.xlu0 %5691 }
 0x5a9   : > { %v5690_v28 = vpop.permute.xlu1 %5689  ;;  %11078 = vmatprep.subr.bf16.mxu0 %v11077_v15  ;;  %5777 = vst.msk [vmem:[#allocation5 + $0x190] sm:$0xff] %vm631_vm0, %v5692_v7  ;;  %v14570_v15 = vld [vmem:[#allocation4 + $0x8] sm:$0xff] }
 0x5aa   : > { %11080 = vmatpush1.bf16.msra.mxu0 %v11079_v59  ;;  %6417 = vrot.lane.b32.xlu0 %v14150_v19, %s17520_s29  ;;  %v5736_v17 = vsel %vm690_vm8, %v5690_v28, %v5692_v7  ;;  %v5735_v4 = vsel %vm690_vm8, %v5688_v37, %v5690_v28  ;;  %v14564_v37 = vld [vmem:[#allocation4 + $0x10] sm:$0xff]  ;;  %v14575_v28 = vld [vmem:[#allocation4 + $0x18] sm:$0xff] }
 0x5ab   : > { %6415 = vrot.lane.b32.xlu1 %v14140_v61, %s17520_s29 }
 0x5ac   : > { %v5696_v42 = vpop.permute.xlu0 %5695 }
 0x5ad   : > { %v5694_v39 = vpop.permute.xlu1 %5693  ;;  %v5862_v62 = vld [vmem:[#allocation5 + $0x178] sm:$0xff] }
 0x5ae   : > { %v11119_v63 = vpack.c.bf16 %v5862_v62, %v5859_v58  ;;  %6421 = vrot.lane.b32.xlu0 %v14157_v23, %s17520_s29  ;;  %v5737_v61 = vsel %vm690_vm8, %v5694_v39, %v5696_v42  ;;  %v5799_v39 = vld [vmem:[%s17202_s4] sm:$0xff]  ;;  %v14584_v58 = vld [vmem:[#allocation4 + $0x20] sm:$0xff] }
 0x5af   : > { %6419 = vrot.lane.b32.xlu1 %v14153_v16, %s17520_s29  ;;  %v11083_v23 = vpack.c.bf16 %v5737_v61, %v5735_v4  ;;  %v5802_v62 = vld [vmem:[%s17202_s4 + $0x18] sm:$0xff]  ;;  %v14593_v61 = vld [vmem:[#allocation4 + $0x30] sm:$0xff] }
 0x5b0   : > { %11120 = vmatpush1.bf16.msra.mxu1 %v11119_v63  ;;  %v5700_v8 = vpop.permute.xlu0 %5699  ;;  %v5865_v46 = vld [vmem:[#allocation5 + $0x190] sm:$0xff]  ;;  %v14589_v63 = vld [vmem:[#allocation4 + $0x28] sm:$0xff]  ;;  %v14606_v4 = vld [vmem:[#allocation4 + $0x40] sm:$0xff] }
 0x5b1   : > { %v5698_v50 = vpop.permute.xlu1 %5697  ;;  %11121 = vmatprep.subr.bf16.mxu1 %v11451_v6 }
 0x5b2   : > { %5780 = vst.msk [vmem:[#allocation5 + $0x1a8] sm:$0xff] %vm631_vm0, %v5698_v50  ;;  %v5738_v19 = vsel %vm690_vm8, %v5696_v42, %v5698_v50  ;;  %6425 = vrot.lane.b32.xlu0 %v14167_v33, %s17520_s29 }
 0x5b3   : > { %6423 = vrot.lane.b32.xlu1 %v14171_v10, %s17520_s29  ;;  %v11081_v16 = vpack.c.bf16 %v5738_v19, %v5736_v17  ;;  %v5801_v19 = vld [vmem:[%s17202_s4 + $0x10] sm:$0xff] }
 0x5b4   : > { %v5704_v54 = vpop.permute.xlu0 %5703 }
 0x5b5   : > { %v5702_v29 = vpop.permute.xlu1 %5701  ;;  %11082 = vmatprep.subr.bf16.mxu0 %v11081_v16  ;;  %5783 = vst.msk [vmem:[#allocation5 + $0x1c0] sm:$0xff] %vm631_vm0, %v5704_v54  ;;  %v14609_v16 = vld [vmem:[#allocation4 + $0x38] sm:$0xff] }
 0x5b6   : > { %11084 = vmatpush1.bf16.msra.mxu0 %v11083_v23  ;;  %6429 = vrot.lane.b32.xlu0 %v14187_v41, %s17520_s29  ;;  %v5740_v40 = vsel %vm690_vm8, %v5702_v29, %v5704_v54  ;;  %v5739_v34 = vsel %vm690_vm8, %v5700_v8, %v5702_v29  ;;  %v5804_v8 = vld [vmem:[%s17202_s4 + $0x28] sm:$0xff]  ;;  %v5803_v23 = vld [vmem:[%s17202_s4 + $0x20] sm:$0xff]  ;;  %v5806_v54 = vld [vmem:[%s17202_s4 + $0x38] sm:$0xff] }
 0x5b7   : > { %6427 = vrot.lane.b32.xlu1 %v14177_v30, %s17520_s29 }
 0x5b8   : > { %v5708_v44 = vpop.permute.xlu0 %5707 }
 0x5b9   : > { %v5706_v3 = vpop.permute.xlu1 %5705  ;;  %v5868_v10 = vld [vmem:[#allocation5 + $0x1a8] sm:$0xff] }
 0x5ba   : > { %v11122_v31 = vpack.c.bf16 %v5868_v10, %v5865_v46  ;;  %6433 = vrot.lane.b32.xlu0 %v14193_v26, %s17520_s29  ;;  %v5741_v30 = vsel %vm690_vm8, %v5706_v3, %v5708_v44  ;;  %v14625_v3 = vld [vmem:[#allocation4 + $0x58] sm:$0xff]  ;;  %v14629_v10 = vld [vmem:[#allocation4 + $0x50] sm:$0xff] }
 0x5bb   : > { %6431 = vrot.lane.b32.xlu1 %v14189_v48, %s17520_s29  ;;  %v11087_v26 = vpack.c.bf16 %v5741_v30, %v5739_v34  ;;  %v14645_v30 = vld [vmem:[#allocation4 + $0x48] sm:$0xff] }
 0x5bc   : > { %11123 = vmatpush1.bf16.msra.mxu1 %v11122_v31  ;;  %v5712_v32 = vpop.permute.xlu0 %5711  ;;  %v5871_v12 = vld [vmem:[#allocation5 + $0x1c0] sm:$0xff]  ;;  %v5805_v31 = vld [vmem:[%s17202_s4 + $0x30] sm:$0xff]  ;;  %v14655_v34 = vld [vmem:[#allocation4 + $0x68] sm:$0xff] }
 0x5bd   : > { %v5710_v33 = vpop.permute.xlu1 %5709  ;;  %11124 = vmatprep.subr.bf16.mxu1 %v11451_v6 }
 0x5be   : > { %5786 = vst.msk [vmem:[#allocation5 + $0x1d8] sm:$0xff] %vm631_vm0, %v5710_v33  ;;  %v5742_v41 = vsel %vm690_vm8, %v5708_v44, %v5710_v33  ;;  %6437 = vrot.lane.b32.xlu0 %v14203_v21, %s17520_s29  ;;  %v5808_v33 = vld [vmem:[%s17202_s4 + $0x48] sm:$0xff] }
 0x5bf   : > { %6435 = vrot.lane.b32.xlu1 %v14207_v47, %s17520_s29  ;;  %v11085_v48 = vpack.c.bf16 %v5742_v41, %v5740_v40  ;;  %v5807_v41 = vld [vmem:[%s17202_s4 + $0x40] sm:$0xff] }
 0x5c0   : > { %v5716_v2 = vpop.permute.xlu0 %5715 }
 0x5c1   : > { %v5714_v25 = vpop.permute.xlu1 %5713  ;;  %11086 = vmatprep.subr.bf16.mxu0 %v11085_v48  ;;  %5789 = vst.msk [vmem:[#allocation5 + $0x1f0] sm:$0xff] %vm631_vm0, %v5716_v2  ;;  %v5810_v48 = vld [vmem:[%s17202_s4 + $0x58] sm:$0xff] }
 0x5c2   : > { %11088 = vmatpush1.bf16.msra.mxu0 %v11087_v26  ;;  %6441 = vrot.lane.b32.xlu0 %v14223_v36, %s17520_s29  ;;  %v5744_v57 = vsel %vm690_vm8, %v5714_v25, %v5716_v2  ;;  %v5743_v38 = vsel %vm690_vm8, %v5712_v32, %v5714_v25  ;;  %v14665_v26 = vld [vmem:[#allocation4 + $0x70] sm:$0xff]  ;;  %v5809_v2 = vld [vmem:[%s17202_s4 + $0x50] sm:$0xff] }
 0x5c3   : > { %6439 = vrot.lane.b32.xlu1 %v14213_v14, %s17520_s29 }
 0x5c4   : > { %v5720_v60 = vpop.permute.xlu0 %5719 }
 0x5c5   : > { %v5718_v45 = vpop.permute.xlu1 %5717  ;;  %v5874_v47 = vld [vmem:[#allocation5 + $0x1d8] sm:$0xff] }
 0x5c6   : > { %v11125_v55 = vpack.c.bf16 %v5874_v47, %v5871_v12  ;;  %6445 = vrot.lane.b32.xlu0 %v14229_v52, %s17520_s29  ;;  %v5745_v14 = vsel %vm690_vm8, %v5718_v45, %v5720_v60  ;;  %v14675_v12 = vld [vmem:[#allocation4 + $0x80] sm:$0xff]  ;;  %v5812_v47 = vld [vmem:[%s17202_s4 + $0x68] sm:$0xff] }
 0x5c7   : > { %6443 = vrot.lane.b32.xlu1 %v14225_v5, %s17520_s29  ;;  %v11091_v52 = vpack.c.bf16 %v5745_v14, %v5743_v38  ;;  %v5811_v14 = vld [vmem:[%s17202_s4 + $0x60] sm:$0xff] }
 0x5c8   : > { %11126 = vmatpush1.bf16.msra.mxu1 %v11125_v55  ;;  %v5724_v51 = vpop.permute.xlu0 %5723  ;;  %v5877_v56 = vld [vmem:[#allocation5 + $0x1f0] sm:$0xff]  ;;  %v14685_v55 = vld [vmem:[#allocation4 + $0x88] sm:$0xff] }
 0x5c9   : > { %v5722_v21 = vpop.permute.xlu1 %5721  ;;  %11127 = vmatprep.subr.bf16.mxu1 %v11451_v6 }
 0x5ca   : > { %5792 = vst.msk [vmem:[#allocation5 + $0x208] sm:$0xff] %vm631_vm0, %v5722_v21  ;;  %v5746_v36 = vsel %vm690_vm8, %v5720_v60, %v5722_v21  ;;  %6449 = vrot.lane.b32.xlu0 %v14239_v24, %s17520_s29  ;;  %v14687_v60 = vld [vmem:[#allocation4 + $0x60] sm:$0xff] }
 0x5cb   : > { %6447 = vrot.lane.b32.xlu1 %v14243_v22, %s17520_s29  ;;  %v11089_v5 = vpack.c.bf16 %v5746_v36, %v5744_v57  ;;  %v5814_v36 = vld [vmem:[%s17202_s4 + $0x78] sm:$0xff] }
 0x5cc   : > { %v5728_v27 = vpop.permute.xlu0 %5727 }
 0x5cd   : > { %v5726_v1 = vpop.permute.xlu1 %5725  ;;  %11090 = vmatprep.subr.bf16.mxu0 %v11089_v5  ;;  %5795 = vst.msk [vmem:[#allocation5 + $0x220] sm:$0xff] %vm631_vm0, %v5728_v27  ;;  %v5813_v5 = vld [vmem:[%s17202_s4 + $0x70] sm:$0xff] }
 0x5ce   : > { %11092 = vmatpush1.bf16.msra.mxu0 %v11091_v52  ;;  %6453 = vrot.lane.b32.xlu0 %v14259_v49, %s17520_s29  ;;  %v5748_v49 = vsel %vm690_vm8, %v5726_v1, %v5728_v27  ;;  %v14717_v27 = vld [vmem:[#allocation4 + $0xa0] sm:$0xff] }
 0x5cf   : > { %6451 = vrot.lane.b32.xlu1 %v14249_v43, %s17520_s29 }
 0x5d0   : > { %v5732_v24 = vpop.permute.xlu0 %5731 }
 0x5d1   : > { %v5730_v0 = vpop.permute.xlu1 %5729  ;;  %v5880_v22 = vld [vmem:[#allocation5 + $0x208] sm:$0xff] }
 0x5d2   : > { %v11128_v53 = vpack.c.bf16 %v5880_v22, %v5877_v56  ;;  %6569 = vrot.lane.b32.xlu0 %v14557_v35, %s17521_s23  ;;  %v5749_v11 = vsel %vm690_vm8, %v5730_v0, %v5732_v24  ;;  %v14719_v22 = vld [vmem:[#allocation4 + $0xb0] sm:$0xff] }
 0x5d3   : > { %6455 = vrot.lane.b32.xlu1 %v14261_v18, %s17520_s29  ;;  %v5747_v18 = vsel %vm690_vm8, %v5724_v51, %v5726_v1  ;;  %v14703_v51 = vld [vmem:[#allocation4 + $0x78] sm:$0xff] }
 0x5d4   : > { %11129 = vmatpush1.bf16.msra.mxu1 %v11128_v53  ;;  %v11095_v7 = vpack.c.bf16 %v5749_v11, %v5747_v18  ;;  %v5883_v42 = vld [vmem:[#allocation5 + $0x220] sm:$0xff]  ;;  %v14709_v1 = vld [vmem:[#allocation4 + $0x98] sm:$0xff] }
 0x5d5   : > { %v5734_v43 = vpop.permute.xlu1 %5733  ;;  %11130 = vmatprep.subr.bf16.mxu1 %v11451_v6  ;;  %v14726_v53 = vld [vmem:[#allocation4 + $0xb8] sm:$0xff] }
 0x5d6   : > { %5798 = vst.msk [vmem:[#allocation5 + $0x238] sm:$0xff] %vm631_vm0, %v5734_v43  ;;  %v5750_v13 = vsel %vm690_vm8, %v5732_v24, %v5734_v43  ;;  %6573 = vrot.lane.b32.xlu0 %v14564_v37, %s17521_s23  ;;  %v14728_v24 = vld [vmem:[#allocation4 + $0x90] sm:$0xff] }
 0x5d7   : > { %6571 = vrot.lane.b32.xlu1 %v14570_v15, %s17521_s23  ;;  %v11093_v59 = vpack.c.bf16 %v5750_v13, %v5748_v49 }
 0x5d9   : > { %11094 = vmatprep.subr.bf16.mxu0 %v11093_v59 }
 0x5da   : > { %11096 = vmatpush1.bf16.msra.mxu0 %v11095_v7  ;;  %6577 = vrot.lane.b32.xlu0 %v14584_v58, %s17521_s23 }
 0x5db   : > { %6575 = vrot.lane.b32.xlu1 %v14575_v28, %s17521_s23 }
 0x5dd   : > { %v5886_v50 = vld [vmem:[#allocation5 + $0x238] sm:$0xff]  ;;  %6024 = vmatmul.mubr.f32.vlgmr.msra.gmra.mrb[16].mxu0 %v5799_v39 }
 0x5de   : > { %v11131_v17 = vpack.c.bf16 %v5886_v50, %v5883_v42  ;;  %10887 = vmatprep.mubr.msk.f32.mxu0 %vm631_vm0, %v5802_v62  ;;  %6581 = vrot.lane.b32.xlu0 %v14593_v61, %s17521_s23 }
 0x5df   : > { %6579 = vrot.lane.b32.xlu1 %v14589_v63, %s17521_s23 }
 0x5e0   : > { %11132 = vmatpush1.bf16.msra.mxu1 %v11131_v17 }
 0x5e1   : > { %6030 = vmatmul.mubr.f32.gmra.mrb[18].mxu0 %v5801_v19  ;;  %11181 = vmatprep.subr.bf16.mxu1 %v11451_v6  ;;  %v14617_v29 = vpop.permute.xlu0 %5897 }
 0x5e2   : > { %10888 = vmatprep.mubr.msk.f32.mxu0 %vm631_vm0, %v5804_v8  ;;  %6585 = vrot.lane.b32.xlu0 %v14606_v4, %s17521_s23 }
 0x5e3   : > { %6583 = vrot.lane.b32.xlu1 %v14609_v16, %s17521_s23  ;;  %6137 = vmatmul.mubr.f32.vlgmr.msra.gmra.mrb[8].mxu1 %v5799_v39  ;;  %v14739_v39 = vld [vmem:[#allocation4 + $0xa8] sm:$0xff] }
 0x5e4   : > { %10895 = vmatprep.mubr.msk.f32.mxu1 %vm631_vm0, %v5802_v62 }
 0x5e5   : > { %6036 = vmatmul.mubr.f32.gmra.mrb[20].mxu0 %v5803_v23  ;;  %v14637_v44 = vpop.permute.xlu0 %5907 }
 0x5e6   : > { %v14627_v46 = vpop.permute.xlu1 %5902  ;;  %10889 = vmatprep.mubr.msk.f32.mxu0 %vm631_vm0, %v5806_v54  ;;  %6591 = vrot.lane.b32.xlu0 %v14625_v3, %s17521_s23 }
 0x5e7   : > { %6589 = vrot.lane.b32.xlu1 %v14629_v10, %s17521_s23  ;;  %6142 = vmatmul.mubr.f32.gmra.mrb[10].mxu1 %v5801_v19 }
 0x5e8   : > { %10896 = vmatprep.mubr.msk.f32.mxu1 %vm631_vm0, %v5804_v8 }
 0x5e9   : > { %6042 = vmatmul.mubr.f32.gmra.mrb[22].mxu0 %v5805_v31  ;;  %v14653_v32 = vpop.permute.xlu0 %5917 }
 0x5ea   : > { %v14647_v40 = vpop.permute.xlu1 %5912  ;;  %10890 = vmatprep.mubr.msk.f32.mxu0 %vm631_vm0, %v5808_v33  ;;  %6595 = vrot.lane.b32.xlu0 %v14655_v34, %s17521_s23 }
 0x5eb   : > { %6147 = vmatmul.mubr.f32.gmra.mrb[12].mxu1 %v5803_v23  ;;  %6587 = vrot.lane.b32.xlu1 %v14645_v30, %s17521_s23 }
 0x5ec   : > { %10897 = vmatprep.mubr.msk.f32.mxu1 %vm631_vm0, %v5806_v54 }
 0x5ed   : > { %6048 = vmatmul.mubr.f32.gmra.mrb[24].mxu0 %v5807_v41  ;;  %v14673_v45 = vpop.permute.xlu0 %5927 }
 0x5ee   : > { %v14667_v25 = vpop.permute.xlu1 %5922  ;;  %10891 = vmatprep.mubr.msk.f32.mxu0 %vm631_vm0, %v5810_v48  ;;  %6601 = vrot.lane.b32.xlu0 %v14675_v12, %s17521_s23 }
 0x5ef   : > { %6152 = vmatmul.mubr.f32.gmra.mrb[14].mxu1 %v5805_v31  ;;  %6597 = vrot.lane.b32.xlu1 %v14665_v26, %s17521_s23 }
 0x5f0   : > { %10898 = vmatprep.mubr.msk.f32.mxu1 %vm631_vm0, %v5808_v33 }
 0x5f1   : > { %6054 = vmatmul.mubr.f32.gmra.mrb[26].mxu0 %v5809_v2  ;;  %v6250_v57 = vpop.permute.xlu0 %6249 }
 0x5f2   : > { %v14689_v21 = vpop.permute.xlu1 %5932  ;;  %10892 = vmatprep.mubr.msk.f32.mxu0 %vm631_vm0, %v5812_v47  ;;  %6593 = vrot.lane.b32.xlu0 %v14687_v60, %s17521_s23 }
 0x5f3   : > { %6157 = vmatmul.mubr.f32.gmra.mrb[16].mxu1 %v5807_v41  ;;  %6603 = vrot.lane.b32.xlu1 %v14685_v55, %s17521_s23 }
 0x5f4   : > { %10899 = vmatprep.mubr.msk.f32.mxu1 %vm631_vm0, %v5810_v48 }
 0x5f5   : > { %6060 = vmatmul.mubr.f32.gmra.mrb[28].mxu0 %v5811_v14  ;;  %v6254_v52 = vpop.permute.xlu0 %6253 }
 0x5f6   : > { %v6252_v38 = vpop.permute.xlu1 %6251  ;;  %10893 = vmatprep.mubr.msk.f32.mxu0 %vm631_vm0, %v5814_v36  ;;  %6339 = vst.msk [vmem:[#allocation5 + $0x10] sm:$0xff] %vm631_vm0, %v6254_v52  ;;  %6607 = vrot.lane.b32.xlu0 %v14709_v1, %s17521_s23 }
 0x5f7   : > { %6162 = vmatmul.mubr.f32.gmra.mrb[18].mxu1 %v5809_v2  ;;  %6599 = vrot.lane.b32.xlu1 %v14703_v51, %s17521_s23  ;;  %v6298_v49 = vsel %vm711_vm9, %v6252_v38, %v6254_v52  ;;  %v6297_v59 = vsel %vm711_vm9, %v6250_v57, %v6252_v38  ;;  %v10903_v57 = vld [vmem:[%s17202_s4 + $0x88] sm:$0xff] }
 0x5f8   : > { %10900 = vmatprep.mubr.msk.f32.mxu1 %vm631_vm0, %v5812_v47 }
 0x5f9   : > { %6066 = vmatmul.mubr.f32.gmra.mrb[30].mxu0 %v5813_v5  ;;  %v6258_v56 = vpop.permute.xlu0 %6257 }
 0x5fa   : > { %v6256_v0 = vpop.permute.xlu1 %6255  ;;  %6613 = vrot.lane.b32.xlu0 %v14719_v22, %s17521_s23  ;;  %10918 = vmatprep.mubr.msk.f32.mxu0 %vm631_vm0, %v10903_v57 }
 0x5fb   : > { %6167 = vmatmul.mubr.f32.gmra.mrb[20].mxu1 %v5811_v14  ;;  %6609 = vrot.lane.b32.xlu1 %v14717_v27, %s17521_s23  ;;  %v6299_v11 = vsel %vm711_vm9, %v6256_v0, %v6258_v56 }
 0x5fc   : > { %10901 = vmatprep.mubr.msk.f32.mxu1 %vm631_vm0, %v5814_v36  ;;  %v11135_v62 = vpack.c.bf16 %v6299_v11, %v6297_v59 }
 0x5fd   : > { %v6262_v18 = vpop.permute.xlu0 %6261  ;;  %v6700_v19 = vld [vmem:[#allocation5 + $0x10] sm:$0xff] }
 0x5fe   : > { %v6260_v43 = vpop.permute.xlu1 %6259  ;;  %6605 = vrot.lane.b32.xlu0 %v14728_v24, %s17521_s23 }
 0x5ff   : > { %6342 = vst.msk [vmem:[#allocation5 + $0x28] sm:$0xff] %vm631_vm0, %v6260_v43  ;;  %v6300_v13 = vsel %vm711_vm9, %v6258_v56, %v6260_v43  ;;  %6172 = vmatmul.mubr.f32.gmra.mrb[22].mxu1 %v5813_v5  ;;  %6615 = vrot.lane.b32.xlu1 %v14726_v53, %s17521_s23 }
 0x600   : > { %v11133_v7 = vpack.c.bf16 %v6300_v13, %v6298_v49  ;;  %10926 = vmatprep.mubr.msk.f32.mxu1 %vm631_vm0, %v10903_v57 }
 0x601   : > { %v6266_v50 = vpop.permute.xlu0 %6265 }
 0x602   : > { %v6264_v42 = vpop.permute.xlu1 %6263  ;;  %11134 = vmatprep.subr.bf16.mxu0 %v11133_v7  ;;  %6345 = vst.msk [vmem:[#allocation5 + $0x40] sm:$0xff] %vm631_vm0, %v6266_v50  ;;  %7134 = vrot.lane.b32.xlu0 %v14570_v15, %s11438_s17 }
 0x603   : > { %11136 = vmatpush1.bf16.msra.mxu0 %v11135_v62  ;;  %6611 = vrot.lane.b32.xlu1 %v14739_v39, %s17521_s23  ;;  %v6302_v41 = vsel %vm711_vm9, %v6264_v42, %v6266_v50  ;;  %v6301_v47 = vsel %vm711_vm9, %v6262_v18, %v6264_v42 }
 0x605   : > { %v6270_v54 = vpop.permute.xlu0 %6269 }
 0x606   : > { %v6268_v17 = vpop.permute.xlu1 %6267  ;;  %v6703_v8 = vld [vmem:[#allocation5 + $0x28] sm:$0xff]  ;;  %7140 = vrot.lane.b32.xlu0 %v14584_v58, %s11438_s17 }
 0x607   : > { %v11182_v23 = vpack.c.bf16 %v6703_v8, %v6700_v19  ;;  %7136 = vrot.lane.b32.xlu1 %v14564_v37, %s11438_s17  ;;  %v6303_v33 = vsel %vm711_vm9, %v6268_v17, %v6270_v54 }
 0x608   : > { %v11139_v36 = vpack.c.bf16 %v6303_v33, %v6301_v47 }
 0x609   : > { %11183 = vmatpush1.bf16.msra.mxu1 %v11182_v23  ;;  %v6274_v2 = vpop.permute.xlu0 %6273  ;;  %v6706_v0 = vld [vmem:[#allocation5 + $0x40] sm:$0xff] }
 0x60a   : > { %v6272_v31 = vpop.permute.xlu1 %6271  ;;  %11184 = vmatprep.subr.bf16.mxu1 %v11451_v6  ;;  %7132 = vrot.lane.b32.xlu0 %v14557_v35, %s11438_s17 }
 0x60b   : > { %6348 = vst.msk [vmem:[#allocation5 + $0x58] sm:$0xff] %vm631_vm0, %v6272_v31  ;;  %v6304_v48 = vsel %vm711_vm9, %v6270_v54, %v6272_v31  ;;  %7142 = vrot.lane.b32.xlu1 %v14589_v63, %s11438_s17 }
 0x60c   : > { %v11137_v14 = vpack.c.bf16 %v6304_v48, %v6302_v41 }
 0x60d   : > { %v6278_v5 = vpop.permute.xlu0 %6277 }
 0x60e   : > { %v6276_v38 = vpop.permute.xlu1 %6275  ;;  %11138 = vmatprep.subr.bf16.mxu0 %v11137_v14  ;;  %6351 = vst.msk [vmem:[#allocation5 + $0x70] sm:$0xff] %vm631_vm0, %v6278_v5  ;;  %7146 = vrot.lane.b32.xlu0 %v14609_v16, %s11438_s17 }
 0x60f   : > { %11140 = vmatpush1.bf16.msra.mxu0 %v11139_v36  ;;  %7138 = vrot.lane.b32.xlu1 %v14575_v28, %s11438_s17  ;;  %v6306_v18 = vsel %vm711_vm9, %v6276_v38, %v6278_v5  ;;  %v6305_v62 = vsel %vm711_vm9, %v6274_v2, %v6276_v38 }
 0x611   : > { %v6282_v11 = vpop.permute.xlu0 %6281 }
 0x612   : > { %v6280_v52 = vpop.permute.xlu1 %6279  ;;  %v6709_v56 = vld [vmem:[#allocation5 + $0x58] sm:$0xff]  ;;  %7152 = vrot.lane.b32.xlu0 %v14629_v10, %s11438_s17 }
 0x613   : > { %v11185_v43 = vpack.c.bf16 %v6709_v56, %v6706_v0  ;;  %7148 = vrot.lane.b32.xlu1 %v14606_v4, %s11438_s17  ;;  %v6307_v13 = vsel %vm711_vm9, %v6280_v52, %v6282_v11 }
 0x614   : > { %v11143_v50 = vpack.c.bf16 %v6307_v13, %v6305_v62 }
 0x615   : > { %11186 = vmatpush1.bf16.msra.mxu1 %v11185_v43  ;;  %v6286_v7 = vpop.permute.xlu0 %6285  ;;  %v6712_v23 = vld [vmem:[#allocation5 + $0x70] sm:$0xff] }
 0x616   : > { %v6284_v49 = vpop.permute.xlu1 %6283  ;;  %11187 = vmatprep.subr.bf16.mxu1 %v11451_v6  ;;  %7144 = vrot.lane.b32.xlu0 %v14593_v61, %s11438_s17 }
 0x617   : > { %6354 = vst.msk [vmem:[#allocation5 + $0x88] sm:$0xff] %vm631_vm0, %v6284_v49  ;;  %v6308_v59 = vsel %vm711_vm9, %v6282_v11, %v6284_v49  ;;  %7154 = vrot.lane.b32.xlu1 %v14625_v3, %s11438_s17 }
 0x618   : > { %v11141_v42 = vpack.c.bf16 %v6308_v59, %v6306_v18 }
 0x619   : > { %v6290_v19 = vpop.permute.xlu0 %6289 }
 0x61a   : > { %v6288_v17 = vpop.permute.xlu1 %6287  ;;  %11142 = vmatprep.subr.bf16.mxu0 %v11141_v42  ;;  %6357 = vst.msk [vmem:[#allocation5 + $0xa0] sm:$0xff] %vm631_vm0, %v6290_v19  ;;  %7158 = vrot.lane.b32.xlu0 %v14655_v34, %s11438_s17 }
 0x61b   : > { %11144 = vmatpush1.bf16.msra.mxu0 %v11143_v50  ;;  %7150 = vrot.lane.b32.xlu1 %v14645_v30, %s11438_s17  ;;  %v6310_v2 = vsel %vm711_vm9, %v6288_v17, %v6290_v19  ;;  %v6309_v57 = vsel %vm711_vm9, %v6286_v7, %v6288_v17 }
 0x61d   : > { %v6294_v33 = vpop.permute.xlu0 %6293 }
 0x61e   : > { %v6292_v8 = vpop.permute.xlu1 %6291  ;;  %v6715_v54 = vld [vmem:[#allocation5 + $0x88] sm:$0xff]  ;;  %7164 = vrot.lane.b32.xlu0 %v14675_v12, %s11438_s17 }
 0x61f   : > { %v11188_v31 = vpack.c.bf16 %v6715_v54, %v6712_v23  ;;  %7160 = vrot.lane.b32.xlu1 %v14665_v26, %s11438_s17  ;;  %v6311_v48 = vsel %vm711_vm9, %v6292_v8, %v6294_v33 }
 0x620   : > { %v11147_v38 = vpack.c.bf16 %v6311_v48, %v6309_v57 }
 0x621   : > { %11189 = vmatpush1.bf16.msra.mxu1 %v11188_v31  ;;  %v6410_v14 = vpop.permute.xlu0 %6409  ;;  %v6718_v56 = vld [vmem:[#allocation5 + $0xa0] sm:$0xff] }
 0x622   : > { %v6296_v41 = vpop.permute.xlu1 %6295  ;;  %11190 = vmatprep.subr.bf16.mxu1 %v11451_v6  ;;  %7156 = vrot.lane.b32.xlu0 %v14687_v60, %s11438_s17 }
 0x623   : > { %6360 = vst.msk [vmem:[#allocation5 + $0xb8] sm:$0xff] %vm631_vm0, %v6296_v41  ;;  %v6312_v47 = vsel %vm711_vm9, %v6294_v33, %v6296_v41  ;;  %7166 = vrot.lane.b32.xlu1 %v14685_v55, %s11438_s17 }
 0x624   : > { %v11145_v36 = vpack.c.bf16 %v6312_v47, %v6310_v2 }
 0x625   : > { %v6414_v52 = vpop.permute.xlu0 %6413 }
 0x626   : > { %v6412_v5 = vpop.permute.xlu1 %6411  ;;  %11146 = vmatprep.subr.bf16.mxu0 %v11145_v36  ;;  %6499 = vst.msk [vmem:[#allocation5 + $0xd0] sm:$0xff] %vm631_vm0, %v6414_v52  ;;  %7170 = vrot.lane.b32.xlu0 %v14709_v1, %s11438_s17 }
 0x627   : > { %11148 = vmatpush1.bf16.msra.mxu0 %v11147_v38  ;;  %7162 = vrot.lane.b32.xlu1 %v14703_v51, %s11438_s17  ;;  %v6458_v59 = vsel %vm732_vm11, %v6412_v5, %v6414_v52  ;;  %v6457_v42 = vsel %vm732_vm11, %v6410_v14, %v6412_v5 }
 0x629   : > { %v6418_v49 = vpop.permute.xlu0 %6417 }
 0x62a   : > { %v6416_v0 = vpop.permute.xlu1 %6415  ;;  %v6721_v43 = vld [vmem:[#allocation5 + $0xb8] sm:$0xff]  ;;  %7176 = vrot.lane.b32.xlu0 %v14719_v22, %s11438_s17 }
 0x62b   : > { %v11191_v11 = vpack.c.bf16 %v6721_v43, %v6718_v56  ;;  %7172 = vrot.lane.b32.xlu1 %v14717_v27, %s11438_s17  ;;  %v6459_v18 = vsel %vm732_vm11, %v6416_v0, %v6418_v49 }
 0x62c   : > { %v11151_v17 = vpack.c.bf16 %v6459_v18, %v6457_v42 }
 0x62d   : > { %11192 = vmatpush1.bf16.msra.mxu1 %v11191_v11  ;;  %v6422_v62 = vpop.permute.xlu0 %6421  ;;  %v6724_v54 = vld [vmem:[#allocation5 + $0xd0] sm:$0xff] }
 0x62e   : > { %v6420_v13 = vpop.permute.xlu1 %6419  ;;  %11193 = vmatprep.subr.bf16.mxu1 %v11451_v6  ;;  %7168 = vrot.lane.b32.xlu0 %v14728_v24, %s11438_s17 }
 0x62f   : > { %6502 = vst.msk [vmem:[#allocation5 + $0xe8] sm:$0xff] %vm631_vm0, %v6420_v13  ;;  %v6460_v7 = vsel %vm732_vm11, %v6418_v49, %v6420_v13  ;;  %7178 = vrot.lane.b32.xlu1 %v14726_v53, %s11438_s17 }
 0x630   : > { %v11149_v50 = vpack.c.bf16 %v6460_v7, %v6458_v59 }
 0x631   : > { %v6426_v8 = vpop.permute.xlu0 %6425 }
 0x632   : > { %v6424_v19 = vpop.permute.xlu1 %6423  ;;  %11150 = vmatprep.subr.bf16.mxu0 %v11149_v50  ;;  %6505 = vst.msk [vmem:[#allocation5 + $0x100] sm:$0xff] %vm631_vm0, %v6426_v8  ;;  %7294 = vrot.lane.b32.xlu0 %v14570_v15, %s17522_s9 }
 0x633   : > { %11152 = vmatpush1.bf16.msra.mxu0 %v11151_v17  ;;  %7174 = vrot.lane.b32.xlu1 %v14739_v39, %s11438_s17  ;;  %v6462_v47 = vsel %vm732_vm11, %v6424_v19, %v6426_v8  ;;  %v6461_v36 = vsel %vm732_vm11, %v6422_v62, %v6424_v19 }
 0x635   : > { %v6430_v41 = vpop.permute.xlu0 %6429 }
 0x636   : > { %v6428_v23 = vpop.permute.xlu1 %6427  ;;  %v6727_v31 = vld [vmem:[#allocation5 + $0xe8] sm:$0xff]  ;;  %7300 = vrot.lane.b32.xlu0 %v14584_v58, %s17522_s9 }
 0x637   : > { %v11194_v33 = vpack.c.bf16 %v6727_v31, %v6724_v54  ;;  %7296 = vrot.lane.b32.xlu1 %v14564_v37, %s17522_s9  ;;  %v6463_v2 = vsel %vm732_vm11, %v6428_v23, %v6430_v41 }
 0x638   : > { %v11155_v5 = vpack.c.bf16 %v6463_v2, %v6461_v36 }
 0x639   : > { %11195 = vmatpush1.bf16.msra.mxu1 %v11194_v33  ;;  %v6434_v57 = vpop.permute.xlu0 %6433  ;;  %v6730_v56 = vld [vmem:[#allocation5 + $0x100] sm:$0xff] }
 0x63a   : > { %v6432_v48 = vpop.permute.xlu1 %6431  ;;  %11196 = vmatprep.subr.bf16.mxu1 %v11451_v6  ;;  %7292 = vrot.lane.b32.xlu0 %v14557_v35, %s17522_s9 }
 0x63b   : > { %6508 = vst.msk [vmem:[#allocation5 + $0x118] sm:$0xff] %vm631_vm0, %v6432_v48  ;;  %v6464_v14 = vsel %vm732_vm11, %v6430_v41, %v6432_v48  ;;  %7302 = vrot.lane.b32.xlu1 %v14589_v63, %s17522_s9 }
 0x63c   : > { %v11153_v38 = vpack.c.bf16 %v6464_v14, %v6462_v47 }
 0x63d   : > { %v6438_v0 = vpop.permute.xlu0 %6437 }
 0x63e   : > { %v6436_v52 = vpop.permute.xlu1 %6435  ;;  %11154 = vmatprep.subr.bf16.mxu0 %v11153_v38  ;;  %6511 = vst.msk [vmem:[#allocation5 + $0x130] sm:$0xff] %vm631_vm0, %v6438_v0  ;;  %7306 = vrot.lane.b32.xlu0 %v14609_v16, %s17522_s9 }
 0x63f   : > { %11156 = vmatpush1.bf16.msra.mxu0 %v11155_v5  ;;  %7298 = vrot.lane.b32.xlu1 %v14575_v28, %s17522_s9  ;;  %v6466_v18 = vsel %vm732_vm11, %v6436_v52, %v6438_v0 }
 0x641   : > { %v6442_v49 = vpop.permute.xlu0 %6441 }
 0x642   : > { %v6440_v63 = vpop.permute.xlu1 %6439  ;;  %v6733_v43 = vld [vmem:[#allocation5 + $0x118] sm:$0xff]  ;;  %7312 = vrot.lane.b32.xlu0 %v14629_v10, %s17522_s9 }
 0x643   : > { %v11197_v11 = vpack.c.bf16 %v6733_v43, %v6730_v56  ;;  %7308 = vrot.lane.b32.xlu1 %v14606_v4, %s17522_s9  ;;  %v6467_v28 = vsel %vm732_vm11, %v6440_v63, %v6442_v49  ;;  %v6465_v4 = vsel %vm732_vm11, %v6434_v57, %v6436_v52 }
 0x644   : > { %v11159_v42 = vpack.c.bf16 %v6467_v28, %v6465_v4 }
 0x645   : > { %11198 = vmatpush1.bf16.msra.mxu1 %v11197_v11  ;;  %v6446_v7 = vpop.permute.xlu0 %6445  ;;  %v6736_v19 = vld [vmem:[#allocation5 + $0x130] sm:$0xff] }
 0x646   : > { %v6444_v13 = vpop.permute.xlu1 %6443  ;;  %11199 = vmatprep.subr.bf16.mxu1 %v11451_v6  ;;  %7304 = vrot.lane.b32.xlu0 %v14593_v61, %s17522_s9 }
 0x647   : > { %6514 = vst.msk [vmem:[#allocation5 + $0x148] sm:$0xff] %vm631_vm0, %v6444_v13  ;;  %v6468_v59 = vsel %vm732_vm11, %v6442_v49, %v6444_v13  ;;  %7314 = vrot.lane.b32.xlu1 %v14625_v3, %s17522_s9 }
 0x648   : > { %v11157_v62 = vpack.c.bf16 %v6468_v59, %v6466_v18 }
 0x649   : > { %v6450_v17 = vpop.permute.xlu0 %6449 }
 0x64a   : > { %v6448_v50 = vpop.permute.xlu1 %6447  ;;  %11158 = vmatprep.subr.bf16.mxu0 %v11157_v62  ;;  %6517 = vst.msk [vmem:[#allocation5 + $0x160] sm:$0xff] %vm631_vm0, %v6450_v17  ;;  %7318 = vrot.lane.b32.xlu0 %v14655_v34, %s17522_s9 }
 0x64b   : > { %11160 = vmatpush1.bf16.msra.mxu0 %v11159_v42  ;;  %7310 = vrot.lane.b32.xlu1 %v14645_v30, %s17522_s9  ;;  %v6470_v41 = vsel %vm732_vm11, %v6448_v50, %v6450_v17  ;;  %v6469_v47 = vsel %vm732_vm11, %v6446_v7, %v6448_v50 }
 0x64d   : > { %v6454_v54 = vpop.permute.xlu0 %6453 }
 0x64e   : > { %v6452_v3 = vpop.permute.xlu1 %6451  ;;  %v6739_v8 = vld [vmem:[#allocation5 + $0x148] sm:$0xff]  ;;  %7324 = vrot.lane.b32.xlu0 %v14675_v12, %s17522_s9 }
 0x64f   : > { %v11200_v23 = vpack.c.bf16 %v6739_v8, %v6736_v19  ;;  %7320 = vrot.lane.b32.xlu1 %v14665_v26, %s17522_s9  ;;  %v6471_v33 = vsel %vm732_vm11, %v6452_v3, %v6454_v54 }
 0x650   : > { %v11163_v57 = vpack.c.bf16 %v6471_v33, %v6469_v47  ;;  %v7407_v33 = vld [vmem:[#allocation4 + $0x18] sm:$0xff] }
 0x651   : > { %11201 = vmatpush1.bf16.msra.mxu1 %v11200_v23  ;;  %v6570_v2 = vpop.permute.xlu0 %6569  ;;  %v6742_v52 = vld [vmem:[#allocation5 + $0x160] sm:$0xff] }
 0x652   : > { %v6456_v31 = vpop.permute.xlu1 %6455  ;;  %11202 = vmatprep.subr.bf16.mxu1 %v11451_v6  ;;  %7316 = vrot.lane.b32.xlu0 %v14687_v60, %s17522_s9 }
 0x653   : > { %6520 = vst.msk [vmem:[#allocation5 + $0x178] sm:$0xff] %vm631_vm0, %v6456_v31  ;;  %v6472_v48 = vsel %vm732_vm11, %v6454_v54, %v6456_v31  ;;  %7326 = vrot.lane.b32.xlu1 %v14685_v55, %s17522_s9 }
 0x654   : > { %v11161_v14 = vpack.c.bf16 %v6472_v48, %v6470_v41 }
 0x655   : > { %v6574_v38 = vpop.permute.xlu0 %6573 }
 0x656   : > { %v6572_v36 = vpop.permute.xlu1 %6571  ;;  %11162 = vmatprep.subr.bf16.mxu0 %v11161_v14  ;;  %6659 = vst.msk [vmem:[#allocation5 + $0x190] sm:$0xff] %vm631_vm0, %v6574_v38  ;;  %7330 = vrot.lane.b32.xlu0 %v14709_v1, %s17522_s9  ;;  %v7412_v14 = vld [vmem:[#allocation4 + $0x40] sm:$0xff] }
 0x657   : > { %11164 = vmatpush1.bf16.msra.mxu0 %v11163_v57  ;;  %7322 = vrot.lane.b32.xlu1 %v14703_v51, %s17522_s9  ;;  %v6618_v49 = vsel %vm753_vm13, %v6572_v36, %v6574_v38 }
 0x659   : > { %v6578_v56 = vpop.permute.xlu0 %6577 }
 0x65a   : > { %v6576_v5 = vpop.permute.xlu1 %6575  ;;  %v6745_v0 = vld [vmem:[#allocation5 + $0x178] sm:$0xff]  ;;  %7336 = vrot.lane.b32.xlu0 %v14719_v22, %s17522_s9 }
 0x65b   : > { %v11203_v63 = vpack.c.bf16 %v6745_v0, %v6742_v52  ;;  %7332 = vrot.lane.b32.xlu1 %v14717_v27, %s17522_s9  ;;  %v6619_v11 = vsel %vm753_vm13, %v6576_v5, %v6578_v56  ;;  %v6617_v27 = vsel %vm753_vm13, %v6570_v2, %v6572_v36 }
 0x65c   : > { %v11167_v59 = vpack.c.bf16 %v6619_v11, %v6617_v27 }
 0x65d   : > { %11204 = vmatpush1.bf16.msra.mxu1 %v11203_v63  ;;  %v6582_v28 = vpop.permute.xlu0 %6581  ;;  %v6748_v42 = vld [vmem:[#allocation5 + $0x190] sm:$0xff] }
 0x65e   : > { %v6580_v43 = vpop.permute.xlu1 %6579  ;;  %11205 = vmatprep.subr.bf16.mxu1 %v11451_v6  ;;  %7328 = vrot.lane.b32.xlu0 %v14728_v24, %s17522_s9 }
 0x65f   : > { %6662 = vst.msk [vmem:[#allocation5 + $0x1a8] sm:$0xff] %vm631_vm0, %v6580_v43  ;;  %v6620_v13 = vsel %vm753_vm13, %v6578_v56, %v6580_v43  ;;  %7338 = vrot.lane.b32.xlu1 %v14726_v53, %s17522_s9 }
 0x660   : > { %v11165_v18 = vpack.c.bf16 %v6620_v13, %v6618_v49 }
 0x661   : > { %v6586_v4 = vpop.permute.xlu0 %6585 }
 0x662   : > { %v6584_v7 = vpop.permute.xlu1 %6583  ;;  %11166 = vmatprep.subr.bf16.mxu0 %v11165_v18  ;;  %6665 = vst.msk [vmem:[#allocation5 + $0x1c0] sm:$0xff] %vm631_vm0, %v6586_v4  ;;  %7454 = vrot.lane.b32.xlu0 %v14570_v15, %s17523_s14 }
 0x663   : > { %11168 = vmatpush1.bf16.msra.mxu0 %v11167_v59  ;;  %7334 = vrot.lane.b32.xlu1 %v14739_v39, %s17522_s9  ;;  %v6622_v24 = vsel %vm753_vm13, %v6584_v7, %v6586_v4  ;;  %v7409_v39 = vld [vmem:[#allocation4 + $0x28] sm:$0xff]  ;;  %v6621_v23 = vsel %vm753_vm13, %v6582_v28, %v6584_v7 }
 0x665   : > { %v6592_v3 = vpop.permute.xlu0 %6591 }
 0x666   : > { %v6590_v62 = vpop.permute.xlu1 %6589  ;;  %v6751_v50 = vld [vmem:[#allocation5 + $0x1a8] sm:$0xff]  ;;  %6668 = vst.msk [vmem:[#allocation5 + $0x1d8] sm:$0xff] %vm631_vm0, %v6592_v3  ;;  %7460 = vrot.lane.b32.xlu0 %v14584_v58, %s17523_s14 }
 0x667   : > { %v11206_v17 = vpack.c.bf16 %v6751_v50, %v6748_v42  ;;  %7456 = vrot.lane.b32.xlu1 %v14564_v37, %s17523_s14  ;;  %v6624_v19 = vsel %vm753_vm13, %v6590_v62, %v6592_v3 }
 0x668   : > { %v11169_v15 = vpack.c.bf16 %v6624_v19, %v6622_v24 }
 0x669   : > { %11207 = vmatpush1.bf16.msra.mxu1 %v11206_v17  ;;  %v6596_v37 = vpop.permute.xlu0 %6595  ;;  %v6754_v58 = vld [vmem:[#allocation5 + $0x1c0] sm:$0xff] }
 0x66a   : > { %v6588_v8 = vpop.permute.xlu1 %6587  ;;  %11208 = vmatprep.subr.bf16.mxu1 %v11451_v6  ;;  %11170 = vmatprep.subr.bf16.mxu0 %v11169_v15  ;;  %v10904_v15 = vld [vmem:[%s17202_s4 + $0x90] sm:$0xff] }
 0x66b   : > { %v6623_v54 = vsel %vm753_vm13, %v6588_v8, %v6590_v62  ;;  %7462 = vrot.lane.b32.xlu1 %v7409_v39, %s17523_s14  ;;  %7452 = vrot.lane.b32.xlu0 %v14557_v35, %s17523_s14 }
 0x66c   : > { %v11171_v31 = vpack.c.bf16 %v6623_v54, %v6621_v23 }
 0x66d   : > { %v6602_v48 = vpop.permute.xlu0 %6601  ;;  %v6757_v2 = vld [vmem:[#allocation5 + $0x1d8] sm:$0xff] }
 0x66e   : > { %v6598_v41 = vpop.permute.xlu1 %6597  ;;  %11172 = vmatpush1.bf16.msra.mxu0 %v11171_v31  ;;  %v11209_v47 = vpack.c.bf16 %v6757_v2, %v6754_v58  ;;  %v7425_v2 = vld [vmem:[#allocation4 + $0xa8] sm:$0xff] }
 0x66f   : > { %6671 = vst.msk [vmem:[#allocation5 + $0x1f0] sm:$0xff] %vm631_vm0, %v6598_v41  ;;  %7458 = vrot.lane.b32.xlu1 %v7407_v33, %s17523_s14  ;;  %7466 = vrot.lane.b32.xlu0 %v14609_v16, %s17523_s14  ;;  %v6626_v35 = vsel %vm753_vm13, %v6596_v37, %v6598_v41  ;;  %v7415_v16 = vld [vmem:[#allocation4 + $0x58] sm:$0xff]  ;;  %v10906_v33 = vld [vmem:[%s17202_s4 + $0xa0] sm:$0xff] }
 0x670   : > { %11210 = vmatpush1.bf16.msra.mxu1 %v11209_v47 }
 0x671   : > { %v6594_v38 = vpop.permute.xlu0 %6593  ;;  %11211 = vmatprep.subr.bf16.mxu1 %v11451_v6 }
 0x672   : > { %v6604_v57 = vpop.permute.xlu1 %6603  ;;  %v6625_v63 = vsel %vm753_vm13, %v6594_v38, %v6596_v37  ;;  %v7422_v37 = vld [vmem:[#allocation4 + $0x90] sm:$0xff]  ;;  %v10908_v38 = vld [vmem:[%s17202_s4 + $0xb0] sm:$0xff] }
 0x673   : > { %6674 = vst.msk [vmem:[#allocation5 + $0x208] sm:$0xff] %vm631_vm0, %v6604_v57  ;;  %v6628_v36 = vsel %vm753_vm13, %v6602_v48, %v6604_v57  ;;  %7468 = vrot.lane.b32.xlu1 %v7412_v14, %s17523_s14  ;;  %7472 = vrot.lane.b32.xlu0 %v14629_v10, %s17523_s14 }
 0x674   : > { %v11173_v5 = vpack.c.bf16 %v6628_v36, %v6626_v35 }
 0x675   : > { %v6608_v56 = vpop.permute.xlu0 %6607 }
 0x676   : > { %v6600_v52 = vpop.permute.xlu1 %6599  ;;  %11174 = vmatprep.subr.bf16.mxu0 %v11173_v5  ;;  %v6760_v49 = vld [vmem:[#allocation5 + $0x1f0] sm:$0xff] }
 0x677   : > { %v6627_v0 = vsel %vm753_vm13, %v6600_v52, %v6602_v48  ;;  %7474 = vrot.lane.b32.xlu1 %v7415_v16, %s17523_s14  ;;  %7464 = vrot.lane.b32.xlu0 %v14593_v61, %s17523_s14  ;;  %v10911_v5 = vld [vmem:[%s17202_s4 + $0xc8] sm:$0xff] }
 0x678   : > { %v11175_v43 = vpack.c.bf16 %v6627_v0, %v6625_v63  ;;  %v10910_v63 = vld [vmem:[%s17202_s4 + $0xc0] sm:$0xff] }
 0x679   : > { %v6614_v28 = vpop.permute.xlu0 %6613 }
 0x67a   : > { %v6610_v11 = vpop.permute.xlu1 %6609  ;;  %v6763_v13 = vld [vmem:[#allocation5 + $0x208] sm:$0xff]  ;;  %11176 = vmatpush1.bf16.msra.mxu0 %v11175_v43  ;;  %v10913_v43 = vld [vmem:[%s17202_s4 + $0xd8] sm:$0xff] }
 0x67b   : > { %6677 = vst.msk [vmem:[#allocation5 + $0x220] sm:$0xff] %vm631_vm0, %v6610_v11  ;;  %v11212_v10 = vpack.c.bf16 %v6763_v13, %v6760_v49  ;;  %7470 = vrot.lane.b32.xlu1 %v14645_v30, %s17523_s14  ;;  %7478 = vrot.lane.b32.xlu0 %v14655_v34, %s17523_s14  ;;  %v6630_v61 = vsel %vm753_vm13, %v6608_v56, %v6610_v11 }
 0x67d   : > { %11213 = vmatpush1.bf16.msra.mxu1 %v11212_v10  ;;  %v6606_v59 = vpop.permute.xlu0 %6605 }
 0x67e   : > { %v6616_v27 = vpop.permute.xlu1 %6615  ;;  %11214 = vmatprep.subr.bf16.mxu1 %v11451_v6  ;;  %v6629_v4 = vsel %vm753_vm13, %v6606_v59, %v6608_v56 }
 0x67f   : > { %6680 = vst.msk [vmem:[#allocation5 + $0x238] sm:$0xff] %vm631_vm0, %v6616_v27  ;;  %v6632_v18 = vsel %vm753_vm13, %v6614_v28, %v6616_v27  ;;  %7480 = vrot.lane.b32.xlu1 %v14665_v26, %s17523_s14  ;;  %7484 = vrot.lane.b32.xlu0 %v14675_v12, %s17523_s14  ;;  %v10902_v12 = vld [vmem:[%s17202_s4 + $0x80] sm:$0xff]  ;;  %v10915_v27 = vld [vmem:[%s17202_s4 + $0xe8] sm:$0xff] }
 0x680   : > { %v11177_v30 = vpack.c.bf16 %v6632_v18, %v6630_v61 }
 0x681   : > { %v7135_v62 = vpop.permute.xlu0 %7134 }
 0x682   : > { %v6612_v7 = vpop.permute.xlu1 %6611  ;;  %11178 = vmatprep.subr.bf16.mxu0 %v11177_v30  ;;  %v6766_v26 = vld [vmem:[#allocation5 + $0x220] sm:$0xff] }
 0x683   : > { %v6631_v34 = vsel %vm753_vm13, %v6612_v7, %v6614_v28  ;;  %7486 = vrot.lane.b32.xlu1 %v14685_v55, %s17523_s14  ;;  %7476 = vrot.lane.b32.xlu0 %v14687_v60, %s17523_s14  ;;  %v10905_v55 = vld [vmem:[%s17202_s4 + $0x98] sm:$0xff]  ;;  %v10912_v28 = vld [vmem:[%s17202_s4 + $0xd0] sm:$0xff] }
 0x684   : > { %v11179_v42 = vpack.c.bf16 %v6631_v34, %v6629_v4  ;;  %v7424_v60 = vld [vmem:[#allocation4 + $0xa0] sm:$0xff] }
 0x685   : > { %v7141_v19 = vpop.permute.xlu0 %7140 }
 0x686   : > { %v7137_v50 = vpop.permute.xlu1 %7136  ;;  %v6769_v17 = vld [vmem:[#allocation5 + $0x238] sm:$0xff]  ;;  %11180 = vmatpush1.bf16.msra.mxu0 %v11179_v42  ;;  %v10917_v42 = vld [vmem:[%s17202_s4 + $0xf8] sm:$0xff] }
 0x687   : > { %7222 = vst.msk [vmem:[#allocation5 + $0x10] sm:$0xff] %vm631_vm0, %v7137_v50  ;;  %v7181_v3 = vsel %vm778_vm12, %v7135_v62, %v7137_v50  ;;  %v11215_v24 = vpack.c.bf16 %v6769_v17, %v6766_v26  ;;  %7482 = vrot.lane.b32.xlu1 %v14703_v51, %s17523_s14  ;;  %7490 = vrot.lane.b32.xlu0 %v14709_v1, %s17523_s14  ;;  %v10907_v1 = vld [vmem:[%s17202_s4 + $0xa8] sm:$0xff] }
 0x689   : > { %11216 = vmatpush1.bf16.msra.mxu1 %v11215_v24  ;;  %6859 = vmatmul.mubr.f32.vlgmr.msra.gmra.mrb[32].mxu0 %v10902_v12  ;;  %v7133_v51 = vpop.permute.xlu0 %7132 }
 0x68a   : > { %v7143_v39 = vpop.permute.xlu1 %7142  ;;  %10919 = vmatprep.mubr.msk.f32.mxu0 %vm631_vm0, %v10905_v55  ;;  %11265 = vmatprep.subr.bf16.mxu1 %v11451_v6  ;;  %v7180_v23 = vsel %vm778_vm12, %v7133_v51, %v7135_v62  ;;  %v10914_v62 = vld [vmem:[%s17202_s4 + $0xe0] sm:$0xff] }
 0x68b   : > { %7225 = vst.msk [vmem:[#allocation5 + $0x28] sm:$0xff] %vm631_vm0, %v7143_v39  ;;  %v7183_v8 = vsel %vm778_vm12, %v7141_v19, %v7143_v39  ;;  %7492 = vrot.lane.b32.xlu1 %v7424_v60, %s17523_s14  ;;  %7496 = vrot.lane.b32.xlu0 %v14719_v22, %s17523_s14  ;;  %v10909_v22 = vld [vmem:[%s17202_s4 + $0xb8] sm:$0xff] }
 0x68c   : > { %6972 = vmatmul.mubr.f32.vlgmr.msra.gmra.mrb[24].mxu1 %v10902_v12  ;;  %v11217_v54 = vpack.c.bf16 %v7183_v8, %v7181_v3  ;;  %v10916_v12 = vld [vmem:[%s17202_s4 + $0xf0] sm:$0xff] }
 0x68d   : > { %10927 = vmatprep.mubr.msk.f32.mxu1 %vm631_vm0, %v10905_v55  ;;  %6865 = vmatmul.mubr.f32.gmra.mrb[34].mxu0 %v10904_v15  ;;  %v7147_v41 = vpop.permute.xlu0 %7146 }
 0x68e   : > { %v7139_v31 = vpop.permute.xlu1 %7138  ;;  %11218 = vmatprep.subr.bf16.mxu0 %v11217_v54  ;;  %10920 = vmatprep.mubr.msk.f32.mxu0 %vm631_vm0, %v10907_v1  ;;  %v7583_v14 = vld [vmem:[#allocation5 + $0x10] sm:$0xff] }
 0x68f   : > { %v7182_v58 = vsel %vm778_vm12, %v7139_v31, %v7141_v19  ;;  %7498 = vrot.lane.b32.xlu1 %v14726_v53, %s17523_s14  ;;  %7488 = vrot.lane.b32.xlu0 %v7422_v37, %s17523_s14  ;;  %v10935_v19 = vld [vmem:[%s17202_s4 + $0x108] sm:$0xff] }
 0x690   : > { %6977 = vmatmul.mubr.f32.gmra.mrb[26].mxu1 %v10904_v15  ;;  %v11219_v48 = vpack.c.bf16 %v7182_v58, %v7180_v23 }
 0x691   : > { %10928 = vmatprep.mubr.msk.f32.mxu1 %vm631_vm0, %v10907_v1  ;;  %6871 = vmatmul.mubr.f32.gmra.mrb[36].mxu0 %v10906_v33  ;;  %v7153_v53 = vpop.permute.xlu0 %7152 }
 0x692   : > { %v7149_v47 = vpop.permute.xlu1 %7148  ;;  %v7586_v57 = vld [vmem:[#allocation5 + $0x28] sm:$0xff]  ;;  %11220 = vmatpush1.bf16.msra.mxu0 %v11219_v48  ;;  %10921 = vmatprep.mubr.msk.f32.mxu0 %vm631_vm0, %v10909_v22 }
 0x693   : > { %7228 = vst.msk [vmem:[#allocation5 + $0x40] sm:$0xff] %vm631_vm0, %v7149_v47  ;;  %v7185_v35 = vsel %vm778_vm12, %v7147_v41, %v7149_v47  ;;  %v11266_v36 = vpack.c.bf16 %v7586_v57, %v7583_v14  ;;  %7494 = vrot.lane.b32.xlu1 %v7425_v2, %s17523_s14 }
 0x694   : > { %6982 = vmatmul.mubr.f32.gmra.mrb[28].mxu1 %v10906_v33 }
 0x695   : > { %11267 = vmatpush1.bf16.msra.mxu1 %v11266_v36  ;;  %10929 = vmatprep.mubr.msk.f32.mxu1 %vm631_vm0, %v10909_v22  ;;  %v7145_v0 = vpop.permute.xlu0 %7144 }
 0x696   : > { %v7155_v16 = vpop.permute.xlu1 %7154  ;;  %6877 = vmatmul.mubr.f32.gmra.mrb[38].mxu0 %v10908_v38  ;;  %11268 = vmatprep.subr.bf16.mxu1 %v11451_v6  ;;  %v7184_v56 = vsel %vm778_vm12, %v7145_v0, %v7147_v41 }
 0x697   : > { %7231 = vst.msk [vmem:[#allocation5 + $0x58] sm:$0xff] %vm631_vm0, %v7155_v16  ;;  %v7187_v52 = vsel %vm778_vm12, %v7153_v53, %v7155_v16  ;;  %10922 = vmatprep.mubr.msk.f32.mxu0 %vm631_vm0, %v10911_v5 }
 0x698   : > { %6987 = vmatmul.mubr.f32.gmra.mrb[30].mxu1 %v10908_v38  ;;  %v11221_v11 = vpack.c.bf16 %v7187_v52, %v7185_v35 }
 0x699   : > { %10930 = vmatprep.mubr.msk.f32.mxu1 %vm631_vm0, %v10911_v5  ;;  %v7159_v10 = vpop.permute.xlu0 %7158 }
 0x69a   : > { %v7151_v49 = vpop.permute.xlu1 %7150  ;;  %6883 = vmatmul.mubr.f32.gmra.mrb[40].mxu0 %v10910_v63  ;;  %11222 = vmatprep.subr.bf16.mxu0 %v11221_v11  ;;  %v7589_v59 = vld [vmem:[#allocation5 + $0x40] sm:$0xff] }
 0x69b   : > { %v7186_v13 = vsel %vm778_vm12, %v7151_v49, %v7153_v53  ;;  %10923 = vmatprep.mubr.msk.f32.mxu0 %vm631_vm0, %v10913_v43 }
 0x69c   : > { %6992 = vmatmul.mubr.f32.gmra.mrb[32].mxu1 %v10910_v63  ;;  %v11223_v61 = vpack.c.bf16 %v7186_v13, %v7184_v56 }
 0x69d   : > { %10931 = vmatprep.mubr.msk.f32.mxu1 %vm631_vm0, %v10913_v43  ;;  %v7165_v4 = vpop.permute.xlu0 %7164 }
 0x69e   : > { %v7161_v18 = vpop.permute.xlu1 %7160  ;;  %v7592_v30 = vld [vmem:[#allocation5 + $0x58] sm:$0xff]  ;;  %6889 = vmatmul.mubr.f32.gmra.mrb[42].mxu0 %v10912_v28 }
 0x69f   : > { %7234 = vst.msk [vmem:[#allocation5 + $0x70] sm:$0xff] %vm631_vm0, %v7161_v18  ;;  %v7189_v7 = vsel %vm778_vm12, %v7159_v10, %v7161_v18  ;;  %v11269_v34 = vpack.c.bf16 %v7592_v30, %v7589_v59  ;;  %11224 = vmatpush1.bf16.msra.mxu0 %v11223_v61  ;;  %10924 = vmatprep.mubr.msk.f32.mxu0 %vm631_vm0, %v10915_v27 }
 0x6a0   : > { %6997 = vmatmul.mubr.f32.gmra.mrb[34].mxu1 %v10912_v28 }
 0x6a1   : > { %11270 = vmatpush1.bf16.msra.mxu1 %v11269_v34  ;;  %10932 = vmatprep.mubr.msk.f32.mxu1 %vm631_vm0, %v10915_v27  ;;  %v7157_v17 = vpop.permute.xlu0 %7156 }
 0x6a2   : > { %v7167_v50 = vpop.permute.xlu1 %7166  ;;  %6895 = vmatmul.mubr.f32.gmra.mrb[44].mxu0 %v10914_v62  ;;  %11271 = vmatprep.subr.bf16.mxu1 %v11451_v6  ;;  %v7188_v3 = vsel %vm778_vm12, %v7157_v17, %v7159_v10 }
 0x6a3   : > { %7237 = vst.msk [vmem:[#allocation5 + $0x88] sm:$0xff] %vm631_vm0, %v7167_v50  ;;  %v7191_v26 = vsel %vm778_vm12, %v7165_v4, %v7167_v50  ;;  %10925 = vmatprep.mubr.msk.f32.mxu0 %vm631_vm0, %v10917_v42 }
 0x6a4   : > { %7002 = vmatmul.mubr.f32.gmra.mrb[36].mxu1 %v10914_v62  ;;  %v11225_v24 = vpack.c.bf16 %v7191_v26, %v7189_v7 }
 0x6a5   : > { %10933 = vmatprep.mubr.msk.f32.mxu1 %vm631_vm0, %v10917_v42  ;;  %v7171_v39 = vpop.permute.xlu0 %7170 }
 0x6a6   : > { %v7163_v55 = vpop.permute.xlu1 %7162  ;;  %6901 = vmatmul.mubr.f32.gmra.mrb[46].mxu0 %v10916_v12  ;;  %11226 = vmatprep.subr.bf16.mxu0 %v11225_v24  ;;  %v7595_v51 = vld [vmem:[#allocation5 + $0x70] sm:$0xff] }
 0x6a7   : > { %v7190_v60 = vsel %vm778_vm12, %v7163_v55, %v7165_v4  ;;  %10950 = vmatprep.mubr.msk.f32.mxu0 %vm631_vm0, %v10935_v19 }
 0x6a8   : > { %7007 = vmatmul.mubr.f32.gmra.mrb[38].mxu1 %v10916_v12  ;;  %v11227_v15 = vpack.c.bf16 %v7190_v60, %v7188_v3 }
 0x6a9   : > { %10958 = vmatprep.mubr.msk.f32.mxu1 %vm631_vm0, %v10935_v19  ;;  %v7177_v37 = vpop.permute.xlu0 %7176 }
 0x6aa   : > { %v7173_v8 = vpop.permute.xlu1 %7172  ;;  %v7598_v1 = vld [vmem:[#allocation5 + $0x88] sm:$0xff]  ;;  %11228 = vmatpush1.bf16.msra.mxu0 %v11227_v15 }
 0x6ab   : > { %7240 = vst.msk [vmem:[#allocation5 + $0xa0] sm:$0xff] %vm631_vm0, %v7173_v8  ;;  %v7193_v23 = vsel %vm778_vm12, %v7171_v39, %v7173_v8  ;;  %v11272_v54 = vpack.c.bf16 %v7598_v1, %v7595_v51 }
 0x6ad   : > { %11273 = vmatpush1.bf16.msra.mxu1 %v11272_v54  ;;  %v7169_v58 = vpop.permute.xlu0 %7168 }
 0x6ae   : > { %v7179_v31 = vpop.permute.xlu1 %7178  ;;  %11274 = vmatprep.subr.bf16.mxu1 %v11451_v6  ;;  %v7192_v41 = vsel %vm778_vm12, %v7169_v58, %v7171_v39 }
 0x6af   : > { %7243 = vst.msk [vmem:[#allocation5 + $0xb8] sm:$0xff] %vm631_vm0, %v7179_v31  ;;  %v7195_v33 = vsel %vm778_vm12, %v7177_v37, %v7179_v31  ;;  %7238 = vst [vmem:[#allocation5 + $0x90] sm:$0xff] %v7192_v41 }
 0x6b0   : > { %v15053_v22 = vpop.f32.mrb[16].mxu0  ;;  %v11229_v48 = vpack.c.bf16 %v7195_v33, %v7193_v23 }
 0x6b1   : > { %v15055_v2 = vpop.f32.mrb[17].mxu0  ;;  %v7295_v57 = vpop.permute.xlu0 %7294 }
 0x6b2   : > { %v7175_v47 = vpop.permute.xlu1 %7174  ;;  %11230 = vmatprep.subr.bf16.mxu0 %v11229_v48  ;;  %v7601_v16 = vld [vmem:[#allocation5 + $0xa0] sm:$0xff] }
 0x6b3   : > { %v7194_v14 = vsel %vm778_vm12, %v7175_v47, %v7177_v37 }
 0x6b4   : > { %7241 = vst [vmem:[#allocation5 + $0xa8] sm:$0xff] %v7194_v14  ;;  %v15058_v35 = vpop.f32.mrb[18].mxu0  ;;  %v11231_v36 = vpack.c.bf16 %v7194_v14, %v7192_v41 }
 0x6b5   : > { %v15060_v53 = vpop.f32.mrb[19].mxu0  ;;  %v7301_v11 = vpop.permute.xlu0 %7300 }
 0x6b6   : > { %v7297_v38 = vpop.permute.xlu1 %7296  ;;  %v6138_v5 = vpop.f32.mrb[8].mxu1  ;;  %v7604_v52 = vld [vmem:[#allocation5 + $0xb8] sm:$0xff]  ;;  %11232 = vmatpush1.bf16.msra.mxu0 %v11231_v36 }
 0x6b7   : > { %7382 = vst.msk [vmem:[#allocation5 + $0xd0] sm:$0xff] %vm631_vm0, %v7297_v38  ;;  %v6139_v0 = vadd.f32 %v6138_v5, %v14617_v29  ;;  %v7341_v63 = vsel %vm804_vm14, %v7295_v57, %v7297_v38  ;;  %v6140_v56 = vpop.f32.mrb[9].mxu1  ;;  %v11275_v43 = vpack.c.bf16 %v7604_v52, %v7601_v16 }
 0x6b8   : > { %v15065_v49 = vpop.f32.mrb[20].mxu0 }
 0x6b9   : > { %6179 = vst.msk [vmem:[#allocation6 + $0x10] sm:$0xff] %vm631_vm0, %v6139_v0  ;;  %11276 = vmatpush1.bf16.msra.mxu1 %v11275_v43  ;;  %v15068_v13 = vpop.f32.mrb[21].mxu0  ;;  %v7293_v59 = vpop.permute.xlu0 %7292 }
 0x6ba   : > { %v7303_v10 = vpop.permute.xlu1 %7302  ;;  %v6143_v28 = vpop.f32.mrb[10].mxu1  ;;  %11277 = vmatprep.subr.bf16.mxu1 %v11451_v6  ;;  %v7340_v30 = vsel %vm804_vm14, %v7293_v59, %v7295_v57 }
 0x6bb   : > { %7385 = vst.msk [vmem:[#allocation5 + $0xe8] sm:$0xff] %vm631_vm0, %v7303_v10  ;;  %v6144_v27 = vadd.f32 %v6143_v28, %v14627_v46  ;;  %v7343_v61 = vsel %vm804_vm14, %v7301_v11, %v7303_v10  ;;  %v6145_v18 = vpop.f32.mrb[11].mxu1 }
 0x6bc   : > { %v15075_v7 = vpop.f32.mrb[22].mxu0  ;;  %v11233_v34 = vpack.c.bf16 %v7343_v61, %v7341_v63 }
 0x6bd   : > { %6182 = vst.msk [vmem:[#allocation6 + $0x28] sm:$0xff] %vm631_vm0, %v6144_v27  ;;  %v15078_v4 = vpop.f32.mrb[23].mxu0  ;;  %v7307_v12 = vpop.permute.xlu0 %7306 }
 0x6be   : > { %v7299_v62 = vpop.permute.xlu1 %7298  ;;  %v6148_v42 = vpop.f32.mrb[12].mxu1  ;;  %11234 = vmatprep.subr.bf16.mxu0 %v11233_v34  ;;  %v7607_v39 = vld [vmem:[#allocation5 + $0xd0] sm:$0xff] }
 0x6bf   : > { %v7342_v50 = vsel %vm804_vm14, %v7299_v62, %v7301_v11  ;;  %v6149_v26 = vadd.f32 %v6148_v42, %v14637_v44  ;;  %v6150_v17 = vpop.f32.mrb[13].mxu1 }
 0x6c0   : > { %v15082_v3 = vpop.f32.mrb[24].mxu0  ;;  %v11235_v24 = vpack.c.bf16 %v7342_v50, %v7340_v30 }
 0x6c1   : > { %6185 = vst.msk [vmem:[#allocation6 + $0x40] sm:$0xff] %vm631_vm0, %v6149_v26  ;;  %v15085_v19 = vpop.f32.mrb[25].mxu0  ;;  %v7313_v54 = vpop.permute.xlu0 %7312 }
 0x6c2   : > { %v7309_v55 = vpop.permute.xlu1 %7308  ;;  %v6153_v60 = vpop.f32.mrb[14].mxu1  ;;  %v7610_v15 = vld [vmem:[#allocation5 + $0xe8] sm:$0xff]  ;;  %11236 = vmatpush1.bf16.msra.mxu0 %v11235_v24 }
 0x6c3   : > { %7388 = vst.msk [vmem:[#allocation5 + $0x100] sm:$0xff] %vm631_vm0, %v7309_v55  ;;  %v6154_v8 = vadd.f32 %v6153_v60, %v14647_v40  ;;  %v7345_v51 = vsel %vm804_vm14, %v7307_v12, %v7309_v55  ;;  %v6155_v1 = vpop.f32.mrb[15].mxu1  ;;  %v11278_v23 = vpack.c.bf16 %v7610_v15, %v7607_v39 }
 0x6c4   : > { %v15090_v37 = vpop.f32.mrb[26].mxu0 }
 0x6c5   : > { %6188 = vst.msk [vmem:[#allocation6 + $0x58] sm:$0xff] %vm631_vm0, %v6154_v8  ;;  %11279 = vmatpush1.bf16.msra.mxu1 %v11278_v23  ;;  %v15093_v31 = vpop.f32.mrb[27].mxu0  ;;  %v7305_v14 = vpop.permute.xlu0 %7304 }
 0x6c6   : > { %v7315_v33 = vpop.permute.xlu1 %7314  ;;  %v6158_v58 = vpop.f32.mrb[16].mxu1  ;;  %11280 = vmatprep.subr.bf16.mxu1 %v11451_v6  ;;  %v7344_v57 = vsel %vm804_vm14, %v7305_v14, %v7307_v12 }
 0x6c7   : > { %7391 = vst.msk [vmem:[#allocation5 + $0x118] sm:$0xff] %vm631_vm0, %v7315_v33  ;;  %v6159_v41 = vadd.f32 %v6158_v58, %v14653_v32  ;;  %v7347_v48 = vsel %vm804_vm14, %v7313_v54, %v7315_v33  ;;  %v6160_v47 = vpop.f32.mrb[17].mxu1 }
 0x6c8   : > { %v15100_v36 = vpop.f32.mrb[28].mxu0  ;;  %v11237_v38 = vpack.c.bf16 %v7347_v48, %v7345_v51 }
 0x6c9   : > { %6191 = vst.msk [vmem:[#allocation6 + $0x70] sm:$0xff] %vm631_vm0, %v6159_v41  ;;  %v15103_v5 = vpop.f32.mrb[29].mxu0  ;;  %v7319_v43 = vpop.permute.xlu0 %7318 }
 0x6ca   : > { %v7311_v16 = vpop.permute.xlu1 %7310  ;;  %v6163_v52 = vpop.f32.mrb[18].mxu1  ;;  %11238 = vmatprep.subr.bf16.mxu0 %v11237_v38  ;;  %v7613_v18 = vld [vmem:[#allocation5 + $0x100] sm:$0xff] }
 0x6cb   : > { %v7346_v0 = vsel %vm804_vm14, %v7311_v16, %v7313_v54  ;;  %v6164_v63 = vadd.f32 %v6163_v52, %v14667_v25  ;;  %v6165_v56 = vpop.f32.mrb[19].mxu1 }
 0x6cc   : > { %v15107_v11 = vpop.f32.mrb[30].mxu0  ;;  %v11239_v10 = vpack.c.bf16 %v7346_v0, %v7344_v57 }
 0x6cd   : > { %6194 = vst.msk [vmem:[#allocation6 + $0x88] sm:$0xff] %vm631_vm0, %v6164_v63  ;;  %v15110_v28 = vpop.f32.mrb[31].mxu0  ;;  %v7325_v50 = vpop.permute.xlu0 %7324 }
 0x6ce   : > { %v7321_v27 = vpop.permute.xlu1 %7320  ;;  %v6168_v61 = vpop.f32.mrb[20].mxu1  ;;  %v7616_v59 = vld [vmem:[#allocation5 + $0x118] sm:$0xff]  ;;  %11240 = vmatpush1.bf16.msra.mxu0 %v11239_v10 }
 0x6cf   : > { %7394 = vst.msk [vmem:[#allocation5 + $0x130] sm:$0xff] %vm631_vm0, %v7321_v27  ;;  %v6169_v30 = vadd.f32 %v6168_v61, %v14673_v45  ;;  %v7349_v34 = vsel %vm804_vm14, %v7319_v43, %v7321_v27  ;;  %v6170_v62 = vpop.f32.mrb[21].mxu1  ;;  %v11281_v42 = vpack.c.bf16 %v7616_v59, %v7613_v18 }
 0x6d1   : > { %6197 = vst.msk [vmem:[#allocation6 + $0xa0] sm:$0xff] %vm631_vm0, %v6169_v30  ;;  %11282 = vmatpush1.bf16.msra.mxu1 %v11281_v42  ;;  %v7317_v55 = vpop.permute.xlu0 %7316 }
 0x6d2   : > { %v7327_v26 = vpop.permute.xlu1 %7326  ;;  %v6173_v17 = vpop.f32.mrb[22].mxu1  ;;  %11283 = vmatprep.subr.bf16.mxu1 %v11451_v6  ;;  %v7348_v39 = vsel %vm804_vm14, %v7317_v55, %v7319_v43 }
 0x6d3   : > { %7397 = vst.msk [vmem:[#allocation5 + $0x148] sm:$0xff] %vm631_vm0, %v7327_v26  ;;  %v6174_v12 = vadd.f32 %v6173_v17, %v14689_v21  ;;  %v7351_v24 = vsel %vm804_vm14, %v7325_v50, %v7327_v26  ;;  %v6175_v60 = vpop.f32.mrb[23].mxu1 }
 0x6d4   : > { %v11241_v15 = vpack.c.bf16 %v7351_v24, %v7349_v34 }
 0x6d5   : > { %6200 = vst.msk [vmem:[#allocation6 + $0xb8] sm:$0xff] %vm631_vm0, %v6174_v12  ;;  %v7331_v1 = vpop.permute.xlu0 %7330 }
 0x6d6   : > { %v7323_v8 = vpop.permute.xlu1 %7322  ;;  %11242 = vmatprep.subr.bf16.mxu0 %v11241_v15  ;;  %v7619_v33 = vld [vmem:[#allocation5 + $0x130] sm:$0xff] }
 0x6d7   : > { %v7350_v51 = vsel %vm804_vm14, %v7323_v8, %v7325_v50 }
 0x6d8   : > { %v11243_v23 = vpack.c.bf16 %v7350_v51, %v7348_v39 }
 0x6d9   : > { %v7337_v47 = vpop.permute.xlu0 %7336 }
 0x6da   : > { %v7333_v54 = vpop.permute.xlu1 %7332  ;;  %v7622_v58 = vld [vmem:[#allocation5 + $0x148] sm:$0xff]  ;;  %11244 = vmatpush1.bf16.msra.mxu0 %v11243_v23 }
 0x6db   : > { %7400 = vst.msk [vmem:[#allocation5 + $0x160] sm:$0xff] %vm631_vm0, %v7333_v54  ;;  %v7353_v41 = vsel %vm804_vm14, %v7331_v1, %v7333_v54  ;;  %v11284_v48 = vpack.c.bf16 %v7622_v58, %v7619_v33 }
 0x6dd   : > { %11285 = vmatpush1.bf16.msra.mxu1 %v11284_v48  ;;  %v7329_v38 = vpop.permute.xlu0 %7328 }
 0x6de   : > { %v7339_v14 = vpop.permute.xlu1 %7338  ;;  %11286 = vmatprep.subr.bf16.mxu1 %v11451_v6  ;;  %v7352_v16 = vsel %vm804_vm14, %v7329_v38, %v7331_v1 }
 0x6df   : > { %7403 = vst.msk [vmem:[#allocation5 + $0x178] sm:$0xff] %vm631_vm0, %v7339_v14  ;;  %v7355_v57 = vsel %vm804_vm14, %v7337_v47, %v7339_v14 }
 0x6e0   : > { %v11245_v52 = vpack.c.bf16 %v7355_v57, %v7353_v41 }
 0x6e1   : > { %v7455_v56 = vpop.permute.xlu0 %7454 }
 0x6e2   : > { %v7335_v0 = vpop.permute.xlu1 %7334  ;;  %11246 = vmatprep.subr.bf16.mxu0 %v11245_v52  ;;  %v7625_v27 = vld [vmem:[#allocation5 + $0x160] sm:$0xff] }
 0x6e3   : > { %v7354_v63 = vsel %vm804_vm14, %v7335_v0, %v7337_v47 }
 0x6e4   : > { %v11247_v43 = vpack.c.bf16 %v7354_v63, %v7352_v16 }
 0x6e5   : > { %v7461_v30 = vpop.permute.xlu0 %7460 }
 0x6e6   : > { %v7457_v10 = vpop.permute.xlu1 %7456  ;;  %v7628_v61 = vld [vmem:[#allocation5 + $0x178] sm:$0xff]  ;;  %11248 = vmatpush1.bf16.msra.mxu0 %v11247_v43 }
 0x6e7   : > { %7542 = vst.msk [vmem:[#allocation5 + $0x190] sm:$0xff] %vm631_vm0, %v7457_v10  ;;  %v7501_v18 = vsel %vm830_vm15, %v7455_v56, %v7457_v10  ;;  %v11287_v59 = vpack.c.bf16 %v7628_v61, %v7625_v27 }
 0x6e9   : > { %11288 = vmatpush1.bf16.msra.mxu1 %v11287_v59  ;;  %v7453_v42 = vpop.permute.xlu0 %7452 }
 0x6ea   : > { %v7463_v34 = vpop.permute.xlu1 %7462  ;;  %11289 = vmatprep.subr.bf16.mxu1 %v11451_v6  ;;  %v7500_v50 = vsel %vm830_vm15, %v7453_v42, %v7455_v56 }
 0x6eb   : > { %7545 = vst.msk [vmem:[#allocation5 + $0x1a8] sm:$0xff] %vm631_vm0, %v7463_v34  ;;  %v7503_v62 = vsel %vm830_vm15, %v7461_v30, %v7463_v34 }
 0x6ec   : > { %v11249_v26 = vpack.c.bf16 %v7503_v62, %v7501_v18 }
 0x6ed   : > { %v7467_v24 = vpop.permute.xlu0 %7466 }
 0x6ee   : > { %v7459_v17 = vpop.permute.xlu1 %7458  ;;  %11250 = vmatprep.subr.bf16.mxu0 %v11249_v26  ;;  %v7631_v39 = vld [vmem:[#allocation5 + $0x190] sm:$0xff] }
 0x6ef   : > { %v7502_v12 = vsel %vm830_vm15, %v7459_v17, %v7461_v30 }
 0x6f0   : > { %v11251_v55 = vpack.c.bf16 %v7502_v12, %v7500_v50 }
 0x6f1   : > { %v7473_v1 = vpop.permute.xlu0 %7472 }
 0x6f2   : > { %v7469_v60 = vpop.permute.xlu1 %7468  ;;  %v7634_v15 = vld [vmem:[#allocation5 + $0x1a8] sm:$0xff]  ;;  %11252 = vmatpush1.bf16.msra.mxu0 %v11251_v55 }
 0x6f3   : > { %7548 = vst.msk [vmem:[#allocation5 + $0x1c0] sm:$0xff] %vm631_vm0, %v7469_v60  ;;  %v7505_v8 = vsel %vm830_vm15, %v7467_v24, %v7469_v60  ;;  %v11290_v51 = vpack.c.bf16 %v7634_v15, %v7631_v39 }
 0x6f5   : > { %11291 = vmatpush1.bf16.msra.mxu1 %v11290_v51  ;;  %v7465_v33 = vpop.permute.xlu0 %7464 }
 0x6f6   : > { %v7475_v23 = vpop.permute.xlu1 %7474  ;;  %11292 = vmatprep.subr.bf16.mxu1 %v11451_v6  ;;  %v7504_v58 = vsel %vm830_vm15, %v7465_v33, %v7467_v24 }
 0x6f7   : > { %7551 = vst.msk [vmem:[#allocation5 + $0x1d8] sm:$0xff] %vm631_vm0, %v7475_v23  ;;  %v7507_v54 = vsel %vm830_vm15, %v7473_v1, %v7475_v23 }
 0x6f8   : > { %v11253_v41 = vpack.c.bf16 %v7507_v54, %v7505_v8 }
 0x6f9   : > { %v7479_v14 = vpop.permute.xlu0 %7478 }
 0x6fa   : > { %v7471_v48 = vpop.permute.xlu1 %7470  ;;  %11254 = vmatprep.subr.bf16.mxu0 %v11253_v41  ;;  %v7637_v16 = vld [vmem:[#allocation5 + $0x1c0] sm:$0xff] }
 0x6fb   : > { %v7506_v47 = vsel %vm830_vm15, %v7471_v48, %v7473_v1  ;;  %v10937_v41 = vld [vmem:[%s17202_s4 + $0x118] sm:$0xff]  ;;  %v10936_v48 = vld [vmem:[%s17202_s4 + $0x110] sm:$0xff] }
 0x6fc   : > { %v11255_v57 = vpack.c.bf16 %v7506_v47, %v7504_v58  ;;  %v10934_v58 = vld [vmem:[%s17202_s4 + $0x100] sm:$0xff]  ;;  %v10939_v47 = vld [vmem:[%s17202_s4 + $0x128] sm:$0xff] }
 0x6fd   : > { %v7485_v56 = vpop.permute.xlu0 %7484 }
 0x6fe   : > { %v7481_v38 = vpop.permute.xlu1 %7480  ;;  %v7640_v52 = vld [vmem:[#allocation5 + $0x1d8] sm:$0xff]  ;;  %11256 = vmatpush1.bf16.msra.mxu0 %v11255_v57  ;;  %v10941_v57 = vld [vmem:[%s17202_s4 + $0x138] sm:$0xff] }
 0x6ff   : > { %7554 = vst.msk [vmem:[#allocation5 + $0x1f0] sm:$0xff] %vm631_vm0, %v7481_v38  ;;  %v7509_v0 = vsel %vm830_vm15, %v7479_v14, %v7481_v38  ;;  %v11293_v63 = vpack.c.bf16 %v7640_v52, %v7637_v16  ;;  %v10940_v38 = vld [vmem:[%s17202_s4 + $0x130] sm:$0xff]  ;;  %v10943_v16 = vld [vmem:[%s17202_s4 + $0x148] sm:$0xff]  ;;  %v10942_v52 = vld [vmem:[%s17202_s4 + $0x140] sm:$0xff] }
 0x701   : > { %11294 = vmatpush1.bf16.msra.mxu1 %v11293_v63  ;;  %v7477_v27 = vpop.permute.xlu0 %7476  ;;  %v10944_v63 = vld [vmem:[%s17202_s4 + $0x150] sm:$0xff] }
 0x702   : > { %v7487_v43 = vpop.permute.xlu1 %7486  ;;  %11295 = vmatprep.subr.bf16.mxu1 %v11451_v6  ;;  %v7508_v61 = vsel %vm830_vm15, %v7477_v27, %v7479_v14  ;;  %v10938_v14 = vld [vmem:[%s17202_s4 + $0x120] sm:$0xff]  ;;  %v10948_v27 = vld [vmem:[%s17202_s4 + $0x170] sm:$0xff] }
 0x703   : > { %7557 = vst.msk [vmem:[#allocation5 + $0x208] sm:$0xff] %vm631_vm0, %v7487_v43  ;;  %v7511_v10 = vsel %vm830_vm15, %v7485_v56, %v7487_v43  ;;  %v10946_v43 = vld [vmem:[%s17202_s4 + $0x160] sm:$0xff] }
 0x704   : > { %v11257_v18 = vpack.c.bf16 %v7511_v10, %v7509_v0  ;;  %v10945_v0 = vld [vmem:[%s17202_s4 + $0x158] sm:$0xff] }
 0x705   : > { %v7491_v34 = vpop.permute.xlu0 %7490  ;;  %v10949_v10 = vld [vmem:[%s17202_s4 + $0x178] sm:$0xff] }
 0x706   : > { %v7483_v59 = vpop.permute.xlu1 %7482  ;;  %11258 = vmatprep.subr.bf16.mxu0 %v11257_v18  ;;  %v7643_v50 = vld [vmem:[#allocation5 + $0x1f0] sm:$0xff]  ;;  %v6028_v18 = vadd.f32 %v15055_v2, %v14617_v29 }
 0x707   : > { %v7510_v30 = vsel %vm830_vm15, %v7483_v59, %v7485_v56  ;;  %v10947_v56 = vld [vmem:[%s17202_s4 + $0x168] sm:$0xff] }
 0x708   : > { %v11259_v62 = vpack.c.bf16 %v7510_v30, %v7508_v61  ;;  %v6026_v61 = vadd.f32 %v15053_v22, %v14617_v29 }
 0x709   : > { %v7497_v24 = vpop.permute.xlu0 %7496 }
 0x70a   : > { %v7493_v42 = vpop.permute.xlu1 %7492  ;;  %v7646_v26 = vld [vmem:[#allocation5 + $0x208] sm:$0xff]  ;;  %11260 = vmatpush1.bf16.msra.mxu0 %v11259_v62 }
 0x70b   : > { %7560 = vst.msk [vmem:[#allocation5 + $0x220] sm:$0xff] %vm631_vm0, %v7493_v42  ;;  %v7513_v17 = vsel %vm830_vm15, %v7491_v34, %v7493_v42  ;;  %v11296_v12 = vpack.c.bf16 %v7646_v26, %v7643_v50  ;;  %v6032_v42 = vadd.f32 %v15058_v35, %v14627_v46  ;;  %v7014_v26 = vld [vmem:[#allocation6 + $0x10] sm:$0xff]  ;;  %v7017_v35 = vld [vmem:[#allocation6 + $0x28] sm:$0xff] }
 0x70d   : > { %11297 = vmatpush1.bf16.msra.mxu1 %v11296_v12  ;;  %v7489_v39 = vpop.permute.xlu0 %7488 }
 0x70e   : > { %v7499_v55 = vpop.permute.xlu1 %7498  ;;  %11298 = vmatprep.subr.bf16.mxu1 %v11451_v6  ;;  %v7512_v15 = vsel %vm830_vm15, %v7489_v39, %v7491_v34 }
 0x70f   : > { %7563 = vst.msk [vmem:[#allocation5 + $0x238] sm:$0xff] %vm631_vm0, %v7499_v55  ;;  %v7515_v60 = vsel %vm830_vm15, %v7497_v24, %v7499_v55 }
 0x710   : > { %v11261_v8 = vpack.c.bf16 %v7515_v60, %v7513_v17  ;;  %v6034_v17 = vadd.f32 %v15060_v53, %v14627_v46  ;;  %v6038_v60 = vadd.f32 %v15065_v49, %v14637_v44  ;;  %v6044_v49 = vadd.f32 %v15075_v7, %v14647_v40 }
 0x712   : > { %v7495_v51 = vpop.permute.xlu1 %7494  ;;  %11262 = vmatprep.subr.bf16.mxu0 %v11261_v8  ;;  %v7649_v54 = vld [vmem:[#allocation5 + $0x220] sm:$0xff] }
 0x713   : > { %v7514_v1 = vsel %vm830_vm15, %v7495_v51, %v7497_v24 }
 0x714   : > { %v11263_v23 = vpack.c.bf16 %v7514_v1, %v7512_v15  ;;  %v6040_v15 = vadd.f32 %v15068_v13, %v14637_v44  ;;  %v6046_v44 = vadd.f32 %v15078_v4, %v14647_v40 }
 0x716   : > { %v7652_v33 = vld [vmem:[#allocation5 + $0x238] sm:$0xff]  ;;  %11264 = vmatpush1.bf16.msra.mxu0 %v11263_v23 }
 0x717   : > { %v11299_v6 = vpack.c.bf16 %v7652_v33, %v7649_v54  ;;  %v7020_v33 = vld [vmem:[#allocation6 + $0x40] sm:$0xff] }
 0x719   : > { %11300 = vmatpush1.bf16.msra.mxu1 %v11299_v6  ;;  %7742 = vmatmul.mubr.f32.vlgmr.msra.gmra.mrb[48].mxu0 %v10934_v58 }
 0x71a   : > { %10951 = vmatprep.mubr.msk.f32.mxu0 %vm631_vm0, %v10937_v41 }
 0x71c   : > { %7855 = vmatmul.mubr.f32.vlgmr.msra.gmra.mrb[40].mxu1 %v10934_v58 }
 0x71d   : > { %10959 = vmatprep.mubr.msk.f32.mxu1 %vm631_vm0, %v10937_v41  ;;  %7748 = vmatmul.mubr.f32.gmra.mrb[50].mxu0 %v10936_v48 }
 0x71e   : > { %10952 = vmatprep.mubr.msk.f32.mxu0 %vm631_vm0, %v10939_v47 }
 0x720   : > { %7860 = vmatmul.mubr.f32.gmra.mrb[42].mxu1 %v10936_v48 }
 0x721   : > { %10960 = vmatprep.mubr.msk.f32.mxu1 %vm631_vm0, %v10939_v47  ;;  %7754 = vmatmul.mubr.f32.gmra.mrb[52].mxu0 %v10938_v14 }
 0x722   : > { %10953 = vmatprep.mubr.msk.f32.mxu0 %vm631_vm0, %v10941_v57 }
 0x724   : > { %7865 = vmatmul.mubr.f32.gmra.mrb[44].mxu1 %v10938_v14  ;;  %v7023_v14 = vld [vmem:[#allocation6 + $0x58] sm:$0xff] }
 0x725   : > { %10961 = vmatprep.mubr.msk.f32.mxu1 %vm631_vm0, %v10941_v57  ;;  %7760 = vmatmul.mubr.f32.gmra.mrb[54].mxu0 %v10940_v38 }
 0x726   : > { %10954 = vmatprep.mubr.msk.f32.mxu0 %vm631_vm0, %v10943_v16 }
 0x728   : > { %7870 = vmatmul.mubr.f32.gmra.mrb[46].mxu1 %v10940_v38  ;;  %v6050_v38 = vadd.f32 %v15082_v3, %v14653_v32 }
 0x729   : > { %10962 = vmatprep.mubr.msk.f32.mxu1 %vm631_vm0, %v10943_v16  ;;  %7766 = vmatmul.mubr.f32.gmra.mrb[56].mxu0 %v10942_v52 }
 0x72a   : > { %10955 = vmatprep.mubr.msk.f32.mxu0 %vm631_vm0, %v10945_v0 }
 0x72c   : > { %7875 = vmatmul.mubr.f32.gmra.mrb[48].mxu1 %v10942_v52  ;;  %v6052_v52 = vadd.f32 %v15085_v19, %v14653_v32 }
 0x72d   : > { %10963 = vmatprep.mubr.msk.f32.mxu1 %vm631_vm0, %v10945_v0  ;;  %7772 = vmatmul.mubr.f32.gmra.mrb[58].mxu0 %v10944_v63 }
 0x72e   : > { %10956 = vmatprep.mubr.msk.f32.mxu0 %vm631_vm0, %v10947_v56 }
 0x730   : > { %7880 = vmatmul.mubr.f32.gmra.mrb[50].mxu1 %v10944_v63 }
 0x731   : > { %10964 = vmatprep.mubr.msk.f32.mxu1 %vm631_vm0, %v10947_v56  ;;  %7778 = vmatmul.mubr.f32.gmra.mrb[60].mxu0 %v10946_v43  ;;  %v7026_v56 = vld [vmem:[#allocation6 + $0x70] sm:$0xff] }
 0x732   : > { %10957 = vmatprep.mubr.msk.f32.mxu0 %vm631_vm0, %v10949_v10 }
 0x734   : > { %7885 = vmatmul.mubr.f32.gmra.mrb[52].mxu1 %v10946_v43 }
 0x735   : > { %10965 = vmatprep.mubr.msk.f32.mxu1 %vm631_vm0, %v10949_v10  ;;  %7784 = vmatmul.mubr.f32.gmra.mrb[62].mxu0 %v10948_v27  ;;  %v6056_v10 = vadd.f32 %v15090_v37, %v14667_v25 }
 0x738   : > { %7890 = vmatmul.mubr.f32.gmra.mrb[54].mxu1 %v10948_v27 }
 0x75c   : > { %v6860_v59 = vpop.f32.mrb[32].mxu0 }
 0x75d   : > { %v15221_v30 = vadd.f32 %v6860_v59, %v6026_v61  ;;  %v6862_v34 = vpop.f32.mrb[33].mxu0  ;;  %v6058_v61 = vadd.f32 %v15093_v31, %v14667_v25 }
 0x75e   : > { %v15223_v62 = vadd.f32 %v6862_v34, %v6028_v18  ;;  %v7029_v34 = vld [vmem:[#allocation6 + $0x88] sm:$0xff] }
 0x75f   : > { %v6973_v50 = vpop.f32.mrb[24].mxu1 }
 0x760   : > { %v7038_v12 = vadd.f32 %v7014_v26, %v6973_v50  ;;  %v6975_v24 = vpop.f32.mrb[25].mxu1  ;;  %v6866_v22 = vpop.f32.mrb[34].mxu0  ;;  %v6062_v50 = vadd.f32 %v15100_v36, %v14673_v45 }
 0x761   : > { %v15229_v55 = vadd.f32 %v6866_v22, %v6032_v42  ;;  %v6868_v29 = vpop.f32.mrb[35].mxu0  ;;  %v7032_v22 = vld [vmem:[#allocation6 + $0xa0] sm:$0xff] }
 0x762   : > { %7062 = vst.msk [vmem:[#allocation6 + $0x10] sm:$0xff] %vm631_vm0, %v7038_v12  ;;  %v15232_v2 = vadd.f32 %v6868_v29, %v6034_v17  ;;  %v6064_v17 = vadd.f32 %v15103_v5, %v14673_v45 }
 0x763   : > { %v6978_v39 = vpop.f32.mrb[26].mxu1 }
 0x764   : > { %v7041_v8 = vadd.f32 %v7017_v35, %v6978_v39  ;;  %v6980_v46 = vpop.f32.mrb[27].mxu1  ;;  %v6872_v53 = vpop.f32.mrb[36].mxu0  ;;  %v6070_v35 = vadd.f32 %v15110_v28, %v14689_v21 }
 0x765   : > { %v15238_v51 = vadd.f32 %v6872_v53, %v6038_v60  ;;  %v6874_v1 = vpop.f32.mrb[37].mxu0  ;;  %v6068_v60 = vadd.f32 %v15107_v11, %v14689_v21  ;;  %v7035_v46 = vld [vmem:[#allocation6 + $0xb8] sm:$0xff] }
 0x766   : > { %7065 = vst.msk [vmem:[#allocation6 + $0x28] sm:$0xff] %vm631_vm0, %v7041_v8  ;;  %v15241_v23 = vadd.f32 %v6874_v1, %v6040_v15 }
 0x767   : > { %v6983_v54 = vpop.f32.mrb[28].mxu1 }
 0x768   : > { %v7044_v58 = vadd.f32 %v7020_v33, %v6983_v54  ;;  %v6985_v6 = vpop.f32.mrb[29].mxu1 }
 0x769   : > { %v6878_v13 = vpop.f32.mrb[38].mxu0 }
 0x76a   : > { %7068 = vst.msk [vmem:[#allocation6 + $0x40] sm:$0xff] %vm631_vm0, %v7044_v58  ;;  %v15248_v41 = vadd.f32 %v6878_v13, %v6044_v49  ;;  %v6880_v48 = vpop.f32.mrb[39].mxu0  ;;  %v7897_v58 = vld [vmem:[#allocation6 + $0x10] sm:$0xff] }
 0x76b   : > { %v6988_v47 = vpop.f32.mrb[30].mxu1  ;;  %v15250_v57 = vadd.f32 %v6880_v48, %v6046_v44 }
 0x76c   : > { %v7047_v16 = vadd.f32 %v7023_v14, %v6988_v47  ;;  %v6990_v7 = vpop.f32.mrb[31].mxu1 }
 0x76d   : > { %v6884_v0 = vpop.f32.mrb[40].mxu0 }
 0x76e   : > { %7071 = vst.msk [vmem:[#allocation6 + $0x58] sm:$0xff] %vm631_vm0, %v7047_v16  ;;  %v15257_v40 = vadd.f32 %v6884_v0, %v6050_v38  ;;  %v6886_v4 = vpop.f32.mrb[41].mxu0 }
 0x76f   : > { %v6993_v63 = vpop.f32.mrb[32].mxu1  ;;  %v15259_v43 = vadd.f32 %v6886_v4, %v6052_v52 }
 0x770   : > { %v7050_v27 = vadd.f32 %v7026_v56, %v6993_v63  ;;  %v6995_v3 = vpop.f32.mrb[33].mxu1 }
 0x771   : > { %v6890_v18 = vpop.f32.mrb[42].mxu0 }
 0x772   : > { %7074 = vst.msk [vmem:[#allocation6 + $0x70] sm:$0xff] %vm631_vm0, %v7050_v27  ;;  %v15266_v32 = vadd.f32 %v6890_v18, %v6056_v10  ;;  %v6892_v19 = vpop.f32.mrb[43].mxu0 }
 0x773   : > { %v6998_v59 = vpop.f32.mrb[34].mxu1  ;;  %v15268_v42 = vadd.f32 %v6892_v19, %v6058_v61 }
 0x774   : > { %v7053_v26 = vadd.f32 %v7029_v34, %v6998_v59  ;;  %v7000_v37 = vpop.f32.mrb[35].mxu1 }
 0x775   : > { %v6896_v12 = vpop.f32.mrb[44].mxu0 }
 0x776   : > { %7077 = vst.msk [vmem:[#allocation6 + $0x88] sm:$0xff] %vm631_vm0, %v7053_v26  ;;  %v15275_v25 = vadd.f32 %v6896_v12, %v6062_v50  ;;  %v6898_v31 = vpop.f32.mrb[45].mxu0 }
 0x777   : > { %v7003_v24 = vpop.f32.mrb[36].mxu1  ;;  %v15277_v29 = vadd.f32 %v6898_v31, %v6064_v17 }
 0x778   : > { %v7056_v39 = vadd.f32 %v7032_v22, %v7003_v24  ;;  %v7005_v36 = vpop.f32.mrb[37].mxu1 }
 0x779   : > { %v6902_v15 = vpop.f32.mrb[46].mxu0 }
 0x77a   : > { %7080 = vst.msk [vmem:[#allocation6 + $0xa0] sm:$0xff] %vm631_vm0, %v7056_v39  ;;  %v15284_v45 = vadd.f32 %v6902_v15, %v6068_v60  ;;  %v6904_v5 = vpop.f32.mrb[47].mxu0 }
 0x77b   : > { %v7008_v8 = vpop.f32.mrb[38].mxu1  ;;  %v15286_v53 = vadd.f32 %v6904_v5, %v6070_v35 }
 0x77c   : > { %v7059_v1 = vadd.f32 %v7035_v46, %v7008_v8  ;;  %v7010_v54 = vpop.f32.mrb[39].mxu1 }
 0x77e   : > { %7083 = vst.msk [vmem:[#allocation6 + $0xb8] sm:$0xff] %vm631_vm0, %v7059_v1 }
 0x7ec   : > { %v7743_v11 = vpop.f32.mrb[48].mxu0 }
 0x7ed   : > { %v15290_v33 = vadd.f32 %v7743_v11, %v15221_v30  ;;  %v7745_v49 = vpop.f32.mrb[49].mxu0 }
 0x7ee   : > { %v15293_v21 = vadd.f32 %v7745_v49, %v15223_v62  ;;  %v7900_v62 = vld [vmem:[#allocation6 + $0x28] sm:$0xff] }
 0x7ef   : > { %v7856_v28 = vpop.f32.mrb[40].mxu1  ;;  %7999 = vrot.lane.b32.xlu0 %v15290_v33, %s11436_s15 }
 0x7f0   : > { %v7921_v6 = vadd.f32 %v7897_v58, %v7856_v28  ;;  %v7858_v44 = vpop.f32.mrb[41].mxu1  ;;  %v7749_v13 = vpop.f32.mrb[50].mxu0 }
 0x7f1   : > { %v15298_v48 = vadd.f32 %v7749_v13, %v15229_v55  ;;  %v7751_v47 = vpop.f32.mrb[51].mxu0 }
 0x7f2   : > { %7945 = vst.msk [vmem:[#allocation6 + $0x10] sm:$0xff] %vm631_vm0, %v7921_v6  ;;  %v15302_v30 = vadd.f32 %v7751_v47, %v15232_v2  ;;  %v7903_v2 = vld [vmem:[#allocation6 + $0x40] sm:$0xff] }
 0x7f3   : > { %v7861_v14 = vpop.f32.mrb[42].mxu1  ;;  %8001 = vrot.lane.b32.xlu1 %v15298_v48, %s11436_s15 }
 0x7f4   : > { %v7924_v38 = vadd.f32 %v7900_v62, %v7861_v14  ;;  %v7863_v16 = vpop.f32.mrb[43].mxu1  ;;  %v7755_v7 = vpop.f32.mrb[52].mxu0 }
 0x7f5   : > { %v15307_v52 = vadd.f32 %v7755_v7, %v15238_v51  ;;  %v7757_v0 = vpop.f32.mrb[53].mxu0 }
 0x7f6   : > { %7948 = vst.msk [vmem:[#allocation6 + $0x28] sm:$0xff] %vm631_vm0, %v7924_v38  ;;  %v15311_v55 = vadd.f32 %v7757_v0, %v15241_v23  ;;  %v7906_v23 = vld [vmem:[#allocation6 + $0x58] sm:$0xff] }
 0x7f7   : > { %v7866_v4 = vpop.f32.mrb[44].mxu1  ;;  %8003 = vrot.lane.b32.xlu0 %v15307_v52, %s11436_s15 }
 0x7f8   : > { %v7927_v63 = vadd.f32 %v7903_v2, %v7866_v4  ;;  %v7868_v56 = vpop.f32.mrb[45].mxu1  ;;  %v7761_v10 = vpop.f32.mrb[54].mxu0 }
 0x7f9   : > { %v15316_v27 = vadd.f32 %v7761_v10, %v15248_v41  ;;  %v7763_v3 = vpop.f32.mrb[55].mxu0 }
 0x7fa   : > { %7951 = vst.msk [vmem:[#allocation6 + $0x40] sm:$0xff] %vm631_vm0, %v7927_v63  ;;  %v15320_v51 = vadd.f32 %v7763_v3, %v15250_v57  ;;  %v7909_v57 = vld [vmem:[#allocation6 + $0x70] sm:$0xff] }
 0x7fb   : > { %v7871_v61 = vpop.f32.mrb[46].mxu1  ;;  %8005 = vrot.lane.b32.xlu1 %v15316_v27, %s11436_s15 }
 0x7fc   : > { %v7930_v18 = vadd.f32 %v7906_v23, %v7871_v61  ;;  %v7873_v19 = vpop.f32.mrb[47].mxu1  ;;  %v7767_v59 = vpop.f32.mrb[56].mxu0 }
 0x7fd   : > { %v15325_v34 = vadd.f32 %v7767_v59, %v15257_v40  ;;  %v7769_v50 = vpop.f32.mrb[57].mxu0 }
 0x7fe   : > { %7954 = vst.msk [vmem:[#allocation6 + $0x58] sm:$0xff] %vm631_vm0, %v7930_v18  ;;  %v15329_v41 = vadd.f32 %v7769_v50, %v15259_v43  ;;  %v7912_v43 = vld [vmem:[#allocation6 + $0x88] sm:$0xff] }
 0x7ff   : > { %v7876_v26 = vpop.f32.mrb[48].mxu1  ;;  %8007 = vrot.lane.b32.xlu0 %v15325_v34, %s11436_s15 }
 0x800   : > { %v7933_v37 = vadd.f32 %v7909_v57, %v7876_v26  ;;  %v7878_v17 = vpop.f32.mrb[49].mxu1  ;;  %v7773_v12 = vpop.f32.mrb[58].mxu0 }
 0x801   : > { %v15334_v31 = vadd.f32 %v7773_v12, %v15266_v32  ;;  %v7775_v24 = vpop.f32.mrb[59].mxu0 }
 0x802   : > { %7957 = vst.msk [vmem:[#allocation6 + $0x70] sm:$0xff] %vm631_vm0, %v7933_v37  ;;  %v15338_v40 = vadd.f32 %v7775_v24, %v15268_v42  ;;  %v7915_v42 = vld [vmem:[#allocation6 + $0xa0] sm:$0xff] }
 0x803   : > { %v7881_v22 = vpop.f32.mrb[50].mxu1  ;;  %8009 = vrot.lane.b32.xlu1 %v15334_v31, %s11436_s15 }
 0x804   : > { %v7936_v60 = vadd.f32 %v7912_v43, %v7881_v22  ;;  %v7883_v39 = vpop.f32.mrb[51].mxu1  ;;  %v7779_v36 = vpop.f32.mrb[60].mxu0 }
 0x805   : > { %v15343_v35 = vadd.f32 %v7779_v36, %v15275_v25  ;;  %v7781_v15 = vpop.f32.mrb[61].mxu0 }
 0x806   : > { %7960 = vst.msk [vmem:[#allocation6 + $0x88] sm:$0xff] %vm631_vm0, %v7936_v60  ;;  %v15347_v32 = vadd.f32 %v7781_v15, %v15277_v29  ;;  %v7918_v29 = vld [vmem:[#allocation6 + $0xb8] sm:$0xff] }
 0x807   : > { %v7886_v5 = vpop.f32.mrb[52].mxu1  ;;  %8011 = vrot.lane.b32.xlu0 %v15343_v35, %s11436_s15 }
 0x808   : > { %v7939_v8 = vadd.f32 %v7915_v42, %v7886_v5  ;;  %v7888_v46 = vpop.f32.mrb[53].mxu1  ;;  %v7785_v1 = vpop.f32.mrb[62].mxu0 }
 0x809   : > { %v15352_v54 = vadd.f32 %v7785_v1, %v15284_v45  ;;  %v7787_v11 = vpop.f32.mrb[63].mxu0 }
 0x80a   : > { %7963 = vst.msk [vmem:[#allocation6 + $0xa0] sm:$0xff] %vm631_vm0, %v7939_v8  ;;  %v15356_v25 = vadd.f32 %v7787_v11, %v15286_v53 }
 0x80b   : > { %17524 = vst [vmem:[#allocation44_spill] sm:$0xff] %v15352_v54  ;;  %v7891_v49 = vpop.f32.mrb[54].mxu1  ;;  %8023 = vrot.lane.b32.xlu0 %v15290_v33, %s11438_s17  ;;  %8013 = vrot.lane.b32.xlu1 %v15352_v54, %s11436_s15  ;;  %s17532_s15 = smov 16  }
 0x80c   : > { %v7942_v28 = vadd.f32 %v7918_v29, %v7891_v49  ;;  %v7893_v58 = vpop.f32.mrb[55].mxu1 }
 0x80e   : > { %7966 = vst.msk [vmem:[#allocation6 + $0xb8] sm:$0xff] %vm631_vm0, %v7942_v28 }
 0x80f   : > { %8027 = vrot.lane.b32.xlu0 %v15307_v52, %s11438_s17  ;;  %8025 = vrot.lane.b32.xlu1 %v15298_v48, %s11438_s17 }
 0x813   : > { %8031 = vrot.lane.b32.xlu0 %v15325_v34, %s11438_s17  ;;  %8029 = vrot.lane.b32.xlu1 %v15316_v27, %s11438_s17 }
 0x817   : > { %8035 = vrot.lane.b32.xlu0 %v15343_v35, %s11438_s17  ;;  %8033 = vrot.lane.b32.xlu1 %v15334_v31, %s11438_s17 }
 0x81b   : > { %8047 = vrot.lane.b32.xlu0 %v15290_v33, %s11443_s10  ;;  %8037 = vrot.lane.b32.xlu1 %v15352_v54, %s11438_s17  ;;  %s17547_s17 = sshll.u32 %s17628_s24, 10  ;;  %s17548_s24 = smov 104  }
 0x81f   : > { %8051 = vrot.lane.b32.xlu0 %v15307_v52, %s11443_s10  ;;  %8049 = vrot.lane.b32.xlu1 %v15298_v48, %s11443_s10 }
 0x823   : > { %8055 = vrot.lane.b32.xlu0 %v15325_v34, %s11443_s10  ;;  %8053 = vrot.lane.b32.xlu1 %v15316_v27, %s11443_s10 }
 0x827   : > { %8059 = vrot.lane.b32.xlu0 %v15343_v35, %s11443_s10  ;;  %8057 = vrot.lane.b32.xlu1 %v15334_v31, %s11443_s10 }
 0x82b   : > { %8071 = vrot.lane.b32.xlu0 %v15290_v33, %s11444_s20  ;;  %8061 = vrot.lane.b32.xlu1 %v15352_v54, %s11443_s10  ;;  %s17557_s10 = smov 84  }
 0x82f   : > { %8075 = vrot.lane.b32.xlu0 %v15307_v52, %s11444_s20  ;;  %8073 = vrot.lane.b32.xlu1 %v15298_v48, %s11444_s20 }
 0x833   : > { %8079 = vrot.lane.b32.xlu0 %v15325_v34, %s11444_s20  ;;  %8077 = vrot.lane.b32.xlu1 %v15316_v27, %s11444_s20 }
 0x837   : > { %8083 = vrot.lane.b32.xlu0 %v15343_v35, %s11444_s20  ;;  %8081 = vrot.lane.b32.xlu1 %v15334_v31, %s11444_s20 }
 0x83b   : > { %8095 = vrot.lane.b32.xlu0 %v15290_v33, %s11445_s11  ;;  %8085 = vrot.lane.b32.xlu1 %v15352_v54, %s11444_s20 }
 0x83f   : > { %8099 = vrot.lane.b32.xlu0 %v15307_v52, %s11445_s11  ;;  %8097 = vrot.lane.b32.xlu1 %v15298_v48, %s11445_s11 }
 0x843   : > { %8103 = vrot.lane.b32.xlu0 %v15325_v34, %s11445_s11  ;;  %8101 = vrot.lane.b32.xlu1 %v15316_v27, %s11445_s11 }
 0x847   : > { %8107 = vrot.lane.b32.xlu0 %v15343_v35, %s11445_s11  ;;  %8105 = vrot.lane.b32.xlu1 %v15334_v31, %s11445_s11 }
 0x84b   : > { %8127 = vrot.lane.b32.xlu0 %v15290_v33, %s11442_s22  ;;  %8109 = vrot.lane.b32.xlu1 %v15352_v54, %s11445_s11 }
 0x84f   : > { %8131 = vrot.lane.b32.xlu0 %v15298_v48, %s11442_s22  ;;  %8129 = vrot.lane.b32.xlu1 %v15293_v21, %s11442_s22 }
 0x853   : > { %8135 = vrot.lane.b32.xlu0 %v15307_v52, %s11442_s22  ;;  %8133 = vrot.lane.b32.xlu1 %v15302_v30, %s11442_s22 }
 0x857   : > { %8139 = vrot.lane.b32.xlu0 %v15316_v27, %s11442_s22  ;;  %8137 = vrot.lane.b32.xlu1 %v15311_v55, %s11442_s22 }
 0x85b   : > { %8143 = vrot.lane.b32.xlu0 %v15325_v34, %s11442_s22  ;;  %8141 = vrot.lane.b32.xlu1 %v15320_v51, %s11442_s22 }
 0x85f   : > { %8147 = vrot.lane.b32.xlu0 %v15334_v31, %s11442_s22  ;;  %8145 = vrot.lane.b32.xlu1 %v15329_v41, %s11442_s22 }
 0x861   : > { %v15459_v45 = vpop.permute.xlu0 %7999 }
 0x863   : > { %8151 = vrot.lane.b32.xlu0 %v15343_v35, %s11442_s22  ;;  %8149 = vrot.lane.b32.xlu1 %v15338_v40, %s11442_s22 }
 0x865   : > { %v15465_v53 = vpop.permute.xlu1 %8001 }
 0x867   : > { %8155 = vrot.lane.b32.xlu0 %v15352_v54, %s11442_s22  ;;  %8153 = vrot.lane.b32.xlu1 %v15347_v32, %s11442_s22 }
 0x869   : > { %v15467_v6 = vpop.permute.xlu0 %8003 }
 0x86b   : > { %8175 = vrot.lane.b32.xlu0 %v15293_v21, %s11446_s12  ;;  %8157 = vrot.lane.b32.xlu1 %v15356_v25, %s11442_s22  ;;  %s16012_s22 = scalar_lea.vmem %s17205_s7, %s17547_s17 }
 0x86d   : > { %v15473_v44 = vpop.permute.xlu1 %8005 }
 0x86f   : > { %8179 = vrot.lane.b32.xlu0 %v15311_v55, %s11446_s12  ;;  %8177 = vrot.lane.b32.xlu1 %v15302_v30, %s11446_s12 }
 0x871   : > { %v15475_v13 = vpop.permute.xlu0 %8007 }
 0x873   : > { %8183 = vrot.lane.b32.xlu0 %v15329_v41, %s11446_s12  ;;  %8181 = vrot.lane.b32.xlu1 %v15320_v51, %s11446_s12 }
 0x875   : > { %v15481_v47 = vpop.permute.xlu1 %8009 }
 0x877   : > { %8187 = vrot.lane.b32.xlu0 %v15347_v32, %s11446_s12  ;;  %8185 = vrot.lane.b32.xlu1 %v15338_v40, %s11446_s12 }
 0x879   : > { %v15483_v14 = vpop.permute.xlu0 %8011 }
 0x87b   : > { %8199 = vrot.lane.b32.xlu0 %v15293_v21, %s11447_s21  ;;  %8189 = vrot.lane.b32.xlu1 %v15356_v25, %s11446_s12 }
 0x87d   : > { %v15489_v62 = vpop.permute.xlu0 %8023  ;;  %v15491_v38 = vpop.permute.xlu1 %8013 }
 0x87e   : > { %v8423_v42 = vcombine.low %v15290_v33, %v15489_v62  ;;  %v8424_v8 = vcombine.high %v15290_v33, %v15489_v62 }
 0x87f   : > { %8203 = vrot.lane.b32.xlu0 %v15311_v55, %s11447_s21  ;;  %8201 = vrot.lane.b32.xlu1 %v15302_v30, %s11447_s21 }
 0x881   : > { %v15497_v16 = vpop.permute.xlu0 %8027  ;;  %v15499_v7 = vpop.permute.xlu1 %8025 }
 0x882   : > { %v8967_v46 = vcombine.low %v15307_v52, %v15497_v16  ;;  %v8968_v1 = vcombine.high %v15307_v52, %v15497_v16  ;;  %v8695_v11 = vcombine.low %v15298_v48, %v15499_v7  ;;  %v8696_v28 = vcombine.high %v15298_v48, %v15499_v7 }
 0x883   : > { %8207 = vrot.lane.b32.xlu0 %v15329_v41, %s11447_s21  ;;  %8205 = vrot.lane.b32.xlu1 %v15320_v51, %s11447_s21  ;;  %v8431_v52 = vrot.slane %v8423_v42, %v11520_v9  ;;  %v8438_v16 = vrot.slane %v8424_v8, %v11520_v9 }
 0x884   : > { %v15646_v7 = vrot.slane %v8695_v11, %v11520_v9 }
 0x885   : > { %v15505_v0 = vpop.permute.xlu0 %8031  ;;  %v15507_v4 = vpop.permute.xlu1 %8029 }
 0x886   : > { %v9511_v62 = vcombine.low %v15325_v34, %v15505_v0  ;;  %v9512_v48 = vcombine.high %v15325_v34, %v15505_v0  ;;  %v15657_v34 = vrot.slane %v8696_v28, %v11520_v9 }
 0x887   : > { %8211 = vrot.lane.b32.xlu0 %v15347_v32, %s11447_s21  ;;  %8209 = vrot.lane.b32.xlu1 %v15338_v40, %s11447_s21 }
 0x888   : > { %v15664_v11 = vrot.slane %v9511_v62, %v11520_v9 }
 0x889   : > { %v15513_v2 = vpop.permute.xlu0 %8035  ;;  %v15515_v63 = vpop.permute.xlu1 %8033 }
 0x88a   : > { %v10055_v0 = vcombine.low %v15343_v35, %v15513_v2 }
 0x88b   : > { %8223 = vrot.lane.b32.xlu0 %v15293_v21, %s11448_s19  ;;  %8213 = vrot.lane.b32.xlu1 %v15356_v25, %s11447_s21 }
 0x88d   : > { %v15521_v56 = vpop.permute.xlu0 %8047  ;;  %v15523_v10 = vpop.permute.xlu1 %8037 }
 0x88e   : > { %17525 = vst [vmem:[#allocation16_spill] sm:$0xff] %v15523_v10  ;;  %v8439_v33 = vcombine.low %v15459_v45, %v15521_v56  ;;  %v8440_v58 = vcombine.high %v15459_v45, %v15521_v56  ;;  %v15643_v45 = vrot.slane %v8968_v1, %v11520_v9  ;;  %v9240_v56 = vcombine.high %v15316_v27, %v15507_v4 }
 0x88f   : > { %8227 = vrot.lane.b32.xlu0 %v15311_v55, %s11448_s19  ;;  %8225 = vrot.lane.b32.xlu1 %v15302_v30, %s11448_s19 }
 0x890   : > { %v8454_v1 = vrot.slane %v8440_v58, %v11520_v9  ;;  %v9783_v58 = vcombine.low %v15334_v31, %v15515_v63 }
 0x891   : > { %v15529_v3 = vpop.permute.xlu0 %8051  ;;  %v15531_v61 = vpop.permute.xlu1 %8049 }
 0x892   : > { %v8984_v28 = vcombine.high %v15467_v6, %v15529_v3  ;;  %v8712_v62 = vcombine.high %v15465_v53, %v15531_v61 }
 0x893   : > { %8231 = vrot.lane.b32.xlu0 %v15329_v41, %s11448_s19  ;;  %8229 = vrot.lane.b32.xlu1 %v15320_v51, %s11448_s19 }
 0x895   : > { %v15537_v23 = vpop.permute.xlu0 %8055  ;;  %v15539_v18 = vpop.permute.xlu1 %8053 }
 0x897   : > { %8235 = vrot.lane.b32.xlu0 %v15347_v32, %s11448_s19  ;;  %8233 = vrot.lane.b32.xlu1 %v15338_v40, %s11448_s19 }
 0x899   : > { %v15545_v19 = vpop.permute.xlu0 %8059  ;;  %v15547_v59 = vpop.permute.xlu1 %8057 }
 0x89b   : > { %8247 = vrot.lane.b32.xlu0 %v15293_v21, %s11449_s18  ;;  %8237 = vrot.lane.b32.xlu1 %v15356_v25, %s11448_s19 }
 0x89d   : > { %v15553_v50 = vpop.permute.xlu0 %8071  ;;  %v15555_v26 = vpop.permute.xlu1 %8061 }
 0x89f   : > { %8251 = vrot.lane.b32.xlu0 %v15311_v55, %s11449_s18  ;;  %8249 = vrot.lane.b32.xlu1 %v15302_v30, %s11449_s18 }
 0x8a1   : > { %v15561_v57 = vpop.permute.xlu0 %8075  ;;  %v15563_v37 = vpop.permute.xlu1 %8073 }
 0x8a3   : > { %8255 = vrot.lane.b32.xlu0 %v15329_v41, %s11449_s18  ;;  %8253 = vrot.lane.b32.xlu1 %v15320_v51, %s11449_s18 }
 0x8a5   : > { %v15569_v17 = vpop.permute.xlu0 %8079  ;;  %v15571_v12 = vpop.permute.xlu1 %8077 }
 0x8a7   : > { %8259 = vrot.lane.b32.xlu0 %v15347_v32, %s11449_s18  ;;  %8257 = vrot.lane.b32.xlu1 %v15338_v40, %s11449_s18 }
 0x8a9   : > { %v15577_v24 = vpop.permute.xlu0 %8083  ;;  %v15579_v22 = vpop.permute.xlu1 %8081 }
 0x8ab   : > { %8271 = vrot.lane.b32.xlu0 %v15293_v21, %s11450_s16  ;;  %8261 = vrot.lane.b32.xlu1 %v15356_v25, %s11449_s18 }
 0x8ad   : > { %v15585_v43 = vpop.permute.xlu0 %8095  ;;  %v15587_v60 = vpop.permute.xlu1 %8085 }
 0x8af   : > { %8275 = vrot.lane.b32.xlu0 %v15311_v55, %s11450_s16  ;;  %8273 = vrot.lane.b32.xlu1 %v15302_v30, %s11450_s16 }
 0x8b1   : > { %v15593_v39 = vpop.permute.xlu0 %8099  ;;  %v15595_v36 = vpop.permute.xlu1 %8097 }
 0x8b2   : > { %17526 = vst [vmem:[#allocation35_spill] sm:$0xff] %v15593_v39  ;;  %17527 = vst [vmem:[#allocation9_spill] sm:$0xff] %v15595_v36  ;;  %v8998_v39 = vrot.slane %v8984_v28, %v11520_v9 }
 0x8b3   : > { %8279 = vrot.lane.b32.xlu0 %v15329_v41, %s11450_s16  ;;  %8277 = vrot.lane.b32.xlu1 %v15320_v51, %s11450_s16 }
 0x8b5   : > { %v15601_v15 = vpop.permute.xlu0 %8103  ;;  %v15603_v5 = vpop.permute.xlu1 %8101 }
 0x8b6   : > { %17528 = vst [vmem:[#allocation11_spill] sm:$0xff] %v15601_v15  ;;  %17529 = vst [vmem:[#allocation7_spill] sm:$0xff] %v15603_v5 }
 0x8b7   : > { %8283 = vrot.lane.b32.xlu0 %v15347_v32, %s11450_s16  ;;  %8281 = vrot.lane.b32.xlu1 %v15338_v40, %s11450_s16 }
 0x8b9   : > { %v15619_v49 = vpop.permute.xlu0 %8107  ;;  %v15621_v29 = vpop.permute.xlu1 %8105 }
 0x8ba   : > { %17530 = vst [vmem:[#allocation33_spill] sm:$0xff] %v15619_v49  ;;  %17531 = vst [vmem:[#allocation29_spill] sm:$0xff] %v15621_v29  ;;  %v15636_v29 = vrot.slane %v8967_v46, %v11520_v9  ;;  %v8447_v46 = vrot.slane %v8439_v33, %v11520_v9  ;;  %v15677_v33 = vrot.slane %v9512_v48, %v11520_v9 }
 0x8bb   : > { %8303 = vrot.lane.b32.xlu0 %v15293_v21, %s17532_s15  ;;  %8285 = vrot.lane.b32.xlu1 %v15356_v25, %s11450_s16  ;;  %v9239_v21 = vcombine.low %v15316_v27, %v15507_v4  ;;  %v10056_v27 = vcombine.high %v15343_v35, %v15513_v2  ;;  %v8983_v4 = vcombine.low %v15467_v6, %v15529_v3  ;;  %s17543_s16 = smov 124  }
 0x8bc   : > { %v9784_v35 = vcombine.high %v15334_v31, %v15515_v63  ;;  %v8711_v2 = vcombine.low %v15465_v53, %v15531_v61  ;;  %v10327_v3 = vcombine.low %v15352_v54, %v15523_v10  ;;  %v15702_v63 = vrot.slane %v10055_v0, %v11520_v9  ;;  %v15711_v53 = vld [vmem:[#allocation6 + $0x28] sm:$0xff] }
 0x8bd   : > { %v15652_v42 = vpop.permute.xlu0 %8127  ;;  %v15654_v8 = vpop.permute.xlu1 %8109  ;;  %v15688_v6 = vrot.slane %v9239_v21, %v11520_v9  ;;  %v8487_v49 = vcombine.low %v8431_v52, %v8447_v46  ;;  %v8488_v5 = vcombine.high %v8431_v52, %v8447_v46  ;;  %v8503_v21 = vcombine.low %v8438_v16, %v8454_v1 }
 0x8be   : > { %17533 = vst [vmem:[#allocation18_spill] sm:$0xff] %v15654_v8  ;;  %v15674_v8 = vld [vmem:[#allocation6 + $0x10] sm:$0xff]  ;;  %v15705_v15 = vrot.slane %v10056_v27, %v11520_v9  ;;  %v8991_v36 = vrot.slane %v8983_v4, %v11520_v9  ;;  %v15714_v61 = vrot.slane %v9783_v58, %v11520_v9  ;;  %v15717_v0 = vrot.slane %v9784_v35, %v11520_v9 }
 0x8bf   : > { %8307 = vrot.lane.b32.xlu0 %v15302_v30, %s17532_s15  ;;  %8305 = vrot.lane.b32.xlu1 %v15674_v8, %s17532_s15  ;;  %v15691_v30 = vrot.slane %v9240_v56, %v11520_v9  ;;  %v8504_v56 = vcombine.high %v8438_v16, %v8454_v1  ;;  %v8719_v52 = vrot.slane %v8711_v2, %v11520_v9 }
 0x8c0   : > { %v9527_v16 = vcombine.low %v15475_v13, %v15537_v23  ;;  %v8726_v1 = vrot.slane %v8712_v62, %v11520_v9  ;;  %v9528_v27 = vcombine.high %v15475_v13, %v15537_v23  ;;  %v15737_v58 = vrot.slane %v8487_v49, %v11537_v20 }
 0x8c1   : > { %v15697_v48 = vpop.permute.xlu0 %8131  ;;  %v15699_v31 = vpop.permute.xlu1 %8129  ;;  %v15740_v35 = vrot.slane %v8488_v5, %v11537_v20  ;;  %v15743_v2 = vrot.slane %v8503_v21, %v11537_v20  ;;  %v15748_v62 = vrot.slane %v8504_v56, %v11537_v20  ;;  %v9031_v13 = vcombine.low %v15636_v29, %v8991_v36  ;;  %v15755_v5 = vld [vmem:[#allocation6 + $0x40] sm:$0xff] }
 0x8c2   : > { %v9032_v23 = vcombine.high %v15636_v29, %v8991_v36  ;;  %v9047_v46 = vcombine.low %v15643_v45, %v8998_v39  ;;  %v9048_v49 = vcombine.high %v15643_v45, %v8998_v39  ;;  %v8759_v21 = vcombine.low %v15646_v7, %v8719_v52 }
 0x8c3   : > { %8311 = vrot.lane.b32.xlu0 %v15311_v55, %s17532_s15  ;;  %8309 = vrot.lane.b32.xlu1 %v15711_v53, %s17532_s15  ;;  %v15727_v55 = vrot.slane %v10327_v3, %v11520_v9  ;;  %v9255_v3 = vcombine.low %v15473_v44, %v15539_v18  ;;  %v9256_v56 = vcombine.high %v15473_v44, %v15539_v18 }
 0x8c4   : > { %v8760_v36 = vcombine.high %v15646_v7, %v8719_v52  ;;  %v8775_v29 = vcombine.low %v15657_v34, %v8726_v1  ;;  %v10071_v10 = vcombine.low %v15483_v14, %v15545_v19  ;;  %v10072_v18 = vcombine.high %v15483_v14, %v15545_v19 }
 0x8c5   : > { %17534 = vst [vmem:[#allocation23_spill] sm:$0xff] %v15727_v55  ;;  %v15732_v4 = vpop.permute.xlu0 %8135  ;;  %v15734_v28 = vpop.permute.xlu1 %8133  ;;  %v9535_v55 = vrot.slane %v9527_v16, %v11520_v9  ;;  %v8776_v16 = vcombine.high %v15657_v34, %v8726_v1  ;;  %v9263_v44 = vrot.slane %v9255_v3, %v11520_v9  ;;  %v9799_v7 = vcombine.low %v15481_v47, %v15547_v59  ;;  %v15792_v1 = vld [vmem:[#allocation6 + $0x58] sm:$0xff] }
 0x8c6   : > { %v15780_v52 = vrot.slane %v9031_v13, %v11537_v20  ;;  %v15786_v54 = vrot.slane %v9047_v46, %v11537_v20  ;;  %v9800_v34 = vcombine.high %v15481_v47, %v15547_v59  ;;  %v15795_v14 = vrot.slane %v9048_v49, %v11537_v20 }
 0x8c7   : > { %8315 = vrot.lane.b32.xlu0 %v15320_v51, %s17532_s15  ;;  %8313 = vrot.lane.b32.xlu1 %v15755_v5, %s17532_s15  ;;  %v9542_v51 = vrot.slane %v9528_v27, %v11520_v9  ;;  %v15783_v27 = vrot.slane %v9032_v23, %v11537_v20  ;;  %v9575_v19 = vcombine.low %v15664_v11, %v9535_v55 }
 0x8c8   : > { %17535 = vst [vmem:[#allocation25_spill] sm:$0xff] %v15795_v14  ;;  %v9576_v3 = vcombine.high %v15664_v11, %v9535_v55  ;;  %v9270_v13 = vrot.slane %v9256_v56, %v11520_v9  ;;  %v15803_v46 = vrot.slane %v8759_v21, %v11537_v20  ;;  %v10079_v59 = vrot.slane %v10071_v10, %v11520_v9 }
 0x8c9   : > { %v15769_v39 = vpop.permute.xlu0 %8139  ;;  %v15771_v45 = vpop.permute.xlu1 %8137  ;;  %v9591_v47 = vcombine.low %v15677_v33, %v9542_v51  ;;  %v15809_v14 = vrot.slane %v8760_v36, %v11537_v20  ;;  %v9303_v11 = vcombine.low %v15688_v6, %v9263_v44  ;;  %v10086_v55 = vrot.slane %v10072_v18, %v11520_v9  ;;  %v15824_v36 = vld [vmem:[#allocation6 + $0x70] sm:$0xff] }
 0x8ca   : > { %17536 = vst [vmem:[#allocation21_spill] sm:$0xff] %v15803_v46  ;;  %v9807_v56 = vrot.slane %v9799_v7, %v11520_v9  ;;  %v15815_v21 = vrot.slane %v8775_v29, %v11537_v20  ;;  %v15818_v46 = vrot.slane %v8776_v16, %v11537_v20  ;;  %v9814_v10 = vrot.slane %v9800_v34, %v11520_v9 }
 0x8cb   : > { %8319 = vrot.lane.b32.xlu0 %v15329_v41, %s17532_s15  ;;  %8317 = vrot.lane.b32.xlu1 %v15792_v1, %s17532_s15  ;;  %v9592_v41 = vcombine.high %v15677_v33, %v9542_v51  ;;  %v9304_v33 = vcombine.high %v15688_v6, %v9263_v44  ;;  %v15827_v51 = vrot.slane %v9575_v19, %v11537_v20 }
 0x8cc   : > { %v15830_v18 = vrot.slane %v9576_v3, %v11537_v20  ;;  %v9319_v29 = vcombine.low %v15691_v30, %v9270_v13  ;;  %v9320_v16 = vcombine.high %v15691_v30, %v9270_v13  ;;  %v15837_v6 = vrot.slane %v9591_v47, %v11537_v20 }
 0x8cd   : > { %v8144_v23 = vpop.permute.xlu0 %8143  ;;  %v8142_v49 = vpop.permute.xlu1 %8141  ;;  %v10119_v44 = vcombine.low %v15702_v63, %v10079_v59  ;;  %v10120_v7 = vcombine.high %v15702_v63, %v10079_v59  ;;  %v15845_v3 = vrot.slane %v9303_v11, %v11537_v20  ;;  %v10135_v30 = vcombine.low %v15705_v15, %v10086_v55  ;;  %v15858_v59 = vld [vmem:[#allocation6 + $0x88] sm:$0xff] }
 0x8ce   : > { %17537 = vst [vmem:[#allocation31_spill] sm:$0xff] %v15830_v18  ;;  %v10136_v13 = vcombine.high %v15705_v15, %v10086_v55  ;;  %v9847_v18 = vcombine.low %v15714_v61, %v9807_v56  ;;  %v9848_v47 = vcombine.high %v15714_v61, %v9807_v56  ;;  %v8159_v63 = vsel %vm1452_vm1, %v15652_v42, %v15699_v31 }
 0x8cf   : > { %8323 = vrot.lane.b32.xlu0 %v15338_v40, %s17532_s15  ;;  %8321 = vrot.lane.b32.xlu1 %v15824_v36, %s17532_s15  ;;  %v15840_v40 = vrot.slane %v9592_v41, %v11537_v20  ;;  %v9863_v41 = vcombine.low %v15717_v0, %v9814_v10  ;;  %v15861_v11 = vrot.slane %v9304_v33, %v11537_v20 }
 0x8d0   : > { %v15864_v15 = vrot.slane %v9319_v29, %v11537_v20  ;;  %v15867_v61 = vrot.slane %v9320_v16, %v11537_v20  ;;  %v15874_v42 = vrot.slane %v10119_v44, %v11537_v20  ;;  %v10344_v31 = vcombine.high %v15491_v38, %v15555_v26 }
 0x8d1   : > { %17538 = vst [vmem:[#allocation27_spill] sm:$0xff] %v15840_v40  ;;  %v8148_v34 = vpop.permute.xlu0 %8147  ;;  %v8146_v19 = vpop.permute.xlu1 %8145  ;;  %v9864_v40 = vcombine.high %v15717_v0, %v9814_v10  ;;  %v10343_v0 = vcombine.low %v15491_v38, %v15555_v26  ;;  %v8160_v55 = vsel %vm1452_vm1, %v15697_v48, %v15734_v28  ;;  %v15885_v10 = vrot.slane %v10135_v30, %v11537_v20 }
 0x8d2   : > { %v15888_v29 = vrot.slane %v10136_v13, %v11537_v20  ;;  %v8455_v16 = vcombine.low %v15553_v50, %v8159_v63  ;;  %v8161_v44 = vsel %vm1452_vm1, %v15732_v4, %v15771_v45  ;;  %v15895_v38 = vrot.slane %v9847_v18, %v11537_v20 }
 0x8d3   : > { %8327 = vrot.lane.b32.xlu0 %v15347_v32, %s17532_s15  ;;  %8325 = vrot.lane.b32.xlu1 %v15858_v59, %s17532_s15  ;;  %v15877_v32 = vrot.slane %v10120_v7, %v11537_v20  ;;  %v15898_v26 = vrot.slane %v9848_v47, %v11537_v20  ;;  %v15901_v48 = vrot.slane %v9863_v41, %v11537_v20  ;;  %v15908_v7 = vld [vmem:[#allocation6 + $0xa0] sm:$0xff] }
 0x8d4   : > { %v15904_v28 = vrot.slane %v9864_v40, %v11537_v20  ;;  %v8456_v30 = vcombine.high %v15553_v50, %v8159_v63  ;;  %v8727_v4 = vcombine.low %v15563_v37, %v8160_v55  ;;  %v8162_v45 = vsel %vm1452_vm1, %v15769_v39, %v8142_v49 }
 0x8d5   : > { %v8152_v56 = vpop.permute.xlu0 %8151  ;;  %v8150_v33 = vpop.permute.xlu1 %8149  ;;  %17539 = vst [vmem:[#allocation15_spill] sm:$0xff] %v15901_v48  ;;  %v8163_v18 = vsel %vm1452_vm1, %v8144_v23, %v8146_v19  ;;  %v15918_v40 = vrot.slane %v10343_v0, %v11520_v9  ;;  %v8728_v13 = vcombine.high %v15563_v37, %v8160_v55  ;;  %v15924_v63 = vrot.slane %v10344_v31, %v11520_v9 }
 0x8d6   : > { %17540 = vst [vmem:[#allocation17_spill] sm:$0xff] %v15904_v28  ;;  %v8164_v47 = vsel %vm1452_vm1, %v8148_v34, %v8150_v33  ;;  %v8463_v39 = vrot.slane %v8455_v16, %v11520_v9  ;;  %v9000_v23 = vcombine.high %v15561_v57, %v8161_v44  ;;  %v9271_v19 = vcombine.low %v15571_v12, %v8162_v45  ;;  %v15935_v34 = vld [vmem:[#allocation6 + $0xb8] sm:$0xff]  ;;  %v17546_v28 = vld [vmem:[#allocation9_spill] sm:$0xff] }
 0x8d7   : > { %8331 = vrot.lane.b32.xlu0 %v15356_v25, %s17532_s15  ;;  %8329 = vrot.lane.b32.xlu1 %v15908_v7, %s17532_s15  ;;  %17541 = vst [vmem:[#allocation14_spill] sm:$0xff] %v15918_v40  ;;  %v8999_v25 = vcombine.low %v15561_v57, %v8161_v44  ;;  %17542 = vst [vmem:[#allocation19_spill] sm:$0xff] %v15924_v63  ;;  %v9272_v0 = vcombine.high %v15571_v12, %v8162_v45  ;;  %v17545_v63 = vld [vmem:[#allocation35_spill] sm:$0xff] }
 0x8d8   : > { %v9543_v37 = vcombine.low %v15569_v17, %v8163_v18  ;;  %v9544_v55 = vcombine.high %v15569_v17, %v8163_v18  ;;  %v8470_v31 = vrot.slane %v8456_v30, %v11520_v9  ;;  %v15939_v33 = vrot.slane %v8727_v4, %v11520_v9 }
 0x8d9   : > { %v8156_v50 = vpop.permute.xlu0 %8155  ;;  %v8154_v41 = vpop.permute.xlu1 %8153  ;;  %v9815_v57 = vcombine.low %v15579_v22, %v8164_v47  ;;  %v15946_v12 = vrot.slane %v8728_v13, %v11520_v9  ;;  %v15949_v17 = vrot.slane %v8999_v25, %v11520_v9  ;;  %v15954_v45 = vrot.slane %v9000_v23, %v11520_v9 }
 0x8da   : > { %v8165_v49 = vsel %vm1452_vm1, %v8152_v56, %v8154_v41  ;;  %v9816_v56 = vcombine.high %v15579_v22, %v8164_v47  ;;  %v15962_v13 = vrot.slane %v9271_v19, %v11520_v9  ;;  %v15965_v25 = vrot.slane %v9272_v0, %v11520_v9 }
 0x8db   : > { %8351 = vrot.lane.b32.xlu0 %v15674_v8, %s17543_s16  ;;  %8333 = vrot.lane.b32.xlu1 %v15935_v34, %s17532_s15  ;;  %v10087_v16 = vcombine.low %v15577_v24, %v8165_v49  ;;  %v10088_v44 = vcombine.high %v15577_v24, %v8165_v49  ;;  %v15968_v24 = vrot.slane %v9543_v37, %v11520_v9 }
 0x8dc   : > { %v15971_v41 = vrot.slane %v9544_v55, %v11520_v9 }
 0x8dd   : > { %v8176_v30 = vpop.permute.xlu0 %8175  ;;  %v8158_v4 = vpop.permute.xlu1 %8157  ;;  %v15986_v19 = vrot.slane %v10087_v16, %v11520_v9  ;;  %v15989_v0 = vrot.slane %v10088_v44, %v11520_v9 }
 0x8de   : > { %v8471_v22 = vcombine.low %v15585_v43, %v8176_v30  ;;  %v8472_v18 = vcombine.high %v15585_v43, %v8176_v30  ;;  %v15959_v47 = vsel %vm1452_vm1, %v8156_v50, %v8158_v4  ;;  %v15976_v43 = vrot.slane %v9815_v57, %v11520_v9 }
 0x8df   : > { %17544 = vst [vmem:[#allocation43_spill] sm:$0xff] %v15959_v47  ;;  %8355 = vrot.lane.b32.xlu0 %v15755_v5, %s17543_s16  ;;  %v15979_v50 = vrot.slane %v9816_v56, %v11520_v9  ;;  %8353 = vrot.lane.b32.xlu1 %v15711_v53, %s17543_s16 }
 0x8e0   : > { %v8479_v23 = vrot.slane %v8471_v22, %v11520_v9  ;;  %v8486_v49 = vrot.slane %v8472_v18, %v11520_v9 }
 0x8e1   : > { %v8180_v57 = vpop.permute.xlu0 %8179  ;;  %v8178_v56 = vpop.permute.xlu1 %8177 }
 0x8e2   : > { %v8519_v30 = vcombine.low %v8463_v39, %v8479_v23  ;;  %v8520_v4 = vcombine.high %v8463_v39, %v8479_v23  ;;  %v8535_v22 = vcombine.low %v8470_v31, %v8486_v49  ;;  %v8536_v18 = vcombine.high %v8470_v31, %v8486_v49 }
 0x8e3   : > { %v9015_v40 = vcombine.low %v17545_v63, %v8180_v57  ;;  %v9016_v16 = vcombine.high %v17545_v63, %v8180_v57  ;;  %v8743_v44 = vcombine.low %v17546_v28, %v8178_v56  ;;  %v8744_v48 = vcombine.high %v17546_v28, %v8178_v56  ;;  %8359 = vrot.lane.b32.xlu0 %v15824_v36, %s17543_s16 }
 0x8e4   : > { %v8527_v55 = vrot.slane %v8519_v30, %v11537_v20  ;;  %v8534_v37 = vrot.slane %v8520_v4, %v11537_v20  ;;  %v8543_v47 = vrot.slane %v8535_v22, %v11537_v20  ;;  %v8550_v39 = vrot.slane %v8536_v18, %v11537_v20  ;;  %8357 = vrot.lane.b32.xlu1 %v15792_v1, %s17543_s16 }
 0x8e5   : > { %v9023_v28 = vrot.slane %v9015_v40, %v11520_v9  ;;  %v9030_v63 = vrot.slane %v9016_v16, %v11520_v9  ;;  %v8751_v31 = vrot.slane %v8743_v44, %v11520_v9  ;;  %v8758_v23 = vrot.slane %v8744_v48, %v11520_v9  ;;  %v16018_v49 = vpop.permute.xlu0 %8183  ;;  %v16020_v57 = vpop.permute.xlu1 %8181 }
 0x8e6   : > { %v8551_v56 = vcombine.low %v15737_v58, %v8527_v55  ;;  %v8552_v30 = vcombine.high %v15737_v58, %v8527_v55  ;;  %v8553_v4 = vcombine.low %v15740_v35, %v8534_v37  ;;  %v8554_v40 = vcombine.high %v15740_v35, %v8534_v37 }
 0x8e7   : > { %v8555_v22 = vcombine.low %v15743_v2, %v8543_v47  ;;  %v8556_v18 = vcombine.high %v15743_v2, %v8543_v47  ;;  %v8557_v48 = vcombine.low %v15748_v62, %v8550_v39  ;;  %v8558_v16 = vcombine.high %v15748_v62, %v8550_v39  ;;  %8363 = vrot.lane.b32.xlu0 %v15908_v7, %s17543_s16 }
 0x8e8   : > { %10599 = vst.msk [vmem:[%s16012_s22] sm:$0xff] %vm639_vm5, %v8551_v56  ;;  %10601 = vst.msk [vmem:[%s16012_s22 + $0x10] sm:$0xff] %vm639_vm5, %v8552_v30  ;;  %v9063_v58 = vcombine.low %v15949_v17, %v9023_v28  ;;  %v9064_v35 = vcombine.high %v15949_v17, %v9023_v28  ;;  %v9079_v2 = vcombine.low %v15954_v45, %v9030_v63  ;;  %8361 = vrot.lane.b32.xlu1 %v15858_v59, %s17543_s16 }
 0x8e9   : > { %10603 = vst.msk [vmem:[%s16012_s22 + $0x20] sm:$0xff] %vm639_vm5, %v8553_v4  ;;  %10605 = vst.msk [vmem:[%s16012_s22 + $0x30] sm:$0xff] %vm639_vm5, %v8554_v40  ;;  %v9080_v47 = vcombine.high %v15954_v45, %v9030_v63  ;;  %v8791_v62 = vcombine.low %v15939_v33, %v8751_v31  ;;  %v8792_v37 = vcombine.high %v15939_v33, %v8751_v31  ;;  %v16058_v45 = vpop.permute.xlu0 %8187  ;;  %v16060_v44 = vpop.permute.xlu1 %8185 }
 0x8ea   : > { %10607 = vst.msk [vmem:[%s16012_s22 + $0x40] sm:$0xff] %vm639_vm5, %v8555_v22  ;;  %10609 = vst.msk [vmem:[%s16012_s22 + $0x50] sm:$0xff] %vm639_vm5, %v8556_v18  ;;  %v8807_v17 = vcombine.low %v15946_v12, %v8758_v23  ;;  %v8808_v55 = vcombine.high %v15946_v12, %v8758_v23  ;;  %v9071_v39 = vrot.slane %v9063_v58, %v11537_v20 }
 0x8eb   : > { %10611 = vst.msk [vmem:[%s16012_s22 + $0x60] sm:$0xff] %vm639_vm5, %v8557_v48  ;;  %10613 = vst.msk [vmem:[%s16012_s22 + $0x70] sm:$0xff] %vm639_vm5, %v8558_v16  ;;  %v9078_v28 = vrot.slane %v9064_v35, %v11537_v20  ;;  %v9087_v63 = vrot.slane %v9079_v2, %v11537_v20  ;;  %v9094_v56 = vrot.slane %v9080_v47, %v11537_v20  ;;  %8375 = vrot.lane.b32.xlu0 %v15674_v8, %s17548_s24  ;;  %v17549_v16 = vld [vmem:[#allocation25_spill] sm:$0xff] }
 0x8ec   : > { %v8799_v30 = vrot.slane %v8791_v62, %v11537_v20  ;;  %v8806_v33 = vrot.slane %v8792_v37, %v11537_v20  ;;  %v8815_v12 = vrot.slane %v8807_v17, %v11537_v20  ;;  %v8822_v31 = vrot.slane %v8808_v55, %v11537_v20  ;;  %8365 = vrot.lane.b32.xlu1 %v15935_v34, %s17543_s16 }
 0x8ed   : > { %v9095_v23 = vcombine.low %v15780_v52, %v9071_v39  ;;  %v9096_v4 = vcombine.high %v15780_v52, %v9071_v39  ;;  %v9097_v40 = vcombine.low %v15783_v27, %v9078_v28  ;;  %v9098_v22 = vcombine.high %v15783_v27, %v9078_v28  ;;  %v16082_v52 = vpop.permute.xlu0 %8199  ;;  %v16084_v2 = vpop.permute.xlu1 %8189  ;;  %v17551_v28 = vld [vmem:[#allocation11_spill] sm:$0xff] }
 0x8ee   : > { %v9099_v18 = vcombine.low %v15786_v54, %v9087_v63  ;;  %v9100_v48 = vcombine.high %v15786_v54, %v9087_v63  ;;  %v9101_v58 = vcombine.low %v17549_v16, %v9094_v56  ;;  %v9102_v35 = vcombine.high %v17549_v16, %v9094_v56  ;;  %v17550_v54 = vld [vmem:[#allocation21_spill] sm:$0xff]  ;;  %v17552_v56 = vld [vmem:[#allocation7_spill] sm:$0xff] }
 0x8ef   : > { %10631 = vst.msk [vmem:[%s16012_s22 + $0x100] sm:$0xff] %vm639_vm5, %v9095_v23  ;;  %10633 = vst.msk [vmem:[%s16012_s22 + $0x110] sm:$0xff] %vm639_vm5, %v9096_v4  ;;  %v8823_v27 = vcombine.low %v17550_v54, %v8799_v30  ;;  %v8824_v47 = vcombine.high %v17550_v54, %v8799_v30  ;;  %v8825_v62 = vcombine.low %v15809_v14, %v8806_v33  ;;  %8379 = vrot.lane.b32.xlu0 %v15755_v5, %s17548_s24 }
 0x8f0   : > { %10635 = vst.msk [vmem:[%s16012_s22 + $0x120] sm:$0xff] %vm639_vm5, %v9097_v40  ;;  %10637 = vst.msk [vmem:[%s16012_s22 + $0x130] sm:$0xff] %vm639_vm5, %v9098_v22  ;;  %v8826_v37 = vcombine.high %v15809_v14, %v8806_v33  ;;  %v8827_v17 = vcombine.low %v15815_v21, %v8815_v12  ;;  %v8828_v55 = vcombine.high %v15815_v21, %v8815_v12  ;;  %8377 = vrot.lane.b32.xlu1 %v15711_v53, %s17548_s24  ;;  %v17553_v33 = vld [vmem:[#allocation33_spill] sm:$0xff] }
 0x8f1   : > { %10639 = vst.msk [vmem:[%s16012_s22 + $0x140] sm:$0xff] %vm639_vm5, %v9099_v18  ;;  %10641 = vst.msk [vmem:[%s16012_s22 + $0x150] sm:$0xff] %vm639_vm5, %v9100_v48  ;;  %v8829_v39 = vcombine.low %v15818_v46, %v8822_v31  ;;  %v8830_v14 = vcombine.high %v15818_v46, %v8822_v31  ;;  %v9559_v63 = vcombine.low %v17551_v28, %v16018_v49  ;;  %v17554_v31 = vld [vmem:[#allocation29_spill] sm:$0xff]  ;;  %v16146_v4 = vpop.permute.xlu0 %8203  ;;  %v16148_v40 = vpop.permute.xlu1 %8201 }
 0x8f2   : > { %10643 = vst.msk [vmem:[%s16012_s22 + $0x160] sm:$0xff] %vm639_vm5, %v9101_v58  ;;  %10645 = vst.msk [vmem:[%s16012_s22 + $0x170] sm:$0xff] %vm639_vm5, %v9102_v35  ;;  %v9560_v21 = vcombine.high %v17551_v28, %v16018_v49  ;;  %v9287_v46 = vcombine.low %v17552_v56, %v16020_v57  ;;  %v9288_v30 = vcombine.high %v17552_v56, %v16020_v57 }
 0x8f3   : > { %10615 = vst.msk [vmem:[%s16012_s22 + $0x80] sm:$0xff] %vm639_vm5, %v8823_v27  ;;  %10617 = vst.msk [vmem:[%s16012_s22 + $0x90] sm:$0xff] %vm639_vm5, %v8824_v47  ;;  %v10103_v49 = vcombine.low %v17553_v33, %v16058_v45  ;;  %v10104_v12 = vcombine.high %v17553_v33, %v16058_v45  ;;  %v9831_v57 = vcombine.low %v17554_v31, %v16060_v44  ;;  %8383 = vrot.lane.b32.xlu0 %v15824_v36, %s17548_s24 }
 0x8f4   : > { %10619 = vst.msk [vmem:[%s16012_s22 + $0xa0] sm:$0xff] %vm639_vm5, %v8825_v62  ;;  %10621 = vst.msk [vmem:[%s16012_s22 + $0xb0] sm:$0xff] %vm639_vm5, %v8826_v37  ;;  %v9832_v23 = vcombine.high %v17554_v31, %v16060_v44  ;;  %v9567_v22 = vrot.slane %v9559_v63, %v11520_v9  ;;  %v9574_v18 = vrot.slane %v9560_v21, %v11520_v9  ;;  %8381 = vrot.lane.b32.xlu1 %v15792_v1, %s17548_s24 }
 0x8f5   : > { %10623 = vst.msk [vmem:[%s16012_s22 + $0xc0] sm:$0xff] %vm639_vm5, %v8827_v17  ;;  %10625 = vst.msk [vmem:[%s16012_s22 + $0xd0] sm:$0xff] %vm639_vm5, %v8828_v55  ;;  %v9295_v48 = vrot.slane %v9287_v46, %v11520_v9  ;;  %v9302_v16 = vrot.slane %v9288_v30, %v11520_v9  ;;  %v16155_v45 = vrot.slane %v10103_v49, %v11520_v9  ;;  %v16180_v28 = vpop.permute.xlu1 %8205  ;;  %v17555_v49 = vld [vmem:[#allocation31_spill] sm:$0xff] }
 0x8f6   : > { %10627 = vst.msk [vmem:[%s16012_s22 + $0xe0] sm:$0xff] %vm639_vm5, %v8829_v39  ;;  %10629 = vst.msk [vmem:[%s16012_s22 + $0xf0] sm:$0xff] %vm639_vm5, %v8830_v14  ;;  %v16158_v58 = vrot.slane %v10104_v12, %v11520_v9  ;;  %v16161_v44 = vrot.slane %v9831_v57, %v11520_v9  ;;  %v16164_v35 = vrot.slane %v9832_v23, %v11520_v9  ;;  %v16178_v14 = vpop.permute.xlu0 %8207 }
 0x8f7   : > { %v9607_v54 = vcombine.low %v15968_v24, %v9567_v22  ;;  %v9608_v27 = vcombine.high %v15968_v24, %v9567_v22  ;;  %v9623_v47 = vcombine.low %v15971_v41, %v9574_v18  ;;  %v9624_v62 = vcombine.high %v15971_v41, %v9574_v18  ;;  %8387 = vrot.lane.b32.xlu0 %v15908_v7, %s17548_s24  ;;  %v17556_v22 = vld [vmem:[#allocation27_spill] sm:$0xff] }
 0x8f8   : > { %v9335_v37 = vcombine.low %v15962_v13, %v9295_v48  ;;  %v9336_v17 = vcombine.high %v15962_v13, %v9295_v48  ;;  %v9351_v55 = vcombine.low %v15965_v25, %v9302_v16  ;;  %v9352_v39 = vcombine.high %v15965_v25, %v9302_v16  ;;  %8385 = vrot.lane.b32.xlu1 %v15858_v59, %s17548_s24 }
 0x8f9   : > { %v9615_v24 = vrot.slane %v9607_v54, %v11537_v20  ;;  %v9622_v63 = vrot.slane %v9608_v27, %v11537_v20  ;;  %v9631_v41 = vrot.slane %v9623_v47, %v11537_v20  ;;  %v9638_v21 = vrot.slane %v9624_v62, %v11537_v20  ;;  %v16204_v16 = vpop.permute.xlu1 %8209 }
 0x8fa   : > { %v9343_v56 = vrot.slane %v9335_v37, %v11537_v20  ;;  %v9350_v13 = vrot.slane %v9336_v17, %v11537_v20  ;;  %v9359_v25 = vrot.slane %v9351_v55, %v11537_v20  ;;  %v9366_v46 = vrot.slane %v9352_v39, %v11537_v20 }
 0x8fb   : > { %v9639_v30 = vcombine.low %v15827_v51, %v9615_v24  ;;  %v9640_v33 = vcombine.high %v15827_v51, %v9615_v24  ;;  %v9641_v12 = vcombine.low %v17555_v49, %v9622_v63  ;;  %v9642_v31 = vcombine.high %v17555_v49, %v9622_v63  ;;  %v16202_v51 = vpop.permute.xlu0 %8211  ;;  %8399 = vrot.lane.b32.xlu0 %v15674_v8, %s17557_s10 }
 0x8fc   : > { %v9643_v57 = vcombine.low %v15837_v6, %v9631_v41  ;;  %v9644_v23 = vcombine.high %v15837_v6, %v9631_v41  ;;  %v9645_v18 = vcombine.low %v17556_v22, %v9638_v21  ;;  %v9646_v48 = vcombine.high %v17556_v22, %v9638_v21  ;;  %8389 = vrot.lane.b32.xlu1 %v15935_v34, %s17548_s24  ;;  %v17559_v22 = vld [vmem:[#allocation17_spill] sm:$0xff] }
 0x8fd   : > { %10663 = vst.msk [vmem:[%s16012_s22 + $0x200] sm:$0xff] %vm639_vm5, %v9639_v30  ;;  %10665 = vst.msk [vmem:[%s16012_s22 + $0x210] sm:$0xff] %vm639_vm5, %v9640_v33  ;;  %v9367_v6 = vcombine.low %v15845_v3, %v9343_v56  ;;  %v9368_v54 = vcombine.high %v15845_v3, %v9343_v56  ;;  %v9369_v27 = vcombine.low %v15861_v11, %v9350_v13  ;;  %v16268_v39 = vpop.permute.xlu1 %8213 }
 0x8fe   : > { %10667 = vst.msk [vmem:[%s16012_s22 + $0x220] sm:$0xff] %vm639_vm5, %v9641_v12  ;;  %10669 = vst.msk [vmem:[%s16012_s22 + $0x230] sm:$0xff] %vm639_vm5, %v9642_v31  ;;  %v9370_v47 = vcombine.high %v15861_v11, %v9350_v13  ;;  %v9371_v62 = vcombine.low %v15864_v15, %v9359_v25  ;;  %v9372_v37 = vcombine.high %v15864_v15, %v9359_v25  ;;  %v17558_v31 = vld [vmem:[#allocation15_spill] sm:$0xff] }
 0x8ff   : > { %10671 = vst.msk [vmem:[%s16012_s22 + $0x240] sm:$0xff] %vm639_vm5, %v9643_v57  ;;  %10673 = vst.msk [vmem:[%s16012_s22 + $0x250] sm:$0xff] %vm639_vm5, %v9644_v23  ;;  %v9373_v3 = vcombine.low %v15867_v61, %v9366_v46  ;;  %v9374_v11 = vcombine.high %v15867_v61, %v9366_v46  ;;  %v10151_v17 = vcombine.low %v15986_v19, %v16155_v45  ;;  %v16266_v55 = vpop.permute.xlu0 %8223  ;;  %8403 = vrot.lane.b32.xlu0 %v15755_v5, %s17557_s10 }
 0x900   : > { %10675 = vst.msk [vmem:[%s16012_s22 + $0x260] sm:$0xff] %vm639_vm5, %v9645_v18  ;;  %10677 = vst.msk [vmem:[%s16012_s22 + $0x270] sm:$0xff] %vm639_vm5, %v9646_v48  ;;  %v10152_v15 = vcombine.high %v15986_v19, %v16155_v45  ;;  %v10167_v61 = vcombine.low %v15989_v0, %v16158_v58  ;;  %v10168_v8 = vcombine.high %v15989_v0, %v16158_v58  ;;  %8401 = vrot.lane.b32.xlu1 %v15711_v53, %s17557_s10  ;;  %v17560_v18 = vld [vmem:[#allocation18_spill] sm:$0xff] }
 0x901   : > { %10647 = vst.msk [vmem:[%s16012_s22 + $0x180] sm:$0xff] %vm639_vm5, %v9367_v6  ;;  %10649 = vst.msk [vmem:[%s16012_s22 + $0x190] sm:$0xff] %vm639_vm5, %v9368_v54  ;;  %v9879_v19 = vcombine.low %v15976_v43, %v16161_v44  ;;  %v9880_v45 = vcombine.high %v15976_v43, %v16161_v44  ;;  %v9895_v0 = vcombine.low %v15979_v50, %v16164_v35  ;;  %v16292_v12 = vpop.permute.xlu1 %8225  ;;  %v17561_v54 = vld [vmem:[#allocation44_spill] sm:$0xff] }
 0x902   : > { %10651 = vst.msk [vmem:[%s16012_s22 + $0x1a0] sm:$0xff] %vm639_vm5, %v9369_v27  ;;  %10653 = vst.msk [vmem:[%s16012_s22 + $0x1b0] sm:$0xff] %vm639_vm5, %v9370_v47  ;;  %v9896_v58 = vcombine.high %v15979_v50, %v16164_v35  ;;  %v10159_v24 = vrot.slane %v10151_v17, %v11537_v20  ;;  %v10166_v63 = vrot.slane %v10152_v15, %v11537_v20 }
 0x903   : > { %10655 = vst.msk [vmem:[%s16012_s22 + $0x1c0] sm:$0xff] %vm639_vm5, %v9371_v62  ;;  %10657 = vst.msk [vmem:[%s16012_s22 + $0x1d0] sm:$0xff] %vm639_vm5, %v9372_v37  ;;  %v10175_v41 = vrot.slane %v10167_v61, %v11537_v20  ;;  %v10182_v21 = vrot.slane %v10168_v8, %v11537_v20  ;;  %v9887_v43 = vrot.slane %v9879_v19, %v11537_v20  ;;  %8407 = vrot.lane.b32.xlu0 %v15824_v36, %s17557_s10  ;;  %v17562_v36 = vld [vmem:[#allocation16_spill] sm:$0xff]  ;;  %v17564_v62 = vld [vmem:[#allocation14_spill] sm:$0xff] }
 0x904   : > { %10659 = vst.msk [vmem:[%s16012_s22 + $0x1e0] sm:$0xff] %vm639_vm5, %v9373_v3  ;;  %10661 = vst.msk [vmem:[%s16012_s22 + $0x1f0] sm:$0xff] %vm639_vm5, %v9374_v11  ;;  %v9894_v44 = vrot.slane %v9880_v45, %v11537_v20  ;;  %v9903_v50 = vrot.slane %v9895_v0, %v11537_v20  ;;  %v9910_v35 = vrot.slane %v9896_v58, %v11537_v20  ;;  %8405 = vrot.lane.b32.xlu1 %v15792_v1, %s17557_s10  ;;  %v17565_v37 = vld [vmem:[#allocation23_spill] sm:$0xff] }
 0x905   : > { %v10183_v56 = vcombine.low %v15874_v42, %v10159_v24  ;;  %v10184_v13 = vcombine.high %v15874_v42, %v10159_v24  ;;  %v10185_v25 = vcombine.low %v15877_v32, %v10166_v63  ;;  %v10186_v46 = vcombine.high %v15877_v32, %v10166_v63  ;;  %v16290_v42 = vpop.permute.xlu0 %8227  ;;  %v16362_v0 = vpop.permute.xlu1 %8229  ;;  %v17569_v58 = vld [vmem:[#allocation19_spill] sm:$0xff] }
 0x906   : > { %v10187_v30 = vcombine.low %v15885_v10, %v10175_v41  ;;  %v10188_v33 = vcombine.high %v15885_v10, %v10175_v41  ;;  %v10189_v5 = vcombine.low %v15888_v29, %v10182_v21  ;;  %v10190_v49 = vcombine.high %v15888_v29, %v10182_v21 }
 0x907   : > { %10695 = vst.msk [vmem:[%s16012_s22 + $0x300] sm:$0xff] %vm639_vm5, %v10183_v56  ;;  %10697 = vst.msk [vmem:[%s16012_s22 + $0x310] sm:$0xff] %vm639_vm5, %v10184_v13  ;;  %v9911_v53 = vcombine.low %v15895_v38, %v9887_v43  ;;  %v9912_v32 = vcombine.high %v15895_v38, %v9887_v43  ;;  %v9913_v10 = vcombine.low %v15898_v26, %v9894_v44  ;;  %8411 = vrot.lane.b32.xlu0 %v15908_v7, %s17557_s10 }
 0x908   : > { %10699 = vst.msk [vmem:[%s16012_s22 + $0x320] sm:$0xff] %vm639_vm5, %v10185_v25  ;;  %10701 = vst.msk [vmem:[%s16012_s22 + $0x330] sm:$0xff] %vm639_vm5, %v10186_v46  ;;  %v9914_v29 = vcombine.high %v15898_v26, %v9894_v44  ;;  %v9915_v57 = vcombine.low %v17558_v31, %v9903_v50  ;;  %v9916_v23 = vcombine.high %v17558_v31, %v9903_v50  ;;  %8409 = vrot.lane.b32.xlu1 %v15858_v59, %s17557_s10 }
 0x909   : > { %10703 = vst.msk [vmem:[%s16012_s22 + $0x340] sm:$0xff] %vm639_vm5, %v10187_v30  ;;  %10705 = vst.msk [vmem:[%s16012_s22 + $0x350] sm:$0xff] %vm639_vm5, %v10188_v33  ;;  %v9917_v38 = vcombine.low %v17559_v22, %v9910_v35  ;;  %v9918_v26 = vcombine.high %v17559_v22, %v9910_v35  ;;  %v10375_v48 = vcombine.low %v17560_v18, %v16084_v2  ;;  %v16350_v1 = vpop.permute.xlu0 %8231  ;;  %v16378_v46 = vpop.permute.xlu1 %8233 }
 0x90a   : > { %10707 = vst.msk [vmem:[%s16012_s22 + $0x360] sm:$0xff] %vm639_vm5, %v10189_v5  ;;  %10709 = vst.msk [vmem:[%s16012_s22 + $0x370] sm:$0xff] %vm639_vm5, %v10190_v49  ;;  %v10376_v6 = vcombine.high %v17560_v18, %v16084_v2  ;;  %v17563_v27 = vcombine.high %v17561_v54, %v17562_v36  ;;  %v10391_v3 = vcombine.low %v17565_v37, %v17564_v62  ;;  %v17566_v2 = vld [vmem:[#allocation43_spill] sm:$0xff] }
 0x90b   : > { %10679 = vst.msk [vmem:[%s16012_s22 + $0x280] sm:$0xff] %vm639_vm5, %v9911_v53  ;;  %10681 = vst.msk [vmem:[%s16012_s22 + $0x290] sm:$0xff] %vm639_vm5, %v9912_v32  ;;  %v10392_v11 = vcombine.high %v17565_v37, %v17564_v62  ;;  %v17567_v17 = vcombine.low %v15587_v60, %v17566_v2  ;;  %v17568_v61 = vcombine.high %v15587_v60, %v17566_v2 }
 0x90c   : > { %10683 = vst.msk [vmem:[%s16012_s22 + $0x2a0] sm:$0xff] %vm639_vm5, %v9913_v10  ;;  %10685 = vst.msk [vmem:[%s16012_s22 + $0x2b0] sm:$0xff] %vm639_vm5, %v9914_v29  ;;  %v10342_v47 = vrot.slane %v17563_v27, %v11520_v9  ;;  %v10383_v19 = vrot.slane %v10375_v48, %v11520_v9  ;;  %v10390_v45 = vrot.slane %v10376_v6, %v11520_v9  ;;  %8413 = vrot.lane.b32.xlu1 %v15935_v34, %s17557_s10 }
 0x90d   : > { %10687 = vst.msk [vmem:[%s16012_s22 + $0x2c0] sm:$0xff] %vm639_vm5, %v9915_v57  ;;  %10689 = vst.msk [vmem:[%s16012_s22 + $0x2d0] sm:$0xff] %vm639_vm5, %v9916_v23  ;;  %v10367_v15 = vrot.slane %v17567_v17, %v11520_v9  ;;  %v10374_v8 = vrot.slane %v17568_v61, %v11520_v9  ;;  %v10399_v60 = vrot.slane %v10391_v3, %v11537_v20  ;;  %v16372_v35 = vpop.permute.xlu0 %8235 }
 0x90e   : > { %10691 = vst.msk [vmem:[%s16012_s22 + $0x2e0] sm:$0xff] %vm639_vm5, %v9917_v38  ;;  %10693 = vst.msk [vmem:[%s16012_s22 + $0x2f0] sm:$0xff] %vm639_vm5, %v9918_v26  ;;  %v10407_v24 = vcombine.low %v10342_v47, %v17569_v58  ;;  %v10408_v63 = vcombine.high %v10342_v47, %v17569_v58  ;;  %v10406_v50 = vrot.slane %v10392_v11, %v11537_v20  ;;  %v16394_v38 = vpop.permute.xlu1 %8237 }
 0x90f   : > { %v10423_v41 = vcombine.low %v10367_v15, %v10383_v19  ;;  %v10424_v21 = vcombine.high %v10367_v15, %v10383_v19  ;;  %v10439_v43 = vcombine.low %v10374_v8, %v10390_v45  ;;  %v10440_v44 = vcombine.high %v10374_v8, %v10390_v45 }
 0x910   : > { %v10415_v59 = vrot.slane %v10407_v24, %v11537_v20  ;;  %v10422_v30 = vrot.slane %v10408_v63, %v11537_v20 }
 0x911   : > { %v10431_v56 = vrot.slane %v10423_v41, %v11537_v20  ;;  %v10438_v13 = vrot.slane %v10424_v21, %v11537_v20  ;;  %v10447_v7 = vrot.slane %v10439_v43, %v11537_v20  ;;  %v10454_v25 = vrot.slane %v10440_v44, %v11537_v20  ;;  %v8248_v57 = vpop.permute.xlu0 %8247 }
 0x912   : > { %v8559_v23 = vcombine.low %v16082_v52, %v8248_v57  ;;  %v8560_v22 = vcombine.high %v16082_v52, %v8248_v57  ;;  %v8250_v48 = vpop.permute.xlu1 %8249 }
 0x913   : > { %v10455_v33 = vcombine.low %v10399_v60, %v10431_v56  ;;  %v10456_v5 = vcombine.high %v10399_v60, %v10431_v56  ;;  %v10457_v49 = vcombine.low %v10406_v50, %v10438_v13  ;;  %v10458_v53 = vcombine.high %v10406_v50, %v10438_v13 }
 0x914   : > { %v10459_v32 = vcombine.low %v10415_v59, %v10447_v7  ;;  %v10460_v10 = vcombine.high %v10415_v59, %v10447_v7  ;;  %v10461_v29 = vcombine.low %v10422_v30, %v10454_v25  ;;  %v10462_v31 = vcombine.high %v10422_v30, %v10454_v25 }
 0x915   : > { %10711 = vst.msk [vmem:[%s16012_s22 + $0x380] sm:$0xff] %vm639_vm5, %v10455_v33  ;;  %10713 = vst.msk [vmem:[%s16012_s22 + $0x390] sm:$0xff] %vm639_vm5, %v10456_v5  ;;  %v8252_v34 = vpop.permute.xlu0 %8251  ;;  %v8831_v6 = vcombine.low %v16148_v40, %v8250_v48  ;;  %v8832_v52 = vcombine.high %v16148_v40, %v8250_v48  ;;  %v16433_v45 = vrot.slane %v8559_v23, %v11520_v9 }
 0x916   : > { %10715 = vst.msk [vmem:[%s16012_s22 + $0x3a0] sm:$0xff] %vm639_vm5, %v10457_v49  ;;  %10717 = vst.msk [vmem:[%s16012_s22 + $0x3b0] sm:$0xff] %vm639_vm5, %v10458_v53  ;;  %v9103_v26 = vcombine.low %v16146_v4, %v8252_v34  ;;  %v9104_v18 = vcombine.high %v16146_v4, %v8252_v34  ;;  %v8254_v47 = vpop.permute.xlu1 %8253  ;;  %v16436_v58 = vrot.slane %v8560_v22, %v11520_v9 }
 0x917   : > { %10719 = vst.msk [vmem:[%s16012_s22 + $0x3c0] sm:$0xff] %vm639_vm5, %v10459_v32  ;;  %10721 = vst.msk [vmem:[%s16012_s22 + $0x3d0] sm:$0xff] %vm639_vm5, %v10460_v10  ;;  %v9375_v62 = vcombine.low %v16180_v28, %v8254_v47  ;;  %v9376_v37 = vcombine.high %v16180_v28, %v8254_v47  ;;  %v16478_v53 = vrot.slane %v8832_v52, %v11520_v9 }
 0x918   : > { %10723 = vst.msk [vmem:[%s16012_s22 + $0x3e0] sm:$0xff] %vm639_vm5, %v10461_v29  ;;  %10725 = vst.msk [vmem:[%s16012_s22 + $0x3f0] sm:$0xff] %vm639_vm5, %v10462_v31  ;;  %v16457_v25 = vrot.slane %v9103_v26, %v11520_v9  ;;  %v16460_v59 = vrot.slane %v9104_v18, %v11520_v9 }
 0x919   : > { %v8256_v54 = vpop.permute.xlu0 %8255  ;;  %v16508_v47 = vrot.slane %v9376_v37, %v11520_v9 }
 0x91a   : > { %v9647_v36 = vcombine.low %v16178_v14, %v8256_v54  ;;  %v9648_v27 = vcombine.high %v16178_v14, %v8256_v54  ;;  %v16418_v2 = vpop.permute.xlu1 %8257  ;;  %v16505_v54 = vrot.slane %v9375_v62, %v11520_v9 }
 0x91b   : > { %v9919_v40 = vcombine.low %v16204_v16, %v16418_v2  ;;  %v9920_v14 = vcombine.high %v16204_v16, %v16418_v2 }
 0x91c   : > { %v16502_v52 = vrot.slane %v9648_v27, %v11520_v9 }
 0x91d   : > { %v16412_v3 = vpop.permute.xlu0 %8259 }
 0x91e   : > { %v10191_v4 = vcombine.low %v16202_v51, %v16412_v3  ;;  %v10192_v11 = vcombine.high %v16202_v51, %v16412_v3  ;;  %v16426_v61 = vpop.permute.xlu1 %8261  ;;  %v16586_v51 = vrot.slane %v9920_v14, %v11520_v9 }
 0x91f   : > { %v10463_v8 = vcombine.low %v16268_v39, %v16426_v61  ;;  %v10464_v19 = vcombine.high %v16268_v39, %v16426_v61 }
 0x921   : > { %v8272_v17 = vpop.permute.xlu0 %8271 }
 0x922   : > { %v8575_v15 = vcombine.low %v16266_v55, %v8272_v17  ;;  %v8576_v28 = vcombine.high %v16266_v55, %v8272_v17  ;;  %v8274_v60 = vpop.permute.xlu1 %8273 }
 0x923   : > { %v8847_v13 = vcombine.low %v16292_v12, %v8274_v60  ;;  %v8848_v7 = vcombine.high %v16292_v12, %v8274_v60  ;;  %v16475_v12 = vrot.slane %v8831_v6, %v11520_v9  ;;  %v16499_v6 = vrot.slane %v9647_v36, %v11520_v9 }
 0x924   : > { %v16439_v24 = vrot.slane %v8575_v15, %v11520_v9  ;;  %v16442_v63 = vrot.slane %v8576_v28, %v11520_v9 }
 0x925   : > { %v8276_v55 = vpop.permute.xlu0 %8275  ;;  %v16469_v5 = vrot.slane %v8847_v13, %v11520_v9 }
 0x926   : > { %v8623_v41 = vcombine.low %v16433_v45, %v16439_v24  ;;  %v8624_v21 = vcombine.high %v16433_v45, %v16439_v24  ;;  %v8639_v43 = vcombine.low %v16436_v58, %v16442_v63  ;;  %v9119_v50 = vcombine.low %v16290_v42, %v8276_v55  ;;  %v8278_v29 = vpop.permute.xlu1 %8277 }
 0x927   : > { %v9120_v56 = vcombine.high %v16290_v42, %v8276_v55  ;;  %v16472_v42 = vrot.slane %v8848_v7, %v11520_v9  ;;  %v9391_v55 = vcombine.low %v16362_v0, %v8278_v29  ;;  %v9392_v36 = vcombine.high %v16362_v0, %v8278_v29 }
 0x928   : > { %v16463_v30 = vrot.slane %v9119_v50, %v11520_v9  ;;  %v16548_v29 = vrot.slane %v10191_v4, %v11520_v9  ;;  %v16669_v44 = vrot.slane %v8639_v43, %v11537_v20 }
 0x929   : > { %v16466_v33 = vrot.slane %v9120_v56, %v11520_v9  ;;  %v8280_v49 = vpop.permute.xlu0 %8279 }
 0x92a   : > { %v9663_v32 = vcombine.low %v16350_v1, %v8280_v49  ;;  %v9664_v10 = vcombine.high %v16350_v1, %v8280_v49  ;;  %v8282_v17 = vpop.permute.xlu1 %8281  ;;  %v16536_v49 = vrot.slane %v9392_v36, %v11520_v9  ;;  %v17577_v24 = vcombine.high %v16457_v25, %v16463_v30 }
 0x92b   : > { %v9935_v62 = vcombine.low %v16378_v46, %v8282_v17  ;;  %v9936_v37 = vcombine.high %v16378_v46, %v8282_v17  ;;  %v17578_v43 = vcombine.low %v16460_v59, %v16466_v33 }
 0x92c   : > { %v16511_v15 = vrot.slane %v9663_v32, %v11520_v9  ;;  %v16514_v28 = vrot.slane %v9664_v10, %v11520_v9 }
 0x92d   : > { %v8284_v48 = vpop.permute.xlu0 %8283  ;;  %v16589_v3 = vrot.slane %v9935_v62, %v11520_v9 }
 0x92e   : > { %v10207_v27 = vcombine.low %v16372_v35, %v8284_v48  ;;  %v10208_v60 = vcombine.high %v16372_v35, %v8284_v48  ;;  %v16533_v35 = vrot.slane %v9391_v55, %v11520_v9  ;;  %v8286_v10 = vpop.permute.xlu1 %8285  ;;  %v16554_v48 = vrot.slane %v10192_v11, %v11520_v9 }
 0x92f   : > { %v16592_v11 = vrot.slane %v9936_v37, %v11520_v9  ;;  %v10479_v4 = vcombine.low %v16394_v38, %v8286_v10  ;;  %v10480_v36 = vcombine.high %v16394_v38, %v8286_v10  ;;  %v16612_v38 = vrot.slane %v10463_v8, %v11520_v9 }
 0x930   : > { %v16539_v46 = vrot.slane %v10207_v27, %v11520_v9  ;;  %v16542_v32 = vrot.slane %v10208_v60, %v11520_v9  ;;  %v16580_v27 = vrot.slane %v9919_v40, %v11520_v9  ;;  %v16618_v37 = vrot.slane %v10464_v19, %v11520_v9 }
 0x931   : > { %v16530_v7 = vpop.permute.xlu0 %8303  ;;  %17570 = vst [vmem:[#allocation46_spill] sm:$0xff] %v16612_v38  ;;  %v16621_v10 = vrot.slane %v10479_v4, %v11520_v9  ;;  %v16624_v2 = vrot.slane %v10480_v36, %v11520_v9 }
 0x932   : > { %v16574_v55 = vpop.permute.xlu1 %8305  ;;  %17571 = vst [vmem:[#allocation8_spill] sm:$0xff] %v16618_v37 }
 0x933   : > { %17572 = vst [vmem:[#allocation48_spill] sm:$0xff] %v16621_v10  ;;  %17573 = vst [vmem:[#allocation53_spill] sm:$0xff] %v16624_v2  ;;  %v17575_v2 = vcombine.high %v16436_v58, %v16442_v63  ;;  %v16693_v58 = vrot.slane %v17578_v43, %v11537_v20  ;;  %v17579_v63 = vcombine.high %v16460_v59, %v16466_v33 }
 0x934   : > { %v17582_v43 = vcombine.low %v16478_v53, %v16472_v42  ;;  %v17583_v33 = vcombine.high %v16478_v53, %v16472_v42  ;;  %v17587_v42 = vcombine.high %v16502_v52, %v16514_v28 }
 0x935   : > { %v16572_v60 = vpop.permute.xlu0 %8307  ;;  %v16675_v37 = vrot.slane %v17575_v2, %v11537_v20  ;;  %v16699_v2 = vrot.slane %v17579_v63, %v11537_v20 }
 0x936   : > { %v16606_v62 = vpop.permute.xlu1 %8309  ;;  %v16717_v59 = vrot.slane %v17582_v43, %v11537_v20  ;;  %v16723_v63 = vrot.slane %v17583_v33, %v11537_v20  ;;  %v16747_v53 = vrot.slane %v17587_v42, %v11537_v20  ;;  %v17588_v33 = vcombine.low %v16505_v54, %v16533_v35 }
 0x937   : > { %v17592_v42 = vcombine.low %v16548_v29, %v16539_v46 }
 0x939   : > { %v16596_v17 = vpop.permute.xlu0 %8311 }
 0x93a   : > { %v8314_v19 = vpop.permute.xlu1 %8313 }
 0x93d   : > { %v8316_v61 = vpop.permute.xlu0 %8315 }
 0x93e   : > { %v8318_v4 = vpop.permute.xlu1 %8317 }
 0x941   : > { %v8320_v40 = vpop.permute.xlu0 %8319 }
 0x942   : > { %v8322_v13 = vpop.permute.xlu1 %8321 }
 0x945   : > { %v8324_v0 = vpop.permute.xlu0 %8323 }
 0x946   : > { %v8326_v56 = vpop.permute.xlu1 %8325 }
 0x949   : > { %v8328_v36 = vpop.permute.xlu0 %8327 }
 0x94a   : > { %v8330_v18 = vpop.permute.xlu1 %8329 }
 0x94d   : > { %v8332_v50 = vpop.permute.xlu0 %8331 }
 0x94e   : > { %v8334_v1 = vpop.permute.xlu1 %8333 }
 0x94f   : > { %v16637_v16 = vsel %vm639_vm5, %v8332_v50, %v8334_v1  ;;  %v16657_v1 = vrot.slane %v8623_v41, %v11537_v20  ;;  %v16663_v50 = vrot.slane %v8624_v21, %v11537_v20  ;;  %v17576_v41 = vcombine.low %v16457_v25, %v16463_v30 }
 0x950   : > { %v16687_v21 = vrot.slane %v17577_v24, %v11537_v20  ;;  %v17581_v30 = vcombine.high %v16475_v12, %v16469_v5 }
 0x951   : > { %v16634_v14 = vpop.permute.xlu0 %8351  ;;  %v16681_v10 = vrot.slane %v17576_v41, %v11537_v20  ;;  %v17580_v41 = vcombine.low %v16475_v12, %v16469_v5  ;;  %v17585_v5 = vcombine.high %v16499_v6, %v16511_v15 }
 0x952   : > { %v16641_v26 = vpop.permute.xlu1 %8353  ;;  %v16711_v24 = vrot.slane %v17581_v30, %v11537_v20  ;;  %v17586_v30 = vcombine.low %v16502_v52, %v16514_v28  ;;  %v17591_v52 = vcombine.high %v16508_v47, %v16536_v49 }
 0x953   : > { %v16705_v38 = vrot.slane %v17580_v41, %v11537_v20  ;;  %v17584_v41 = vcombine.low %v16499_v6, %v16511_v15  ;;  %v16735_v12 = vrot.slane %v17585_v5, %v11537_v20  ;;  %v17589_v6 = vcombine.high %v16505_v54, %v16533_v35 }
 0x954   : > { %v16741_v43 = vrot.slane %v17586_v30, %v11537_v20  ;;  %v17590_v5 = vcombine.low %v16508_v47, %v16536_v49  ;;  %v16771_v28 = vrot.slane %v17591_v52, %v11537_v20  ;;  %v17594_v35 = vcombine.high %v16548_v29, %v16539_v46 }
 0x955   : > { %v16639_v8 = vpop.permute.xlu0 %8355  ;;  %v16759_v15 = vrot.slane %v17589_v6, %v11537_v20  ;;  %v17597_v49 = vcombine.high %v16554_v48, %v16542_v32  ;;  %v17599_v46 = vcombine.low %v16580_v27, %v16589_v3 }
 0x956   : > { %v16645_v34 = vpop.permute.xlu1 %8357  ;;  %v16765_v30 = vrot.slane %v17590_v5, %v11537_v20  ;;  %v16783_v6 = vrot.slane %v17594_v35, %v11537_v20  ;;  %v17595_v5 = vcombine.low %v16554_v48, %v16542_v32  ;;  %v17601_v35 = vcombine.high %v16580_v27, %v16589_v3 }
 0x957   : > { %v16795_v52 = vrot.slane %v17597_v49, %v11537_v20  ;;  %v16804_v29 = vrot.slane %v17599_v46, %v11537_v20  ;;  %v17603_v32 = vcombine.low %v16586_v51, %v16592_v11  ;;  %v8337_v27 = vsel %vm639_vm5, %v16596_v17, %v8314_v19 }
 0x958   : > { %v16789_v47 = vrot.slane %v17595_v5, %v11537_v20  ;;  %v16810_v5 = vrot.slane %v17601_v35, %v11537_v20  ;;  %v8338_v35 = vsel %vm639_vm5, %v8316_v61, %v8318_v4 }
 0x959   : > { %v16643_v39 = vpop.permute.xlu0 %8359  ;;  %17598 = vst [vmem:[#allocation40_spill] sm:$0xff] %v16795_v52  ;;  %17600 = vst [vmem:[#allocation12_spill] sm:$0xff] %v16804_v29  ;;  %v16816_v48 = vrot.slane %v17603_v32, %v11537_v20  ;;  %v8339_v32 = vsel %vm639_vm5, %v8320_v40, %v8322_v13 }
 0x95a   : > { %v16649_v23 = vpop.permute.xlu1 %8361  ;;  %17596 = vst [vmem:[#allocation42_spill] sm:$0xff] %v16789_v47  ;;  %17602 = vst [vmem:[#allocation51_spill] sm:$0xff] %v16810_v5 }
 0x95b   : > { %17604 = vst [vmem:[#allocation47_spill] sm:$0xff] %v16816_v48 }
 0x95d   : > { %v16647_v22 = vpop.permute.xlu0 %8363 }
 0x95e   : > { %v16651_v31 = vpop.permute.xlu1 %8365 }
 0x95f   : > { %17574 = vst [vmem:[#allocation49_spill] sm:$0xff] %v16651_v31  ;;  %v16729_v31 = vrot.slane %v17584_v41, %v11537_v20  ;;  %v16753_v41 = vrot.slane %v17588_v33, %v11537_v20  ;;  %v16777_v33 = vrot.slane %v17592_v42, %v11537_v20  ;;  %v8335_v42 = vsel %vm639_vm5, %v16530_v7, %v16574_v55 }
 0x960   : > { %v8336_v7 = vsel %vm639_vm5, %v16572_v60, %v16606_v62  ;;  %v17605_v55 = vcombine.high %v16586_v51, %v16592_v11  ;;  %v8340_v60 = vsel %vm639_vm5, %v8324_v0, %v8326_v56  ;;  %v8341_v62 = vsel %vm639_vm5, %v8328_v36, %v8330_v18 }
 0x961   : > { %v8376_v57 = vpop.permute.xlu0 %8375  ;;  %17593 = vst [vmem:[#allocation45_spill] sm:$0xff] %v16777_v33 }
 0x962   : > { %v8378_v25 = vpop.permute.xlu1 %8377  ;;  %v16825_v49 = vrot.slane %v17605_v55, %v11537_v20  ;;  %v8591_v3 = vcombine.low %v8335_v42, %v8376_v57  ;;  %v8592_v46 = vcombine.high %v8335_v42, %v8376_v57 }
 0x963   : > { %v8863_v52 = vcombine.low %v8336_v7, %v8378_v25  ;;  %v8864_v51 = vcombine.high %v8336_v7, %v8378_v25 }
 0x964   : > { %17606 = vst [vmem:[#allocation38_spill] sm:$0xff] %v16825_v49  ;;  %v8599_v57 = vrot.slane %v8591_v3, %v11520_v9  ;;  %v8606_v61 = vrot.slane %v8592_v46, %v11520_v9 }
 0x965   : > { %v8380_v45 = vpop.permute.xlu0 %8379  ;;  %v16842_v36 = vrot.slane %v8863_v52, %v11520_v9 }
 0x966   : > { %v8382_v33 = vpop.permute.xlu1 %8381  ;;  %v9135_v48 = vcombine.low %v8337_v27, %v8380_v45  ;;  %v9136_v5 = vcombine.high %v8337_v27, %v8380_v45  ;;  %v16845_v45 = vrot.slane %v8864_v51, %v11520_v9 }
 0x967   : > { %v9407_v47 = vcombine.low %v8338_v35, %v8382_v33  ;;  %v9408_v17 = vcombine.high %v8338_v35, %v8382_v33 }
 0x968   : > { %v16836_v40 = vrot.slane %v9135_v48, %v11520_v9  ;;  %v16839_v56 = vrot.slane %v9136_v5, %v11520_v9 }
 0x969   : > { %v8384_v54 = vpop.permute.xlu0 %8383  ;;  %v16858_v5 = vrot.slane %v9407_v47, %v11520_v9  ;;  %v16861_v52 = vrot.slane %v9408_v17, %v11520_v9 }
 0x96a   : > { %v8386_v11 = vpop.permute.xlu1 %8385  ;;  %v9679_v55 = vcombine.low %v8339_v32, %v8384_v54  ;;  %v9680_v49 = vcombine.high %v8339_v32, %v8384_v54 }
 0x96b   : > { %v9951_v18 = vcombine.low %v8340_v60, %v8386_v11  ;;  %v9952_v0 = vcombine.high %v8340_v60, %v8386_v11 }
 0x96c   : > { %v16852_v42 = vrot.slane %v9679_v55, %v11520_v9 }
 0x96d   : > { %v8388_v29 = vpop.permute.xlu0 %8387  ;;  %v16872_v3 = vrot.slane %v9951_v18, %v11520_v9 }
 0x96e   : > { %v10223_v19 = vcombine.low %v8341_v62, %v8388_v29  ;;  %v10224_v13 = vcombine.high %v8341_v62, %v8388_v29  ;;  %v16849_v54 = vpop.permute.xlu1 %8389  ;;  %v16855_v29 = vrot.slane %v9680_v49, %v11520_v9  ;;  %v16875_v49 = vrot.slane %v9952_v0, %v11520_v9 }
 0x96f   : > { %v10495_v47 = vcombine.low %v16637_v16, %v16849_v54  ;;  %v10496_v46 = vcombine.high %v16637_v16, %v16849_v54 }
 0x970   : > { %v16864_v48 = vrot.slane %v10223_v19, %v11520_v9  ;;  %v16867_v7 = vrot.slane %v10224_v13, %v11520_v9 }
 0x971   : > { %v8400_v4 = vpop.permute.xlu0 %8399 }
 0x972   : > { %v8607_v25 = vcombine.low %v16634_v14, %v8400_v4  ;;  %v8608_v33 = vcombine.high %v16634_v14, %v8400_v4  ;;  %v8402_v11 = vpop.permute.xlu1 %8401 }
 0x973   : > { %v8879_v19 = vcombine.low %v16641_v26, %v8402_v11  ;;  %v8880_v13 = vcombine.high %v16641_v26, %v8402_v11 }
 0x974   : > { %v8615_v14 = vrot.slane %v8607_v25, %v11520_v9  ;;  %v8622_v27 = vrot.slane %v8608_v33, %v11520_v9 }
 0x975   : > { %v8404_v35 = vpop.permute.xlu0 %8403  ;;  %v8887_v25 = vrot.slane %v8879_v19, %v11520_v9  ;;  %v8894_v26 = vrot.slane %v8880_v13, %v11520_v9 }
 0x976   : > { %v8655_v32 = vcombine.low %v8599_v57, %v8615_v14  ;;  %v8656_v60 = vcombine.high %v8599_v57, %v8615_v14  ;;  %v8671_v62 = vcombine.low %v8606_v61, %v8622_v27  ;;  %v8672_v51 = vcombine.high %v8606_v61, %v8622_v27 }
 0x977   : > { %v9151_v55 = vcombine.low %v16639_v8, %v8404_v35  ;;  %v9152_v17 = vcombine.high %v16639_v8, %v8404_v35  ;;  %v8928_v19 = vcombine.high %v16842_v36, %v8887_v25  ;;  %v8944_v13 = vcombine.high %v16845_v45, %v8894_v26 }
 0x978   : > { %v8663_v18 = vrot.slane %v8655_v32, %v11537_v20  ;;  %v8670_v0 = vrot.slane %v8656_v60, %v11537_v20  ;;  %v8679_v4 = vrot.slane %v8671_v62, %v11537_v20  ;;  %v8686_v57 = vrot.slane %v8672_v51, %v11537_v20 }
 0x979   : > { %v9159_v61 = vrot.slane %v9151_v55, %v11520_v9  ;;  %v9166_v8 = vrot.slane %v9152_v17, %v11520_v9  ;;  %v8408_v55 = vpop.permute.xlu0 %8407  ;;  %v16913_v17 = vpop.permute.xlu1 %8405 }
 0x97a   : > { %v8687_v33 = vcombine.low %v16657_v1, %v8663_v18  ;;  %v8688_v14 = vcombine.high %v16657_v1, %v8663_v18  ;;  %v8689_v27 = vcombine.low %v16663_v50, %v8670_v0  ;;  %v8690_v35 = vcombine.high %v16663_v50, %v8670_v0 }
 0x97b   : > { %v8691_v32 = vcombine.low %v16669_v44, %v8679_v4  ;;  %v8692_v60 = vcombine.high %v16669_v44, %v8679_v4  ;;  %v8693_v62 = vcombine.low %v16675_v37, %v8686_v57  ;;  %v8694_v51 = vcombine.high %v16675_v37, %v8686_v57 }
 0x97c   : > { %10600 = vst.msk [vmem:[%s16012_s22 + $0x8] sm:$0xff] %vm639_vm5, %v8687_v33  ;;  %10602 = vst.msk [vmem:[%s16012_s22 + $0x18] sm:$0xff] %vm639_vm5, %v8688_v14  ;;  %v9199_v1 = vcombine.low %v16836_v40, %v9159_v61  ;;  %v9200_v50 = vcombine.high %v16836_v40, %v9159_v61  ;;  %v9215_v11 = vcombine.low %v16839_v56, %v9166_v8 }
 0x97d   : > { %10604 = vst.msk [vmem:[%s16012_s22 + $0x28] sm:$0xff] %vm639_vm5, %v8689_v27  ;;  %10606 = vst.msk [vmem:[%s16012_s22 + $0x38] sm:$0xff] %vm639_vm5, %v8690_v35  ;;  %v9216_v44 = vcombine.high %v16839_v56, %v9166_v8  ;;  %v8927_v37 = vcombine.low %v16842_v36, %v8887_v25  ;;  %v8943_v40 = vcombine.low %v16845_v45, %v8894_v26 }
 0x97e   : > { %10608 = vst.msk [vmem:[%s16012_s22 + $0x48] sm:$0xff] %vm639_vm5, %v8691_v32  ;;  %10610 = vst.msk [vmem:[%s16012_s22 + $0x58] sm:$0xff] %vm639_vm5, %v8692_v60  ;;  %v9207_v56 = vrot.slane %v9199_v1, %v11537_v20  ;;  %v9214_v18 = vrot.slane %v9200_v50, %v11537_v20  ;;  %v9223_v0 = vrot.slane %v9215_v11, %v11537_v20  ;;  %v8412_v60 = vpop.permute.xlu0 %8411 }
 0x97f   : > { %10612 = vst.msk [vmem:[%s16012_s22 + $0x68] sm:$0xff] %vm639_vm5, %v8693_v62  ;;  %10614 = vst.msk [vmem:[%s16012_s22 + $0x78] sm:$0xff] %vm639_vm5, %v8694_v51  ;;  %v9230_v4 = vrot.slane %v9216_v44, %v11537_v20  ;;  %v8935_v57 = vrot.slane %v8927_v37, %v11537_v20  ;;  %v8942_v36 = vrot.slane %v8928_v19, %v11537_v20  ;;  %v8410_v62 = vpop.permute.xlu1 %8409 }
 0x980   : > { %v8951_v61 = vrot.slane %v8943_v40, %v11537_v20  ;;  %v8958_v45 = vrot.slane %v8944_v13, %v11537_v20  ;;  %v9231_v8 = vcombine.low %v16681_v10, %v9207_v56  ;;  %v9232_v25 = vcombine.high %v16681_v10, %v9207_v56 }
 0x981   : > { %v9233_v26 = vcombine.low %v16687_v21, %v9214_v18  ;;  %v9234_v33 = vcombine.high %v16687_v21, %v9214_v18  ;;  %v9235_v14 = vcombine.low %v16693_v58, %v9223_v0  ;;  %v9236_v27 = vcombine.high %v16693_v58, %v9223_v0 }
 0x982   : > { %v9237_v35 = vcombine.low %v16699_v2, %v9230_v4  ;;  %v9238_v32 = vcombine.high %v16699_v2, %v9230_v4  ;;  %10632 = vst.msk [vmem:[%s16012_s22 + $0x108] sm:$0xff] %vm639_vm5, %v9231_v8  ;;  %10634 = vst.msk [vmem:[%s16012_s22 + $0x118] sm:$0xff] %vm639_vm5, %v9232_v25  ;;  %v8959_v10 = vcombine.low %v16705_v38, %v8935_v57 }
 0x983   : > { %10636 = vst.msk [vmem:[%s16012_s22 + $0x128] sm:$0xff] %vm639_vm5, %v9233_v26  ;;  %10638 = vst.msk [vmem:[%s16012_s22 + $0x138] sm:$0xff] %vm639_vm5, %v9234_v33  ;;  %v8960_v21 = vcombine.high %v16705_v38, %v8935_v57  ;;  %v8961_v58 = vcombine.low %v16711_v24, %v8942_v36  ;;  %v8962_v2 = vcombine.high %v16711_v24, %v8942_v36 }
 0x984   : > { %10640 = vst.msk [vmem:[%s16012_s22 + $0x148] sm:$0xff] %vm639_vm5, %v9235_v14  ;;  %10642 = vst.msk [vmem:[%s16012_s22 + $0x158] sm:$0xff] %vm639_vm5, %v9236_v27  ;;  %v8963_v38 = vcombine.low %v16717_v59, %v8951_v61  ;;  %v8964_v51 = vcombine.high %v16717_v59, %v8951_v61  ;;  %v8965_v24 = vcombine.low %v16723_v63, %v8958_v45 }
 0x985   : > { %10644 = vst.msk [vmem:[%s16012_s22 + $0x168] sm:$0xff] %vm639_vm5, %v9237_v35  ;;  %10646 = vst.msk [vmem:[%s16012_s22 + $0x178] sm:$0xff] %vm639_vm5, %v9238_v32  ;;  %v8966_v1 = vcombine.high %v16723_v63, %v8958_v45  ;;  %v9695_v50 = vcombine.low %v16643_v39, %v8408_v55  ;;  %v9696_v11 = vcombine.high %v16643_v39, %v8408_v55 }
 0x986   : > { %10616 = vst.msk [vmem:[%s16012_s22 + $0x88] sm:$0xff] %vm639_vm5, %v8959_v10  ;;  %10618 = vst.msk [vmem:[%s16012_s22 + $0x98] sm:$0xff] %vm639_vm5, %v8960_v21  ;;  %v9423_v44 = vcombine.low %v16645_v34, %v16913_v17  ;;  %v9424_v59 = vcombine.high %v16645_v34, %v16913_v17  ;;  %v10239_v63 = vcombine.low %v16647_v22, %v8412_v60 }
 0x987   : > { %10620 = vst.msk [vmem:[%s16012_s22 + $0xa8] sm:$0xff] %vm639_vm5, %v8961_v58  ;;  %10622 = vst.msk [vmem:[%s16012_s22 + $0xb8] sm:$0xff] %vm639_vm5, %v8962_v2  ;;  %v10240_v37 = vcombine.high %v16647_v22, %v8412_v60  ;;  %v9967_v39 = vcombine.low %v16649_v23, %v8410_v62  ;;  %v9968_v55 = vcombine.high %v16649_v23, %v8410_v62 }
 0x988   : > { %10624 = vst.msk [vmem:[%s16012_s22 + $0xc8] sm:$0xff] %vm639_vm5, %v8963_v38  ;;  %10626 = vst.msk [vmem:[%s16012_s22 + $0xd8] sm:$0xff] %vm639_vm5, %v8964_v51  ;;  %v9703_v19 = vrot.slane %v9695_v50, %v11520_v9  ;;  %v9710_v34 = vrot.slane %v9696_v11, %v11520_v9  ;;  %v9431_v17 = vrot.slane %v9423_v44, %v11520_v9 }
 0x989   : > { %10628 = vst.msk [vmem:[%s16012_s22 + $0xe8] sm:$0xff] %vm639_vm5, %v8965_v24  ;;  %10630 = vst.msk [vmem:[%s16012_s22 + $0xf8] sm:$0xff] %vm639_vm5, %v8966_v1  ;;  %v9438_v40 = vrot.slane %v9424_v59, %v11520_v9  ;;  %v10247_v13 = vrot.slane %v10239_v63, %v11520_v9  ;;  %v16999_v56 = vrot.slane %v10240_v37, %v11520_v9 }
 0x98a   : > { %v17002_v18 = vrot.slane %v9967_v39, %v11520_v9  ;;  %v17005_v22 = vrot.slane %v9968_v55, %v11520_v9  ;;  %v9743_v23 = vcombine.low %v16852_v42, %v9703_v19  ;;  %v9744_v0 = vcombine.high %v16852_v42, %v9703_v19  ;;  %v17607_v55 = vld [vmem:[#allocation45_spill] sm:$0xff] }
 0x98b   : > { %v9759_v4 = vcombine.low %v16855_v29, %v9710_v34  ;;  %v9760_v57 = vcombine.high %v16855_v29, %v9710_v34  ;;  %v9471_v36 = vcombine.low %v16858_v5, %v9431_v17  ;;  %v9472_v61 = vcombine.high %v16858_v5, %v9431_v17 }
 0x98c   : > { %v9487_v45 = vcombine.low %v16861_v52, %v9438_v40  ;;  %v9488_v8 = vcombine.high %v16861_v52, %v9438_v40  ;;  %v9751_v25 = vrot.slane %v9743_v23, %v11537_v20  ;;  %v9758_v26 = vrot.slane %v9744_v0, %v11537_v20 }
 0x98d   : > { %v9767_v42 = vrot.slane %v9759_v4, %v11537_v20  ;;  %v9774_v33 = vrot.slane %v9760_v57, %v11537_v20  ;;  %v9479_v29 = vrot.slane %v9471_v36, %v11537_v20  ;;  %v9486_v5 = vrot.slane %v9472_v61, %v11537_v20  ;;  %v8414_v4 = vpop.permute.xlu1 %8413  ;;  %v17611_v61 = vld [vmem:[#allocation51_spill] sm:$0xff] }
 0x98e   : > { %v9495_v14 = vrot.slane %v9487_v45, %v11537_v20  ;;  %v9502_v52 = vrot.slane %v9488_v8, %v11537_v20  ;;  %v9775_v27 = vcombine.low %v16729_v31, %v9751_v25  ;;  %v9776_v35 = vcombine.high %v16729_v31, %v9751_v25  ;;  %v17612_v25 = vld [vmem:[#allocation47_spill] sm:$0xff] }
 0x98f   : > { %v9777_v32 = vcombine.low %v16735_v12, %v9758_v26  ;;  %v9778_v10 = vcombine.high %v16735_v12, %v9758_v26  ;;  %v9779_v21 = vcombine.low %v16741_v43, %v9767_v42  ;;  %v9780_v58 = vcombine.high %v16741_v43, %v9767_v42 }
 0x990   : > { %v9781_v2 = vcombine.low %v16747_v53, %v9774_v33  ;;  %v9782_v60 = vcombine.high %v16747_v53, %v9774_v33  ;;  %10664 = vst.msk [vmem:[%s16012_s22 + $0x208] sm:$0xff] %vm639_vm5, %v9775_v27  ;;  %10666 = vst.msk [vmem:[%s16012_s22 + $0x218] sm:$0xff] %vm639_vm5, %v9776_v35  ;;  %v9503_v31 = vcombine.low %v16753_v41, %v9479_v29  ;;  %v17613_v33 = vld [vmem:[#allocation38_spill] sm:$0xff] }
 0x991   : > { %10668 = vst.msk [vmem:[%s16012_s22 + $0x228] sm:$0xff] %vm639_vm5, %v9777_v32  ;;  %10670 = vst.msk [vmem:[%s16012_s22 + $0x238] sm:$0xff] %vm639_vm5, %v9778_v10  ;;  %v9504_v12 = vcombine.high %v16753_v41, %v9479_v29  ;;  %v9505_v43 = vcombine.low %v16759_v15, %v9486_v5  ;;  %v9506_v53 = vcombine.high %v16759_v15, %v9486_v5 }
 0x992   : > { %10672 = vst.msk [vmem:[%s16012_s22 + $0x248] sm:$0xff] %vm639_vm5, %v9779_v21  ;;  %10674 = vst.msk [vmem:[%s16012_s22 + $0x258] sm:$0xff] %vm639_vm5, %v9780_v58  ;;  %v9507_v62 = vcombine.low %v16765_v30, %v9495_v14  ;;  %v9508_v41 = vcombine.high %v16765_v30, %v9495_v14  ;;  %v9509_v38 = vcombine.low %v16771_v28, %v9502_v52  ;;  %v17614_v14 = vld [vmem:[#allocation49_spill] sm:$0xff] }
 0x993   : > { %10676 = vst.msk [vmem:[%s16012_s22 + $0x268] sm:$0xff] %vm639_vm5, %v9781_v2  ;;  %10678 = vst.msk [vmem:[%s16012_s22 + $0x278] sm:$0xff] %vm639_vm5, %v9782_v60  ;;  %v9510_v15 = vcombine.high %v16771_v28, %v9502_v52  ;;  %v10287_v51 = vcombine.low %v16864_v48, %v10247_v13  ;;  %v10288_v24 = vcombine.high %v16864_v48, %v10247_v13  ;;  %v17608_v13 = vld [vmem:[#allocation42_spill] sm:$0xff] }
 0x994   : > { %10648 = vst.msk [vmem:[%s16012_s22 + $0x188] sm:$0xff] %vm639_vm5, %v9503_v31  ;;  %10650 = vst.msk [vmem:[%s16012_s22 + $0x198] sm:$0xff] %vm639_vm5, %v9504_v12  ;;  %v10303_v1 = vcombine.low %v16867_v7, %v16999_v56  ;;  %v10304_v30 = vcombine.high %v16867_v7, %v16999_v56  ;;  %v10015_v28 = vcombine.low %v16872_v3, %v17002_v18  ;;  %v17615_v12 = vld [vmem:[#allocation46_spill] sm:$0xff] }
 0x995   : > { %10652 = vst.msk [vmem:[%s16012_s22 + $0x1a8] sm:$0xff] %vm639_vm5, %v9505_v43  ;;  %10654 = vst.msk [vmem:[%s16012_s22 + $0x1b8] sm:$0xff] %vm639_vm5, %v9506_v53  ;;  %v10016_v48 = vcombine.high %v16872_v3, %v17002_v18  ;;  %v10031_v50 = vcombine.low %v16875_v49, %v17005_v22  ;;  %v10032_v7 = vcombine.high %v16875_v49, %v17005_v22  ;;  %v17609_v22 = vld [vmem:[#allocation40_spill] sm:$0xff] }
 0x996   : > { %10656 = vst.msk [vmem:[%s16012_s22 + $0x1c8] sm:$0xff] %vm639_vm5, %v9507_v62  ;;  %10658 = vst.msk [vmem:[%s16012_s22 + $0x1d8] sm:$0xff] %vm639_vm5, %v9508_v41  ;;  %v10295_v11 = vrot.slane %v10287_v51, %v11537_v20  ;;  %v10302_v44 = vrot.slane %v10288_v24, %v11537_v20  ;;  %v10311_v59 = vrot.slane %v10303_v1, %v11537_v20  ;;  %v17616_v43 = vld [vmem:[#allocation48_spill] sm:$0xff] }
 0x997   : > { %10660 = vst.msk [vmem:[%s16012_s22 + $0x1e8] sm:$0xff] %vm639_vm5, %v9509_v38  ;;  %10662 = vst.msk [vmem:[%s16012_s22 + $0x1f8] sm:$0xff] %vm639_vm5, %v9510_v15  ;;  %v10318_v63 = vrot.slane %v10304_v30, %v11537_v20  ;;  %v10023_v37 = vrot.slane %v10015_v28, %v11537_v20  ;;  %v10030_v3 = vrot.slane %v10016_v48, %v11537_v20  ;;  %v17619_v38 = vld [vmem:[#allocation8_spill] sm:$0xff]  ;;  %v17620_v15 = vld [vmem:[#allocation53_spill] sm:$0xff] }
 0x998   : > { %v10039_v39 = vrot.slane %v10031_v50, %v11537_v20  ;;  %v10046_v49 = vrot.slane %v10032_v7, %v11537_v20  ;;  %v10319_v19 = vcombine.low %v17607_v55, %v10295_v11  ;;  %v10320_v34 = vcombine.high %v17607_v55, %v10295_v11 }
 0x999   : > { %v10321_v17 = vcombine.low %v16783_v6, %v10302_v44  ;;  %v10322_v40 = vcombine.high %v16783_v6, %v10302_v44  ;;  %v10323_v56 = vcombine.low %v17608_v13, %v10311_v59  ;;  %v10324_v18 = vcombine.high %v17608_v13, %v10311_v59  ;;  %v17610_v6 = vld [vmem:[#allocation12_spill] sm:$0xff] }
 0x99a   : > { %v10325_v23 = vcombine.low %v17609_v22, %v10318_v63  ;;  %v10326_v0 = vcombine.high %v17609_v22, %v10318_v63  ;;  %10696 = vst.msk [vmem:[%s16012_s22 + $0x308] sm:$0xff] %vm639_vm5, %v10319_v19  ;;  %10698 = vst.msk [vmem:[%s16012_s22 + $0x318] sm:$0xff] %vm639_vm5, %v10320_v34  ;;  %v10047_v57 = vcombine.low %v17610_v6, %v10023_v37 }
 0x99b   : > { %10700 = vst.msk [vmem:[%s16012_s22 + $0x328] sm:$0xff] %vm639_vm5, %v10321_v17  ;;  %10702 = vst.msk [vmem:[%s16012_s22 + $0x338] sm:$0xff] %vm639_vm5, %v10322_v40  ;;  %v10048_v36 = vcombine.high %v17610_v6, %v10023_v37  ;;  %v10049_v45 = vcombine.low %v17611_v61, %v10030_v3  ;;  %v10050_v8 = vcombine.high %v17611_v61, %v10030_v3 }
 0x99c   : > { %10704 = vst.msk [vmem:[%s16012_s22 + $0x348] sm:$0xff] %vm639_vm5, %v10323_v56  ;;  %10706 = vst.msk [vmem:[%s16012_s22 + $0x358] sm:$0xff] %vm639_vm5, %v10324_v18  ;;  %v10051_v26 = vcombine.low %v17612_v25, %v10039_v39  ;;  %v10052_v42 = vcombine.high %v17612_v25, %v10039_v39  ;;  %v10053_v29 = vcombine.low %v17613_v33, %v10046_v49 }
 0x99d   : > { %10708 = vst.msk [vmem:[%s16012_s22 + $0x368] sm:$0xff] %vm639_vm5, %v10325_v23  ;;  %10710 = vst.msk [vmem:[%s16012_s22 + $0x378] sm:$0xff] %vm639_vm5, %v10326_v0  ;;  %v10054_v5 = vcombine.high %v17613_v33, %v10046_v49  ;;  %v10511_v52 = vcombine.low %v17614_v14, %v8414_v4  ;;  %v10512_v27 = vcombine.high %v17614_v14, %v8414_v4 }
 0x99e   : > { %10680 = vst.msk [vmem:[%s16012_s22 + $0x288] sm:$0xff] %vm639_vm5, %v10047_v57  ;;  %10682 = vst.msk [vmem:[%s16012_s22 + $0x298] sm:$0xff] %vm639_vm5, %v10048_v36  ;;  %v10503_v35 = vrot.slane %v10495_v47, %v11520_v9  ;;  %v10510_v32 = vrot.slane %v10496_v46, %v11520_v9  ;;  %v17617_v53 = vcombine.low %v17615_v12, %v17616_v43 }
 0x99f   : > { %10684 = vst.msk [vmem:[%s16012_s22 + $0x2a8] sm:$0xff] %vm639_vm5, %v10049_v45  ;;  %10686 = vst.msk [vmem:[%s16012_s22 + $0x2b8] sm:$0xff] %vm639_vm5, %v10050_v8  ;;  %v10519_v10 = vrot.slane %v10511_v52, %v11520_v9  ;;  %v10526_v21 = vrot.slane %v10512_v27, %v11520_v9  ;;  %v17618_v47 = vcombine.high %v17615_v12, %v17616_v43 }
 0x9a0   : > { %10688 = vst.msk [vmem:[%s16012_s22 + $0x2c8] sm:$0xff] %vm639_vm5, %v10051_v26  ;;  %10690 = vst.msk [vmem:[%s16012_s22 + $0x2d8] sm:$0xff] %vm639_vm5, %v10052_v42  ;;  %v10535_v62 = vrot.slane %v17617_v53, %v11537_v20  ;;  %v17621_v51 = vcombine.low %v17619_v38, %v17620_v15  ;;  %v17622_v1 = vcombine.high %v17619_v38, %v17620_v15 }
 0x9a1   : > { %10692 = vst.msk [vmem:[%s16012_s22 + $0x2e8] sm:$0xff] %vm639_vm5, %v10053_v29  ;;  %10694 = vst.msk [vmem:[%s16012_s22 + $0x2f8] sm:$0xff] %vm639_vm5, %v10054_v5  ;;  %v10559_v58 = vcombine.low %v10503_v35, %v10519_v10  ;;  %v10560_v2 = vcombine.high %v10503_v35, %v10519_v10  ;;  %v10575_v60 = vcombine.low %v10510_v32, %v10526_v21 }
 0x9a2   : > { %v10576_v31 = vcombine.high %v10510_v32, %v10526_v21  ;;  %v10542_v16 = vrot.slane %v17618_v47, %v11537_v20  ;;  %v10551_v24 = vrot.slane %v17621_v51, %v11537_v20  ;;  %v10558_v30 = vrot.slane %v17622_v1, %v11537_v20 }
 0x9a3   : > { %v10567_v54 = vrot.slane %v10559_v58, %v11537_v20  ;;  %v10574_v9 = vrot.slane %v10560_v2, %v11537_v20  ;;  %v10583_v46 = vrot.slane %v10575_v60, %v11537_v20 }
 0x9a4   : > { %v10590_v41 = vrot.slane %v10576_v31, %v11537_v20 }
 0x9a5   : > { %v10591_v28 = vcombine.low %v10535_v62, %v10567_v54  ;;  %v10592_v48 = vcombine.high %v10535_v62, %v10567_v54  ;;  %v10593_v50 = vcombine.low %v10542_v16, %v10574_v9  ;;  %v10594_v7 = vcombine.high %v10542_v16, %v10574_v9 }
 0x9a6   : > { %v10595_v11 = vcombine.low %v10551_v24, %v10583_v46  ;;  %v10596_v44 = vcombine.high %v10551_v24, %v10583_v46  ;;  %v10597_v59 = vcombine.low %v10558_v30, %v10590_v41  ;;  %v10598_v63 = vcombine.high %v10558_v30, %v10590_v41 }
 0x9a7   : > { %10712 = vst.msk [vmem:[%s16012_s22 + $0x388] sm:$0xff] %vm639_vm5, %v10591_v28  ;;  %10714 = vst.msk [vmem:[%s16012_s22 + $0x398] sm:$0xff] %vm639_vm5, %v10592_v48 }
 0x9a8   : > { %10716 = vst.msk [vmem:[%s16012_s22 + $0x3a8] sm:$0xff] %vm639_vm5, %v10593_v50  ;;  %10718 = vst.msk [vmem:[%s16012_s22 + $0x3b8] sm:$0xff] %vm639_vm5, %v10594_v7 }
 0x9a9   : > { %10720 = vst.msk [vmem:[%s16012_s22 + $0x3c8] sm:$0xff] %vm639_vm5, %v10595_v11  ;;  %10722 = vst.msk [vmem:[%s16012_s22 + $0x3d8] sm:$0xff] %vm639_vm5, %v10596_v44 }
 0x9aa   : > { %10724 = vst.msk [vmem:[%s16012_s22 + $0x3e8] sm:$0xff] %vm639_vm5, %v10597_v59  ;;  %10726 = vst.msk [vmem:[%s16012_s22 + $0x3f8] sm:$0xff] %vm639_vm5, %v10598_v63 }
 0x9ab PF: > { %s18_s26 = sadd.s32 1, %s11408_s26   ;;  %s17623_s24 = smov %s11404_s25 }
 0x9ac   : > { %p15_p5 = scmp.ge.s32.totalorder %s18_s26, 4   ;;  %s17624_s25 = smov %s17626_s27 }
 0x9ae   :  { %17 = sbr.rel (!%p15_p5) target bundleno = 2 (0x2), region = 93 }

</bundles_post_ra>
